<compile_context>
chip_gen: v5e
topology: v5e:2x2
jax: 0.10.0
libtpu: 0.0.40
codegen_flags: <defaults>
</compile_context>

<pallas_src>
import jax
import jax.numpy as jnp
from jax import lax
from jax.experimental import pallas as pl
from jax.experimental.pallas import tpu as pltpu


# -----------------------------------------------------------------------------
# Static architecture constants (match the PyTorch module defaults)
# -----------------------------------------------------------------------------
_KEYPOINTS = 17
_FEATURES = 6
_IN_DIM = _KEYPOINTS * _FEATURES      # 102
_IN_PAD = 128                         # input features lane-padded to 128
_D_EMB = 128
_D_MODEL = 256
_D_FF = 2048

# ---- packed f32 bias/LN slab layout: (name, true width), each segment padded
#      up to the next multiple of 128 lanes ----
_BIAS_LAYOUT = [
    ("e1b", _D_EMB), ("e2b", _D_MODEL), ("bA", _D_MODEL),
    ("ln1g", _D_MODEL), ("ln1b", _D_MODEL),
    ("f1b", _D_FF), ("f2b", _D_MODEL),
    ("ln2g", _D_MODEL), ("ln2b", _D_MODEL),
    ("d1b", _D_MODEL), ("d2b", _D_MODEL),
    ("d3b", 32), ("o1b", 2), ("d4b", 32), ("o2b", 8),
]


def _bias_offsets():
    offs, off = {}, 0
    for name, w in _BIAS_LAYOUT:
        offs[name] = (off, w)
        off += -(-w // 128) * 128
    return offs, off


_BIAS_OFF, _BIAS_TOTAL = _bias_offsets()      # total = 4992 lanes


# ---- packed bf16 weight slab layout (256 lanes wide):
#      name -> (row_offset, lane_offset, rows, cols).  Row offsets are multiples
#      of 16 (bf16 sublane packing), lane offsets are multiples of 128 (vreg). ----
_W_SEG = {
    "e1w": (0,    0,   _IN_PAD, _D_EMB),       # (128, 128), rows zero-padded from 102
    "e2w": (128,  0,   _D_EMB, _D_MODEL),      # (128, 256)
    "wA":  (256,  0,   _D_MODEL, _D_MODEL),    # fused V-proj @ out-proj
    "d1w": (512,  0,   _D_MODEL, _D_MODEL),
    "d2w": (768,  0,   _D_MODEL, _D_MODEL),
    "d3w": (1024, 0,   _D_MODEL, 32),
    "d4w": (1024, 128, _D_MODEL, 32),
    "o1w": (1280, 0,   32, 8),                 # cols zero-padded from 2 to 8
    "o2w": (1280, 128, 32, 8),
}
_W_SLAB_ROWS = 1312                            # 1280 + 32, multiple of 16
_W_SLAB_LANES = 256


# -----------------------------------------------------------------------------
# Kernel
# -----------------------------------------------------------------------------
def tracking_match_kernel(
    x_ref,                 # (P, 128)             f32  (features zero-padded 102 -> 128)
    w_ref,                 # (1312, 256)          bf16  packed resident weights
    bias_ref,              # (1, 4992)            f32   packed biases / LN params
    f1w_hbm, f2w_hbm,      # (256,2048),(2048,256) bf16 in HBM (manual DMA)
    out_ref,               # (P_pad + 8, 8)       f32   rows [0:P]=output1, [P_pad:P_pad+8]=output2
    f1w_vmem, f2w_vmem, dma_sem,   # scratch
):
    f32 = jnp.float32
    P = x_ref.shape[0]
    P_pad = out_ref.shape[0] - 8

    # Kick off the big FFN weight DMAs immediately; they overlap with the
    # embedding + attention compute below and are waited right before use.
    cp_f1 = pltpu.make_async_copy(f1w_hbm, f1w_vmem, dma_sem.at[0])
    cp_f2 = pltpu.make_async_copy(f2w_hbm, f2w_vmem, dma_sem.at[1])
    cp_f1.start()
    cp_f2.start()

    def weight(name):
        r0, c0, nr, nc = _W_SEG[name]
        return w_ref[r0:r0 + nr, c0:c0 + nc]                 # static slice of VMEM slab

    def bias(name, width=None):
        off, w = _BIAS_OFF[name]
        w = w if width is None else width                    # padding lanes are zero
        return bias_ref[:, off:off + w]

    def lin(h, w, b):
        # bf16 x bf16 on the MXU, f32 accumulation, f32 bias.
        return jnp.dot(h.astype(w.dtype), w, preferred_element_type=f32) + b

    def layernorm(h, g, b, eps=1e-5):
        mu = jnp.mean(h, axis=-1, keepdims=True)
        var = jnp.mean((h - mu) ** 2, axis=-1, keepdims=True)
        return (h - mu) * lax.rsqrt(var + eps) * g + b

    x = x_ref[...]                                           # (P, 128)

    # embedding1 -> relu ; embedding2 -> relu   (dropout = identity)
    h = jax.nn.relu(lin(x, weight("e1w"), bias("e1b")))      # (P, 128)
    h = jax.nn.relu(lin(h, weight("e2w"), bias("e2b")))      # (P, 256)

    wA = weight("wA")
    bA = bias("bA")
    ln1g, ln1b = bias("ln1g"), bias("ln1b")
    ln2g, ln2b = bias("ln2g"), bias("ln2b")
    f1b, f2b = bias("f1b"), bias("f2b")

    # EncoderLayer applied num_layers=2 times with SHARED weights.
    def encoder_iter(h, first):
        # self-attention with seq_len == 1  =>  single fused matmul
        attn = lin(h, wA, bA)                                # (P, 256)
        h = layernorm(h + attn, ln1g, ln1b)
        if first:
            cp_f1.wait()                                     # f1w needed now
        mid = jax.nn.relu(lin(h, f1w_vmem[...], f1b))        # (P, 2048)
        if first:
            cp_f2.wait()                                     # f2w overlapped with the matmul above
        ff = lin(mid, f2w_vmem[...], f2b)                    # (P, 256)
        return layernorm(h + ff, ln2g, ln2b)

    h = encoder_iter(h, True)
    h = encoder_iter(h, False)

    # decoders
    h = jax.nn.relu(lin(h, weight("d1w"), bias("d1b")))      # (P, 256)
    h = jax.nn.relu(lin(h, weight("d2w"), bias("d2b")))      # (P, 256)

    # head 1: per-frame-pair 2-way output (o1w / o1b zero-padded to 8 lanes)
    s1 = jax.nn.relu(lin(h, weight("d3w"), bias("d3b")))     # (P, 32)
    o1 = lin(s1, weight("o1w"), bias("o1b", 8))              # (P, 8); lanes 2:8 are zero
    out_ref[0:P, :] = o1

    # head 2: mean over frame pairs (dim=-2), then 8-way output
    s2 = jnp.mean(h, axis=0, keepdims=True)                  # (1, 256)
    s2 = jax.nn.relu(lin(s2, weight("d4w"), bias("d4b")))    # (1, 32)
    o2 = lin(s2, weight("o2w"), bias("o2b"))                 # (1, 8)
    out_ref[P_pad:P_pad + 8, :] = jnp.broadcast_to(o2, (8, 8))


# -----------------------------------------------------------------------------
# One-time parameter preparation (hoisted out of the per-call hot path)
# -----------------------------------------------------------------------------
def _pack_biases(vals):
    pieces = []
    for name, w in _BIAS_LAYOUT:
        v = jnp.asarray(vals[name], jnp.float32).reshape(1, -1)
        assert v.shape[1] == w, (name, v.shape, w)
        pad = -(-w // 128) * 128 - w
        pieces.append(jnp.pad(v, ((0, 0), (0, pad))))
    return jnp.concatenate(pieces, axis=1)


def prepare_params(params):
    """Fold the attention projections, cast to bf16 and pack the weight/bias slabs.

    Call ONCE; the result is reused by every tracking_match_forward() call.
    The attention fold (softmax over a single key == 1) is only valid for the
    inference path of this module (seq_len == 1, dropout identity).
    """
    f32, bf16 = jnp.float32, jnp.bfloat16

    wv = params["wv"].astype(f32)
    wo = params["wo"].astype(f32)
    wA = wv @ wo                                              # (256, 256)
    bA = params["bv"].astype(f32) @ wo + params["bo"].astype(f32)

    bias_pack = _pack_biases({
        "e1b": params["e1b"], "e2b": params["e2b"], "bA": bA,
        "ln1g": params["ln1g"], "ln1b": params["ln1b"],
        "f1b": params["f1b"], "f2b": params["f2b"],
        "ln2g": params["ln2g"], "ln2b": params["ln2b"],
        "d1b": params["d1b"], "d2b": params["d2b"],
        "d3b": params["d3b"], "o1b": params["o1b"],
        "d4b": params["d4b"], "o2b": params["o2b"],
    })

    slab = jnp.zeros((_W_SLAB_ROWS, _W_SLAB_LANES), bf16)

    def put(slab, name, w):
        r0, c0, nr, nc = _W_SEG[name]
        w = jnp.asarray(w, f32)
        w = jnp.pad(w, ((0, nr - w.shape[0]), (0, nc - w.shape[1])))
        return lax.dynamic_update_slice(slab, w.astype(bf16), (r0, c0))

    slab = put(slab, "e1w", params["e1w"])
    slab = put(slab, "e2w", params["e2w"])
    slab = put(slab, "wA", wA)
    slab = put(slab, "d1w", params["d1w"])
    slab = put(slab, "d2w", params["d2w"])
    slab = put(slab, "d3w", params["d3w"])
    slab = put(slab, "d4w", params["d4w"])
    slab = put(slab, "o1w", params["o1w"])
    slab = put(slab, "o2w", params["o2w"])

    return {
        "w_slab": slab,
        "bias": bias_pack,
        "f1w": params["f1w"].astype(bf16),
        "f2w": params["f2w"].astype(bf16),
    }


# -----------------------------------------------------------------------------
# Per-call wrapper
# -----------------------------------------------------------------------------
def tracking_match_forward(src, prep):
    """src: (1, P, 17, 6) f32, prep: prepare_params() output
       -> (output1 (1, P, 2), output2 (1, 8))"""
    B, P, K, F = src.shape
    assert B == 1, "module is defined for batch size 1"
    assert K * F == _IN_DIM
    x = src.reshape(P, K * F).astype(jnp.float32)
    x = jnp.pad(x, ((0, 0), (0, _IN_PAD - _IN_DIM)))          # (P, 128)

    P_pad = -(-P // 8) * 8
    out_rows = P_pad + 8

    vmem_spec = pl.BlockSpec(memory_space=pltpu.MemorySpace.VMEM)
    hbm_spec = pl.BlockSpec(memory_space=pl.ANY)              # f1w / f2w: manual DMA

    flops = 2 * P * (
        _IN_PAD * _D_EMB + _D_EMB * _D_MODEL
        + 2 * (_D_MODEL * _D_MODEL + _D_MODEL * _D_FF + _D_FF * _D_MODEL)
        + 2 * _D_MODEL * _D_MODEL + _D_MODEL * 32 + 32 * 8
    ) + 2 * (_D_MODEL * 32 + 32 * 8)
    args = (x, prep["w_slab"], prep["bias"], prep["f1w"], prep["f2w"])
    bytes_accessed = sum(int(a.size) * a.dtype.itemsize for a in args) + out_rows * 8 * 4

    out = pl.pallas_call(
        tracking_match_kernel,
        out_shape=jax.ShapeDtypeStruct((out_rows, 8), jnp.float32),
        in_specs=[vmem_spec, vmem_spec, vmem_spec, hbm_spec, hbm_spec],
        out_specs=vmem_spec,
        scratch_shapes=[
            pltpu.VMEM((_D_MODEL, _D_FF), jnp.bfloat16),      # f1w staging
            pltpu.VMEM((_D_FF, _D_MODEL), jnp.bfloat16),      # f2w staging
            pltpu.SemaphoreType.DMA((2,)),
        ],
        compiler_params=pltpu.CompilerParams(vmem_limit_bytes=8 << 20),
        cost_estimate=pl.CostEstimate(
            flops=int(flops),
            transcendentals=int(4 * P),                       # 4 layernorm rsqrt rows
            bytes_accessed=int(bytes_accessed)),
    )(*args)

    out1 = out[0:P, 0:2].reshape(B, P, 2)
    out2 = out[P_pad:P_pad + 1, :].reshape(B, 8)
    return out1, out2


# -----------------------------------------------------------------------------
# Pure-JAX fp32 reference (mirrors the PyTorch forward, inference semantics)
# -----------------------------------------------------------------------------
def tracking_match_reference(src, params):
    P = src.shape[1]
    x = src.reshape(P, -1).astype(jnp.float32)

    def lin(h, w, b):
        return h @ w + b

    def ln(h, g, b, eps=1e-5):
        mu = h.mean(-1, keepdims=True)
        var = ((h - mu) ** 2).mean(-1, keepdims=True)
        return (h - mu) / jnp.sqrt(var + eps) * g + b

    h = jax.nn.relu(lin(x, params["e1w"], params["e1b"]))
    h = jax.nn.relu(lin(h, params["e2w"], params["e2b"]))
    for _ in range(2):
        v = lin(h, params["wv"], params["bv"])
        attn = lin(v, params["wo"], params["bo"])
        h = ln(h + attn, params["ln1g"], params["ln1b"])
        ff = lin(jax.nn.relu(lin(h, params["f1w"], params["f1b"])),
                 params["f2w"], params["f2b"])
        h = ln(h + ff, params["ln2g"], params["ln2b"])
    h = jax.nn.relu(lin(h, params["d1w"], params["d1b"]))
    h = jax.nn.relu(lin(h, params["d2w"], params["d2b"]))
    s1 = jax.nn.relu(lin(h, params["d3w"], params["d3b"]))
    out1 = lin(s1, params["o1w"], params["o1b"])
    s2 = jnp.mean(h, axis=0, keepdims=True)
    s2 = jax.nn.relu(lin(s2, params["d4w"], params["d4b"]))
    out2 = lin(s2, params["o2w"], params["o2b"])
    return out1[None], out2


# -----------------------------------------------------------------------------
# Deterministic parameter construction (synthetic, no checkpoint)
# -----------------------------------------------------------------------------
def make_params(key, d_model=_D_MODEL, d_ff=_D_FF):
    in_dim = _IN_DIM

    def w(k, shape, scale=0.02):
        return scale * jax.random.normal(k, shape, dtype=jnp.float32)

    names_shapes = {
        "e1w": (in_dim, _D_EMB),  "e1b": (1, _D_EMB),
        "e2w": (_D_EMB, d_model), "e2b": (1, d_model),
        "wv": (d_model, d_model), "bv": (1, d_model),
        "wo": (d_model, d_model), "bo": (1, d_model),
        "f1w": (d_model, d_ff),   "f1b": (1, d_ff),
        "f2w": (d_ff, d_model),   "f2b": (1, d_model),
        "d1w": (d_model, d_model), "d1b": (1, d_model),
        "d2w": (d_model, d_model), "d2b": (1, d_model),
        "d3w": (d_model, 32), "d3b": (1, 32),
        "o1w": (32, 2),       "o1b": (1, 2),
        "d4w": (d_model, 32), "d4b": (1, 32),
        "o2w": (32, 8),       "o2b": (1, 8),
    }
    keys = jax.random.split(key, len(names_shapes))
    params = {}
    for k, (name, shape) in zip(keys, names_shapes.items()):
        params[name] = w(k, shape, scale=0.01 if name.endswith("b") else 0.02)
    # LayerNorm affine params: gamma=1, beta=0 (PyTorch default init)
    params["ln1g"] = jnp.ones((1, d_model), jnp.float32)
    params["ln1b"] = jnp.zeros((1, d_model), jnp.float32)
    params["ln2g"] = jnp.ones((1, d_model), jnp.float32)
    params["ln2b"] = jnp.zeros((1, d_model), jnp.float32)
    return params


if __name__ == "__main__":
    key = jax.random.PRNGKey(0)
    k_param, k_input = jax.random.split(key)

    params = make_params(k_param)

    # One-time preprocessing (attention fold, bf16 casts, slab packing) — hoisted
    # out of the per-call path.
    prep = jax.block_until_ready(prepare_params(params))

    # small input consistent with the module: (batch=1, frame_pairs=8, 17, 6)
    src = jax.random.normal(k_input, (1, 8, 17, 6), dtype=jnp.float32)

    out1, out2 = tracking_match_forward(src, prep)
    jax.block_until_ready((out1, out2))

    assert out1.shape == (1, 8, 2) and out1.dtype == jnp.float32
    assert out2.shape == (1, 8) and out2.dtype == jnp.float32

    # Numerical sanity vs fp32 reference (bf16 weights => tolerance, not exact).
    ref1, ref2 = tracking_match_reference(src, params)
    err1 = float(jnp.max(jnp.abs(out1 - ref1)))
    err2 = float(jnp.max(jnp.abs(out2 - ref2)))
    assert err1 < 5e-2 and err2 < 5e-2, (err1, err2)

    print("KERNEL_OK")
</pallas_src>

<mosaic_0001>
module attributes {stable_mosaic.version = 11 : i64} {
  func.func @tracking_match_kernel(%arg0: memref<8x128xf32, #tpu.memory_space<vmem>>, %arg1: memref<1312x256xbf16, #tpu.memory_space<vmem>>, %arg2: memref<1x4992xf32, #tpu.memory_space<vmem>>, %arg3: memref<256x2048xbf16, #tpu.memory_space<any>>, %arg4: memref<2048x256xbf16, #tpu.memory_space<any>>, %arg5: memref<16x8xf32, #tpu.memory_space<vmem>>, %arg6: memref<256x2048xbf16, #tpu.memory_space<vmem>>, %arg7: memref<2048x256xbf16, #tpu.memory_space<vmem>>, %arg8: memref<2x!tpu.dma_semaphore, #tpu.memory_space<semaphore_mem>>) attributes {dimension_semantics = [], scalar_prefetch = 0 : i64, scratch_operands = 3 : i64, tpu.core_type = #tpu.core_type<tc>} {
    %c0_i32 = arith.constant 0 : i32
    %0 = tpu.memref_slice %arg8[%c0_i32] : memref<2x!tpu.dma_semaphore, #tpu.memory_space<semaphore_mem>> -> memref<1x!tpu.dma_semaphore, #tpu.memory_space<semaphore_mem>>
    %1 = tpu.memref_squeeze %0 : memref<1x!tpu.dma_semaphore, #tpu.memory_space<semaphore_mem>> -> memref<!tpu.dma_semaphore, #tpu.memory_space<semaphore_mem>>
    tpu.enqueue_dma source(%arg3 : memref<256x2048xbf16, #tpu.memory_space<any>>) target(%arg6 : memref<256x2048xbf16, #tpu.memory_space<vmem>>) target_semaphore(%1 : memref<!tpu.dma_semaphore, #tpu.memory_space<semaphore_mem>>)
    %c1_i32 = arith.constant 1 : i32
    %2 = tpu.memref_slice %arg8[%c1_i32] : memref<2x!tpu.dma_semaphore, #tpu.memory_space<semaphore_mem>> -> memref<1x!tpu.dma_semaphore, #tpu.memory_space<semaphore_mem>>
    %3 = tpu.memref_squeeze %2 : memref<1x!tpu.dma_semaphore, #tpu.memory_space<semaphore_mem>> -> memref<!tpu.dma_semaphore, #tpu.memory_space<semaphore_mem>>
    tpu.enqueue_dma source(%arg4 : memref<2048x256xbf16, #tpu.memory_space<any>>) target(%arg7 : memref<2048x256xbf16, #tpu.memory_space<vmem>>) target_semaphore(%3 : memref<!tpu.dma_semaphore, #tpu.memory_space<semaphore_mem>>)
    %c0 = arith.constant 0 : index
    %c0_0 = arith.constant 0 : index
    %4 = vector.load %arg0[%c0, %c0_0] : memref<8x128xf32, #tpu.memory_space<vmem>>, vector<8x128xf32>
    %c0_1 = arith.constant 0 : index
    %c0_2 = arith.constant 0 : index
    %5 = vector.load %arg1[%c0_1, %c0_2] : memref<1312x256xbf16, #tpu.memory_space<vmem>>, vector<128x128xbf16>
    %c0_3 = arith.constant 0 : index
    %c0_4 = arith.constant 0 : index
    %6 = vector.load %arg2[%c0_3, %c0_4] : memref<1x4992xf32, #tpu.memory_space<vmem>>, vector<1x128xf32>
    %7 = arith.truncf %4 : vector<8x128xf32> to vector<8x128xbf16>
    %cst = arith.constant dense<0.000000e+00> : vector<8x128xf32>
    %8 = tpu.matmul %7, %5, %cst {dimension_numbers = #tpu.dot_dimension_numbers<[1], [0], [0], [1], [0, 0, 1, 1], [], []>} : vector<8x128xbf16>, vector<128x128xbf16>, vector<8x128xf32> -> vector<8x128xf32>
    %9 = vector.broadcast %6 : vector<1x128xf32> to vector<8x128xf32>
    %10 = arith.addf %8, %9 : vector<8x128xf32>
    %cst_5 = arith.constant 0.000000e+00 : f32
    %11 = vector.broadcast %cst_5 : f32 to vector<8x128xf32>
    %12 = arith.maximumf %10, %11 : vector<8x128xf32>
    %c128 = arith.constant 128 : index
    %c0_6 = arith.constant 0 : index
    %13 = vector.load %arg1[%c128, %c0_6] : memref<1312x256xbf16, #tpu.memory_space<vmem>>, vector<128x256xbf16>
    %c0_7 = arith.constant 0 : index
    %c128_8 = arith.constant 128 : index
    %14 = vector.load %arg2[%c0_7, %c128_8] : memref<1x4992xf32, #tpu.memory_space<vmem>>, vector<1x256xf32>
    %15 = arith.truncf %12 : vector<8x128xf32> to vector<8x128xbf16>
    %cst_9 = arith.constant dense<0.000000e+00> : vector<8x256xf32>
    %16 = tpu.matmul %15, %13, %cst_9 {dimension_numbers = #tpu.dot_dimension_numbers<[1], [0], [0], [1], [0, 0, 1, 1], [], []>} : vector<8x128xbf16>, vector<128x256xbf16>, vector<8x256xf32> -> vector<8x256xf32>
    %17 = vector.broadcast %14 : vector<1x256xf32> to vector<8x256xf32>
    %18 = arith.addf %16, %17 : vector<8x256xf32>
    %cst_10 = arith.constant 0.000000e+00 : f32
    %19 = vector.broadcast %cst_10 : f32 to vector<8x256xf32>
    %20 = arith.maximumf %18, %19 : vector<8x256xf32>
    %c256 = arith.constant 256 : index
    %c0_11 = arith.constant 0 : index
    %21 = vector.load %arg1[%c256, %c0_11] : memref<1312x256xbf16, #tpu.memory_space<vmem>>, vector<256x256xbf16>
    %c0_12 = arith.constant 0 : index
    %c384 = arith.constant 384 : index
    %22 = vector.load %arg2[%c0_12, %c384] : memref<1x4992xf32, #tpu.memory_space<vmem>>, vector<1x256xf32>
    %c0_13 = arith.constant 0 : index
    %c640 = arith.constant 640 : index
    %23 = vector.load %arg2[%c0_13, %c640] : memref<1x4992xf32, #tpu.memory_space<vmem>>, vector<1x256xf32>
    %c0_14 = arith.constant 0 : index
    %c896 = arith.constant 896 : index
    %24 = vector.load %arg2[%c0_14, %c896] : memref<1x4992xf32, #tpu.memory_space<vmem>>, vector<1x256xf32>
    %c0_15 = arith.constant 0 : index
    %c3456 = arith.constant 3456 : index
    %25 = vector.load %arg2[%c0_15, %c3456] : memref<1x4992xf32, #tpu.memory_space<vmem>>, vector<1x256xf32>
    %c0_16 = arith.constant 0 : index
    %c3712 = arith.constant 3712 : index
    %26 = vector.load %arg2[%c0_16, %c3712] : memref<1x4992xf32, #tpu.memory_space<vmem>>, vector<1x256xf32>
    %c0_17 = arith.constant 0 : index
    %c1152 = arith.constant 1152 : index
    %27 = vector.load %arg2[%c0_17, %c1152] : memref<1x4992xf32, #tpu.memory_space<vmem>>, vector<1x2048xf32>
    %c0_18 = arith.constant 0 : index
    %c3200 = arith.constant 3200 : index
    %28 = vector.load %arg2[%c0_18, %c3200] : memref<1x4992xf32, #tpu.memory_space<vmem>>, vector<1x256xf32>
    %29 = arith.truncf %20 : vector<8x256xf32> to vector<8x256xbf16>
    %cst_19 = arith.constant dense<0.000000e+00> : vector<8x256xf32>
    %30 = tpu.matmul %29, %21, %cst_19 {dimension_numbers = #tpu.dot_dimension_numbers<[1], [0], [0], [1], [0, 0, 1, 1], [], []>} : vector<8x256xbf16>, vector<256x256xbf16>, vector<8x256xf32> -> vector<8x256xf32>
    %31 = vector.broadcast %22 : vector<1x256xf32> to vector<8x256xf32>
    %32 = arith.addf %30, %31 : vector<8x256xf32>
    %33 = arith.addf %20, %32 : vector<8x256xf32>
    %cst_20 = arith.constant dense<0.000000e+00> : vector<8xf32>
    %34 = vector.multi_reduction <add>, %33, %cst_20 [1] : vector<8x256xf32> to vector<8xf32>
    %35 = vector.shape_cast %34 : vector<8xf32> to vector<8x1xf32>
    %cst_21 = arith.constant 2.560000e+02 : f32
    %36 = vector.broadcast %cst_21 : f32 to vector<8x1xf32>
    %37 = arith.divf %35, %36 : vector<8x1xf32>
    %38 = vector.broadcast %37 : vector<8x1xf32> to vector<8x256xf32>
    %39 = arith.subf %33, %38 : vector<8x256xf32>
    %40 = arith.mulf %39, %39 : vector<8x256xf32>
    %cst_22 = arith.constant dense<0.000000e+00> : vector<8xf32>
    %41 = vector.multi_reduction <add>, %40, %cst_22 [1] : vector<8x256xf32> to vector<8xf32>
    %42 = vector.shape_cast %41 : vector<8xf32> to vector<8x1xf32>
    %cst_23 = arith.constant 2.560000e+02 : f32
    %43 = vector.broadcast %cst_23 : f32 to vector<8x1xf32>
    %44 = arith.divf %42, %43 : vector<8x1xf32>
    %45 = vector.broadcast %37 : vector<8x1xf32> to vector<8x256xf32>
    %46 = arith.subf %33, %45 : vector<8x256xf32>
    %cst_24 = arith.constant 9.99999974E-6 : f32
    %47 = vector.broadcast %cst_24 : f32 to vector<8x1xf32>
    %48 = arith.addf %44, %47 : vector<8x1xf32>
    %49 = math.rsqrt %48 : vector<8x1xf32>
    %50 = vector.broadcast %49 : vector<8x1xf32> to vector<8x256xf32>
    %51 = arith.mulf %46, %50 : vector<8x256xf32>
    %52 = vector.broadcast %23 : vector<1x256xf32> to vector<8x256xf32>
    %53 = arith.mulf %51, %52 : vector<8x256xf32>
    %54 = vector.broadcast %24 : vector<1x256xf32> to vector<8x256xf32>
    %55 = arith.addf %53, %54 : vector<8x256xf32>
    %c0_i32_25 = arith.constant 0 : i32
    %56 = tpu.memref_slice %arg8[%c0_i32_25] : memref<2x!tpu.dma_semaphore, #tpu.memory_space<semaphore_mem>> -> memref<1x!tpu.dma_semaphore, #tpu.memory_space<semaphore_mem>>
    %57 = tpu.memref_squeeze %56 : memref<1x!tpu.dma_semaphore, #tpu.memory_space<semaphore_mem>> -> memref<!tpu.dma_semaphore, #tpu.memory_space<semaphore_mem>>
    tpu.wait_dma2 semaphore(%57 : memref<!tpu.dma_semaphore, #tpu.memory_space<semaphore_mem>>) src(%arg3 : memref<256x2048xbf16, #tpu.memory_space<any>>) dst(%arg6 : memref<256x2048xbf16, #tpu.memory_space<vmem>>)
    %c0_26 = arith.constant 0 : index
    %c0_27 = arith.constant 0 : index
    %58 = vector.load %arg6[%c0_26, %c0_27] : memref<256x2048xbf16, #tpu.memory_space<vmem>>, vector<256x2048xbf16>
    %59 = arith.truncf %55 : vector<8x256xf32> to vector<8x256xbf16>
    %cst_28 = arith.constant dense<0.000000e+00> : vector<8x2048xf32>
    %60 = tpu.matmul %59, %58, %cst_28 {dimension_numbers = #tpu.dot_dimension_numbers<[1], [0], [0], [1], [0, 0, 1, 1], [], []>} : vector<8x256xbf16>, vector<256x2048xbf16>, vector<8x2048xf32> -> vector<8x2048xf32>
    %61 = vector.broadcast %27 : vector<1x2048xf32> to vector<8x2048xf32>
    %62 = arith.addf %60, %61 : vector<8x2048xf32>
    %cst_29 = arith.constant 0.000000e+00 : f32
    %63 = vector.broadcast %cst_29 : f32 to vector<8x2048xf32>
    %64 = arith.maximumf %62, %63 : vector<8x2048xf32>
    %c1_i32_30 = arith.constant 1 : i32
    %65 = tpu.memref_slice %arg8[%c1_i32_30] : memref<2x!tpu.dma_semaphore, #tpu.memory_space<semaphore_mem>> -> memref<1x!tpu.dma_semaphore, #tpu.memory_space<semaphore_mem>>
    %66 = tpu.memref_squeeze %65 : memref<1x!tpu.dma_semaphore, #tpu.memory_space<semaphore_mem>> -> memref<!tpu.dma_semaphore, #tpu.memory_space<semaphore_mem>>
    tpu.wait_dma2 semaphore(%66 : memref<!tpu.dma_semaphore, #tpu.memory_space<semaphore_mem>>) src(%arg4 : memref<2048x256xbf16, #tpu.memory_space<any>>) dst(%arg7 : memref<2048x256xbf16, #tpu.memory_space<vmem>>)
    %c0_31 = arith.constant 0 : index
    %c0_32 = arith.constant 0 : index
    %67 = vector.load %arg7[%c0_31, %c0_32] : memref<2048x256xbf16, #tpu.memory_space<vmem>>, vector<2048x256xbf16>
    %68 = arith.truncf %64 : vector<8x2048xf32> to vector<8x2048xbf16>
    %cst_33 = arith.constant dense<0.000000e+00> : vector<8x256xf32>
    %69 = tpu.matmul %68, %67, %cst_33 {dimension_numbers = #tpu.dot_dimension_numbers<[1], [0], [0], [1], [0, 0, 1, 1], [], []>} : vector<8x2048xbf16>, vector<2048x256xbf16>, vector<8x256xf32> -> vector<8x256xf32>
    %70 = vector.broadcast %28 : vector<1x256xf32> to vector<8x256xf32>
    %71 = arith.addf %69, %70 : vector<8x256xf32>
    %72 = arith.addf %55, %71 : vector<8x256xf32>
    %cst_34 = arith.constant dense<0.000000e+00> : vector<8xf32>
    %73 = vector.multi_reduction <add>, %72, %cst_34 [1] : vector<8x256xf32> to vector<8xf32>
    %74 = vector.shape_cast %73 : vector<8xf32> to vector<8x1xf32>
    %cst_35 = arith.constant 2.560000e+02 : f32
    %75 = vector.broadcast %cst_35 : f32 to vector<8x1xf32>
    %76 = arith.divf %74, %75 : vector<8x1xf32>
    %77 = vector.broadcast %76 : vector<8x1xf32> to vector<8x256xf32>
    %78 = arith.subf %72, %77 : vector<8x256xf32>
    %79 = arith.mulf %78, %78 : vector<8x256xf32>
    %cst_36 = arith.constant dense<0.000000e+00> : vector<8xf32>
    %80 = vector.multi_reduction <add>, %79, %cst_36 [1] : vector<8x256xf32> to vector<8xf32>
    %81 = vector.shape_cast %80 : vector<8xf32> to vector<8x1xf32>
    %cst_37 = arith.constant 2.560000e+02 : f32
    %82 = vector.broadcast %cst_37 : f32 to vector<8x1xf32>
    %83 = arith.divf %81, %82 : vector<8x1xf32>
    %84 = vector.broadcast %76 : vector<8x1xf32> to vector<8x256xf32>
    %85 = arith.subf %72, %84 : vector<8x256xf32>
    %cst_38 = arith.constant 9.99999974E-6 : f32
    %86 = vector.broadcast %cst_38 : f32 to vector<8x1xf32>
    %87 = arith.addf %83, %86 : vector<8x1xf32>
    %88 = math.rsqrt %87 : vector<8x1xf32>
    %89 = vector.broadcast %88 : vector<8x1xf32> to vector<8x256xf32>
    %90 = arith.mulf %85, %89 : vector<8x256xf32>
    %91 = vector.broadcast %25 : vector<1x256xf32> to vector<8x256xf32>
    %92 = arith.mulf %90, %91 : vector<8x256xf32>
    %93 = vector.broadcast %26 : vector<1x256xf32> to vector<8x256xf32>
    %94 = arith.addf %92, %93 : vector<8x256xf32>
    %95 = arith.truncf %94 : vector<8x256xf32> to vector<8x256xbf16>
    %cst_39 = arith.constant dense<0.000000e+00> : vector<8x256xf32>
    %96 = tpu.matmul %95, %21, %cst_39 {dimension_numbers = #tpu.dot_dimension_numbers<[1], [0], [0], [1], [0, 0, 1, 1], [], []>} : vector<8x256xbf16>, vector<256x256xbf16>, vector<8x256xf32> -> vector<8x256xf32>
    %97 = vector.broadcast %22 : vector<1x256xf32> to vector<8x256xf32>
    %98 = arith.addf %96, %97 : vector<8x256xf32>
    %99 = arith.addf %94, %98 : vector<8x256xf32>
    %cst_40 = arith.constant dense<0.000000e+00> : vector<8xf32>
    %100 = vector.multi_reduction <add>, %99, %cst_40 [1] : vector<8x256xf32> to vector<8xf32>
    %101 = vector.shape_cast %100 : vector<8xf32> to vector<8x1xf32>
    %cst_41 = arith.constant 2.560000e+02 : f32
    %102 = vector.broadcast %cst_41 : f32 to vector<8x1xf32>
    %103 = arith.divf %101, %102 : vector<8x1xf32>
    %104 = vector.broadcast %103 : vector<8x1xf32> to vector<8x256xf32>
    %105 = arith.subf %99, %104 : vector<8x256xf32>
    %106 = arith.mulf %105, %105 : vector<8x256xf32>
    %cst_42 = arith.constant dense<0.000000e+00> : vector<8xf32>
    %107 = vector.multi_reduction <add>, %106, %cst_42 [1] : vector<8x256xf32> to vector<8xf32>
    %108 = vector.shape_cast %107 : vector<8xf32> to vector<8x1xf32>
    %cst_43 = arith.constant 2.560000e+02 : f32
    %109 = vector.broadcast %cst_43 : f32 to vector<8x1xf32>
    %110 = arith.divf %108, %109 : vector<8x1xf32>
    %111 = vector.broadcast %103 : vector<8x1xf32> to vector<8x256xf32>
    %112 = arith.subf %99, %111 : vector<8x256xf32>
    %cst_44 = arith.constant 9.99999974E-6 : f32
    %113 = vector.broadcast %cst_44 : f32 to vector<8x1xf32>
    %114 = arith.addf %110, %113 : vector<8x1xf32>
    %115 = math.rsqrt %114 : vector<8x1xf32>
    %116 = vector.broadcast %115 : vector<8x1xf32> to vector<8x256xf32>
    %117 = arith.mulf %112, %116 : vector<8x256xf32>
    %118 = vector.broadcast %23 : vector<1x256xf32> to vector<8x256xf32>
    %119 = arith.mulf %117, %118 : vector<8x256xf32>
    %120 = vector.broadcast %24 : vector<1x256xf32> to vector<8x256xf32>
    %121 = arith.addf %119, %120 : vector<8x256xf32>
    %c0_45 = arith.constant 0 : index
    %c0_46 = arith.constant 0 : index
    %122 = vector.load %arg6[%c0_45, %c0_46] : memref<256x2048xbf16, #tpu.memory_space<vmem>>, vector<256x2048xbf16>
    %123 = arith.truncf %121 : vector<8x256xf32> to vector<8x256xbf16>
    %cst_47 = arith.constant dense<0.000000e+00> : vector<8x2048xf32>
    %124 = tpu.matmul %123, %122, %cst_47 {dimension_numbers = #tpu.dot_dimension_numbers<[1], [0], [0], [1], [0, 0, 1, 1], [], []>} : vector<8x256xbf16>, vector<256x2048xbf16>, vector<8x2048xf32> -> vector<8x2048xf32>
    %125 = vector.broadcast %27 : vector<1x2048xf32> to vector<8x2048xf32>
    %126 = arith.addf %124, %125 : vector<8x2048xf32>
    %cst_48 = arith.constant 0.000000e+00 : f32
    %127 = vector.broadcast %cst_48 : f32 to vector<8x2048xf32>
    %128 = arith.maximumf %126, %127 : vector<8x2048xf32>
    %c0_49 = arith.constant 0 : index
    %c0_50 = arith.constant 0 : index
    %129 = vector.load %arg7[%c0_49, %c0_50] : memref<2048x256xbf16, #tpu.memory_space<vmem>>, vector<2048x256xbf16>
    %130 = arith.truncf %128 : vector<8x2048xf32> to vector<8x2048xbf16>
    %cst_51 = arith.constant dense<0.000000e+00> : vector<8x256xf32>
    %131 = tpu.matmul %130, %129, %cst_51 {dimension_numbers = #tpu.dot_dimension_numbers<[1], [0], [0], [1], [0, 0, 1, 1], [], []>} : vector<8x2048xbf16>, vector<2048x256xbf16>, vector<8x256xf32> -> vector<8x256xf32>
    %132 = vector.broadcast %28 : vector<1x256xf32> to vector<8x256xf32>
    %133 = arith.addf %131, %132 : vector<8x256xf32>
    %134 = arith.addf %121, %133 : vector<8x256xf32>
    %cst_52 = arith.constant dense<0.000000e+00> : vector<8xf32>
    %135 = vector.multi_reduction <add>, %134, %cst_52 [1] : vector<8x256xf32> to vector<8xf32>
    %136 = vector.shape_cast %135 : vector<8xf32> to vector<8x1xf32>
    %cst_53 = arith.constant 2.560000e+02 : f32
    %137 = vector.broadcast %cst_53 : f32 to vector<8x1xf32>
    %138 = arith.divf %136, %137 : vector<8x1xf32>
    %139 = vector.broadcast %138 : vector<8x1xf32> to vector<8x256xf32>
    %140 = arith.subf %134, %139 : vector<8x256xf32>
    %141 = arith.mulf %140, %140 : vector<8x256xf32>
    %cst_54 = arith.constant dense<0.000000e+00> : vector<8xf32>
    %142 = vector.multi_reduction <add>, %141, %cst_54 [1] : vector<8x256xf32> to vector<8xf32>
    %143 = vector.shape_cast %142 : vector<8xf32> to vector<8x1xf32>
    %cst_55 = arith.constant 2.560000e+02 : f32
    %144 = vector.broadcast %cst_55 : f32 to vector<8x1xf32>
    %145 = arith.divf %143, %144 : vector<8x1xf32>
    %146 = vector.broadcast %138 : vector<8x1xf32> to vector<8x256xf32>
    %147 = arith.subf %134, %146 : vector<8x256xf32>
    %cst_56 = arith.constant 9.99999974E-6 : f32
    %148 = vector.broadcast %cst_56 : f32 to vector<8x1xf32>
    %149 = arith.addf %145, %148 : vector<8x1xf32>
    %150 = math.rsqrt %149 : vector<8x1xf32>
    %151 = vector.broadcast %150 : vector<8x1xf32> to vector<8x256xf32>
    %152 = arith.mulf %147, %151 : vector<8x256xf32>
    %153 = vector.broadcast %25 : vector<1x256xf32> to vector<8x256xf32>
    %154 = arith.mulf %152, %153 : vector<8x256xf32>
    %155 = vector.broadcast %26 : vector<1x256xf32> to vector<8x256xf32>
    %156 = arith.addf %154, %155 : vector<8x256xf32>
    %c512 = arith.constant 512 : index
    %c0_57 = arith.constant 0 : index
    %157 = vector.load %arg1[%c512, %c0_57] : memref<1312x256xbf16, #tpu.memory_space<vmem>>, vector<256x256xbf16>
    %c0_58 = arith.constant 0 : index
    %c3968 = arith.constant 3968 : index
    %158 = vector.load %arg2[%c0_58, %c3968] : memref<1x4992xf32, #tpu.memory_space<vmem>>, vector<1x256xf32>
    %159 = arith.truncf %156 : vector<8x256xf32> to vector<8x256xbf16>
    %cst_59 = arith.constant dense<0.000000e+00> : vector<8x256xf32>
    %160 = tpu.matmul %159, %157, %cst_59 {dimension_numbers = #tpu.dot_dimension_numbers<[1], [0], [0], [1], [0, 0, 1, 1], [], []>} : vector<8x256xbf16>, vector<256x256xbf16>, vector<8x256xf32> -> vector<8x256xf32>
    %161 = vector.broadcast %158 : vector<1x256xf32> to vector<8x256xf32>
    %162 = arith.addf %160, %161 : vector<8x256xf32>
    %cst_60 = arith.constant 0.000000e+00 : f32
    %163 = vector.broadcast %cst_60 : f32 to vector<8x256xf32>
    %164 = arith.maximumf %162, %163 : vector<8x256xf32>
    %c768 = arith.constant 768 : index
    %c0_61 = arith.constant 0 : index
    %165 = vector.load %arg1[%c768, %c0_61] : memref<1312x256xbf16, #tpu.memory_space<vmem>>, vector<256x256xbf16>
    %c0_62 = arith.constant 0 : index
    %c4224 = arith.constant 4224 : index
    %166 = vector.load %arg2[%c0_62, %c4224] : memref<1x4992xf32, #tpu.memory_space<vmem>>, vector<1x256xf32>
    %167 = arith.truncf %164 : vector<8x256xf32> to vector<8x256xbf16>
    %cst_63 = arith.constant dense<0.000000e+00> : vector<8x256xf32>
    %168 = tpu.matmul %167, %165, %cst_63 {dimension_numbers = #tpu.dot_dimension_numbers<[1], [0], [0], [1], [0, 0, 1, 1], [], []>} : vector<8x256xbf16>, vector<256x256xbf16>, vector<8x256xf32> -> vector<8x256xf32>
    %169 = vector.broadcast %166 : vector<1x256xf32> to vector<8x256xf32>
    %170 = arith.addf %168, %169 : vector<8x256xf32>
    %cst_64 = arith.constant 0.000000e+00 : f32
    %171 = vector.broadcast %cst_64 : f32 to vector<8x256xf32>
    %172 = arith.maximumf %170, %171 : vector<8x256xf32>
    %c1024 = arith.constant 1024 : index
    %c0_65 = arith.constant 0 : index
    %173 = vector.load %arg1[%c1024, %c0_65] : memref<1312x256xbf16, #tpu.memory_space<vmem>>, vector<256x32xbf16>
    %c0_66 = arith.constant 0 : index
    %c4480 = arith.constant 4480 : index
    %174 = vector.load %arg2[%c0_66, %c4480] : memref<1x4992xf32, #tpu.memory_space<vmem>>, vector<1x32xf32>
    %175 = arith.truncf %172 : vector<8x256xf32> to vector<8x256xbf16>
    %cst_67 = arith.constant dense<0.000000e+00> : vector<8x32xf32>
    %176 = tpu.matmul %175, %173, %cst_67 {dimension_numbers = #tpu.dot_dimension_numbers<[1], [0], [0], [1], [0, 0, 1, 1], [], []>} : vector<8x256xbf16>, vector<256x32xbf16>, vector<8x32xf32> -> vector<8x32xf32>
    %177 = vector.broadcast %174 : vector<1x32xf32> to vector<8x32xf32>
    %178 = arith.addf %176, %177 : vector<8x32xf32>
    %cst_68 = arith.constant 0.000000e+00 : f32
    %179 = vector.broadcast %cst_68 : f32 to vector<8x32xf32>
    %180 = arith.maximumf %178, %179 : vector<8x32xf32>
    %c1280 = arith.constant 1280 : index
    %c0_69 = arith.constant 0 : index
    %181 = vector.load %arg1[%c1280, %c0_69] : memref<1312x256xbf16, #tpu.memory_space<vmem>>, vector<32x8xbf16>
    %c0_70 = arith.constant 0 : index
    %c4608 = arith.constant 4608 : index
    %182 = vector.load %arg2[%c0_70, %c4608] : memref<1x4992xf32, #tpu.memory_space<vmem>>, vector<1x8xf32>
    %183 = arith.truncf %180 : vector<8x32xf32> to vector<8x32xbf16>
    %cst_71 = arith.constant dense<0.000000e+00> : vector<8x8xf32>
    %184 = tpu.matmul %183, %181, %cst_71 {dimension_numbers = #tpu.dot_dimension_numbers<[1], [0], [0], [1], [0, 0, 1, 1], [], []>} : vector<8x32xbf16>, vector<32x8xbf16>, vector<8x8xf32> -> vector<8x8xf32>
    %185 = vector.broadcast %182 : vector<1x8xf32> to vector<8x8xf32>
    %186 = arith.addf %184, %185 : vector<8x8xf32>
    %c0_72 = arith.constant 0 : index
    %c0_73 = arith.constant 0 : index
    %187 = vector.load %arg5[%c0_72, %c0_73] : memref<16x8xf32, #tpu.memory_space<vmem>>, vector<8x8xf32>
    tpu.vector_store %arg5[%c0_72, %c0_73], %186 {strides = array<i32>} : memref<16x8xf32, #tpu.memory_space<vmem>>, vector<8x8xf32>,
    %cst_74 = arith.constant dense<0.000000e+00> : vector<256xf32>
    %188 = vector.multi_reduction <add>, %172, %cst_74 [0] : vector<8x256xf32> to vector<256xf32>
    %189 = vector.shape_cast %188 : vector<256xf32> to vector<1x256xf32>
    %cst_75 = arith.constant 8.000000e+00 : f32
    %190 = vector.broadcast %cst_75 : f32 to vector<1x256xf32>
    %191 = arith.divf %189, %190 : vector<1x256xf32>
    %c1024_76 = arith.constant 1024 : index
    %c128_77 = arith.constant 128 : index
    %192 = vector.load %arg1[%c1024_76, %c128_77] : memref<1312x256xbf16, #tpu.memory_space<vmem>>, vector<256x32xbf16>
    %c0_78 = arith.constant 0 : index
    %c4736 = arith.constant 4736 : index
    %193 = vector.load %arg2[%c0_78, %c4736] : memref<1x4992xf32, #tpu.memory_space<vmem>>, vector<1x32xf32>
    %194 = arith.truncf %191 : vector<1x256xf32> to vector<1x256xbf16>
    %cst_79 = arith.constant dense<0.000000e+00> : vector<1x32xf32>
    %195 = tpu.matmul %194, %192, %cst_79 {dimension_numbers = #tpu.dot_dimension_numbers<[1], [0], [0], [1], [0, 0, 1, 1], [], []>} : vector<1x256xbf16>, vector<256x32xbf16>, vector<1x32xf32> -> vector<1x32xf32>
    %196 = arith.addf %195, %193 : vector<1x32xf32>
    %cst_80 = arith.constant 0.000000e+00 : f32
    %197 = vector.broadcast %cst_80 : f32 to vector<1x32xf32>
    %198 = arith.maximumf %196, %197 : vector<1x32xf32>
    %c1280_81 = arith.constant 1280 : index
    %c128_82 = arith.constant 128 : index
    %199 = vector.load %arg1[%c1280_81, %c128_82] : memref<1312x256xbf16, #tpu.memory_space<vmem>>, vector<32x8xbf16>
    %c0_83 = arith.constant 0 : index
    %c4864 = arith.constant 4864 : index
    %200 = vector.load %arg2[%c0_83, %c4864] : memref<1x4992xf32, #tpu.memory_space<vmem>>, vector<1x8xf32>
    %201 = arith.truncf %198 : vector<1x32xf32> to vector<1x32xbf16>
    %cst_84 = arith.constant dense<0.000000e+00> : vector<1x8xf32>
    %202 = tpu.matmul %201, %199, %cst_84 {dimension_numbers = #tpu.dot_dimension_numbers<[1], [0], [0], [1], [0, 0, 1, 1], [], []>} : vector<1x32xbf16>, vector<32x8xbf16>, vector<1x8xf32> -> vector<1x8xf32>
    %203 = arith.addf %202, %200 : vector<1x8xf32>
    %204 = vector.shape_cast %203 : vector<1x8xf32> to vector<1x8xf32>
    %205 = vector.broadcast %204 : vector<1x8xf32> to vector<8x8xf32>
    %c8 = arith.constant 8 : index
    %c0_85 = arith.constant 0 : index
    %206 = vector.load %arg5[%c8, %c0_85] : memref<16x8xf32, #tpu.memory_space<vmem>>, vector<8x8xf32>
    tpu.vector_store %arg5[%c8, %c0_85], %205 {strides = array<i32>} : memref<16x8xf32, #tpu.memory_space<vmem>>, vector<8x8xf32>,
    return
  }
}

</mosaic_0001>

<bundles_post_ra>
// kernel: tpu_custom_call.1
= control target key start
LH: loop header
LB: loop body
LE: loop exit
PB: predicated region body
PF: predicated region fallthrough
CT: control target
= control target key end

     0   :  { %10 = vsyncpa [#allocation6], 0  ;;  %s14653_s0 = inlined_call_operand.hbm [shape: f32[8,128], index: 0, kind: input, shape index: {}]   ;;  %s14654_s1 = inlined_call_operand.hbm [shape: bf16[1312,256], index: 1, kind: input, shape index: {}]   ;;  %s14655_s2 = inlined_call_operand.hbm [shape: f32[1,4992], index: 2, kind: input, shape index: {}]   ;;  %s14656_s3 = inlined_call_operand.hbm [shape: bf16[256,2048], index: 3, kind: input, shape index: {}]   ;;  %s14657_s4 = inlined_call_operand.hbm [shape: bf16[2048,256], index: 4, kind: input, shape index: {}]   ;;  %s14658_s5 = inlined_call_operand.vmem [shape: f32[16,8], index: 5, kind: output, shape index: {}]  }
   0x1   :  { %11 = vsyncpa [#allocation8], 0  ;;  %s27_s20 = sshll.u32 %s14654_s1, 4  ;;  %s12872_s21 = smov [#allocation7]   ;;  %s28_s20 = int_to_ptr.hbm [resolvable:$true] %s27_s20 }
   0x2   :  { %s29_s22 = sshll.u32 %s12872_s21, 4  ;;  %s17_s25 = sshll.u32 %s14653_s0, 4  ;;  %s30_s22 = int_to_ptr.vmem [resolvable:$true] %s29_s22  ;;  %s18_s25 = int_to_ptr.hbm [resolvable:$true] %s17_s25 }
   0x3   :  { %s12873_s26 = smov 128   ;;  %s12874_s27 = smov 8  }
   0x4   :  { %35 = dma.hbm_to_vmem [thread:$0]  %s28_s20, 20992, %s30_s22, [#allocation8], %s12873_s26, %s12873_s26, %s12874_s27  }
   0x5   :  { %s12875_s28 = smov [#allocation5]   ;;  %s41_s7 = sshll.u32 %s14655_s2, 4  ;;  %s42_s7 = int_to_ptr.hbm [resolvable:$true] %s41_s7 }
   0x6   :  { %s19_s29 = sshll.u32 %s12875_s28, 4  ;;  %s12876_s1 = smov [#allocation9]   ;;  %s20_s29 = int_to_ptr.vmem [resolvable:$true] %s19_s29 }
   0x7   :  { %22 = dma.hbm_to_vmem [thread:$0]  %s18_s25, 128, %s20_s29, [#allocation6]  }
   0x8   :  { %s43_s8 = sshll.u32 %s12876_s1, 4  ;;  %s44_s8 = int_to_ptr.vmem [resolvable:$true] %s43_s8 }
   0x9   :  { %46 = dma.hbm_to_vmem [thread:$0]  %s42_s7, 624, %s44_s8, [#allocation8]  }
   0xa   :  { %12864 = dma.done.wait [#allocation6], 128  }
   0xb   :  { %12865 = vsyncadd [#allocation6], 4294967168 }
   0xc   :  { %12866 = dma.done.wait [#allocation8], 21616  }
   0xd   :  { %12867 = vsyncadd [#allocation8], 4294945680  ;;  %v12920_v0 = vld [vmem:[#allocation9 + $0x1b] sm:$0x3]  ;;  %v12922_v1 = vld [vmem:[#allocation9 + $0x1d] sm:$0x3] }
   0xe   :  { %14950 = vst [vmem:[#allocation20_spill] sm:$0xff] %v12920_v0  ;;  %v12924_v2 = vld [vmem:[#allocation9 + $0x9] sm:$0xff]  ;;  %v12926_v3 = vld [vmem:[#allocation9 + $0x11] sm:$0xff]  ;;  %v12928_v4 = vld [vmem:[#allocation9 + $0x19] sm:$0x3]  ;;  %s67_s9 = sshll.u32 %s14656_s3, 4  ;;  %s68_s9 = int_to_ptr.hbm [resolvable:$true] %s67_s9 }
   0xf   :  { %14951 = vst [vmem:[#allocation21_spill] sm:$0xff] %v12922_v1  ;;  %v8126_v5 = vld [vmem:[#allocation7 + $0x70] sm:$0xf]  ;;  %v11803_v6 = vld [vmem:[#allocation7 + $0x74] sm:$0xf0]  ;;  %s12878_s10 = smov [#allocation2]  }
  0x10   :  { %14952 = vst [vmem:[#allocation22_spill] sm:$0xff] %v12924_v2  ;;  %v8122_v7 = vld [vmem:[#allocation7 + $0x60] sm:$0xf]  ;;  %v11802_v8 = vld [vmem:[#allocation7 + $0x64] sm:$0xf0]  ;;  %v8127_v9 = vor.u32 %v11803_v6, %v8126_v5  ;;  %v87_v6 = vld [vmem:[#allocation5] sm:$0xff] }
  0x11   :  { %14953 = vst [vmem:[#allocation23_spill] sm:$0xff] %v12926_v3  ;;  %v8123_v10 = vor.u32 %v11802_v8, %v8122_v7  ;;  %v8118_v11 = vld [vmem:[#allocation7 + $0x50] sm:$0xf]  ;;  %v11801_v12 = vld [vmem:[#allocation7 + $0x54] sm:$0xf0]  ;;  %v105_v7 = vpack.c.bf16 %v87_v6, %v87_v6  ;;  %s69_s11 = sshll.u32 %s12878_s10, 4  ;;  %s70_s11 = int_to_ptr.vmem [resolvable:$true] %s69_s11 }
  0x12   :  { %157 = vmatpush.bf16.msra.mxu0 %v8127_v9  ;;  %v8186_v13 = vld [vmem:[#allocation7 + $0xf0] sm:$0xf]  ;;  %v11819_v14 = vld [vmem:[#allocation7 + $0xf4] sm:$0xf0]  ;;  %v11818_v16 = vld [vmem:[#allocation7 + $0xf4] sm:$0xf]  ;;  %v8119_v19 = vor.u32 %v11801_v12, %v8118_v11 }
  0x13   :  { %v8187_v15 = vor.u32 %v11819_v14, %v8186_v13  ;;  %v8188_v17 = vld [vmem:[#allocation7 + $0xf8] sm:$0xf0]  ;;  %v8178_v18 = vld [vmem:[#allocation7 + $0xe0] sm:$0xf]  ;;  %v11817_v21 = vld [vmem:[#allocation7 + $0xe4] sm:$0xf0] }
  0x14   :  { %v8191_v20 = vor.u32 %v11818_v16, %v8188_v17  ;;  %v11816_v22 = vld [vmem:[#allocation7 + $0xe4] sm:$0xf]  ;;  %v8180_v23 = vld [vmem:[#allocation7 + $0xe8] sm:$0xf0]  ;;  %v8114_v24 = vld [vmem:[#allocation7 + $0x40] sm:$0xf]  ;;  %v8179_v26 = vor.u32 %v11817_v21, %v8178_v18 }
  0x15   :  { %v11800_v25 = vld [vmem:[#allocation7 + $0x44] sm:$0xf0]  ;;  %274 = vmatpush.bf16.msra.mxu1 %v8187_v15  ;;  %v8183_v27 = vor.u32 %v11816_v22, %v8180_v23  ;;  %v8170_v28 = vld [vmem:[#allocation7 + $0xd0] sm:$0xf]  ;;  %v11815_v29 = vld [vmem:[#allocation7 + $0xd4] sm:$0xf0] }
  0x16   :  { %158 = vmatpush.bf16.msra.mxu0 %v8123_v10  ;;  %287 = vmatpush.bf16.msra.mxu2 %v8191_v20  ;;  %v11814_v30 = vld [vmem:[#allocation7 + $0xd4] sm:$0xf]  ;;  %v8172_v31 = vld [vmem:[#allocation7 + $0xd8] sm:$0xf0]  ;;  %v8115_v32 = vor.u32 %v11800_v25, %v8114_v24  ;;  %v8110_v33 = vld [vmem:[#allocation7 + $0x30] sm:$0xf]  ;;  %v8171_v35 = vor.u32 %v11815_v29, %v8170_v28 }
  0x17   :  { %v11799_v34 = vld [vmem:[#allocation7 + $0x34] sm:$0xf0]  ;;  %v8175_v36 = vor.u32 %v11814_v30, %v8172_v31  ;;  %v8162_v37 = vld [vmem:[#allocation7 + $0xc0] sm:$0xf]  ;;  %v11813_v38 = vld [vmem:[#allocation7 + $0xc4] sm:$0xf0] }
  0x18   :  { %v11812_v39 = vld [vmem:[#allocation7 + $0xc4] sm:$0xf]  ;;  %v8164_v40 = vld [vmem:[#allocation7 + $0xc8] sm:$0xf0]  ;;  %v8111_v41 = vor.u32 %v11799_v34, %v8110_v33  ;;  %v8106_v42 = vld [vmem:[#allocation7 + $0x20] sm:$0xf]  ;;  %v8163_v44 = vor.u32 %v11813_v38, %v8162_v37 }
  0x19   :  { %275 = vmatpush.bf16.msra.mxu1 %v8179_v26  ;;  %v11798_v43 = vld [vmem:[#allocation7 + $0x24] sm:$0xf0]  ;;  %v8167_v45 = vor.u32 %v11812_v39, %v8164_v40  ;;  %v8154_v46 = vld [vmem:[#allocation7 + $0xb0] sm:$0xf]  ;;  %v11811_v47 = vld [vmem:[#allocation7 + $0xb4] sm:$0xf0] }
  0x1a   :  { %159 = vmatpush.bf16.msra.mxu0 %v8119_v19  ;;  %288 = vmatpush.bf16.msra.mxu2 %v8183_v27  ;;  %v11810_v48 = vld [vmem:[#allocation7 + $0xb4] sm:$0xf]  ;;  %v8156_v49 = vld [vmem:[#allocation7 + $0xb8] sm:$0xf0]  ;;  %v8107_v50 = vor.u32 %v11798_v43, %v8106_v42  ;;  %v8102_v51 = vld [vmem:[#allocation7 + $0x10] sm:$0xf]  ;;  %v8155_v53 = vor.u32 %v11811_v47, %v8154_v46 }
  0x1b   :  { %v11797_v52 = vld [vmem:[#allocation7 + $0x14] sm:$0xf0]  ;;  %v8159_v54 = vor.u32 %v11810_v48, %v8156_v49  ;;  %v8146_v55 = vld [vmem:[#allocation7 + $0xa0] sm:$0xf]  ;;  %v11809_v56 = vld [vmem:[#allocation7 + $0xa4] sm:$0xf0] }
  0x1c   :  { %v11808_v57 = vld [vmem:[#allocation7 + $0xa4] sm:$0xf]  ;;  %v8148_v58 = vld [vmem:[#allocation7 + $0xa8] sm:$0xf0]  ;;  %v8103_v59 = vor.u32 %v11797_v52, %v8102_v51  ;;  %v8098_v60 = vld [vmem:[#allocation7] sm:$0xf]  ;;  %v8147_v62 = vor.u32 %v11809_v56, %v8146_v55 }
  0x1d   :  { %276 = vmatpush.bf16.msra.mxu1 %v8171_v35  ;;  %v11796_v61 = vld [vmem:[#allocation7 + $0x4] sm:$0xf0]  ;;  %v8151_v63 = vor.u32 %v11808_v57, %v8148_v58  ;;  %v8138_v8 = vld [vmem:[#allocation7 + $0x90] sm:$0xf]  ;;  %v11807_v9 = vld [vmem:[#allocation7 + $0x94] sm:$0xf0] }
  0x1e   :  { %160 = vmatpush.bf16.msra.mxu0 %v8115_v32  ;;  %289 = vmatpush.bf16.msra.mxu2 %v8175_v36  ;;  %v8099_v5 = vor.u32 %v11796_v61, %v8098_v60  ;;  %v11806_v10 = vld [vmem:[#allocation7 + $0x94] sm:$0xf]  ;;  %v8139_v11 = vor.u32 %v11807_v9, %v8138_v8  ;;  %v8140_v12 = vld [vmem:[#allocation7 + $0x98] sm:$0xf0]  ;;  %v8130_v14 = vld [vmem:[#allocation7 + $0x80] sm:$0xf] }
  0x1f   :  { %v8143_v13 = vor.u32 %v11806_v10, %v8140_v12  ;;  %v11805_v15 = vld [vmem:[#allocation7 + $0x84] sm:$0xf0]  ;;  %v11804_v16 = vld [vmem:[#allocation7 + $0x84] sm:$0xf]  ;;  %v8132_v18 = vld [vmem:[#allocation7 + $0x88] sm:$0xf0] }
  0x20   :  { %v8131_v17 = vor.u32 %v11805_v15, %v8130_v14  ;;  %v8135_v19 = vor.u32 %v11804_v16, %v8132_v18  ;;  %v8250_v20 = vld [vmem:[#allocation7 + $0x170] sm:$0xf]  ;;  %v11835_v21 = vld [vmem:[#allocation7 + $0x174] sm:$0xf0]  ;;  %v11834_v22 = vld [vmem:[#allocation7 + $0x174] sm:$0xf] }
  0x21   :  { %277 = vmatpush.bf16.msra.mxu1 %v8163_v44  ;;  %v12930_v23 = vor.u32 %v11835_v21, %v8250_v20  ;;  %v8252_v24 = vld [vmem:[#allocation7 + $0x178] sm:$0xf0]  ;;  %v8242_v25 = vld [vmem:[#allocation7 + $0x160] sm:$0xf]  ;;  %v11833_v26 = vld [vmem:[#allocation7 + $0x164] sm:$0xf0] }
  0x22   :  { %161 = vmatpush.bf16.msra.mxu0 %v8111_v41  ;;  %290 = vmatpush.bf16.msra.mxu2 %v8167_v45  ;;  %v12932_v27 = vor.u32 %v11834_v22, %v8252_v24  ;;  %v11832_v28 = vld [vmem:[#allocation7 + $0x164] sm:$0xf]  ;;  %v8244_v29 = vld [vmem:[#allocation7 + $0x168] sm:$0xf0]  ;;  %v8314_v30 = vld [vmem:[#allocation7 + $0x1f0] sm:$0xf]  ;;  %v12935_v31 = vor.u32 %v11833_v26, %v8242_v25 }
  0x23   :  { %509 = vmatpush.bf16.msra.mxu3 %v12930_v23  ;;  %v11851_v32 = vld [vmem:[#allocation7 + $0x1f4] sm:$0xf0]  ;;  %v11850_v33 = vld [vmem:[#allocation7 + $0x1f4] sm:$0xf]  ;;  %v8316_v34 = vld [vmem:[#allocation7 + $0x1f8] sm:$0xf0]  ;;  %v12938_v35 = vor.u32 %v11832_v28, %v8244_v29 }
  0x24   :  { %v12940_v36 = vor.u32 %v11851_v32, %v8314_v30  ;;  %v12942_v37 = vor.u32 %v11850_v33, %v8316_v34  ;;  %v8234_v38 = vld [vmem:[#allocation7 + $0x150] sm:$0xf]  ;;  %v11831_v39 = vld [vmem:[#allocation7 + $0x154] sm:$0xf0]  ;;  %v11830_v40 = vld [vmem:[#allocation7 + $0x154] sm:$0xf] }
  0x25   :  { %278 = vmatpush.bf16.msra.mxu1 %v8155_v53  ;;  %v8236_v41 = vld [vmem:[#allocation7 + $0x158] sm:$0xf0]  ;;  %v8306_v42 = vld [vmem:[#allocation7 + $0x1e0] sm:$0xf]  ;;  %v11849_v43 = vld [vmem:[#allocation7 + $0x1e4] sm:$0xf0]  ;;  %v12949_v47 = vor.u32 %v11831_v39, %v8234_v38 }
  0x26   :  { %162 = vmatpush.bf16.msra.mxu0 %v8107_v50  ;;  %291 = vmatpush.bf16.msra.mxu2 %v8159_v54  ;;  %v12946_v44 = vor.u32 %v11849_v43, %v8306_v42  ;;  %v11848_v45 = vld [vmem:[#allocation7 + $0x1e4] sm:$0xf]  ;;  %v8308_v46 = vld [vmem:[#allocation7 + $0x1e8] sm:$0xf0]  ;;  %v8226_v49 = vld [vmem:[#allocation7 + $0x140] sm:$0xf]  ;;  %v12954_v51 = vor.u32 %v11830_v40, %v8236_v41 }
  0x27   :  { %510 = vmatpush.bf16.msra.mxu3 %v12935_v31  ;;  %v12951_v48 = vor.u32 %v11848_v45, %v8308_v46  ;;  %v11829_v50 = vld [vmem:[#allocation7 + $0x144] sm:$0xf0]  ;;  %v8298_v52 = vld [vmem:[#allocation7 + $0x1d0] sm:$0xf]  ;;  %v11847_v53 = vld [vmem:[#allocation7 + $0x1d4] sm:$0xf0] }
  0x28   :  { %v11846_v54 = vld [vmem:[#allocation7 + $0x1d4] sm:$0xf]  ;;  %v11828_v55 = vld [vmem:[#allocation7 + $0x144] sm:$0xf]  ;;  %v8228_v56 = vld [vmem:[#allocation7 + $0x148] sm:$0xf0]  ;;  %v12958_v58 = vor.u32 %v11847_v53, %v8298_v52  ;;  %v12963_v61 = vor.u32 %v11829_v50, %v8226_v49 }
  0x29   :  { %279 = vmatpush.bf16.msra.mxu1 %v8147_v62  ;;  %v8300_v57 = vld [vmem:[#allocation7 + $0x1d8] sm:$0xf0]  ;;  %v8290_v60 = vld [vmem:[#allocation7 + $0x1c0] sm:$0xf]  ;;  %v11845_v62 = vld [vmem:[#allocation7 + $0x1c4] sm:$0xf0]  ;;  %v12966_v6 = vor.u32 %v11828_v55, %v8228_v56 }
  0x2a   :  { %163 = vmatpush.bf16.msra.mxu0 %v8103_v59  ;;  %292 = vmatpush.bf16.msra.mxu2 %v8151_v63  ;;  %v12960_v59 = vor.u32 %v11846_v54, %v8300_v57  ;;  %v11844_v63 = vld [vmem:[#allocation7 + $0x1c4] sm:$0xf]  ;;  %v11827_v8 = vld [vmem:[#allocation7 + $0x134] sm:$0xf0]  ;;  %v11826_v9 = vld [vmem:[#allocation7 + $0x134] sm:$0xf] }
  0x2b   :  { %511 = vmatpush.bf16.msra.mxu3 %v12949_v47  ;;  %v8220_v10 = vld [vmem:[#allocation7 + $0x138] sm:$0xf0]  ;;  %v11843_v15 = vld [vmem:[#allocation7 + $0x1b4] sm:$0xf0]  ;;  %v11842_v16 = vld [vmem:[#allocation7 + $0x1b4] sm:$0xf] }
  0x2c   :  { %v12978_v18 = vor.u32 %v11826_v9, %v8220_v10  ;;  %v11825_v20 = vld [vmem:[#allocation7 + $0x124] sm:$0xf0]  ;;  %v11824_v21 = vld [vmem:[#allocation7 + $0x124] sm:$0xf]  ;;  %v8212_v22 = vld [vmem:[#allocation7 + $0x128] sm:$0xf0] }
  0x2d   :  { %280 = vmatpush.bf16.msra.mxu1 %v8139_v11  ;;  %v12970_v11 = vor.u32 %v11845_v62, %v8290_v60  ;;  %v12990_v28 = vor.u32 %v11824_v21, %v8212_v22  ;;  %v12729_v29 = vld [vmem:[#allocation9] ss:$0 sm:$0xff]  ;;  %v8202_v39 = vld [vmem:[#allocation7 + $0x110] sm:$0xf]  ;;  %v11823_v40 = vld [vmem:[#allocation7 + $0x114] sm:$0xf0] }
  0x2e   :  { %164 = vmatpush.bf16.msra.mxu0 %v8099_v5  ;;  %293 = vmatpush.bf16.msra.mxu2 %v8143_v13  ;;  %v8292_v5 = vld [vmem:[#allocation7 + $0x1c8] sm:$0xf0]  ;;  %v8282_v13 = vld [vmem:[#allocation7 + $0x1b0] sm:$0xf]  ;;  %v11822_v41 = vld [vmem:[#allocation7 + $0x114] sm:$0xf]  ;;  %v12996_v42 = vor.u32 %v11823_v40, %v8202_v39 }
  0x2f   :  { %v12972_v12 = vor.u32 %v11844_v63, %v8292_v5  ;;  %512 = vmatpush.bf16.msra.mxu3 %v12963_v61  ;;  %v12982_v24 = vor.u32 %v11843_v15, %v8282_v13  ;;  %14954 = vst [vmem:[#allocation24_spill] sm:$0xff] %v12990_v28  ;;  %v8204_v43 = vld [vmem:[#allocation7 + $0x118] sm:$0xf0]  ;;  %v8274_v46 = vld [vmem:[#allocation7 + $0x1a0] sm:$0xf]  ;;  %s81_s14 = sshll.u32 %s14657_s4, 4  ;;  %s82_s14 = int_to_ptr.hbm [resolvable:$true] %s81_s14 }
  0x30   :  { %14955 = vst [vmem:[#allocation25_spill] sm:$0xff] %v12996_v42  ;;  %v12998_v45 = vor.u32 %v11822_v41, %v8204_v43  ;;  %v11841_v49 = vld [vmem:[#allocation7 + $0x1a4] sm:$0xf0]  ;;  %v11840_v50 = vld [vmem:[#allocation7 + $0x1a4] sm:$0xf]  ;;  %s12879_s15 = smov [#allocation3]  }
  0x31   :  { %165 = vmatmul.bf16.vlgmr.msra.gmra.mxu0 %v105_v7  ;;  %281 = vmatpush.bf16.msra.mxu1 %v8131_v17  ;;  %v8218_v7 = vld [vmem:[#allocation7 + $0x130] sm:$0xf]  ;;  %v8284_v17 = vld [vmem:[#allocation7 + $0x1b8] sm:$0xf0]  ;;  %v13001_v52 = vor.u32 %v11841_v49, %v8274_v46  ;;  %v8276_v53 = vld [vmem:[#allocation7 + $0x1a8] sm:$0xf0] }
  0x32   :  { %294 = vmatpush.bf16.msra.mxu2 %v8135_v19  ;;  %522 = vmatpush.bf16.msrb.mxu0 %v12940_v36  ;;  %v12975_v14 = vor.u32 %v11827_v8, %v8218_v7  ;;  %v8210_v19 = vld [vmem:[#allocation7 + $0x120] sm:$0xf]  ;;  %v12984_v25 = vor.u32 %v11842_v16, %v8284_v17  ;;  %14956 = vst [vmem:[#allocation26_spill] sm:$0xff] %v12998_v45  ;;  %v11821_v56 = vld [vmem:[#allocation7 + $0x104] sm:$0xf0]  ;;  %s83_s16 = sshll.u32 %s12879_s15, 4  ;;  %s84_s16 = int_to_ptr.vmem [resolvable:$true] %s83_s16 }
  0x33   :  { %v12987_v26 = vor.u32 %v11825_v20, %v8210_v19  ;;  %14957 = vst [vmem:[#allocation27_spill] sm:$0xff] %v13001_v52  ;;  %v13004_v54 = vor.u32 %v11840_v50, %v8276_v53  ;;  %v8194_v55 = vld [vmem:[#allocation7 + $0x100] sm:$0xf]  ;;  %v11820_v57 = vld [vmem:[#allocation7 + $0x104] sm:$0xf] }
  0x34   :  { %513 = vmatpush.bf16.msra.mxu3 %v12975_v14  ;;  %v13007_v60 = vor.u32 %v11821_v56, %v8194_v55  ;;  %v8196_v62 = vld [vmem:[#allocation7 + $0x108] sm:$0xf0]  ;;  %v8266_v5 = vld [vmem:[#allocation7 + $0x190] sm:$0xf]  ;;  %v11839_v7 = vld [vmem:[#allocation7 + $0x194] sm:$0xf0] }
  0x35   :  { %535 = vmatpush.bf16.msrb.mxu1 %v12932_v27  ;;  %14958 = vst [vmem:[#allocation28_spill] sm:$0xff] %v13004_v54  ;;  %v13010_v63 = vor.u32 %v11820_v57, %v8196_v62  ;;  %v13013_v8 = vor.u32 %v11839_v7, %v8266_v5  ;;  %v11838_v9 = vld [vmem:[#allocation7 + $0x194] sm:$0xf]  ;;  %v8268_v10 = vld [vmem:[#allocation7 + $0x198] sm:$0xf0] }
  0x36   :  { %548 = vmatpush.bf16.msrb.mxu2 %v12942_v37  ;;  %523 = vmatpush.bf16.msrb.mxu0 %v12946_v44  ;;  %14959 = vst [vmem:[#allocation29_spill] sm:$0xff] %v13007_v60  ;;  %v13016_v13 = vor.u32 %v11838_v9, %v8268_v10  ;;  %v8258_v15 = vld [vmem:[#allocation7 + $0x180] sm:$0xf]  ;;  %v11837_v16 = vld [vmem:[#allocation7 + $0x184] sm:$0xf0] }
  0x37   :  { %14960 = vst [vmem:[#allocation30_spill] sm:$0xff] %v13010_v63  ;;  %v11836_v17 = vld [vmem:[#allocation7 + $0x184] sm:$0xf]  ;;  %v13020_v19 = vor.u32 %v11837_v16, %v8258_v15  ;;  %v8260_v20 = vld [vmem:[#allocation7 + $0x188] sm:$0xf0] }
  0x38   :  { %514 = vmatpush.bf16.msra.mxu3 %v12987_v26  ;;  %14961 = vst [vmem:[#allocation31_spill] sm:$0xff] %v13013_v8  ;;  %v13022_v21 = vor.u32 %v11836_v17, %v8260_v20  ;;  %v187_v22 = vld [vmem:[#allocation9 + $0x1] sm:$0x3]  ;;  %v13026_v53 = vld [vmem:[#allocation9 + $0x3] sm:$0x3] }
  0x39   :  { %536 = vmatpush.bf16.msrb.mxu1 %v12938_v35  ;;  %14962 = vst [vmem:[#allocation32_spill] sm:$0xff] %v13016_v13  ;;  %v14663_v55 = vperm.slane %v13026_v53, 0  ;;  %v14664_v62 = vperm.slane %v13026_v53, 1  ;;  %72 = dma.hbm_to_vmem [thread:$0]  %s68_s9, 32768, %s70_s11, [#allocation4] }
  0x3a   :  { %549 = vmatpush.bf16.msrb.mxu2 %v12951_v48  ;;  %524 = vmatpush.bf16.msrb.mxu0 %v12958_v58  ;;  %14963 = vst [vmem:[#allocation33_spill] sm:$0xff] %v13020_v19  ;;  %86 = dma.hbm_to_vmem [thread:$0]  %s82_s14, 32768, %s84_s16, [#allocation4 + $0x1] }
  0x3b   :  { %14964 = vst [vmem:[#allocation34_spill] sm:$0xff] %v13022_v21 }
  0x3c   :  { %515 = vmatpush.bf16.msra.mxu3 %v12996_v42  ;;  %14965 = vst [vmem:[#allocation35_spill] sm:$0xff] %v13026_v53 }
  0x3d   :  { %537 = vmatpush.bf16.msrb.mxu1 %v12954_v51 }
  0x3e   :  { %550 = vmatpush.bf16.msrb.mxu2 %v12960_v59  ;;  %525 = vmatpush.bf16.msrb.mxu0 %v12970_v11 }
  0x40   :  { %516 = vmatpush.bf16.msra.mxu3 %v13007_v60 }
  0x41   :  { %538 = vmatpush.bf16.msrb.mxu1 %v12966_v6 }
  0x42   :  { %551 = vmatpush.bf16.msrb.mxu2 %v12972_v12  ;;  %526 = vmatpush.bf16.msrb.mxu0 %v12982_v24 }
  0x45   :  { %539 = vmatpush.bf16.msrb.mxu1 %v12978_v18 }
  0x46   :  { %552 = vmatpush.bf16.msrb.mxu2 %v12984_v25  ;;  %527 = vmatpush.bf16.msrb.mxu0 %v13001_v52 }
  0x49   :  { %540 = vmatpush.bf16.msrb.mxu1 %v12990_v28 }
  0x4a   :  { %553 = vmatpush.bf16.msrb.mxu2 %v13004_v54  ;;  %528 = vmatpush.bf16.msrb.mxu0 %v13013_v8 }
  0x4d   :  { %541 = vmatpush.bf16.msrb.mxu1 %v12998_v45 }
  0x4e   :  { %554 = vmatpush.bf16.msrb.mxu2 %v13016_v13  ;;  %529 = vmatpush.bf16.msrb.mxu0 %v13020_v19 }
  0x51   :  { %542 = vmatpush.bf16.msrb.mxu1 %v13010_v63 }
  0x52   :  { %555 = vmatpush.bf16.msrb.mxu2 %v13022_v21 }
  0xae   :  { %v166_v30 = vpop.f32.mrf.mxu0 }
  0xaf   :  { %v167_v32 = vadd.f32 %v12729_v29, %v166_v30  ;;  %v190_v29 = vperm.slane %v187_v22, 0 }
  0xb1   :  { %v170_v33 = vmax.f32 %v167_v32, 0.0 }
  0xb3   :  { %v188_v34 = vpack.c.bf16 %v170_v33, %v170_v33 }
  0xb5   :  { %282 = vmatmul.bf16.vlgmr.msra.gmra.mxu1 %v188_v34  ;;  %295 = vmatmul.bf16.vlgmr.msra.gmra.mxu2 %v188_v34  ;;  %v191_v34 = vperm.slane %v187_v22, 1 }
  0xb6   :  { %v168_v38 = vpop.f32.mrf.mxu0 }
 0x132   :  { %v283_v30 = vpop.f32.mrf.mxu1 }
 0x133   :  { %v284_v32 = vadd.f32 %v283_v30, %v190_v29 }
 0x135   :  { %v300_v33 = vmax.f32 %v284_v32, 0.0 }
 0x137   :  { %v342_v38 = vpack.c.bf16 %v300_v33, %v300_v33 }
 0x138   :  { %v296_v39 = vpop.f32.mrf.mxu2 }
 0x139   :  { %v297_v40 = vadd.f32 %v296_v39, %v191_v34  ;;  %517 = vmatmul.bf16.vlgmr.msra.gmra.mxu3 %v342_v38  ;;  %543 = vmatmul.bf16.vlgmr.msrb.gmra.mxu1 %v342_v38  ;;  %v12877_v34 = vmov 256.0  }
 0x13a   :  { %v285_v41 = vpop.f32.mrf.mxu1  ;;  %12730 = vrcp.f32 %v12877_v34 }
 0x13b   :  { %v301_v43 = vmax.f32 %v297_v40, 0.0 }
 0x13d   :  { %v343_v46 = vpack.c.bf16 %v301_v43, %v301_v43 }
 0x13f   :  { %530 = vmatmul.bf16.vlgmr.msrb.gmra.mxu0 %v343_v46  ;;  %556 = vmatmul.bf16.vlgmr.msrb.gmra.mxu2 %v343_v46 }
 0x140   :  { %v298_v49 = vpop.f32.mrf.mxu2  ;;  %v12731_v38 = vpop.eup %12730 }
 0x141   :  { %v567_v39 = vmul.f32 256.0, %v12731_v38  ;;  %vm571_vm0 = vweird.f32 %v12731_v38 }
 0x143   :  { %v568_v40 = vsub.f32 1.0, %v567_v39 }
 0x145   :  { %v569_v41 = vmul.f32 %v12731_v38, %v568_v40 }
 0x147   :  { %v570_v46 = vadd.f32 %v12731_v38, %v569_v41 }
 0x149   :  { %v13034_v49 = vsel %vm571_vm0, %v12731_v38, %v570_v46 }
 0x14a   :  { %14966 = vst [vmem:[#allocation36_spill] sm:$0xff] %v13034_v49 }
 0x1b6   :  { %v544_v50 = vpop.f32.mrf.mxu1 }
 0x1b7   :  { %v545_v9 = vadd.f32 %v544_v50, %v14664_v62 }
 0x1bc   :  { %v518_v56 = vpop.f32.mrf.mxu3  ;;  %v531_v57 = vpop.f32.mrf.mxu0 }
 0x1bd   :  { %v519_v5 = vadd.f32 %v518_v56, %v14663_v55 }
 0x1be   :  { %v546_v7 = vpop.f32.mrf.mxu1 }
 0x1bf   :  { %v532_v10 = vadd.f32 %v531_v57, %v519_v5 }
 0x1c1   :  { %v561_v22 = vadd.f32 %v532_v10, %v300_v33 }
 0x1c2   :  { %v557_v15 = vpop.f32.mrf.mxu2 }
 0x1c3   :  { %v558_v16 = vadd.f32 %v557_v15, %v545_v9 }
 0x1c4   :  { %v520_v17 = vpop.f32.mrf.mxu3  ;;  %v533_v20 = vpop.f32.mrf.mxu0 }
 0x1c5   :  { %v562_v29 = vadd.f32 %v558_v16, %v301_v43 }
 0x1c7   :  { %v563_v30 = vadd.f32 %v562_v29, %v561_v22 }
 0x1c9   :  { %564 = vadd.xlane.f32.xlu0 %v563_v30 }
 0x1ca   :  { %v559_v32 = vpop.f32.mrf.mxu2 }
 0x1cb   :  { %v13046_v32 = vld [vmem:[#allocation9 + $0x7] sm:$0x3] }
 0x1cc   :  { %14968 = vst [vmem:[#allocation38_spill] sm:$0xff] %v13046_v32  ;;  %v14659_v41 = vperm.slane %v13046_v32, 0  ;;  %v14660_v46 = vperm.slane %v13046_v32, 1 }
 0x23c   :  { %v565_v50 = vpop.xlane.xlu0 %564 }
 0x23d   :  { %v573_v56 = vmul.f32 %v13034_v49, %v565_v50 }
 0x23f   :  { %v574_v57 = vsub.f32 %v561_v22, %v573_v56  ;;  %v575_v5 = vsub.f32 %v562_v29, %v573_v56  ;;  %v13044_v29 = vld [vmem:[#allocation9 + $0x5] sm:$0x3] }
 0x240   :  { %14967 = vst [vmem:[#allocation37_spill] sm:$0xff] %v13044_v29  ;;  %v14662_v38 = vperm.slane %v13044_v29, 0  ;;  %v14661_v39 = vperm.slane %v13044_v29, 1 }
 0x241   :  { %v576_v33 = vmul.f32 %v574_v57, %v574_v57  ;;  %v577_v43 = vmul.f32 %v575_v5, %v575_v5 }
 0x243   :  { %v578_v7 = vadd.f32 %v577_v43, %v576_v33 }
 0x245   :  { %579 = vadd.xlane.f32.xlu0 %v578_v7 }
 0x2b8   :  { %v580_v9 = vpop.xlane.xlu0 %579 }
 0x2b9   :  { %v581_v10 = vmul.f32 %v580_v9, %v13034_v49 }
 0x2bb   :  { %v582_v15 = vadd.f32 1e-05, %v581_v10 }
 0x2bd   :  { %12732 = vrsqrt.f32 %v582_v15  ;;  %vm589_vm2 = vweird.f32 %v582_v15 }
 0x2c3   :  { %v12733_v16 = vpop.eup %12732 }
 0x2c4   :  { %v584_v17 = vmul.f32 %v12733_v16, %v582_v15  ;;  %vm590_vm1 = vweird.f32 %v12733_v16 }
 0x2c5   :  { %vm591_vm3 = vmor %vm589_vm2, %vm590_vm1 }
 0x2c6   :  { %v585_v20 = vmul.f32 %v12733_v16, %v584_v17 }
 0x2c8   :  { %v586_v22 = vmul.f32 0.5, %v585_v20 }
 0x2ca   :  { %v587_v30 = vsub.f32 1.5, %v586_v22 }
 0x2cc   :  { %v588_v34 = vmul.f32 %v12733_v16, %v587_v30 }
 0x2ce   :  { %v592_v40 = vsel %vm591_vm3, %v12733_v16, %v588_v34 }
 0x2cf   :  { %v593_v50 = vmul.f32 %v592_v40, %v574_v57  ;;  %v594_v56 = vmul.f32 %v592_v40, %v575_v5 }
 0x2d1   :  { %v600_v33 = vmul.f32 %v14662_v38, %v593_v50  ;;  %v601_v43 = vmul.f32 %v14661_v39, %v594_v56 }
 0x2d3   :  { %v13058_v7 = vadd.f32 %v14659_v41, %v600_v33  ;;  %v13062_v9 = vadd.f32 %v14660_v46, %v601_v43 }
 0x2d5   :  { %14969 = vst [vmem:[#allocation39_spill] sm:$0xff] %v13058_v7 }
 0x2d6   :  { %14970 = vst [vmem:[#allocation40_spill] sm:$0xff] %v13062_v9 }
 0x2d7   :  { %12868 = dma.done.wait [#allocation4], 32768 }
 0x2d8   :  { %12869 = vsyncadd [#allocation4], 4294934528  ;;  %v8770_v10 = vld [vmem:[#allocation2 + $0x380] sm:$0xf]  ;;  %v11964_v17 = vld [vmem:[#allocation2 + $0x384] sm:$0xf] }
 0x2d9   :  { %v11972_v15 = vld [vmem:[#allocation2 + $0x3bc] sm:$0xf0]  ;;  %v8772_v20 = vld [vmem:[#allocation2 + $0x3c0] sm:$0xf0]  ;;  %v8780_v21 = vld [vmem:[#allocation2 + $0x3c8] sm:$0xf0] }
 0x2da   :  { %v9282_v57 = vld [vmem:[#allocation2 + $0x780] sm:$0xf]  ;;  %v8771_v5 = vor.u32 %v11972_v15, %v8770_v10  ;;  %v8775_v30 = vor.u32 %v11964_v17, %v8772_v20  ;;  %v12092_v34 = vld [vmem:[#allocation2 + $0x784] sm:$0xf]  ;;  %v11957_v63 = vld [vmem:[#allocation2 + $0x344] sm:$0xf0] }
 0x2db   :  { %v12100_v16 = vld [vmem:[#allocation2 + $0x7bc] sm:$0xf0]  ;;  %v9284_v40 = vld [vmem:[#allocation2 + $0x7c0] sm:$0xf0]  ;;  %v9226_v19 = vld [vmem:[#allocation2 + $0x708] sm:$0xf] }
 0x2dc   :  { %v9283_v22 = vor.u32 %v12100_v16, %v9282_v57  ;;  %v8706_v50 = vld [vmem:[#allocation2 + $0x300] sm:$0xf]  ;;  %2185 = vmatpush.bf16.msrb.mxu3 %v8771_v5  ;;  %v9287_v56 = vor.u32 %v12092_v34, %v9284_v40  ;;  %2211 = vmatpush.bf16.msra.mxu1 %v8775_v30  ;;  %v11948_v38 = vld [vmem:[#allocation2 + $0x304] sm:$0xf]  ;;  %v8716_v60 = vld [vmem:[#allocation2 + $0x348] sm:$0xf0] }
 0x2dd   :  { %v11956_v33 = vld [vmem:[#allocation2 + $0x33c] sm:$0xf0]  ;;  %v8708_v55 = vld [vmem:[#allocation2 + $0x340] sm:$0xf0]  ;;  %v9266_v13 = vld [vmem:[#allocation2 + $0x730] sm:$0xf] }
 0x2de   :  { %v9218_v41 = vld [vmem:[#allocation2 + $0x700] sm:$0xf]  ;;  %2198 = vmatpush.bf16.msra.mxu0 %v9283_v22  ;;  %v8707_v46 = vor.u32 %v11956_v33, %v8706_v50  ;;  %v12076_v10 = vld [vmem:[#allocation2 + $0x704] sm:$0xf]  ;;  %2224 = vmatpush.bf16.msra.mxu2 %v9287_v56  ;;  %v8711_v15 = vor.u32 %v11948_v38, %v8708_v55  ;;  %v8756_v45 = vld [vmem:[#allocation2 + $0x370] sm:$0xf0] }
 0x2df   :  { %v12084_v43 = vld [vmem:[#allocation2 + $0x73c] sm:$0xf0]  ;;  %v9220_v62 = vld [vmem:[#allocation2 + $0x740] sm:$0xf0]  ;;  %v9274_v8 = vld [vmem:[#allocation2 + $0x738] sm:$0xf] }
 0x2e0   :  { %v9219_v39 = vor.u32 %v12084_v43, %v9218_v41  ;;  %v8642_v57 = vld [vmem:[#allocation2 + $0x280] sm:$0xf]  ;;  %v9223_v17 = vor.u32 %v12076_v10, %v9220_v62  ;;  %v11932_v5 = vld [vmem:[#allocation2 + $0x284] sm:$0xf]  ;;  %2186 = vmatpush.bf16.msrb.mxu3 %v8707_v46  ;;  %2212 = vmatpush.bf16.msra.mxu1 %v8711_v15  ;;  %v8764_v42 = vld [vmem:[#allocation2 + $0x378] sm:$0xf0] }
 0x2e1   :  { %v11940_v16 = vld [vmem:[#allocation2 + $0x2bc] sm:$0xf0]  ;;  %v8644_v40 = vld [vmem:[#allocation2 + $0x2c0] sm:$0xf0] }
 0x2e2   :  { %v9154_v20 = vld [vmem:[#allocation2 + $0x680] sm:$0xf]  ;;  %v8643_v34 = vor.u32 %v11940_v16, %v8642_v57  ;;  %v12060_v29 = vld [vmem:[#allocation2 + $0x684] sm:$0xf]  ;;  %2199 = vmatpush.bf16.msra.mxu0 %v9219_v39  ;;  %v8647_v30 = vor.u32 %v11932_v5, %v8644_v40  ;;  %2225 = vmatpush.bf16.msra.mxu2 %v9223_v17 }
 0x2e3   :  { %v12068_v32 = vld [vmem:[#allocation2 + $0x6bc] sm:$0xf0]  ;;  %v9156_v22 = vld [vmem:[#allocation2 + $0x6c0] sm:$0xf0] }
 0x2e4   :  { %v9155_v41 = vor.u32 %v12068_v32, %v9154_v20  ;;  %v8578_v50 = vld [vmem:[#allocation2 + $0x200] sm:$0xf]  ;;  %v9159_v55 = vor.u32 %v12060_v29, %v9156_v22  ;;  %v11916_v43 = vld [vmem:[#allocation2 + $0x204] sm:$0xf]  ;;  %2187 = vmatpush.bf16.msrb.mxu3 %v8643_v34  ;;  %2213 = vmatpush.bf16.msra.mxu1 %v8647_v30 }
 0x2e5   :  { %v11924_v33 = vld [vmem:[#allocation2 + $0x23c] sm:$0xf0]  ;;  %v8580_v62 = vld [vmem:[#allocation2 + $0x240] sm:$0xf0] }
 0x2e6   :  { %v9090_v56 = vld [vmem:[#allocation2 + $0x600] sm:$0xf]  ;;  %v12044_v10 = vld [vmem:[#allocation2 + $0x604] sm:$0xf]  ;;  %v8579_v46 = vor.u32 %v11924_v33, %v8578_v50  ;;  %2200 = vmatpush.bf16.msra.mxu0 %v9155_v41  ;;  %v8583_v16 = vor.u32 %v11916_v43, %v8580_v62  ;;  %2226 = vmatpush.bf16.msra.mxu2 %v9159_v55 }
 0x2e7   :  { %v12052_v38 = vld [vmem:[#allocation2 + $0x63c] sm:$0xf0]  ;;  %v9092_v53 = vld [vmem:[#allocation2 + $0x640] sm:$0xf0] }
 0x2e8   :  { %v9091_v57 = vor.u32 %v12052_v38, %v9090_v56  ;;  %v8514_v39 = vld [vmem:[#allocation2 + $0x180] sm:$0xf]  ;;  %v9095_v20 = vor.u32 %v12044_v10, %v9092_v53  ;;  %v11900_v40 = vld [vmem:[#allocation2 + $0x184] sm:$0xf]  ;;  %2188 = vmatpush.bf16.msrb.mxu3 %v8579_v46  ;;  %2214 = vmatpush.bf16.msra.mxu1 %v8583_v16 }
 0x2e9   :  { %v11908_v15 = vld [vmem:[#allocation2 + $0x1bc] sm:$0xf0]  ;;  %v8516_v17 = vld [vmem:[#allocation2 + $0x1c0] sm:$0xf0] }
 0x2ea   :  { %v9026_v32 = vld [vmem:[#allocation2 + $0x580] sm:$0xf]  ;;  %v12028_v29 = vld [vmem:[#allocation2 + $0x584] sm:$0xf]  ;;  %v8515_v1 = vor.u32 %v11908_v15, %v8514_v39  ;;  %2201 = vmatpush.bf16.msra.mxu0 %v9091_v57  ;;  %v8519_v50 = vor.u32 %v11900_v40, %v8516_v17  ;;  %2227 = vmatpush.bf16.msra.mxu2 %v9095_v20 }
 0x2eb   :  { %v12036_v5 = vld [vmem:[#allocation2 + $0x5bc] sm:$0xf0]  ;;  %v9028_v22 = vld [vmem:[#allocation2 + $0x5c0] sm:$0xf0] }
 0x2ec   :  { %v9027_v34 = vor.u32 %v12036_v5, %v9026_v32  ;;  %v8450_v41 = vld [vmem:[#allocation2 + $0x100] sm:$0xf]  ;;  %v9031_v56 = vor.u32 %v12028_v29, %v9028_v22  ;;  %v11884_v43 = vld [vmem:[#allocation2 + $0x104] sm:$0xf]  ;;  %2189 = vmatpush.bf16.msrb.mxu3 %v8515_v1  ;;  %2215 = vmatpush.bf16.msra.mxu1 %v8519_v50 }
 0x2ed   :  { %v11892_v30 = vld [vmem:[#allocation2 + $0x13c] sm:$0xf0]  ;;  %v8452_v55 = vld [vmem:[#allocation2 + $0x140] sm:$0xf0] }
 0x2ee   :  { %v8962_v33 = vld [vmem:[#allocation2 + $0x500] sm:$0xf]  ;;  %v12012_v53 = vld [vmem:[#allocation2 + $0x504] sm:$0xf]  ;;  %v8451_v10 = vor.u32 %v11892_v30, %v8450_v41  ;;  %2202 = vmatpush.bf16.msra.mxu0 %v9027_v34  ;;  %v8455_v39 = vor.u32 %v11884_v43, %v8452_v55  ;;  %2228 = vmatpush.bf16.msra.mxu2 %v9031_v56  ;;  %v8778_v55 = vld [vmem:[#allocation2 + $0x388] sm:$0xf] }
 0x2ef   :  { %v12020_v38 = vld [vmem:[#allocation2 + $0x53c] sm:$0xf0]  ;;  %v8964_v62 = vld [vmem:[#allocation2 + $0x540] sm:$0xf0] }
 0x2f0   :  { %v8963_v46 = vor.u32 %v12020_v38, %v8962_v33  ;;  %v8386_v57 = vld [vmem:[#allocation2 + $0x80] sm:$0xf]  ;;  %v8967_v32 = vor.u32 %v12012_v53, %v8964_v62  ;;  %v11868_v40 = vld [vmem:[#allocation2 + $0x84] sm:$0xf]  ;;  %2190 = vmatpush.bf16.msrb.mxu3 %v8451_v10  ;;  %2216 = vmatpush.bf16.msra.mxu1 %v8455_v39  ;;  %v11973_v53 = vld [vmem:[#allocation2 + $0x3c4] sm:$0xf0] }
 0x2f1   :  { %v11876_v16 = vld [vmem:[#allocation2 + $0xbc] sm:$0xf0]  ;;  %v8388_v20 = vld [vmem:[#allocation2 + $0xc0] sm:$0xf0]  ;;  %v9290_v62 = vld [vmem:[#allocation2 + $0x788] sm:$0xf] }
 0x2f2   :  { %v8898_v15 = vld [vmem:[#allocation2 + $0x480] sm:$0xf]  ;;  %v11996_v17 = vld [vmem:[#allocation2 + $0x484] sm:$0xf]  ;;  %v8387_v22 = vor.u32 %v11876_v16, %v8386_v57  ;;  %2203 = vmatpush.bf16.msra.mxu0 %v8963_v46  ;;  %v8391_v34 = vor.u32 %v11868_v40, %v8388_v20  ;;  %2229 = vmatpush.bf16.msra.mxu2 %v8967_v32  ;;  %v12101_v57 = vld [vmem:[#allocation2 + $0x7c4] sm:$0xf0]  ;;  %v8779_v40 = vor.u32 %v11973_v53, %v8778_v55 }
 0x2f3   :  { %v12004_v5 = vld [vmem:[#allocation2 + $0x4bc] sm:$0xf0]  ;;  %v8900_v29 = vld [vmem:[#allocation2 + $0x4c0] sm:$0xf0]  ;;  %v11965_v16 = vld [vmem:[#allocation2 + $0x38c] sm:$0xf]  ;;  %v9291_v20 = vor.u32 %v12101_v57, %v9290_v62 }
 0x2f4   :  { %v8322_v0 = vld [vmem:[#allocation2] sm:$0xf]  ;;  %v8899_v1 = vor.u32 %v12004_v5, %v8898_v15  ;;  %v11852_v30 = vld [vmem:[#allocation2 + $0x4] sm:$0xf]  ;;  %v8903_v33 = vor.u32 %v11996_v17, %v8900_v29  ;;  %2191 = vmatpush.bf16.msrb.mxu3 %v8387_v22  ;;  %2217 = vmatpush.bf16.msra.mxu1 %v8391_v34  ;;  %v12093_v15 = vld [vmem:[#allocation2 + $0x78c] sm:$0xf]  ;;  %v8783_v17 = vor.u32 %v11965_v16, %v8780_v21 }
 0x2f5   :  { %v11860_v49 = vld [vmem:[#allocation2 + $0x3c] sm:$0xf0]  ;;  %v8324_v56 = vld [vmem:[#allocation2 + $0x40] sm:$0xf0]  ;;  %v9292_v5 = vld [vmem:[#allocation2 + $0x7c8] sm:$0xf0] }
 0x2f6   :  { %v8834_v50 = vld [vmem:[#allocation2 + $0x400] sm:$0xf]  ;;  %v11980_v38 = vld [vmem:[#allocation2 + $0x404] sm:$0xf]  ;;  %v8323_v10 = vor.u32 %v11860_v49, %v8322_v0  ;;  %2204 = vmatpush.bf16.msra.mxu0 %v8899_v1  ;;  %v8327_v39 = vor.u32 %v11852_v30, %v8324_v56  ;;  %2230 = vmatpush.bf16.msra.mxu2 %v8903_v33  ;;  %v8714_v29 = vld [vmem:[#allocation2 + $0x308] sm:$0xf]  ;;  %v9295_v22 = vor.u32 %v12093_v15, %v9292_v5 }
 0x2f7   :  { %v11988_v41 = vld [vmem:[#allocation2 + $0x43c] sm:$0xf0]  ;;  %v8836_v43 = vld [vmem:[#allocation2 + $0x440] sm:$0xf0]  ;;  %v12085_v0 = vld [vmem:[#allocation2 + $0x744] sm:$0xf0]  ;;  %v13066_v1 = vpack.c.bf16 %v13058_v7, %v13058_v7  ;;  %v8715_v21 = vor.u32 %v11957_v63, %v8714_v29 }
 0x2f8   :  { %v8835_v46 = vor.u32 %v11988_v41, %v8834_v50  ;;  %v8839_v32 = vor.u32 %v11980_v38, %v8836_v43  ;;  %2192 = vmatpush.bf16.msrb.mxu3 %v8323_v10  ;;  %v11949_v49 = vld [vmem:[#allocation2 + $0x30c] sm:$0xf]  ;;  %2218 = vmatpush.bf16.msra.mxu1 %v8327_v39  ;;  %v13070_v41 = vpack.c.bf16 %v13062_v9, %v13062_v9  ;;  %v8650_v56 = vld [vmem:[#allocation2 + $0x288] sm:$0xf]  ;;  %v9234_v9 = vld [vmem:[#allocation2 + $0x710] sm:$0xf] }
 0x2f9   :  { %v12077_v34 = vld [vmem:[#allocation2 + $0x70c] sm:$0xf]  ;;  %v9227_v30 = vor.u32 %v12085_v0, %v9226_v19  ;;  %v8719_v33 = vor.u32 %v11949_v49, %v8716_v60  ;;  %v11941_v38 = vld [vmem:[#allocation2 + $0x2c4] sm:$0xf0]  ;;  %v8724_v7 = vld [vmem:[#allocation2 + $0x350] sm:$0xf0] }
 0x2fa   :  { %2205 = vmatpush.bf16.msra.mxu0 %v8835_v46  ;;  %v9228_v50 = vld [vmem:[#allocation2 + $0x748] sm:$0xf0]  ;;  %2231 = vmatpush.bf16.msra.mxu2 %v8839_v32  ;;  %v9162_v43 = vld [vmem:[#allocation2 + $0x688] sm:$0xf]  ;;  %v8651_v63 = vor.u32 %v11941_v38, %v8650_v56 }
 0x2fb   :  { %v9231_v55 = vor.u32 %v12077_v34, %v9228_v50  ;;  %v12069_v53 = vld [vmem:[#allocation2 + $0x6c4] sm:$0xf0]  ;;  %v11933_v62 = vld [vmem:[#allocation2 + $0x28c] sm:$0xf]  ;;  %2193 = vmatmul.bf16.vlgmr.msrb.gmra.mxu3 %v13066_v1  ;;  %2219 = vmatmul.bf16.vlgmr.msra.gmra.mxu1 %v13066_v1 }
 0x2fc   :  { %2237 = vmatpush.bf16.msra.mxu3 %v8779_v40  ;;  %2263 = vmatpush.bf16.msrb.mxu1 %v8783_v17  ;;  %v8652_v10 = vld [vmem:[#allocation2 + $0x2c8] sm:$0xf0]  ;;  %v9163_v60 = vor.u32 %v12069_v53, %v9162_v43  ;;  %v8586_v46 = vld [vmem:[#allocation2 + $0x208] sm:$0xf] }
 0x2fd   :  { %v12061_v57 = vld [vmem:[#allocation2 + $0x68c] sm:$0xf]  ;;  %2232 = vmatmul.bf16.vlgmr.msra.gmra.mxu2 %v13070_v41  ;;  %2206 = vmatmul.bf16.vlgmr.msra.gmra.mxu0 %v13070_v41  ;;  %v8655_v19 = vor.u32 %v11933_v62, %v8652_v10  ;;  %v11925_v39 = vld [vmem:[#allocation2 + $0x244] sm:$0xf0] }
 0x2fe   :  { %2250 = vmatpush.bf16.msrb.mxu0 %v9291_v20  ;;  %2276 = vmatpush.bf16.msrb.mxu2 %v9295_v22  ;;  %v9164_v16 = vld [vmem:[#allocation2 + $0x6c8] sm:$0xf0]  ;;  %v9098_v15 = vld [vmem:[#allocation2 + $0x608] sm:$0xf]  ;;  %v8587_v22 = vor.u32 %v11925_v39, %v8586_v46 }
 0x2ff   :  { %v9167_v5 = vor.u32 %v12061_v57, %v9164_v16  ;;  %v12053_v32 = vld [vmem:[#allocation2 + $0x644] sm:$0xf0]  ;;  %v11917_v40 = vld [vmem:[#allocation2 + $0x20c] sm:$0xf] }
 0x300   :  { %2238 = vmatpush.bf16.msra.mxu3 %v8715_v21  ;;  %2264 = vmatpush.bf16.msrb.mxu1 %v8719_v33  ;;  %v8588_v20 = vld [vmem:[#allocation2 + $0x248] sm:$0xf0]  ;;  %v9099_v0 = vor.u32 %v12053_v32, %v9098_v15  ;;  %v8522_v34 = vld [vmem:[#allocation2 + $0x188] sm:$0xf] }
 0x301   :  { %v12045_v17 = vld [vmem:[#allocation2 + $0x60c] sm:$0xf]  ;;  %v8591_v49 = vor.u32 %v11917_v40, %v8588_v20  ;;  %v11909_v50 = vld [vmem:[#allocation2 + $0x1c4] sm:$0xf0] }
 0x302   :  { %2251 = vmatpush.bf16.msrb.mxu0 %v9227_v30  ;;  %2277 = vmatpush.bf16.msrb.mxu2 %v9231_v55  ;;  %v9100_v29 = vld [vmem:[#allocation2 + $0x648] sm:$0xf0]  ;;  %v9034_v21 = vld [vmem:[#allocation2 + $0x588] sm:$0xf]  ;;  %v8523_v53 = vor.u32 %v11909_v50, %v8522_v34 }
 0x303   :  { %v9103_v30 = vor.u32 %v12045_v17, %v9100_v29  ;;  %v12037_v33 = vld [vmem:[#allocation2 + $0x5c4] sm:$0xf0]  ;;  %v11901_v56 = vld [vmem:[#allocation2 + $0x18c] sm:$0xf] }
 0x304   :  { %2239 = vmatpush.bf16.msra.mxu3 %v8651_v63  ;;  %2265 = vmatpush.bf16.msrb.mxu1 %v8655_v19  ;;  %v8524_v38 = vld [vmem:[#allocation2 + $0x1c8] sm:$0xf0]  ;;  %v9035_v62 = vor.u32 %v12037_v33, %v9034_v21  ;;  %v8458_v57 = vld [vmem:[#allocation2 + $0x108] sm:$0xf] }
 0x305   :  { %v12029_v43 = vld [vmem:[#allocation2 + $0x58c] sm:$0xf]  ;;  %v8527_v10 = vor.u32 %v11901_v56, %v8524_v38  ;;  %v11893_v16 = vld [vmem:[#allocation2 + $0x144] sm:$0xf0] }
 0x306   :  { %2252 = vmatpush.bf16.msrb.mxu0 %v9163_v60  ;;  %2278 = vmatpush.bf16.msrb.mxu2 %v9167_v5  ;;  %v9036_v55 = vld [vmem:[#allocation2 + $0x5c8] sm:$0xf0]  ;;  %v8970_v63 = vld [vmem:[#allocation2 + $0x508] sm:$0xf]  ;;  %v8459_v32 = vor.u32 %v11893_v16, %v8458_v57 }
 0x307   :  { %v9039_v60 = vor.u32 %v12029_v43, %v9036_v55  ;;  %v12021_v19 = vld [vmem:[#allocation2 + $0x544] sm:$0xf0]  ;;  %v11885_v46 = vld [vmem:[#allocation2 + $0x10c] sm:$0xf] }
 0x308   :  { %2240 = vmatpush.bf16.msra.mxu3 %v8587_v22  ;;  %2266 = vmatpush.bf16.msrb.mxu1 %v8591_v49  ;;  %v8460_v39 = vld [vmem:[#allocation2 + $0x148] sm:$0xf0]  ;;  %v8971_v40 = vor.u32 %v12021_v19, %v8970_v63  ;;  %v8394_v17 = vld [vmem:[#allocation2 + $0x88] sm:$0xf]  ;;  %v8786_v19 = vld [vmem:[#allocation2 + $0x390] sm:$0xf] }
 0x309   :  { %v12013_v15 = vld [vmem:[#allocation2 + $0x50c] sm:$0xf]  ;;  %v8463_v20 = vor.u32 %v11885_v46, %v8460_v39  ;;  %v11877_v29 = vld [vmem:[#allocation2 + $0xc4] sm:$0xf0]  ;;  %v11974_v46 = vld [vmem:[#allocation2 + $0x3cc] sm:$0xf0] }
 0x30a   :  { %2253 = vmatpush.bf16.msrb.mxu0 %v9099_v0  ;;  %2279 = vmatpush.bf16.msrb.mxu2 %v9103_v30  ;;  %v8972_v5 = vld [vmem:[#allocation2 + $0x548] sm:$0xf0]  ;;  %v8906_v22 = vld [vmem:[#allocation2 + $0x488] sm:$0xf]  ;;  %v8395_v33 = vor.u32 %v11877_v29, %v8394_v17  ;;  %v9298_v39 = vld [vmem:[#allocation2 + $0x790] sm:$0xf] }
 0x30b   :  { %v8975_v0 = vor.u32 %v12013_v15, %v8972_v5  ;;  %v12005_v49 = vld [vmem:[#allocation2 + $0x4c4] sm:$0xf0]  ;;  %v11869_v34 = vld [vmem:[#allocation2 + $0x8c] sm:$0xf]  ;;  %v12102_v5 = vld [vmem:[#allocation2 + $0x7cc] sm:$0xf0] }
 0x30c   :  { %2241 = vmatpush.bf16.msra.mxu3 %v8523_v53  ;;  %2267 = vmatpush.bf16.msrb.mxu1 %v8527_v10  ;;  %v8396_v50 = vld [vmem:[#allocation2 + $0xc8] sm:$0xf0]  ;;  %v8330_v56 = vld [vmem:[#allocation2 + $0x8] sm:$0xf]  ;;  %v8907_v43 = vor.u32 %v12005_v49, %v8906_v22  ;;  %v8788_v17 = vld [vmem:[#allocation2 + $0x3d0] sm:$0xf0]  ;;  %v8787_v49 = vor.u32 %v11974_v46, %v8786_v19 }
 0x30d   :  { %v11997_v21 = vld [vmem:[#allocation2 + $0x48c] sm:$0xf]  ;;  %v11861_v38 = vld [vmem:[#allocation2 + $0x44] sm:$0xf0]  ;;  %v8399_v55 = vor.u32 %v11869_v34, %v8396_v50  ;;  %v12094_v29 = vld [vmem:[#allocation2 + $0x794] sm:$0xf]  ;;  %v9299_v34 = vor.u32 %v12102_v5, %v9298_v39 }
 0x30e   :  { %2254 = vmatpush.bf16.msrb.mxu0 %v9035_v62  ;;  %2280 = vmatpush.bf16.msrb.mxu2 %v9039_v60  ;;  %v8908_v30 = vld [vmem:[#allocation2 + $0x4c8] sm:$0xf0]  ;;  %v8842_v53 = vld [vmem:[#allocation2 + $0x408] sm:$0xf]  ;;  %v8331_v15 = vor.u32 %v11861_v38, %v8330_v56  ;;  %v9300_v22 = vld [vmem:[#allocation2 + $0x7d0] sm:$0xf0] }
 0x30f   :  { %v11989_v62 = vld [vmem:[#allocation2 + $0x444] sm:$0xf0]  ;;  %v11853_v10 = vld [vmem:[#allocation2 + $0xc] sm:$0xf]  ;;  %v8911_v57 = vor.u32 %v11997_v21, %v8908_v30  ;;  %v8722_v21 = vld [vmem:[#allocation2 + $0x310] sm:$0xf] }
 0x310   :  { %2242 = vmatpush.bf16.msra.mxu3 %v8459_v32  ;;  %2268 = vmatpush.bf16.msrb.mxu1 %v8463_v20  ;;  %v8332_v16 = vld [vmem:[#allocation2 + $0x48] sm:$0xf0]  ;;  %v11966_v32 = vld [vmem:[#allocation2 + $0x394] sm:$0xf]  ;;  %v11958_v30 = vld [vmem:[#allocation2 + $0x34c] sm:$0xf0] }
 0x311   :  { %v11981_v63 = vld [vmem:[#allocation2 + $0x40c] sm:$0xf]  ;;  %v8335_v20 = vor.u32 %v11853_v10, %v8332_v16  ;;  %v8791_v50 = vor.u32 %v11966_v32, %v8788_v17  ;;  %v12086_v56 = vld [vmem:[#allocation2 + $0x74c] sm:$0xf0]  ;;  %v11950_v38 = vld [vmem:[#allocation2 + $0x314] sm:$0xf] }
 0x312   :  { %2255 = vmatpush.bf16.msrb.mxu0 %v8971_v40  ;;  %2281 = vmatpush.bf16.msrb.mxu2 %v8975_v0  ;;  %v8844_v60 = vld [vmem:[#allocation2 + $0x448] sm:$0xf0]  ;;  %v8843_v40 = vor.u32 %v11989_v62, %v8842_v53  ;;  %v8723_v53 = vor.u32 %v11958_v30, %v8722_v21  ;;  %v9235_v62 = vor.u32 %v12086_v56, %v9234_v9  ;;  %v11942_v16 = vld [vmem:[#allocation2 + $0x2cc] sm:$0xf0]  ;;  %v11934_v46 = vld [vmem:[#allocation2 + $0x294] sm:$0xf] }
 0x313   :  { %v8847_v0 = vor.u32 %v11981_v63, %v8844_v60  ;;  %v8727_v10 = vor.u32 %v11950_v38, %v8724_v7  ;;  %v9170_v63 = vld [vmem:[#allocation2 + $0x690] sm:$0xf]  ;;  %v8660_v39 = vld [vmem:[#allocation2 + $0x2d0] sm:$0xf0] }
 0x314   :  { %2243 = vmatpush.bf16.msra.mxu3 %v8395_v33  ;;  %2269 = vmatpush.bf16.msrb.mxu1 %v8399_v55  ;;  %v9303_v33 = vor.u32 %v12094_v29, %v9300_v22  ;;  %v9236_v55 = vld [vmem:[#allocation2 + $0x750] sm:$0xf0]  ;;  %v12070_v19 = vld [vmem:[#allocation2 + $0x6cc] sm:$0xf0]  ;;  %v8663_v9 = vor.u32 %v11934_v46, %v8660_v39 }
 0x315   :  { %v9172_v5 = vld [vmem:[#allocation2 + $0x6d0] sm:$0xf0]  ;;  %v9171_v7 = vor.u32 %v12070_v19, %v9170_v63  ;;  %v8594_v17 = vld [vmem:[#allocation2 + $0x210] sm:$0xf] }
 0x316   :  { %2256 = vmatpush.bf16.msrb.mxu0 %v8907_v43  ;;  %2282 = vmatpush.bf16.msrb.mxu2 %v8911_v57  ;;  %v12078_v43 = vld [vmem:[#allocation2 + $0x714] sm:$0xf]  ;;  %v8658_v57 = vld [vmem:[#allocation2 + $0x290] sm:$0xf] }
 0x317   :  { %v9239_v60 = vor.u32 %v12078_v43, %v9236_v55  ;;  %v8659_v32 = vor.u32 %v11942_v16, %v8658_v57  ;;  %v12054_v22 = vld [vmem:[#allocation2 + $0x64c] sm:$0xf0]  ;;  %v12030_v57 = vld [vmem:[#allocation2 + $0x594] sm:$0xf] }
 0x318   :  { %2244 = vmatpush.bf16.msra.mxu3 %v8331_v15  ;;  %2270 = vmatpush.bf16.msrb.mxu1 %v8335_v20  ;;  %v12062_v15 = vld [vmem:[#allocation2 + $0x694] sm:$0xf]  ;;  %v9106_v20 = vld [vmem:[#allocation2 + $0x610] sm:$0xf] }
 0x319   :  { %v9175_v29 = vor.u32 %v12062_v15, %v9172_v5  ;;  %v9107_v30 = vor.u32 %v12054_v22, %v9106_v20  ;;  %v8530_v56 = vld [vmem:[#allocation2 + $0x190] sm:$0xf]  ;;  %v9044_v16 = vld [vmem:[#allocation2 + $0x5d0] sm:$0xf0] }
 0x31a   :  { %2257 = vmatpush.bf16.msrb.mxu0 %v8843_v40  ;;  %2283 = vmatpush.bf16.msrb.mxu2 %v8847_v0  ;;  %v11926_v40 = vld [vmem:[#allocation2 + $0x24c] sm:$0xf0]  ;;  %v11918_v0 = vld [vmem:[#allocation2 + $0x214] sm:$0xf]  ;;  %v9047_v5 = vor.u32 %v12030_v57, %v9044_v16 }
 0x31b   :  { %2245 = vmatmul.bf16.vlgmr.msra.gmra.mxu3 %v13066_v1  ;;  %2271 = vmatmul.bf16.vlgmr.msrb.gmra.mxu1 %v13066_v1  ;;  %v8595_v21 = vor.u32 %v11926_v40, %v8594_v17  ;;  %v11910_v38 = vld [vmem:[#allocation2 + $0x1cc] sm:$0xf0]  ;;  %v12014_v17 = vld [vmem:[#allocation2 + $0x514] sm:$0xf] }
 0x31c   :  { %2289 = vmatpush.bf16.msrb.mxu3 %v8787_v49  ;;  %2315 = vmatpush.bf16.msra.mxu1 %v8791_v50  ;;  %v8596_v49 = vld [vmem:[#allocation2 + $0x250] sm:$0xf0]  ;;  %v9042_v43 = vld [vmem:[#allocation2 + $0x590] sm:$0xf]  ;;  %v8531_v63 = vor.u32 %v11910_v38, %v8530_v56 }
 0x31d   :  { %2284 = vmatmul.bf16.vlgmr.msrb.gmra.mxu2 %v13070_v41  ;;  %2258 = vmatmul.bf16.vlgmr.msrb.gmra.mxu0 %v13070_v41  ;;  %v9108_v50 = vld [vmem:[#allocation2 + $0x650] sm:$0xf0]  ;;  %v8466_v46 = vld [vmem:[#allocation2 + $0x110] sm:$0xf] }
 0x31e   :  { %2302 = vmatpush.bf16.msra.mxu0 %v9299_v34  ;;  %2328 = vmatpush.bf16.msra.mxu2 %v9303_v33  ;;  %v12046_v34 = vld [vmem:[#allocation2 + $0x614] sm:$0xf]  ;;  %v8599_v33 = vor.u32 %v11918_v0, %v8596_v49  ;;  %v11894_v39 = vld [vmem:[#allocation2 + $0x14c] sm:$0xf0] }
 0x31f   :  { %v9111_v55 = vor.u32 %v12046_v34, %v9108_v50  ;;  %v8978_v15 = vld [vmem:[#allocation2 + $0x510] sm:$0xf]  ;;  %v8980_v40 = vld [vmem:[#allocation2 + $0x550] sm:$0xf0]  ;;  %v8467_v20 = vor.u32 %v11894_v39, %v8466_v46 }
 0x320   :  { %2290 = vmatpush.bf16.msrb.mxu3 %v8723_v53  ;;  %2316 = vmatpush.bf16.msra.mxu1 %v8727_v10  ;;  %v12038_v53 = vld [vmem:[#allocation2 + $0x5cc] sm:$0xf0]  ;;  %v8532_v10 = vld [vmem:[#allocation2 + $0x1d0] sm:$0xf0]  ;;  %v8983_v50 = vor.u32 %v12014_v17, %v8980_v40  ;;  %v11967_v17 = vld [vmem:[#allocation2 + $0x39c] sm:$0xf] }
 0x321   :  { %v8402_v0 = vld [vmem:[#allocation2 + $0x90] sm:$0xf]  ;;  %v11998_v56 = vld [vmem:[#allocation2 + $0x494] sm:$0xf]  ;;  %v8796_v40 = vld [vmem:[#allocation2 + $0x3d8] sm:$0xf0] }
 0x322   :  { %2303 = vmatpush.bf16.msra.mxu0 %v9235_v62  ;;  %2329 = vmatpush.bf16.msra.mxu2 %v9239_v60  ;;  %v11902_v62 = vld [vmem:[#allocation2 + $0x194] sm:$0xf]  ;;  %v9043_v60 = vor.u32 %v12038_v53, %v9042_v43  ;;  %v11878_v49 = vld [vmem:[#allocation2 + $0xcc] sm:$0xf0] }
 0x323   :  { %v8535_v19 = vor.u32 %v11902_v62, %v8532_v10  ;;  %v8914_v34 = vld [vmem:[#allocation2 + $0x490] sm:$0xf]  ;;  %v8916_v38 = vld [vmem:[#allocation2 + $0x4d0] sm:$0xf0]  ;;  %v8403_v43 = vor.u32 %v11878_v49, %v8402_v0  ;;  %v9308_v0 = vld [vmem:[#allocation2 + $0x7d8] sm:$0xf0] }
 0x324   :  { %2291 = vmatpush.bf16.msrb.mxu3 %v8659_v32  ;;  %2317 = vmatpush.bf16.msra.mxu1 %v8663_v9  ;;  %v12022_v32 = vld [vmem:[#allocation2 + $0x54c] sm:$0xf0]  ;;  %v8468_v9 = vld [vmem:[#allocation2 + $0x150] sm:$0xf0] }
 0x325   :  { %v11862_v53 = vld [vmem:[#allocation2 + $0x4c] sm:$0xf0]  ;;  %v11982_v46 = vld [vmem:[#allocation2 + $0x414] sm:$0xf] }
 0x326   :  { %2304 = vmatpush.bf16.msra.mxu0 %v9171_v7  ;;  %2330 = vmatpush.bf16.msra.mxu2 %v9175_v29  ;;  %v11886_v7 = vld [vmem:[#allocation2 + $0x114] sm:$0xf]  ;;  %v8979_v29 = vor.u32 %v12022_v32, %v8978_v15  ;;  %v8850_v57 = vld [vmem:[#allocation2 + $0x410] sm:$0xf]  ;;  %v8794_v15 = vld [vmem:[#allocation2 + $0x398] sm:$0xf] }
 0x327   :  { %v8471_v22 = vor.u32 %v11886_v7, %v8468_v9  ;;  %v11990_v16 = vld [vmem:[#allocation2 + $0x44c] sm:$0xf0]  ;;  %v8852_v39 = vld [vmem:[#allocation2 + $0x450] sm:$0xf0]  ;;  %v9306_v32 = vld [vmem:[#allocation2 + $0x798] sm:$0xf] }
 0x328   :  { %2292 = vmatpush.bf16.msrb.mxu3 %v8595_v21  ;;  %2318 = vmatpush.bf16.msra.mxu1 %v8599_v33  ;;  %v12006_v21 = vld [vmem:[#allocation2 + $0x4cc] sm:$0xf0]  ;;  %v8404_v33 = vld [vmem:[#allocation2 + $0xd0] sm:$0xf0]  ;;  %v12103_v9 = vld [vmem:[#allocation2 + $0x7d4] sm:$0xf0]  ;;  %v8855_v49 = vor.u32 %v11982_v46, %v8852_v39 }
 0x329   :  { %v8915_v62 = vor.u32 %v12006_v21, %v8914_v34  ;;  %v8799_v21 = vor.u32 %v11967_v17, %v8796_v40  ;;  %v9178_v46 = vld [vmem:[#allocation2 + $0x698] sm:$0xf] }
 0x32a   :  { %2305 = vmatpush.bf16.msra.mxu0 %v9107_v30  ;;  %2331 = vmatpush.bf16.msra.mxu2 %v9111_v55  ;;  %v11870_v30 = vld [vmem:[#allocation2 + $0x94] sm:$0xf]  ;;  %v8338_v55 = vld [vmem:[#allocation2 + $0x10] sm:$0xf] }
 0x32b   :  { %v8407_v10 = vor.u32 %v11870_v30, %v8404_v33  ;;  %v8339_v7 = vor.u32 %v11862_v53, %v8338_v55  ;;  %v8730_v30 = vld [vmem:[#allocation2 + $0x318] sm:$0xf]  ;;  %v11951_v55 = vld [vmem:[#allocation2 + $0x31c] sm:$0xf] }
 0x32c   :  { %2293 = vmatpush.bf16.msrb.mxu3 %v8531_v63  ;;  %2319 = vmatpush.bf16.msra.mxu1 %v8535_v19  ;;  %v11854_v63 = vld [vmem:[#allocation2 + $0x14] sm:$0xf]  ;;  %v11959_v33 = vld [vmem:[#allocation2 + $0x354] sm:$0xf0]  ;;  %v8732_v53 = vld [vmem:[#allocation2 + $0x358] sm:$0xf0] }
 0x32d   :  { %v8340_v19 = vld [vmem:[#allocation2 + $0x50] sm:$0xf0] }
 0x32e   :  { %2306 = vmatpush.bf16.msra.mxu0 %v9043_v60  ;;  %2332 = vmatpush.bf16.msra.mxu2 %v9047_v5  ;;  %v8919_v60 = vor.u32 %v11998_v56, %v8916_v38  ;;  %v11975_v5 = vld [vmem:[#allocation2 + $0x3d4] sm:$0xf0] }
 0x32f   :  { %v8795_v34 = vor.u32 %v11975_v5, %v8794_v15  ;;  %v9242_v56 = vld [vmem:[#allocation2 + $0x718] sm:$0xf]  ;;  %v11935_v5 = vld [vmem:[#allocation2 + $0x29c] sm:$0xf] }
 0x330   :  { %2294 = vmatpush.bf16.msrb.mxu3 %v8467_v20  ;;  %2320 = vmatpush.bf16.msra.mxu1 %v8471_v22  ;;  %v8851_v20 = vor.u32 %v11990_v16, %v8850_v57  ;;  %v12095_v22 = vld [vmem:[#allocation2 + $0x79c] sm:$0xf]  ;;  %v8731_v57 = vor.u32 %v11959_v33, %v8730_v30  ;;  %v12071_v15 = vld [vmem:[#allocation2 + $0x6d4] sm:$0xf0] }
 0x331   :  { %v9311_v38 = vor.u32 %v12095_v22, %v9308_v0  ;;  %v9179_v40 = vor.u32 %v12071_v15, %v9178_v46  ;;  %v11927_v22 = vld [vmem:[#allocation2 + $0x254] sm:$0xf0]  ;;  %v12047_v30 = vld [vmem:[#allocation2 + $0x61c] sm:$0xf] }
 0x332   :  { %2307 = vmatpush.bf16.msra.mxu0 %v8979_v29  ;;  %2333 = vmatpush.bf16.msra.mxu2 %v8983_v50  ;;  %v8343_v29 = vor.u32 %v11854_v63, %v8340_v19  ;;  %v9307_v50 = vor.u32 %v12103_v9, %v9306_v32  ;;  %v8735_v63 = vor.u32 %v11951_v55, %v8732_v53  ;;  %v11943_v19 = vld [vmem:[#allocation2 + $0x2d4] sm:$0xf0]  ;;  %v8668_v32 = vld [vmem:[#allocation2 + $0x2d8] sm:$0xf0] }
 0x333   :  { %v9180_v9 = vld [vmem:[#allocation2 + $0x6d8] sm:$0xf0]  ;;  %v9114_v0 = vld [vmem:[#allocation2 + $0x618] sm:$0xf] }
 0x334   :  { %2295 = vmatpush.bf16.msrb.mxu3 %v8403_v43  ;;  %2321 = vmatpush.bf16.msra.mxu1 %v8407_v10  ;;  %v12087_v43 = vld [vmem:[#allocation2 + $0x754] sm:$0xf0]  ;;  %v9244_v10 = vld [vmem:[#allocation2 + $0x758] sm:$0xf0] }
 0x335   :  { %v9243_v16 = vor.u32 %v12087_v43, %v9242_v56  ;;  %v9116_v33 = vld [vmem:[#allocation2 + $0x658] sm:$0xf0]  ;;  %v8538_v55 = vld [vmem:[#allocation2 + $0x198] sm:$0xf] }
 0x336   :  { %2308 = vmatpush.bf16.msra.mxu0 %v8915_v62  ;;  %2334 = vmatpush.bf16.msra.mxu2 %v8919_v60  ;;  %v12079_v62 = vld [vmem:[#allocation2 + $0x71c] sm:$0xf]  ;;  %v8666_v60 = vld [vmem:[#allocation2 + $0x298] sm:$0xf] }
 0x337   :  { %v9247_v39 = vor.u32 %v12079_v62, %v9244_v10  ;;  %v8667_v17 = vor.u32 %v11943_v19, %v8666_v60  ;;  %v11911_v53 = vld [vmem:[#allocation2 + $0x1d4] sm:$0xf0]  ;;  %v9119_v10 = vor.u32 %v12047_v30, %v9116_v33  ;;  %v12031_v60 = vld [vmem:[#allocation2 + $0x59c] sm:$0xf] }
 0x338   :  { %2296 = vmatpush.bf16.msrb.mxu3 %v8339_v7  ;;  %2322 = vmatpush.bf16.msra.mxu1 %v8343_v29  ;;  %v12063_v7 = vld [vmem:[#allocation2 + $0x69c] sm:$0xf]  ;;  %v8602_v29 = vld [vmem:[#allocation2 + $0x218] sm:$0xf]  ;;  %v8539_v46 = vor.u32 %v11911_v53, %v8538_v55 }
 0x339   :  { %v8603_v56 = vor.u32 %v11927_v22, %v8602_v29  ;;  %v9050_v62 = vld [vmem:[#allocation2 + $0x598] sm:$0xf]  ;;  %v9052_v19 = vld [vmem:[#allocation2 + $0x5d8] sm:$0xf0] }
 0x33a   :  { %2309 = vmatpush.bf16.msra.mxu0 %v8851_v20  ;;  %2335 = vmatpush.bf16.msra.mxu2 %v8855_v49  ;;  %v8671_v20 = vor.u32 %v11935_v5, %v8668_v32  ;;  %v9183_v49 = vor.u32 %v12063_v7, %v9180_v9  ;;  %v8474_v5 = vld [vmem:[#allocation2 + $0x118] sm:$0xf]  ;;  %v9055_v9 = vor.u32 %v12031_v60, %v9052_v19  ;;  %v12015_v29 = vld [vmem:[#allocation2 + $0x51c] sm:$0xf] }
 0x33b   :  { %2297 = vmatmul.bf16.vlgmr.msrb.gmra.mxu3 %v13066_v1  ;;  %2323 = vmatmul.bf16.vlgmr.msra.gmra.mxu1 %v13066_v1  ;;  %v11895_v32 = vld [vmem:[#allocation2 + $0x154] sm:$0xf0]  ;;  %v8988_v22 = vld [vmem:[#allocation2 + $0x558] sm:$0xf0] }
 0x33c   :  { %2341 = vmatpush.bf16.msra.mxu3 %v8795_v34  ;;  %2367 = vmatpush.bf16.msrb.mxu1 %v8799_v21  ;;  %v12055_v34 = vld [vmem:[#allocation2 + $0x654] sm:$0xf0]  ;;  %v8604_v21 = vld [vmem:[#allocation2 + $0x258] sm:$0xf0]  ;;  %v8991_v33 = vor.u32 %v12015_v29, %v8988_v22  ;;  %v11968_v29 = vld [vmem:[#allocation2 + $0x3a4] sm:$0xf] }
 0x33d   :  { %2336 = vmatmul.bf16.vlgmr.msra.gmra.mxu2 %v13070_v41  ;;  %2310 = vmatmul.bf16.vlgmr.msra.gmra.mxu0 %v13070_v41  ;;  %v8986_v7 = vld [vmem:[#allocation2 + $0x518] sm:$0xf]  ;;  %v11999_v55 = vld [vmem:[#allocation2 + $0x49c] sm:$0xf]  ;;  %v8804_v22 = vld [vmem:[#allocation2 + $0x3e0] sm:$0xf0] }
 0x33e   :  { %2354 = vmatpush.bf16.msrb.mxu0 %v9307_v50  ;;  %2380 = vmatpush.bf16.msrb.mxu2 %v9311_v38  ;;  %v11919_v50 = vld [vmem:[#allocation2 + $0x21c] sm:$0xf]  ;;  %v9115_v38 = vor.u32 %v12055_v34, %v9114_v0  ;;  %v8475_v0 = vor.u32 %v11895_v32, %v8474_v5  ;;  %v8922_v30 = vld [vmem:[#allocation2 + $0x498] sm:$0xf] }
 0x33f   :  { %v8607_v43 = vor.u32 %v11919_v50, %v8604_v21  ;;  %v8410_v50 = vld [vmem:[#allocation2 + $0x98] sm:$0xf]  ;;  %v8924_v53 = vld [vmem:[#allocation2 + $0x4d8] sm:$0xf0] }
 0x340   :  { %2342 = vmatpush.bf16.msra.mxu3 %v8731_v57  ;;  %2368 = vmatpush.bf16.msrb.mxu1 %v8735_v63  ;;  %v12039_v57 = vld [vmem:[#allocation2 + $0x5d4] sm:$0xf0]  ;;  %v8540_v63 = vld [vmem:[#allocation2 + $0x1d8] sm:$0xf0] }
 0x341   :  { %v11879_v21 = vld [vmem:[#allocation2 + $0xd4] sm:$0xf0]  ;;  %v11983_v5 = vld [vmem:[#allocation2 + $0x41c] sm:$0xf] }
 0x342   :  { %2355 = vmatpush.bf16.msrb.mxu0 %v9243_v16  ;;  %2381 = vmatpush.bf16.msrb.mxu2 %v9247_v39  ;;  %v11903_v16 = vld [vmem:[#allocation2 + $0x19c] sm:$0xf]  ;;  %v9051_v39 = vor.u32 %v12039_v57, %v9050_v62  ;;  %v8411_v62 = vor.u32 %v11879_v21, %v8410_v50  ;;  %v11863_v57 = vld [vmem:[#allocation2 + $0x54] sm:$0xf0]  ;;  %v9316_v50 = vld [vmem:[#allocation2 + $0x7e0] sm:$0xf0] }
 0x343   :  { %v8543_v15 = vor.u32 %v11903_v16, %v8540_v63  ;;  %v8858_v60 = vld [vmem:[#allocation2 + $0x418] sm:$0xf]  ;;  %v8860_v32 = vld [vmem:[#allocation2 + $0x458] sm:$0xf0] }
 0x344   :  { %2343 = vmatpush.bf16.msra.mxu3 %v8667_v17  ;;  %2369 = vmatpush.bf16.msrb.mxu1 %v8671_v20  ;;  %v12023_v17 = vld [vmem:[#allocation2 + $0x554] sm:$0xf0]  ;;  %v8476_v20 = vld [vmem:[#allocation2 + $0x158] sm:$0xf0]  ;;  %v8863_v21 = vor.u32 %v11983_v5, %v8860_v32  ;;  %v9186_v5 = vld [vmem:[#allocation2 + $0x6a0] sm:$0xf] }
 0x345   :  { %v11991_v19 = vld [vmem:[#allocation2 + $0x454] sm:$0xf0] }
 0x346   :  { %2356 = vmatpush.bf16.msrb.mxu0 %v9179_v40  ;;  %2382 = vmatpush.bf16.msrb.mxu2 %v9183_v49  ;;  %v11887_v40 = vld [vmem:[#allocation2 + $0x11c] sm:$0xf]  ;;  %v8987_v49 = vor.u32 %v12023_v17, %v8986_v7  ;;  %v8802_v7 = vld [vmem:[#allocation2 + $0x3a0] sm:$0xf] }
 0x347   :  { %v8479_v34 = vor.u32 %v11887_v40, %v8476_v20  ;;  %v9314_v17 = vld [vmem:[#allocation2 + $0x7a0] sm:$0xf] }
 0x348   :  { %2344 = vmatpush.bf16.msra.mxu3 %v8603_v56  ;;  %2370 = vmatpush.bf16.msrb.mxu1 %v8607_v43  ;;  %v12007_v56 = vld [vmem:[#allocation2 + $0x4d4] sm:$0xf0]  ;;  %v8412_v43 = vld [vmem:[#allocation2 + $0xd8] sm:$0xf0]  ;;  %v12104_v20 = vld [vmem:[#allocation2 + $0x7dc] sm:$0xf0] }
 0x349   :  { %v8923_v16 = vor.u32 %v12007_v56, %v8922_v30  ;;  %v8807_v56 = vor.u32 %v11968_v29, %v8804_v22 }
 0x34a   :  { %2357 = vmatpush.bf16.msrb.mxu0 %v9115_v38  ;;  %2383 = vmatpush.bf16.msrb.mxu2 %v9119_v10  ;;  %v11871_v38 = vld [vmem:[#allocation2 + $0x9c] sm:$0xf]  ;;  %v8346_v10 = vld [vmem:[#allocation2 + $0x18] sm:$0xf] }
 0x34b   :  { %v8415_v63 = vor.u32 %v11871_v38, %v8412_v43  ;;  %v8347_v40 = vor.u32 %v11863_v57, %v8346_v10  ;;  %v8738_v38 = vld [vmem:[#allocation2 + $0x320] sm:$0xf]  ;;  %v11952_v10 = vld [vmem:[#allocation2 + $0x324] sm:$0xf] }
 0x34c   :  { %2345 = vmatpush.bf16.msra.mxu3 %v8539_v46  ;;  %2371 = vmatpush.bf16.msrb.mxu1 %v8543_v15  ;;  %v11855_v46 = vld [vmem:[#allocation2 + $0x1c] sm:$0xf]  ;;  %v11960_v43 = vld [vmem:[#allocation2 + $0x35c] sm:$0xf0]  ;;  %v8740_v57 = vld [vmem:[#allocation2 + $0x360] sm:$0xf0] }
 0x34d   :  { %v8348_v15 = vld [vmem:[#allocation2 + $0x58] sm:$0xf0] }
 0x34e   :  { %2358 = vmatpush.bf16.msrb.mxu0 %v9051_v39  ;;  %2384 = vmatpush.bf16.msrb.mxu2 %v9055_v9  ;;  %v8927_v39 = vor.u32 %v11999_v55, %v8924_v53  ;;  %v11976_v9 = vld [vmem:[#allocation2 + $0x3dc] sm:$0xf0] }
 0x34f   :  { %v8803_v30 = vor.u32 %v11976_v9, %v8802_v7  ;;  %v9250_v55 = vld [vmem:[#allocation2 + $0x720] sm:$0xf]  ;;  %v11936_v9 = vld [vmem:[#allocation2 + $0x2a4] sm:$0xf] }
 0x350   :  { %2346 = vmatpush.bf16.msra.mxu3 %v8475_v0  ;;  %2372 = vmatpush.bf16.msrb.mxu1 %v8479_v34  ;;  %v8859_v0 = vor.u32 %v11991_v19, %v8858_v60  ;;  %v12096_v34 = vld [vmem:[#allocation2 + $0x7a4] sm:$0xf]  ;;  %v8739_v60 = vor.u32 %v11960_v43, %v8738_v38  ;;  %v12072_v7 = vld [vmem:[#allocation2 + $0x6dc] sm:$0xf0] }
 0x351   :  { %v9319_v53 = vor.u32 %v12096_v34, %v9316_v50  ;;  %v9187_v22 = vor.u32 %v12072_v7, %v9186_v5  ;;  %v11928_v34 = vld [vmem:[#allocation2 + $0x25c] sm:$0xf0]  ;;  %v12048_v38 = vld [vmem:[#allocation2 + $0x624] sm:$0xf] }
 0x352   :  { %2359 = vmatpush.bf16.msrb.mxu0 %v8987_v49  ;;  %2385 = vmatpush.bf16.msrb.mxu2 %v8991_v33  ;;  %v8351_v49 = vor.u32 %v11855_v46, %v8348_v15  ;;  %v9315_v33 = vor.u32 %v12104_v20, %v9314_v17  ;;  %v8743_v46 = vor.u32 %v11952_v10, %v8740_v57  ;;  %v11944_v15 = vld [vmem:[#allocation2 + $0x2dc] sm:$0xf0]  ;;  %v8676_v17 = vld [vmem:[#allocation2 + $0x2e0] sm:$0xf0] }
 0x353   :  { %v9188_v20 = vld [vmem:[#allocation2 + $0x6e0] sm:$0xf0]  ;;  %v9122_v50 = vld [vmem:[#allocation2 + $0x620] sm:$0xf] }
 0x354   :  { %2347 = vmatpush.bf16.msra.mxu3 %v8411_v62  ;;  %2373 = vmatpush.bf16.msrb.mxu1 %v8415_v63  ;;  %v12088_v62 = vld [vmem:[#allocation2 + $0x75c] sm:$0xf0]  ;;  %v9252_v63 = vld [vmem:[#allocation2 + $0x760] sm:$0xf0] }
 0x355   :  { %v9251_v19 = vor.u32 %v12088_v62, %v9250_v55  ;;  %v9124_v43 = vld [vmem:[#allocation2 + $0x660] sm:$0xf0]  ;;  %v8546_v10 = vld [vmem:[#allocation2 + $0x1a0] sm:$0xf] }
 0x356   :  { %2360 = vmatpush.bf16.msrb.mxu0 %v8923_v16  ;;  %2386 = vmatpush.bf16.msrb.mxu2 %v8927_v39  ;;  %v12080_v16 = vld [vmem:[#allocation2 + $0x724] sm:$0xf]  ;;  %v8674_v39 = vld [vmem:[#allocation2 + $0x2a0] sm:$0xf] }
 0x357   :  { %v9255_v32 = vor.u32 %v12080_v16, %v9252_v63  ;;  %v8675_v29 = vor.u32 %v11944_v15, %v8674_v39  ;;  %v11912_v57 = vld [vmem:[#allocation2 + $0x1dc] sm:$0xf0]  ;;  %v9127_v63 = vor.u32 %v12048_v38, %v9124_v43  ;;  %v12032_v39 = vld [vmem:[#allocation2 + $0x5a4] sm:$0xf] }
 0x358   :  { %2348 = vmatpush.bf16.msra.mxu3 %v8347_v40  ;;  %2374 = vmatpush.bf16.msrb.mxu1 %v8351_v49  ;;  %v12064_v40 = vld [vmem:[#allocation2 + $0x6a4] sm:$0xf]  ;;  %v8610_v49 = vld [vmem:[#allocation2 + $0x220] sm:$0xf]  ;;  %v8547_v5 = vor.u32 %v11912_v57, %v8546_v10 }
 0x359   :  { %v8611_v55 = vor.u32 %v11928_v34, %v8610_v49  ;;  %v9058_v16 = vld [vmem:[#allocation2 + $0x5a0] sm:$0xf]  ;;  %v9060_v15 = vld [vmem:[#allocation2 + $0x5e0] sm:$0xf0] }
 0x35a   :  { %2361 = vmatpush.bf16.msrb.mxu0 %v8859_v0  ;;  %2387 = vmatpush.bf16.msrb.mxu2 %v8863_v21  ;;  %v8679_v0 = vor.u32 %v11936_v9, %v8676_v17  ;;  %v9191_v21 = vor.u32 %v12064_v40, %v9188_v20  ;;  %v8482_v9 = vld [vmem:[#allocation2 + $0x120] sm:$0xf]  ;;  %v9063_v20 = vor.u32 %v12032_v39, %v9060_v15  ;;  %v12016_v49 = vld [vmem:[#allocation2 + $0x524] sm:$0xf] }
 0x35b   :  { %2349 = vmatmul.bf16.vlgmr.msra.gmra.mxu3 %v13066_v1  ;;  %2375 = vmatmul.bf16.vlgmr.msrb.gmra.mxu1 %v13066_v1  ;;  %v11896_v17 = vld [vmem:[#allocation2 + $0x15c] sm:$0xf0]  ;;  %v8996_v34 = vld [vmem:[#allocation2 + $0x560] sm:$0xf0] }
 0x35c   :  { %2393 = vmatpush.bf16.msrb.mxu3 %v8803_v30  ;;  %2419 = vmatpush.bf16.msra.mxu1 %v8807_v56  ;;  %v12056_v30 = vld [vmem:[#allocation2 + $0x65c] sm:$0xf0]  ;;  %v8612_v56 = vld [vmem:[#allocation2 + $0x260] sm:$0xf0]  ;;  %v8999_v43 = vor.u32 %v12016_v49, %v8996_v34  ;;  %v11969_v49 = vld [vmem:[#allocation2 + $0x3ac] sm:$0xf] }
 0x35d   :  { %2388 = vmatmul.bf16.vlgmr.msrb.gmra.mxu2 %v13070_v41  ;;  %2362 = vmatmul.bf16.vlgmr.msrb.gmra.mxu0 %v13070_v41  ;;  %v8994_v40 = vld [vmem:[#allocation2 + $0x520] sm:$0xf]  ;;  %v12000_v10 = vld [vmem:[#allocation2 + $0x4a4] sm:$0xf]  ;;  %v8812_v34 = vld [vmem:[#allocation2 + $0x3e8] sm:$0xf0] }
 0x35e   :  { %2406 = vmatpush.bf16.msra.mxu0 %v9315_v33  ;;  %2432 = vmatpush.bf16.msra.mxu2 %v9319_v53  ;;  %v11920_v33 = vld [vmem:[#allocation2 + $0x224] sm:$0xf]  ;;  %v9123_v53 = vor.u32 %v12056_v30, %v9122_v50  ;;  %v8483_v50 = vor.u32 %v11896_v17, %v8482_v9  ;;  %v8930_v38 = vld [vmem:[#allocation2 + $0x4a0] sm:$0xf] }
 0x35f   :  { %v8615_v62 = vor.u32 %v11920_v33, %v8612_v56  ;;  %v8418_v33 = vld [vmem:[#allocation2 + $0xa0] sm:$0xf]  ;;  %v8932_v57 = vld [vmem:[#allocation2 + $0x4e0] sm:$0xf0] }
 0x360   :  { %2394 = vmatpush.bf16.msrb.mxu3 %v8739_v60  ;;  %2420 = vmatpush.bf16.msra.mxu1 %v8743_v46  ;;  %v12040_v60 = vld [vmem:[#allocation2 + $0x5dc] sm:$0xf0]  ;;  %v8548_v46 = vld [vmem:[#allocation2 + $0x1e0] sm:$0xf0] }
 0x361   :  { %v11880_v56 = vld [vmem:[#allocation2 + $0xdc] sm:$0xf0]  ;;  %v11984_v9 = vld [vmem:[#allocation2 + $0x424] sm:$0xf] }
 0x362   :  { %2407 = vmatpush.bf16.msra.mxu0 %v9251_v19  ;;  %2433 = vmatpush.bf16.msra.mxu2 %v9255_v32  ;;  %v11904_v19 = vld [vmem:[#allocation2 + $0x1a4] sm:$0xf]  ;;  %v9059_v32 = vor.u32 %v12040_v60, %v9058_v16  ;;  %v8419_v16 = vor.u32 %v11880_v56, %v8418_v33  ;;  %v11864_v60 = vld [vmem:[#allocation2 + $0x5c] sm:$0xf0]  ;;  %v9324_v33 = vld [vmem:[#allocation2 + $0x7e8] sm:$0xf0] }
 0x363   :  { %v8551_v7 = vor.u32 %v11904_v19, %v8548_v46  ;;  %v8866_v39 = vld [vmem:[#allocation2 + $0x420] sm:$0xf]  ;;  %v8868_v17 = vld [vmem:[#allocation2 + $0x460] sm:$0xf0] }
 0x364   :  { %2395 = vmatpush.bf16.msrb.mxu3 %v8675_v29  ;;  %2421 = vmatpush.bf16.msra.mxu1 %v8679_v0  ;;  %v12024_v29 = vld [vmem:[#allocation2 + $0x55c] sm:$0xf0]  ;;  %v8484_v0 = vld [vmem:[#allocation2 + $0x160] sm:$0xf0]  ;;  %v8871_v56 = vor.u32 %v11984_v9, %v8868_v17  ;;  %v9194_v9 = vld [vmem:[#allocation2 + $0x6a8] sm:$0xf] }
 0x365   :  { %v11992_v15 = vld [vmem:[#allocation2 + $0x45c] sm:$0xf0] }
 0x366   :  { %2408 = vmatpush.bf16.msra.mxu0 %v9187_v22  ;;  %2434 = vmatpush.bf16.msra.mxu2 %v9191_v21  ;;  %v11888_v22 = vld [vmem:[#allocation2 + $0x124] sm:$0xf]  ;;  %v8995_v21 = vor.u32 %v12024_v29, %v8994_v40  ;;  %v8810_v40 = vld [vmem:[#allocation2 + $0x3a8] sm:$0xf] }
 0x367   :  { %v8487_v30 = vor.u32 %v11888_v22, %v8484_v0  ;;  %v9322_v29 = vld [vmem:[#allocation2 + $0x7a8] sm:$0xf] }
 0x368   :  { %2396 = vmatpush.bf16.msrb.mxu3 %v8611_v55  ;;  %2422 = vmatpush.bf16.msra.mxu1 %v8615_v62  ;;  %v12008_v55 = vld [vmem:[#allocation2 + $0x4dc] sm:$0xf0]  ;;  %v8420_v62 = vld [vmem:[#allocation2 + $0xe0] sm:$0xf0]  ;;  %v12105_v0 = vld [vmem:[#allocation2 + $0x7e4] sm:$0xf0] }
 0x369   :  { %v8931_v19 = vor.u32 %v12008_v55, %v8930_v38  ;;  %v8815_v55 = vor.u32 %v11969_v49, %v8812_v34 }
 0x36a   :  { %2409 = vmatpush.bf16.msra.mxu0 %v9123_v53  ;;  %2435 = vmatpush.bf16.msra.mxu2 %v9127_v63  ;;  %v11872_v53 = vld [vmem:[#allocation2 + $0xa4] sm:$0xf]  ;;  %v8354_v63 = vld [vmem:[#allocation2 + $0x20] sm:$0xf] }
 0x36b   :  { %v8423_v46 = vor.u32 %v11872_v53, %v8420_v62  ;;  %v8355_v22 = vor.u32 %v11864_v60, %v8354_v63  ;;  %v8746_v53 = vld [vmem:[#allocation2 + $0x328] sm:$0xf]  ;;  %v11953_v63 = vld [vmem:[#allocation2 + $0x32c] sm:$0xf] }
 0x36c   :  { %2397 = vmatpush.bf16.msrb.mxu3 %v8547_v5  ;;  %2423 = vmatpush.bf16.msra.mxu1 %v8551_v7  ;;  %v11856_v5 = vld [vmem:[#allocation2 + $0x24] sm:$0xf]  ;;  %v11961_v62 = vld [vmem:[#allocation2 + $0x364] sm:$0xf0]  ;;  %v8748_v60 = vld [vmem:[#allocation2 + $0x368] sm:$0xf0] }
 0x36d   :  { %v8356_v7 = vld [vmem:[#allocation2 + $0x60] sm:$0xf0] }
 0x36e   :  { %2410 = vmatpush.bf16.msra.mxu0 %v9059_v32  ;;  %2436 = vmatpush.bf16.msra.mxu2 %v9063_v20  ;;  %v8935_v32 = vor.u32 %v12000_v10, %v8932_v57  ;;  %v11977_v20 = vld [vmem:[#allocation2 + $0x3e4] sm:$0xf0] }
 0x36f   :  { %v8811_v38 = vor.u32 %v11977_v20, %v8810_v40  ;;  %v9258_v10 = vld [vmem:[#allocation2 + $0x728] sm:$0xf]  ;;  %v11937_v20 = vld [vmem:[#allocation2 + $0x2ac] sm:$0xf] }
 0x370   :  { %2398 = vmatpush.bf16.msrb.mxu3 %v8483_v50  ;;  %2424 = vmatpush.bf16.msra.mxu1 %v8487_v30  ;;  %v8867_v50 = vor.u32 %v11992_v15, %v8866_v39  ;;  %v12097_v30 = vld [vmem:[#allocation2 + $0x7ac] sm:$0xf]  ;;  %v8747_v39 = vor.u32 %v11961_v62, %v8746_v53  ;;  %v12073_v40 = vld [vmem:[#allocation2 + $0x6e4] sm:$0xf0] }
 0x371   :  { %v9327_v57 = vor.u32 %v12097_v30, %v9324_v33  ;;  %v9195_v34 = vor.u32 %v12073_v40, %v9194_v9  ;;  %v11929_v30 = vld [vmem:[#allocation2 + $0x264] sm:$0xf0]  ;;  %v12049_v53 = vld [vmem:[#allocation2 + $0x62c] sm:$0xf] }
 0x372   :  { %2411 = vmatpush.bf16.msra.mxu0 %v8995_v21  ;;  %2437 = vmatpush.bf16.msra.mxu2 %v8999_v43  ;;  %v8359_v21 = vor.u32 %v11856_v5, %v8356_v7  ;;  %v9323_v43 = vor.u32 %v12105_v0, %v9322_v29  ;;  %v8751_v5 = vor.u32 %v11953_v63, %v8748_v60  ;;  %v11945_v7 = vld [vmem:[#allocation2 + $0x2e4] sm:$0xf0]  ;;  %v8684_v29 = vld [vmem:[#allocation2 + $0x2e8] sm:$0xf0] }
 0x373   :  { %v9196_v0 = vld [vmem:[#allocation2 + $0x6e8] sm:$0xf0]  ;;  %v9130_v33 = vld [vmem:[#allocation2 + $0x628] sm:$0xf] }
 0x374   :  { %2399 = vmatpush.bf16.msrb.mxu3 %v8419_v16  ;;  %2425 = vmatpush.bf16.msra.mxu1 %v8423_v46  ;;  %v12089_v16 = vld [vmem:[#allocation2 + $0x764] sm:$0xf0]  ;;  %v9260_v46 = vld [vmem:[#allocation2 + $0x768] sm:$0xf0] }
 0x375   :  { %v9259_v15 = vor.u32 %v12089_v16, %v9258_v10  ;;  %v9132_v62 = vld [vmem:[#allocation2 + $0x668] sm:$0xf0]  ;;  %v14682_v10 = vperm.slane %v12924_v2, 1  ;;  %v8554_v16 = vld [vmem:[#allocation2 + $0x1a8] sm:$0xf] }
 0x376   :  { %2412 = vmatpush.bf16.msra.mxu0 %v8931_v19  ;;  %2438 = vmatpush.bf16.msra.mxu2 %v8935_v32  ;;  %v12081_v19 = vld [vmem:[#allocation2 + $0x72c] sm:$0xf]  ;;  %v8682_v32 = vld [vmem:[#allocation2 + $0x2a8] sm:$0xf] }
 0x377   :  { %v9263_v17 = vor.u32 %v12081_v19, %v9260_v46  ;;  %v8683_v49 = vor.u32 %v11945_v7, %v8682_v32  ;;  %v11913_v46 = vld [vmem:[#allocation2 + $0x1e4] sm:$0xf0]  ;;  %v9135_v32 = vor.u32 %v12049_v53, %v9132_v62  ;;  %v11905_v7 = vld [vmem:[#allocation2 + $0x1ac] sm:$0xf] }
 0x378   :  { %2400 = vmatpush.bf16.msrb.mxu3 %v8355_v22  ;;  %2426 = vmatpush.bf16.msra.mxu1 %v8359_v21  ;;  %v12065_v22 = vld [vmem:[#allocation2 + $0x6ac] sm:$0xf]  ;;  %v8618_v21 = vld [vmem:[#allocation2 + $0x228] sm:$0xf] }
 0x379   :  { %v8556_v9 = vld [vmem:[#allocation2 + $0x1e8] sm:$0xf0] }
 0x37a   :  { %2413 = vmatpush.bf16.msra.mxu0 %v8867_v50  ;;  %2439 = vmatpush.bf16.msra.mxu2 %v8871_v56  ;;  %v8687_v50 = vor.u32 %v11937_v20, %v8684_v29  ;;  %v9199_v56 = vor.u32 %v12065_v22, %v9196_v0  ;;  %v2207_v63 = vpop.f32.mrf.mxu0  ;;  %v12033_v40 = vld [vmem:[#allocation2 + $0x5ac] sm:$0xf]  ;;  %v8555_v22 = vor.u32 %v11913_v46, %v8554_v16  ;;  %v11881_v46 = vld [vmem:[#allocation2 + $0xe4] sm:$0xf0] }
 0x37b   :  { %2401 = vmatmul.bf16.vlgmr.msrb.gmra.mxu3 %v13066_v1  ;;  %2427 = vmatmul.bf16.vlgmr.msra.gmra.mxu1 %v13066_v1  ;;  %v9068_v20 = vld [vmem:[#allocation2 + $0x5e8] sm:$0xf0] }
 0x37c   :  { %2445 = vmatpush.bf16.msra.mxu3 %v8811_v38  ;;  %2471 = vmatpush.bf16.msrb.mxu1 %v8815_v55  ;;  %v12057_v38 = vld [vmem:[#allocation2 + $0x664] sm:$0xf0]  ;;  %v8620_v55 = vld [vmem:[#allocation2 + $0x268] sm:$0xf0] }
 0x37d   :  { %2440 = vmatmul.bf16.vlgmr.msra.gmra.mxu2 %v13070_v41  ;;  %2414 = vmatmul.bf16.vlgmr.msra.gmra.mxu0 %v13070_v41  ;;  %v9131_v60 = vor.u32 %v12057_v38, %v9130_v33  ;;  %v9071_v33 = vor.u32 %v12033_v40, %v9068_v20  ;;  %v11889_v38 = vld [vmem:[#allocation2 + $0x12c] sm:$0xf]  ;;  %v11978_v40 = vld [vmem:[#allocation2 + $0x3ec] sm:$0xf0] }
 0x37e   :  { %2458 = vmatpush.bf16.msrb.mxu0 %v9323_v43  ;;  %2484 = vmatpush.bf16.msrb.mxu2 %v9327_v57  ;;  %v11921_v43 = vld [vmem:[#allocation2 + $0x22c] sm:$0xf]  ;;  %v8619_v57 = vor.u32 %v11929_v30, %v8618_v21  ;;  %v9002_v21 = vld [vmem:[#allocation2 + $0x528] sm:$0xf]  ;;  %v2194_v30 = vpop.f32.mrf.mxu3 }
 0x37f   :  { %v8623_v19 = vor.u32 %v11921_v43, %v8620_v55  ;;  %v8492_v43 = vld [vmem:[#allocation2 + $0x168] sm:$0xf0] }
 0x380   :  { %2446 = vmatpush.bf16.msra.mxu3 %v8747_v39  ;;  %2472 = vmatpush.bf16.msrb.mxu1 %v8751_v5  ;;  %v9066_v39 = vld [vmem:[#allocation2 + $0x5a8] sm:$0xf]  ;;  %v2220_v5 = vpop.f32.mrf.mxu1  ;;  %v2233_v53 = vpop.f32.mrf.mxu2  ;;  %v12017_v62 = vld [vmem:[#allocation2 + $0x52c] sm:$0xf] }
 0x381   :  { %v2221_v29 = vadd.f32 %v2220_v5, %v14682_v10  ;;  %v8818_v10 = vld [vmem:[#allocation2 + $0x3b0] sm:$0xf] }
 0x382   :  { %2459 = vmatpush.bf16.msrb.mxu0 %v9259_v15  ;;  %2485 = vmatpush.bf16.msrb.mxu2 %v9263_v17  ;;  %v12041_v15 = vld [vmem:[#allocation2 + $0x5e4] sm:$0xf0]  ;;  %v14681_v17 = vperm.slane %v12924_v2, 0 }
 0x383   :  { %v9067_v0 = vor.u32 %v12041_v15, %v9066_v39  ;;  %v13098_v16 = vadd.f32 %v2233_v53, %v2221_v29  ;;  %v2209_v15 = vpop.f32.mrf.mxu0  ;;  %v11873_v29 = vld [vmem:[#allocation2 + $0xac] sm:$0xf] }
 0x384   :  { %2447 = vmatpush.bf16.msra.mxu3 %v8683_v49  ;;  %2473 = vmatpush.bf16.msrb.mxu1 %v8687_v50  ;;  %v8559_v49 = vor.u32 %v11905_v7, %v8556_v9  ;;  %v11897_v50 = vld [vmem:[#allocation2 + $0x164] sm:$0xf0]  ;;  %v2195_v55 = vadd.f32 %v2194_v30, %v14681_v17  ;;  %v8428_v53 = vld [vmem:[#allocation2 + $0xe8] sm:$0xf0] }
 0x385   :  { %v8938_v7 = vld [vmem:[#allocation2 + $0x4a8] sm:$0xf] }
 0x386   :  { %2460 = vmatpush.bf16.msrb.mxu0 %v9195_v34  ;;  %2486 = vmatpush.bf16.msrb.mxu2 %v9199_v56  ;;  %v8490_v34 = vld [vmem:[#allocation2 + $0x128] sm:$0xf]  ;;  %v13100_v39 = vadd.f32 %v2207_v63, %v2195_v55  ;;  %v2196_v15 = vpop.f32.mrf.mxu3 }
 0x387   :  { %v12025_v56 = vld [vmem:[#allocation2 + $0x564] sm:$0xf0] }
 0x388   :  { %2448 = vmatpush.bf16.msra.mxu3 %v8619_v57  ;;  %2474 = vmatpush.bf16.msrb.mxu1 %v8623_v19  ;;  %v9004_v57 = vld [vmem:[#allocation2 + $0x568] sm:$0xf0]  ;;  %v8426_v19 = vld [vmem:[#allocation2 + $0xa8] sm:$0xf]  ;;  %v9003_v5 = vor.u32 %v12025_v56, %v9002_v21  ;;  %v2222_v20 = vpop.f32.mrf.mxu1  ;;  %v8431_v21 = vor.u32 %v11873_v29, %v8428_v53  ;;  %v2235_v17 = vpop.f32.mrf.mxu2  ;;  %v12098_v29 = vld [vmem:[#allocation2 + $0x7b4] sm:$0xf] }
 0x389   :  { %v12009_v9 = vld [vmem:[#allocation2 + $0x4e4] sm:$0xf0]  ;;  %v9007_v30 = vor.u32 %v12017_v62, %v9004_v57  ;;  %v8427_v63 = vor.u32 %v11881_v46, %v8426_v19  ;;  %v8364_v62 = vld [vmem:[#allocation2 + $0x68] sm:$0xf0]  ;;  %v12106_v46 = vld [vmem:[#allocation2 + $0x7ec] sm:$0xf0] }
 0x38a   :  { %2461 = vmatpush.bf16.msrb.mxu0 %v9131_v60  ;;  %2487 = vmatpush.bf16.msrb.mxu2 %v9135_v32  ;;  %v8491_v60 = vor.u32 %v11897_v50, %v8490_v34  ;;  %v8495_v32 = vor.u32 %v11889_v38, %v8492_v43  ;;  %v12001_v34 = vld [vmem:[#allocation2 + $0x4ac] sm:$0xf]  ;;  %v8362_v55 = vld [vmem:[#allocation2 + $0x28] sm:$0xf]  ;;  %v9332_v53 = vld [vmem:[#allocation2 + $0x7f0] sm:$0xf0] }
 0x38b   :  { %v8940_v50 = vld [vmem:[#allocation2 + $0x4e8] sm:$0xf0]  ;;  %v8874_v56 = vld [vmem:[#allocation2 + $0x428] sm:$0xf]  ;;  %v8754_v17 = vld [vmem:[#allocation2 + $0x330] sm:$0xf] }
 0x38c   :  { %2449 = vmatpush.bf16.msra.mxu3 %v8555_v22  ;;  %2475 = vmatpush.bf16.msrb.mxu1 %v8559_v49  ;;  %v8939_v49 = vor.u32 %v12009_v9, %v8938_v7  ;;  %v11993_v38 = vld [vmem:[#allocation2 + $0x464] sm:$0xf0]  ;;  %v11857_v43 = vld [vmem:[#allocation2 + $0x2c] sm:$0xf]  ;;  %v11962_v22 = vld [vmem:[#allocation2 + $0x36c] sm:$0xf0] }
 0x38d   :  { %v11985_v57 = vld [vmem:[#allocation2 + $0x42c] sm:$0xf]  ;;  %v8875_v7 = vor.u32 %v11993_v38, %v8874_v56  ;;  %v8367_v9 = vor.u32 %v11857_v43, %v8364_v62  ;;  %v8755_v56 = vor.u32 %v11962_v22, %v8754_v17  ;;  %v8690_v38 = vld [vmem:[#allocation2 + $0x2b0] sm:$0xf] }
 0x38e   :  { %2462 = vmatpush.bf16.msrb.mxu0 %v9067_v0  ;;  %2488 = vmatpush.bf16.msrb.mxu2 %v9071_v33  ;;  %v11865_v0 = vld [vmem:[#allocation2 + $0x64] sm:$0xf0]  ;;  %v8943_v33 = vor.u32 %v12001_v34, %v8940_v50  ;;  %v8876_v20 = vld [vmem:[#allocation2 + $0x468] sm:$0xf0]  ;;  %v8819_v34 = vor.u32 %v11978_v40, %v8818_v10  ;;  %v11946_v43 = vld [vmem:[#allocation2 + $0x2ec] sm:$0xf0] }
 0x38f   :  { %v8363_v19 = vor.u32 %v11865_v0, %v8362_v55  ;;  %v12090_v55 = vld [vmem:[#allocation2 + $0x76c] sm:$0xf0]  ;;  %v11954_v0 = vld [vmem:[#allocation2 + $0x334] sm:$0xf]  ;;  %v8691_v22 = vor.u32 %v11946_v43, %v8690_v38 }
 0x390   :  { %2450 = vmatpush.bf16.msra.mxu3 %v8491_v60  ;;  %2476 = vmatpush.bf16.msrb.mxu1 %v8495_v32  ;;  %v9330_v60 = vld [vmem:[#allocation2 + $0x7b0] sm:$0xf]  ;;  %v8820_v32 = vld [vmem:[#allocation2 + $0x3f0] sm:$0xf0]  ;;  %v9267_v10 = vor.u32 %v12090_v55, %v9266_v13  ;;  %v8759_v40 = vor.u32 %v11954_v0, %v8756_v45 }
 0x391   :  { %v9331_v50 = vor.u32 %v12106_v46, %v9330_v60  ;;  %v8692_v60 = vld [vmem:[#allocation2 + $0x2f0] sm:$0xf0] }
 0x392   :  { %2463 = vmatpush.bf16.msrb.mxu0 %v9003_v5  ;;  %2489 = vmatpush.bf16.msrb.mxu2 %v9007_v30  ;;  %v11970_v5 = vld [vmem:[#allocation2 + $0x3b4] sm:$0xf]  ;;  %v8879_v30 = vor.u32 %v11985_v57, %v8876_v20  ;;  %v12074_v57 = vld [vmem:[#allocation2 + $0x6ec] sm:$0xf0] }
 0x393   :  { %v8823_v15 = vor.u32 %v11970_v5, %v8820_v32  ;;  %v11938_v20 = vld [vmem:[#allocation2 + $0x2b4] sm:$0xf]  ;;  %v8626_v5 = vld [vmem:[#allocation2 + $0x230] sm:$0xf] }
 0x394   :  { %2451 = vmatpush.bf16.msra.mxu3 %v8427_v63  ;;  %2477 = vmatpush.bf16.msrb.mxu1 %v8431_v21  ;;  %v9335_v63 = vor.u32 %v12098_v29, %v9332_v53  ;;  %v9268_v21 = vld [vmem:[#allocation2 + $0x770] sm:$0xf0]  ;;  %v8695_v13 = vor.u32 %v11938_v20, %v8692_v60  ;;  %v11930_v32 = vld [vmem:[#allocation2 + $0x26c] sm:$0xf0] }
 0x395   :  { %v9204_v46 = vld [vmem:[#allocation2 + $0x6f0] sm:$0xf0]  ;;  %v12058_v29 = vld [vmem:[#allocation2 + $0x66c] sm:$0xf0]  ;;  %v8627_v17 = vor.u32 %v11930_v32, %v8626_v5 }
 0x396   :  { %2464 = vmatpush.bf16.msrb.mxu0 %v8939_v49  ;;  %2490 = vmatpush.bf16.msrb.mxu2 %v8943_v33  ;;  %v12082_v49 = vld [vmem:[#allocation2 + $0x734] sm:$0xf]  ;;  %v9202_v33 = vld [vmem:[#allocation2 + $0x6b0] sm:$0xf] }
 0x397   :  { %v9271_v62 = vor.u32 %v12082_v49, %v9268_v21  ;;  %v9203_v45 = vor.u32 %v12074_v57, %v9202_v33  ;;  %v11922_v53 = vld [vmem:[#allocation2 + $0x234] sm:$0xf]  ;;  %v11914_v21 = vld [vmem:[#allocation2 + $0x1ec] sm:$0xf0] }
 0x398   :  { %2452 = vmatpush.bf16.msra.mxu3 %v8363_v19  ;;  %2478 = vmatpush.bf16.msrb.mxu1 %v8367_v9  ;;  %v12066_v19 = vld [vmem:[#allocation2 + $0x6b4] sm:$0xf]  ;;  %v9010_v5 = vld [vmem:[#allocation2 + $0x530] sm:$0xf] }
 0x399   :  { %v9207_v9 = vor.u32 %v12066_v19, %v9204_v46  ;;  %v11906_v43 = vld [vmem:[#allocation2 + $0x1b4] sm:$0xf] }
 0x39a   :  { %2465 = vmatpush.bf16.msrb.mxu0 %v8875_v7  ;;  %2491 = vmatpush.bf16.msrb.mxu2 %v8879_v30  ;;  %v9138_v7 = vld [vmem:[#allocation2 + $0x630] sm:$0xf]  ;;  %v8628_v30 = vld [vmem:[#allocation2 + $0x270] sm:$0xf0]  ;;  %v2259_v55 = vpop.f32.mrf.mxu0 }
 0x39b   :  { %2453 = vmatmul.bf16.vlgmr.msra.gmra.mxu3 %v13066_v1  ;;  %2479 = vmatmul.bf16.vlgmr.msrb.gmra.mxu1 %v13066_v1  ;;  %v9139_v0 = vor.u32 %v12058_v29, %v9138_v7  ;;  %v8631_v49 = vor.u32 %v11922_v53, %v8628_v30  ;;  %v8564_v33 = vld [vmem:[#allocation2 + $0x1f0] sm:$0xf0] }
 0x39c   :  { %2497 = vmatpush.bf16.msrb.mxu3 %v8819_v34  ;;  %2523 = vmatpush.bf16.msra.mxu1 %v8823_v15  ;;  %v12050_v34 = vld [vmem:[#allocation2 + $0x634] sm:$0xf]  ;;  %v14685_v15 = vperm.slane %v12924_v2, 3 }
 0x39d   :  { %2492 = vmatmul.bf16.vlgmr.msrb.gmra.mxu2 %v13070_v41  ;;  %2466 = vmatmul.bf16.vlgmr.msrb.gmra.mxu0 %v13070_v41  ;;  %v12034_v57 = vld [vmem:[#allocation2 + $0x5b4] sm:$0xf] }
 0x39e   :  { %2510 = vmatpush.bf16.msra.mxu0 %v9331_v50  ;;  %2536 = vmatpush.bf16.msra.mxu2 %v9335_v63  ;;  %v9140_v50 = vld [vmem:[#allocation2 + $0x670] sm:$0xf0]  ;;  %v8562_v63 = vld [vmem:[#allocation2 + $0x1b0] sm:$0xf]  ;;  %v2246_v32 = vpop.f32.mrf.mxu3 }
 0x39f   :  { %v9143_v38 = vor.u32 %v12050_v34, %v9140_v50  ;;  %v9076_v20 = vld [vmem:[#allocation2 + $0x5f0] sm:$0xf0]  ;;  %v8563_v19 = vor.u32 %v11914_v21, %v8562_v63  ;;  %v11882_v21 = vld [vmem:[#allocation2 + $0xec] sm:$0xf0] }
 0x3a0   :  { %2498 = vmatpush.bf16.msrb.mxu3 %v8755_v56  ;;  %2524 = vmatpush.bf16.msra.mxu1 %v8759_v40  ;;  %v9074_v56 = vld [vmem:[#allocation2 + $0x5b0] sm:$0xf]  ;;  %v2272_v40 = vpop.f32.mrf.mxu1  ;;  %v9079_v7 = vor.u32 %v12034_v57, %v9076_v20  ;;  %v11890_v29 = vld [vmem:[#allocation2 + $0x134] sm:$0xf]  ;;  %v2285_v34 = vpop.f32.mrf.mxu2  ;;  %v11963_v57 = vld [vmem:[#allocation2 + $0x374] sm:$0xf0] }
 0x3a1   :  { %v2273_v60 = vadd.f32 %v2272_v40, %v14685_v15  ;;  %v8500_v53 = vld [vmem:[#allocation2 + $0x170] sm:$0xf0] }
 0x3a2   :  { %2511 = vmatpush.bf16.msra.mxu0 %v9267_v10  ;;  %2537 = vmatpush.bf16.msra.mxu2 %v9271_v62  ;;  %v12042_v10 = vld [vmem:[#allocation2 + $0x5ec] sm:$0xf0]  ;;  %v14686_v62 = vperm.slane %v12924_v2, 2  ;;  %v12018_v50 = vld [vmem:[#allocation2 + $0x534] sm:$0xf] }
 0x3a3   :  { %v9075_v46 = vor.u32 %v12042_v10, %v9074_v56  ;;  %v13114_v63 = vadd.f32 %v2285_v34, %v2273_v60  ;;  %v2261_v10 = vpop.f32.mrf.mxu0  ;;  %v11874_v60 = vld [vmem:[#allocation2 + $0xb4] sm:$0xf] }
 0x3a4   :  { %2499 = vmatpush.bf16.msrb.mxu3 %v8691_v22  ;;  %2525 = vmatpush.bf16.msra.mxu1 %v8695_v13  ;;  %v8567_v22 = vor.u32 %v11906_v43, %v8564_v33  ;;  %v11898_v13 = vld [vmem:[#allocation2 + $0x16c] sm:$0xf0]  ;;  %v2247_v30 = vadd.f32 %v2246_v32, %v14686_v62  ;;  %v8436_v34 = vld [vmem:[#allocation2 + $0xf0] sm:$0xf0]  ;;  %v8826_v62 = vld [vmem:[#allocation2 + $0x3b8] sm:$0xf] }
 0x3a5   :  { %v8946_v43 = vld [vmem:[#allocation2 + $0x4b0] sm:$0xf] }
 0x3a6   :  { %2512 = vmatpush.bf16.msra.mxu0 %v9203_v45  ;;  %2538 = vmatpush.bf16.msra.mxu2 %v9207_v9  ;;  %v8498_v45 = vld [vmem:[#allocation2 + $0x130] sm:$0xf]  ;;  %v13116_v56 = vadd.f32 %v2259_v55, %v2247_v30  ;;  %v2248_v10 = vpop.f32.mrf.mxu3 }
 0x3a7   :  { %v12026_v9 = vld [vmem:[#allocation2 + $0x56c] sm:$0xf0] }
 0x3a8   :  { %2500 = vmatpush.bf16.msrb.mxu3 %v8627_v17  ;;  %2526 = vmatpush.bf16.msra.mxu1 %v8631_v49  ;;  %v9012_v17 = vld [vmem:[#allocation2 + $0x570] sm:$0xf0]  ;;  %v8434_v49 = vld [vmem:[#allocation2 + $0xb0] sm:$0xf]  ;;  %v9011_v40 = vor.u32 %v12026_v9, %v9010_v5  ;;  %v2274_v20 = vpop.f32.mrf.mxu1  ;;  %v8439_v5 = vor.u32 %v11874_v60, %v8436_v34  ;;  %v2287_v15 = vpop.f32.mrf.mxu2  ;;  %v12099_v60 = vld [vmem:[#allocation2 + $0x7bc] sm:$0xf] }
 0x3a9   :  { %v12010_v33 = vld [vmem:[#allocation2 + $0x4ec] sm:$0xf0]  ;;  %v9015_v32 = vor.u32 %v12018_v50, %v9012_v17  ;;  %v8435_v55 = vor.u32 %v11882_v21, %v8434_v49  ;;  %v8372_v50 = vld [vmem:[#allocation2 + $0x70] sm:$0xf0]  ;;  %v12107_v21 = vld [vmem:[#allocation2 + $0x7f4] sm:$0xf0] }
 0x3aa   :  { %2513 = vmatpush.bf16.msra.mxu0 %v9139_v0  ;;  %2539 = vmatpush.bf16.msra.mxu2 %v9143_v38  ;;  %v8499_v0 = vor.u32 %v11898_v13, %v8498_v45  ;;  %v8503_v38 = vor.u32 %v11890_v29, %v8500_v53  ;;  %v12002_v45 = vld [vmem:[#allocation2 + $0x4b4] sm:$0xf]  ;;  %v8370_v30 = vld [vmem:[#allocation2 + $0x30] sm:$0xf]  ;;  %v9340_v34 = vld [vmem:[#allocation2 + $0x7f8] sm:$0xf0] }
 0x3ab   :  { %v8948_v13 = vld [vmem:[#allocation2 + $0x4f0] sm:$0xf0]  ;;  %v8882_v9 = vld [vmem:[#allocation2 + $0x430] sm:$0xf]  ;;  %v8762_v15 = vld [vmem:[#allocation2 + $0x338] sm:$0xf] }
 0x3ac   :  { %2501 = vmatpush.bf16.msrb.mxu3 %v8563_v19  ;;  %2527 = vmatpush.bf16.msra.mxu1 %v8567_v22  ;;  %v8947_v22 = vor.u32 %v12010_v33, %v8946_v43  ;;  %v11994_v29 = vld [vmem:[#allocation2 + $0x46c] sm:$0xf0]  ;;  %v11858_v53 = vld [vmem:[#allocation2 + $0x34] sm:$0xf]  ;;  %v11979_v19 = vld [vmem:[#allocation2 + $0x3f4] sm:$0xf0] }
 0x3ad   :  { %v11986_v17 = vld [vmem:[#allocation2 + $0x434] sm:$0xf]  ;;  %v8883_v43 = vor.u32 %v11994_v29, %v8882_v9  ;;  %v8375_v33 = vor.u32 %v11858_v53, %v8372_v50  ;;  %v8763_v9 = vor.u32 %v11963_v57, %v8762_v15  ;;  %v8698_v29 = vld [vmem:[#allocation2 + $0x2b8] sm:$0xf] }
 0x3ae   :  { %2514 = vmatpush.bf16.msra.mxu0 %v9075_v46  ;;  %2540 = vmatpush.bf16.msra.mxu2 %v9079_v7  ;;  %v11866_v46 = vld [vmem:[#allocation2 + $0x6c] sm:$0xf0]  ;;  %v8951_v7 = vor.u32 %v12002_v45, %v8948_v13  ;;  %v8884_v20 = vld [vmem:[#allocation2 + $0x470] sm:$0xf0]  ;;  %v8827_v45 = vor.u32 %v11979_v19, %v8826_v62  ;;  %v11947_v53 = vld [vmem:[#allocation2 + $0x2f4] sm:$0xf0] }
 0x3af   :  { %v8371_v49 = vor.u32 %v11866_v46, %v8370_v30  ;;  %v12091_v30 = vld [vmem:[#allocation2 + $0x774] sm:$0xf0]  ;;  %v11955_v46 = vld [vmem:[#allocation2 + $0x33c] sm:$0xf]  ;;  %v8699_v57 = vor.u32 %v11947_v53, %v8698_v29 }
 0x3b0   :  { %2502 = vmatpush.bf16.msrb.mxu3 %v8499_v0  ;;  %2528 = vmatpush.bf16.msra.mxu1 %v8503_v38  ;;  %v9338_v0 = vld [vmem:[#allocation2 + $0x7b8] sm:$0xf]  ;;  %v8828_v38 = vld [vmem:[#allocation2 + $0x3f8] sm:$0xf0]  ;;  %v9275_v62 = vor.u32 %v12091_v30, %v9274_v8  ;;  %v8767_v19 = vor.u32 %v11955_v46, %v8764_v42 }
 0x3b1   :  { %v9339_v13 = vor.u32 %v12107_v21, %v9338_v0  ;;  %v8700_v0 = vld [vmem:[#allocation2 + $0x2f8] sm:$0xf0] }
 0x3b2   :  { %2515 = vmatpush.bf16.msra.mxu0 %v9011_v40  ;;  %2541 = vmatpush.bf16.msra.mxu2 %v9015_v32  ;;  %v11971_v40 = vld [vmem:[#allocation2 + $0x3bc] sm:$0xf]  ;;  %v8887_v32 = vor.u32 %v11986_v17, %v8884_v20  ;;  %v12075_v17 = vld [vmem:[#allocation2 + $0x6f4] sm:$0xf0] }
 0x3b3   :  { %v8831_v10 = vor.u32 %v11971_v40, %v8828_v38  ;;  %v11939_v20 = vld [vmem:[#allocation2 + $0x2bc] sm:$0xf]  ;;  %v8634_v40 = vld [vmem:[#allocation2 + $0x238] sm:$0xf] }
 0x3b4   :  { %2503 = vmatpush.bf16.msrb.mxu3 %v8435_v55  ;;  %2529 = vmatpush.bf16.msra.mxu1 %v8439_v5  ;;  %v9343_v55 = vor.u32 %v12099_v60, %v9340_v34  ;;  %v9276_v5 = vld [vmem:[#allocation2 + $0x778] sm:$0xf0]  ;;  %v8703_v8 = vor.u32 %v11939_v20, %v8700_v0  ;;  %v11931_v38 = vld [vmem:[#allocation2 + $0x274] sm:$0xf0] }
 0x3b5   :  { %v9212_v21 = vld [vmem:[#allocation2 + $0x6f8] sm:$0xf0]  ;;  %v12059_v60 = vld [vmem:[#allocation2 + $0x674] sm:$0xf0]  ;;  %v8635_v15 = vor.u32 %v11931_v38, %v8634_v40 }
 0x3b6   :  { %2516 = vmatpush.bf16.msra.mxu0 %v8947_v22  ;;  %2542 = vmatpush.bf16.msra.mxu2 %v8951_v7  ;;  %v12083_v22 = vld [vmem:[#allocation2 + $0x73c] sm:$0xf]  ;;  %v9210_v7 = vld [vmem:[#allocation2 + $0x6b8] sm:$0xf] }
 0x3b7   :  { %v9279_v50 = vor.u32 %v12083_v22, %v9276_v5  ;;  %v9211_v42 = vor.u32 %v12075_v17, %v9210_v7  ;;  %v11923_v34 = vld [vmem:[#allocation2 + $0x23c] sm:$0xf]  ;;  %v11915_v5 = vld [vmem:[#allocation2 + $0x1f4] sm:$0xf0] }
 0x3b8   :  { %2504 = vmatpush.bf16.msrb.mxu3 %v8371_v49  ;;  %2530 = vmatpush.bf16.msra.mxu1 %v8375_v33  ;;  %v12067_v49 = vld [vmem:[#allocation2 + $0x6bc] sm:$0xf]  ;;  %v9018_v40 = vld [vmem:[#allocation2 + $0x538] sm:$0xf] }
 0x3b9   :  { %v9215_v33 = vor.u32 %v12067_v49, %v9212_v21  ;;  %v11907_v53 = vld [vmem:[#allocation2 + $0x1bc] sm:$0xf] }
 0x3ba   :  { %2517 = vmatpush.bf16.msra.mxu0 %v8883_v43  ;;  %2543 = vmatpush.bf16.msra.mxu2 %v8887_v32  ;;  %v9146_v43 = vld [vmem:[#allocation2 + $0x638] sm:$0xf]  ;;  %v8636_v32 = vld [vmem:[#allocation2 + $0x278] sm:$0xf0]  ;;  %v2311_v30 = vpop.f32.mrf.mxu0 }
 0x3bb   :  { %2505 = vmatmul.bf16.vlgmr.msrb.gmra.mxu3 %v13066_v1  ;;  %2531 = vmatmul.bf16.vlgmr.msra.gmra.mxu1 %v13066_v1  ;;  %v9147_v46 = vor.u32 %v12059_v60, %v9146_v43  ;;  %v8639_v22 = vor.u32 %v11923_v34, %v8636_v32  ;;  %v8572_v7 = vld [vmem:[#allocation2 + $0x1f8] sm:$0xf0] }
 0x3bc   :  { %2549 = vmatpush.bf16.msra.mxu3 %v8827_v45  ;;  %2575 = vmatpush.bf16.msrb.mxu1 %v8831_v10  ;;  %v12051_v45 = vld [vmem:[#allocation2 + $0x63c] sm:$0xf]  ;;  %v14690_v10 = vperm.slane %v12924_v2, 5 }
 0x3bd   :  { %2544 = vmatmul.bf16.vlgmr.msra.gmra.mxu2 %v13070_v41  ;;  %2518 = vmatmul.bf16.vlgmr.msra.gmra.mxu0 %v13070_v41  ;;  %v12035_v17 = vld [vmem:[#allocation2 + $0x5bc] sm:$0xf] }
 0x3be   :  { %2562 = vmatpush.bf16.msrb.mxu0 %v9339_v13  ;;  %2588 = vmatpush.bf16.msrb.mxu2 %v9343_v55  ;;  %v9148_v13 = vld [vmem:[#allocation2 + $0x678] sm:$0xf0]  ;;  %v8570_v55 = vld [vmem:[#allocation2 + $0x1b8] sm:$0xf]  ;;  %v2298_v38 = vpop.f32.mrf.mxu3 }
 0x3bf   :  { %v9151_v29 = vor.u32 %v12051_v45, %v9148_v13  ;;  %v9084_v20 = vld [vmem:[#allocation2 + $0x5f8] sm:$0xf0]  ;;  %v8571_v49 = vor.u32 %v11915_v5, %v8570_v55  ;;  %v11883_v5 = vld [vmem:[#allocation2 + $0xf4] sm:$0xf0] }
 0x3c0   :  { %2550 = vmatpush.bf16.msra.mxu3 %v8763_v9  ;;  %2576 = vmatpush.bf16.msrb.mxu1 %v8767_v19  ;;  %v9082_v9 = vld [vmem:[#allocation2 + $0x5b8] sm:$0xf]  ;;  %v2324_v19 = vpop.f32.mrf.mxu1  ;;  %v9087_v43 = vor.u32 %v12035_v17, %v9084_v20  ;;  %v11891_v60 = vld [vmem:[#allocation2 + $0x13c] sm:$0xf]  ;;  %v2337_v45 = vpop.f32.mrf.mxu2 }
 0x3c1   :  { %v2325_v0 = vadd.f32 %v2324_v19, %v14690_v10  ;;  %v8508_v34 = vld [vmem:[#allocation2 + $0x178] sm:$0xf0] }
 0x3c2   :  { %2563 = vmatpush.bf16.msrb.mxu0 %v9275_v62  ;;  %2589 = vmatpush.bf16.msrb.mxu2 %v9279_v50  ;;  %v12043_v62 = vld [vmem:[#allocation2 + $0x5f4] sm:$0xf0]  ;;  %v14689_v50 = vperm.slane %v12924_v2, 4  ;;  %v12019_v13 = vld [vmem:[#allocation2 + $0x53c] sm:$0xf] }
 0x3c3   :  { %v9083_v21 = vor.u32 %v12043_v62, %v9082_v9  ;;  %v13130_v55 = vadd.f32 %v2337_v45, %v2325_v0  ;;  %v2313_v62 = vpop.f32.mrf.mxu0  ;;  %v11875_v0 = vld [vmem:[#allocation2 + $0xbc] sm:$0xf] }
 0x3c4   :  { %2551 = vmatpush.bf16.msra.mxu3 %v8699_v57  ;;  %2577 = vmatpush.bf16.msrb.mxu1 %v8703_v8  ;;  %v8575_v57 = vor.u32 %v11907_v53, %v8572_v7  ;;  %v11899_v8 = vld [vmem:[#allocation2 + $0x174] sm:$0xf0]  ;;  %v2299_v32 = vadd.f32 %v2298_v38, %v14689_v50  ;;  %v8444_v45 = vld [vmem:[#allocation2 + $0xf8] sm:$0xf0] }
 0x3c5   :  { %v8954_v53 = vld [vmem:[#allocation2 + $0x4b8] sm:$0xf]  ;;  %v8892_v50 = vld [vmem:[#allocation2 + $0x478] sm:$0xf0] }
 0x3c6   :  { %2564 = vmatpush.bf16.msrb.mxu0 %v9211_v42  ;;  %2590 = vmatpush.bf16.msrb.mxu2 %v9215_v33  ;;  %v8506_v42 = vld [vmem:[#allocation2 + $0x138] sm:$0xf]  ;;  %v13132_v9 = vadd.f32 %v2311_v30, %v2299_v32 }
 0x3c7   :  { %v12027_v33 = vld [vmem:[#allocation2 + $0x574] sm:$0xf0] }
 0x3c8   :  { %2552 = vmatpush.bf16.msra.mxu3 %v8635_v15  ;;  %2578 = vmatpush.bf16.msrb.mxu1 %v8639_v22  ;;  %v9020_v15 = vld [vmem:[#allocation2 + $0x578] sm:$0xf0]  ;;  %v8442_v22 = vld [vmem:[#allocation2 + $0xb8] sm:$0xf]  ;;  %v9019_v19 = vor.u32 %v12027_v33, %v9018_v40  ;;  %v2326_v20 = vpop.f32.mrf.mxu1  ;;  %v2339_v62 = vpop.f32.mrf.mxu2 }
 0x3c9   :  { %v12011_v7 = vld [vmem:[#allocation2 + $0x4f4] sm:$0xf0]  ;;  %v9023_v38 = vor.u32 %v12019_v13, %v9020_v15  ;;  %v8443_v30 = vor.u32 %v11883_v5, %v8442_v22  ;;  %v11859_v13 = vld [vmem:[#allocation2 + $0x3c] sm:$0xf] }
 0x3ca   :  { %2565 = vmatpush.bf16.msrb.mxu0 %v9147_v46  ;;  %2591 = vmatpush.bf16.msrb.mxu2 %v9151_v29  ;;  %v8507_v46 = vor.u32 %v11899_v8, %v8506_v42  ;;  %v8511_v29 = vor.u32 %v11891_v60, %v8508_v34  ;;  %v12003_v42 = vld [vmem:[#allocation2 + $0x4bc] sm:$0xf]  ;;  %v8378_v40 = vld [vmem:[#allocation2 + $0x38] sm:$0xf]  ;;  %v2300_v34 = vpop.f32.mrf.mxu3 }
 0x3cb   :  { %v8956_v8 = vld [vmem:[#allocation2 + $0x4f8] sm:$0xf0]  ;;  %v11867_v33 = vld [vmem:[#allocation2 + $0x74] sm:$0xf0]  ;;  %v14694_v34 = vperm.slane %v12926_v3, 0 }
 0x3cc   :  { %2553 = vmatpush.bf16.msra.mxu3 %v8571_v49  ;;  %2579 = vmatpush.bf16.msrb.mxu1 %v8575_v57  ;;  %v8447_v57 = vor.u32 %v11875_v0, %v8444_v45  ;;  %v8890_v60 = vld [vmem:[#allocation2 + $0x438] sm:$0xf]  ;;  %v8959_v32 = vor.u32 %v12003_v42, %v8956_v8  ;;  %v8380_v15 = vld [vmem:[#allocation2 + $0x78] sm:$0xf0]  ;;  %v8379_v10 = vor.u32 %v11867_v33, %v8378_v40  ;;  %v14692_v40 = vperm.slane %v12926_v3, 1 }
 0x3cd   :  { %v11987_v20 = vld [vmem:[#allocation2 + $0x43c] sm:$0xf]  ;;  %v8383_v22 = vor.u32 %v11859_v13, %v8380_v15 }
 0x3ce   :  { %2566 = vmatpush.bf16.msrb.mxu0 %v9083_v21  ;;  %2592 = vmatpush.bf16.msrb.mxu2 %v9087_v43  ;;  %v8955_v21 = vor.u32 %v12011_v7, %v8954_v53  ;;  %v11995_v43 = vld [vmem:[#allocation2 + $0x474] sm:$0xf0]  ;;  %v8895_v5 = vor.u32 %v11987_v20, %v8892_v50  ;;  %v14696_v7 = vperm.slane %v12924_v2, 6 }
 0x3d0   :  { %2554 = vmatpush.bf16.msra.mxu3 %v8507_v46  ;;  %2580 = vmatpush.bf16.msrb.mxu1 %v8511_v29  ;;  %v8891_v46 = vor.u32 %v11995_v43, %v8890_v60 }
 0x3d2   :  { %2567 = vmatpush.bf16.msrb.mxu0 %v9019_v19  ;;  %2593 = vmatpush.bf16.msrb.mxu2 %v9023_v38  ;;  %v14695_v19 = vperm.slane %v12924_v2, 7 }
 0x3d4   :  { %2555 = vmatpush.bf16.msra.mxu3 %v8443_v30  ;;  %2581 = vmatpush.bf16.msrb.mxu1 %v8447_v57 }
 0x3d6   :  { %2568 = vmatpush.bf16.msrb.mxu0 %v8955_v21  ;;  %2594 = vmatpush.bf16.msrb.mxu2 %v8959_v32 }
 0x3d8   :  { %2556 = vmatpush.bf16.msra.mxu3 %v8379_v10  ;;  %2582 = vmatpush.bf16.msrb.mxu1 %v8383_v22  ;;  %v2376_v53 = vpop.f32.mrf.mxu1 }
 0x3d9   :  { %v2377_v10 = vadd.f32 %v2376_v53, %v14695_v19 }
 0x3da   :  { %2569 = vmatpush.bf16.msrb.mxu0 %v8891_v46  ;;  %2595 = vmatpush.bf16.msrb.mxu2 %v8895_v5  ;;  %v2363_v29 = vpop.f32.mrf.mxu0 }
 0x3db   :  { %2557 = vmatmul.bf16.vlgmr.msra.gmra.mxu3 %v13066_v1  ;;  %2583 = vmatmul.bf16.vlgmr.msrb.gmra.mxu1 %v13066_v1 }
 0x3dd   :  { %2570 = vmatmul.bf16.vlgmr.msrb.gmra.mxu0 %v13070_v41  ;;  %2596 = vmatmul.bf16.vlgmr.msrb.gmra.mxu2 %v13070_v41 }
 0x3de   :  { %v2350_v50 = vpop.f32.mrf.mxu3 }
 0x3df   :  { %v2351_v38 = vadd.f32 %v2350_v50, %v14696_v7  ;;  %v14691_v50 = vperm.slane %v12926_v3, 3 }
 0x3e0   :  { %v2389_v0 = vpop.f32.mrf.mxu2  ;;  %v2378_v8 = vpop.f32.mrf.mxu1 }
 0x3e1   :  { %v13146_v45 = vadd.f32 %v2389_v0, %v2377_v10  ;;  %v13148_v42 = vadd.f32 %v2363_v29, %v2351_v38 }
 0x3e2   :  { %v2365_v1 = vpop.f32.mrf.mxu0 }
 0x3e3   :  { %v14693_v1 = vperm.slane %v12926_v3, 2 }
 0x3e6   :  { %v2352_v21 = vpop.f32.mrf.mxu3 }
 0x3e8   :  { %v2391_v57 = vpop.f32.mrf.mxu2 }
 0x3f8   :  { %v2428_v60 = vpop.f32.mrf.mxu1 }
 0x3f9   :  { %v2429_v32 = vadd.f32 %v2428_v60, %v14692_v40  ;;  %v14698_v40 = vperm.slane %v12926_v3, 4 }
 0x3fa   :  { %v2415_v33 = vpop.f32.mrf.mxu0 }
 0x3fe   :  { %v2402_v43 = vpop.f32.mrf.mxu3 }
 0x3ff   :  { %v2403_v13 = vadd.f32 %v2402_v43, %v14694_v34 }
 0x400   :  { %v2441_v15 = vpop.f32.mrf.mxu2  ;;  %v2430_v5 = vpop.f32.mrf.mxu1 }
 0x401   :  { %v13158_v62 = vadd.f32 %v2441_v15, %v2429_v32  ;;  %v13160_v20 = vadd.f32 %v2415_v33, %v2403_v13 }
 0x402   :  { %v2417_v46 = vpop.f32.mrf.mxu0 }
 0x403   :  { %v14700_v46 = vperm.slane %v12926_v3, 6 }
 0x406   :  { %v2404_v53 = vpop.f32.mrf.mxu3 }
 0x408   :  { %v2443_v10 = vpop.f32.mrf.mxu2 }
 0x409   :  { %v14697_v10 = vperm.slane %v12926_v3, 5 }
 0x418   :  { %v2480_v0 = vpop.f32.mrf.mxu1 }
 0x419   :  { %v2481_v8 = vadd.f32 %v2480_v0, %v14691_v50 }
 0x41a   :  { %v2467_v38 = vpop.f32.mrf.mxu0 }
 0x41e   :  { %v2454_v21 = vpop.f32.mrf.mxu3 }
 0x41f   :  { %v2455_v57 = vadd.f32 %v2454_v21, %v14693_v1 }
 0x420   :  { %v2493_v33 = vpop.f32.mrf.mxu2  ;;  %v2482_v15 = vpop.f32.mrf.mxu1 }
 0x421   :  { %v13170_v60 = vadd.f32 %v2493_v33, %v2481_v8  ;;  %v13172_v32 = vadd.f32 %v2467_v38, %v2455_v57 }
 0x422   :  { %v2469_v43 = vpop.f32.mrf.mxu0 }
 0x426   :  { %v2456_v5 = vpop.f32.mrf.mxu3 }
 0x428   :  { %v2495_v53 = vpop.f32.mrf.mxu2 }
 0x438   :  { %v2532_v50 = vpop.f32.mrf.mxu1 }
 0x439   :  { %v2533_v8 = vadd.f32 %v2532_v50, %v14697_v10  ;;  %v14699_v50 = vperm.slane %v12926_v3, 7 }
 0x43a   :  { %v2519_v0 = vpop.f32.mrf.mxu0 }
 0x43e   :  { %v2506_v21 = vpop.f32.mrf.mxu3 }
 0x43f   :  { %v2507_v38 = vadd.f32 %v2506_v21, %v14698_v40 }
 0x440   :  { %v2545_v57 = vpop.f32.mrf.mxu2  ;;  %v2534_v53 = vpop.f32.mrf.mxu1 }
 0x441   :  { %v13182_v33 = vadd.f32 %v2545_v57, %v2533_v8  ;;  %v13184_v43 = vadd.f32 %v2519_v0, %v2507_v38 }
 0x442   :  { %v2521_v15 = vpop.f32.mrf.mxu0 }
 0x446   :  { %v2508_v34 = vpop.f32.mrf.mxu3 }
 0x448   :  { %v2547_v19 = vpop.f32.mrf.mxu2 }
 0x458   :  { %v2584_v10 = vpop.f32.mrf.mxu1 }
 0x459   :  { %v2585_v8 = vadd.f32 %v2584_v10, %v14699_v50 }
 0x45a   :  { %v2571_v7 = vpop.f32.mrf.mxu0 }
 0x45e   :  { %v2558_v21 = vpop.f32.mrf.mxu3 }
 0x45f   :  { %v2559_v0 = vadd.f32 %v2558_v21, %v14700_v46 }
 0x460   :  { %v2597_v38 = vpop.f32.mrf.mxu2  ;;  %v2586_v19 = vpop.f32.mrf.mxu1 }
 0x461   :  { %v13194_v57 = vadd.f32 %v2571_v7, %v2559_v0  ;;  %v13196_v15 = vadd.f32 %v2597_v38, %v2585_v8 }
 0x462   :  { %v2573_v34 = vpop.f32.mrf.mxu0 }
 0x466   :  { %v2560_v5 = vpop.f32.mrf.mxu3 }
 0x468   :  { %v2599_v1 = vpop.f32.mrf.mxu2 }
 0x469   :  { %12870 = dma.done.wait [#allocation4 + $0x1], 32768 }
 0x46a   :  { %12871 = vsyncadd [#allocation4 + $0x1], 4294934528  ;;  %v9402_v10 = vld [vmem:[#allocation3 + $0x70] sm:$0xf]  ;;  %v12123_v50 = vld [vmem:[#allocation3 + $0x74] sm:$0xf0] }
 0x46b   :  { %v9466_v22 = vld [vmem:[#allocation3 + $0xf0] sm:$0xf]  ;;  %v13200_v13 = vor.u32 %v12123_v50, %v9402_v10  ;;  %v12139_v21 = vld [vmem:[#allocation3 + $0xf4] sm:$0xf0]  ;;  %v9394_v46 = vld [vmem:[#allocation3 + $0x60] sm:$0xf] }
 0x46c   :  { %v9594_v7 = vld [vmem:[#allocation3 + $0x1f0] sm:$0xf]  ;;  %v12171_v0 = vld [vmem:[#allocation3 + $0x1f4] sm:$0xf0]  ;;  %v13202_v8 = vor.u32 %v12139_v21, %v9466_v22  ;;  %v12121_v5 = vld [vmem:[#allocation3 + $0x64] sm:$0xf0] }
 0x46d   :  { %14971 = vst [vmem:[#allocation41_spill] sm:$0xff] %v13200_v13  ;;  %v13204_v38 = vor.u32 %v12171_v0, %v9594_v7  ;;  %v9530_v34 = vld [vmem:[#allocation3 + $0x170] sm:$0xf]  ;;  %v12155_v19 = vld [vmem:[#allocation3 + $0x174] sm:$0xf0]  ;;  %4178 = vmatpush.bf16.msrb.mxu3 %v13200_v13  ;;  %v13211_v50 = vor.u32 %v12121_v5, %v9394_v46  ;;  %vm7843_vm14 = vcmask 261120  }
 0x46e   :  { %14972 = vst [vmem:[#allocation42_spill] sm:$0xff] %v13202_v8  ;;  %v13207_v1 = vor.u32 %v12155_v19, %v9530_v34  ;;  %v9458_v53 = vld [vmem:[#allocation3 + $0xe0] sm:$0xf]  ;;  %v12137_v40 = vld [vmem:[#allocation3 + $0xe4] sm:$0xf0]  ;;  %4191 = vmatpush.bf16.msra.mxu0 %v13202_v8  ;;  %vm7860_vm15 = vcmask 64512  }
 0x46f   :  { %14973 = vst [vmem:[#allocation43_spill] sm:$0xff] %v13204_v38  ;;  %4217 = vmatpush.bf16.msra.mxu2 %v13204_v38  ;;  %v13213_v22 = vor.u32 %v12137_v40, %v9458_v53  ;;  %v9586_v10 = vld [vmem:[#allocation3 + $0x1e0] sm:$0xf]  ;;  %v12169_v21 = vld [vmem:[#allocation3 + $0x1e4] sm:$0xf0] }
 0x470   :  { %14974 = vst [vmem:[#allocation44_spill] sm:$0xff] %v13207_v1  ;;  %v9522_v7 = vld [vmem:[#allocation3 + $0x160] sm:$0xf]  ;;  %4204 = vmatpush.bf16.msra.mxu1 %v13207_v1  ;;  %v13216_v0 = vor.u32 %v12169_v21, %v9586_v10  ;;  %v12153_v34 = vld [vmem:[#allocation3 + $0x164] sm:$0xf0] }
 0x471   :  { %14975 = vst [vmem:[#allocation45_spill] sm:$0xff] %v13211_v50  ;;  %v9386_v19 = vld [vmem:[#allocation3 + $0x50] sm:$0xf]  ;;  %v12119_v29 = vld [vmem:[#allocation3 + $0x54] sm:$0xf0]  ;;  %v13218_v30 = vor.u32 %v12153_v34, %v9522_v7  ;;  %4179 = vmatpush.bf16.msrb.mxu3 %v13211_v50 }
 0x472   :  { %14976 = vst [vmem:[#allocation46_spill] sm:$0xff] %v13213_v22  ;;  %v9450_v17 = vld [vmem:[#allocation3 + $0xd0] sm:$0xf]  ;;  %v12135_v41 = vld [vmem:[#allocation3 + $0xd4] sm:$0xf0]  ;;  %v13221_v46 = vor.u32 %v12119_v29, %v9386_v19  ;;  %4192 = vmatpush.bf16.msra.mxu0 %v13213_v22 }
 0x473   :  { %14977 = vst [vmem:[#allocation47_spill] sm:$0xff] %v13216_v0  ;;  %v9578_v49 = vld [vmem:[#allocation3 + $0x1d0] sm:$0xf]  ;;  %v12167_v40 = vld [vmem:[#allocation3 + $0x1d4] sm:$0xf0]  ;;  %4218 = vmatpush.bf16.msra.mxu2 %v13216_v0  ;;  %v13225_v10 = vor.u32 %v12135_v41, %v9450_v17 }
 0x474   :  { %14978 = vst [vmem:[#allocation48_spill] sm:$0xff] %v13218_v30  ;;  %v9514_v53 = vld [vmem:[#allocation3 + $0x150] sm:$0xf]  ;;  %v12151_v5 = vld [vmem:[#allocation3 + $0x154] sm:$0xf0]  ;;  %v13227_v21 = vor.u32 %v12167_v40, %v9578_v49  ;;  %4205 = vmatpush.bf16.msra.mxu1 %v13218_v30 }
 0x475   :  { %14979 = vst [vmem:[#allocation49_spill] sm:$0xff] %v13221_v46  ;;  %v9378_v7 = vld [vmem:[#allocation3 + $0x40] sm:$0xf]  ;;  %v12117_v34 = vld [vmem:[#allocation3 + $0x44] sm:$0xf0]  ;;  %v13230_v38 = vor.u32 %v12151_v5, %v9514_v53  ;;  %4180 = vmatpush.bf16.msrb.mxu3 %v13221_v46 }
 0x476   :  { %14980 = vst [vmem:[#allocation50_spill] sm:$0xff] %v13225_v10  ;;  %v9442_v3 = vld [vmem:[#allocation3 + $0xc0] sm:$0xf]  ;;  %v12133_v29 = vld [vmem:[#allocation3 + $0xc4] sm:$0xf0]  ;;  %v13233_v22 = vor.u32 %v12117_v34, %v9378_v7  ;;  %4193 = vmatpush.bf16.msra.mxu0 %v13225_v10 }
 0x477   :  { %14981 = vst [vmem:[#allocation51_spill] sm:$0xff] %v13227_v21  ;;  %v9570_v19 = vld [vmem:[#allocation3 + $0x1c0] sm:$0xf]  ;;  %v12165_v50 = vld [vmem:[#allocation3 + $0x1c4] sm:$0xf0]  ;;  %4219 = vmatpush.bf16.msra.mxu2 %v13227_v21  ;;  %v13237_v17 = vor.u32 %v12133_v29, %v9442_v3 }
 0x478   :  { %14982 = vst [vmem:[#allocation52_spill] sm:$0xff] %v13230_v38  ;;  %v9506_v1 = vld [vmem:[#allocation3 + $0x140] sm:$0xf]  ;;  %v12149_v8 = vld [vmem:[#allocation3 + $0x144] sm:$0xf0]  ;;  %v13239_v49 = vor.u32 %v12165_v50, %v9570_v19  ;;  %4206 = vmatpush.bf16.msra.mxu1 %v13230_v38 }
 0x479   :  { %14983 = vst [vmem:[#allocation53_spill] sm:$0xff] %v13233_v22  ;;  %v9370_v41 = vld [vmem:[#allocation3 + $0x30] sm:$0xf]  ;;  %v12115_v40 = vld [vmem:[#allocation3 + $0x34] sm:$0xf0]  ;;  %v13242_v5 = vor.u32 %v12149_v8, %v9506_v1  ;;  %4181 = vmatpush.bf16.msrb.mxu3 %v13233_v22 }
 0x47a   :  { %14984 = vst [vmem:[#allocation54_spill] sm:$0xff] %v13237_v17  ;;  %v9434_v53 = vld [vmem:[#allocation3 + $0xb0] sm:$0xf]  ;;  %v12131_v0 = vld [vmem:[#allocation3 + $0xb4] sm:$0xf0]  ;;  %v13245_v10 = vor.u32 %v12115_v40, %v9370_v41  ;;  %4194 = vmatpush.bf16.msra.mxu0 %v13237_v17 }
 0x47b   :  { %14985 = vst [vmem:[#allocation55_spill] sm:$0xff] %v13239_v49  ;;  %v9562_v30 = vld [vmem:[#allocation3 + $0x1b0] sm:$0xf]  ;;  %v12163_v46 = vld [vmem:[#allocation3 + $0x1b4] sm:$0xf0]  ;;  %4220 = vmatpush.bf16.msra.mxu2 %v13239_v49  ;;  %v13249_v3 = vor.u32 %v12131_v0, %v9434_v53 }
 0x47c   :  { %14986 = vst [vmem:[#allocation56_spill] sm:$0xff] %v13242_v5  ;;  %v9498_v7 = vld [vmem:[#allocation3 + $0x130] sm:$0xf]  ;;  %v12147_v34 = vld [vmem:[#allocation3 + $0x134] sm:$0xf0]  ;;  %v13251_v50 = vor.u32 %v12163_v46, %v9562_v30  ;;  %4207 = vmatpush.bf16.msra.mxu1 %v13242_v5 }
 0x47d   :  { %14987 = vst [vmem:[#allocation57_spill] sm:$0xff] %v13245_v10  ;;  %v9362_v29 = vld [vmem:[#allocation3 + $0x20] sm:$0xf]  ;;  %v12113_v8 = vld [vmem:[#allocation3 + $0x24] sm:$0xf0]  ;;  %v13254_v19 = vor.u32 %v12147_v34, %v9498_v7  ;;  %4182 = vmatpush.bf16.msrb.mxu3 %v13245_v10 }
 0x47e   :  { %14988 = vst [vmem:[#allocation58_spill] sm:$0xff] %v13249_v3  ;;  %v9426_v1 = vld [vmem:[#allocation3 + $0xa0] sm:$0xf]  ;;  %v12129_v21 = vld [vmem:[#allocation3 + $0xa4] sm:$0xf0]  ;;  %v13257_v17 = vor.u32 %v12113_v8, %v9362_v29  ;;  %4195 = vmatpush.bf16.msra.mxu0 %v13249_v3 }
 0x47f   :  { %14989 = vst [vmem:[#allocation59_spill] sm:$0xff] %v13251_v50  ;;  %v9554_v38 = vld [vmem:[#allocation3 + $0x1a0] sm:$0xf]  ;;  %v12161_v22 = vld [vmem:[#allocation3 + $0x1a4] sm:$0xf0]  ;;  %4221 = vmatpush.bf16.msra.mxu2 %v13251_v50  ;;  %v13261_v30 = vor.u32 %v12129_v21, %v9426_v1 }
 0x480   :  { %14990 = vst [vmem:[#allocation60_spill] sm:$0xff] %v13254_v19  ;;  %v9490_v41 = vld [vmem:[#allocation3 + $0x120] sm:$0xf]  ;;  %v12145_v40 = vld [vmem:[#allocation3 + $0x124] sm:$0xf0]  ;;  %v13263_v0 = vor.u32 %v12161_v22, %v9554_v38  ;;  %4208 = vmatpush.bf16.msra.mxu1 %v13254_v19 }
 0x481   :  { %14991 = vst [vmem:[#allocation61_spill] sm:$0xff] %v13257_v17  ;;  %v9354_v46 = vld [vmem:[#allocation3 + $0x10] sm:$0xf]  ;;  %v12111_v53 = vld [vmem:[#allocation3 + $0x14] sm:$0xf0]  ;;  %v13266_v34 = vor.u32 %v12145_v40, %v9490_v41  ;;  %4183 = vmatpush.bf16.msrb.mxu3 %v13257_v17 }
 0x482   :  { %14992 = vst [vmem:[#allocation62_spill] sm:$0xff] %v13261_v30  ;;  %v9418_v7 = vld [vmem:[#allocation3 + $0x90] sm:$0xf]  ;;  %v12127_v49 = vld [vmem:[#allocation3 + $0x94] sm:$0xf0]  ;;  %v13269_v3 = vor.u32 %v12111_v53, %v9354_v46  ;;  %4196 = vmatpush.bf16.msra.mxu0 %v13261_v30 }
 0x483   :  { %14993 = vst [vmem:[#allocation63_spill] sm:$0xff] %v13263_v0  ;;  %v9546_v5 = vld [vmem:[#allocation3 + $0x190] sm:$0xf]  ;;  %v12159_v10 = vld [vmem:[#allocation3 + $0x194] sm:$0xf0]  ;;  %4222 = vmatpush.bf16.msra.mxu2 %v13263_v0  ;;  %v13273_v38 = vor.u32 %v12127_v49, %v9418_v7 }
 0x484   :  { %14994 = vst [vmem:[#allocation64_spill] sm:$0xff] %v13266_v34  ;;  %v9482_v29 = vld [vmem:[#allocation3 + $0x110] sm:$0xf]  ;;  %v12143_v8 = vld [vmem:[#allocation3 + $0x114] sm:$0xf0]  ;;  %v13275_v22 = vor.u32 %v12159_v10, %v9546_v5  ;;  %4209 = vmatpush.bf16.msra.mxu1 %v13266_v34 }
 0x485   :  { %14995 = vst [vmem:[#allocation65_spill] sm:$0xff] %v13269_v3  ;;  %v9346_v21 = vld [vmem:[#allocation3] sm:$0xf]  ;;  %v12109_v1 = vld [vmem:[#allocation3 + $0x4] sm:$0xf0]  ;;  %v13278_v19 = vor.u32 %v12143_v8, %v9482_v29  ;;  %4184 = vmatpush.bf16.msrb.mxu3 %v13269_v3 }
 0x486   :  { %14996 = vst [vmem:[#allocation66_spill] sm:$0xff] %v13273_v38  ;;  %v9410_v41 = vld [vmem:[#allocation3 + $0x80] sm:$0xf]  ;;  %v12125_v40 = vld [vmem:[#allocation3 + $0x84] sm:$0xf0]  ;;  %v13281_v0 = vor.u32 %v12109_v1, %v9346_v21  ;;  %4197 = vmatpush.bf16.msra.mxu0 %v13273_v38 }
 0x487   :  { %14997 = vst [vmem:[#allocation67_spill] sm:$0xff] %v13275_v22  ;;  %v9538_v50 = vld [vmem:[#allocation3 + $0x180] sm:$0xf]  ;;  %v12157_v17 = vld [vmem:[#allocation3 + $0x184] sm:$0xf0]  ;;  %4223 = vmatpush.bf16.msra.mxu2 %v13275_v22  ;;  %v13285_v7 = vor.u32 %v12125_v40, %v9410_v41  ;;  %v15007_v40 = vmax.f32 %v13100_v39, 0.0 }
 0x488   :  { %14998 = vst [vmem:[#allocation68_spill] sm:$0xff] %v13278_v19  ;;  %v9658_v46 = vld [vmem:[#allocation3 + $0x270] sm:$0xf]  ;;  %v12187_v53 = vld [vmem:[#allocation3 + $0x274] sm:$0xf0]  ;;  %v13287_v29 = vor.u32 %v12157_v17, %v9538_v50  ;;  %4210 = vmatpush.bf16.msra.mxu1 %v13278_v19 }
 0x489   :  { %v9722_v13 = vld [vmem:[#allocation3 + $0x2f0] sm:$0xf]  ;;  %v12203_v2 = vld [vmem:[#allocation3 + $0x2f4] sm:$0xf0]  ;;  %14999 = vst [vmem:[#allocation69_spill] sm:$0xff] %v13281_v0  ;;  %v13290_v30 = vor.u32 %v12187_v53, %v9658_v46  ;;  %4185 = vmatpush.bf16.msrb.mxu3 %v13281_v0  ;;  %v13304_v46 = vpack.c.bf16 %v15007_v40, %v15007_v40 }
 0x48a   :  { %v9850_v54 = vld [vmem:[#allocation3 + $0x3f0] sm:$0xf]  ;;  %v12235_v49 = vld [vmem:[#allocation3 + $0x3f4] sm:$0xf0]  ;;  %v9474_v10 = vld [vmem:[#allocation3 + $0x100] sm:$0xf]  ;;  %v13292_v3 = vor.u32 %v12203_v2, %v9722_v13  ;;  %4198 = vmatpush.bf16.msra.mxu0 %v13285_v7 }
 0x48b   :  { %v12141_v5 = vld [vmem:[#allocation3 + $0x104] sm:$0xf0]  ;;  %15000 = vst [vmem:[#allocation70_spill] sm:$0xff] %v13285_v7  ;;  %v9786_v8 = vld [vmem:[#allocation3 + $0x370] sm:$0xf]  ;;  %v13294_v1 = vor.u32 %v12235_v49, %v9850_v54  ;;  %4224 = vmatpush.bf16.msra.mxu2 %v13287_v29  ;;  %v15008_v13 = vmax.f32 %v13114_v63, 0.0 }
 0x48c   :  { %15001 = vst [vmem:[#allocation71_spill] sm:$0xff] %v13287_v29  ;;  %v12219_v34 = vld [vmem:[#allocation3 + $0x374] sm:$0xf0]  ;;  %v9650_v21 = vld [vmem:[#allocation3 + $0x260] sm:$0xf]  ;;  %v13296_v28 = vor.u32 %v12141_v5, %v9474_v10  ;;  %4186 = vmatmul.bf16.vlgmr.msrb.gmra.mxu3 %v13304_v46 }
 0x48d   :  { %15002 = vst [vmem:[#allocation72_spill] sm:$0xff] %v13290_v30  ;;  %v12185_v38 = vld [vmem:[#allocation3 + $0x264] sm:$0xf0]  ;;  %v9714_v52 = vld [vmem:[#allocation3 + $0x2e0] sm:$0xf]  ;;  %v13299_v17 = vor.u32 %v12219_v34, %v9786_v8  ;;  %v13311_v53 = vpack.c.bf16 %v15008_v13, %v15008_v13  ;;  %v15009_v34 = vmax.f32 %v13098_v16, 0.0  ;;  %4230 = vmatpush.bf16.msra.mxu3 %v13290_v30 }
 0x48e   :  { %15003 = vst [vmem:[#allocation73_spill] sm:$0xff] %v13292_v3  ;;  %v12201_v22 = vld [vmem:[#allocation3 + $0x2e4] sm:$0xf0]  ;;  %v9842_v50 = vld [vmem:[#allocation3 + $0x3e0] sm:$0xf]  ;;  %4243 = vmatpush.bf16.msrb.mxu0 %v13292_v3  ;;  %v13320_v39 = vor.u32 %v12185_v38, %v9650_v21  ;;  %4211 = vmatpush.bf16.msra.mxu1 %v13296_v28  ;;  %v15013_v13 = vmax.f32 %v13116_v56, 0.0 }
 0x48f   :  { %15004 = vst [vmem:[#allocation74_spill] sm:$0xff] %v13294_v1  ;;  %v12233_v41 = vld [vmem:[#allocation3 + $0x3e4] sm:$0xf0]  ;;  %v9778_v2 = vld [vmem:[#allocation3 + $0x360] sm:$0xf]  ;;  %v13316_v49 = vpack.c.bf16 %v15009_v34, %v15009_v34  ;;  %v13322_v10 = vor.u32 %v12201_v22, %v9714_v52  ;;  %4269 = vmatpush.bf16.msrb.mxu2 %v13294_v1 }
 0x490   :  { %15005 = vst [vmem:[#allocation75_spill] sm:$0xff] %v13296_v28  ;;  %v12217_v54 = vld [vmem:[#allocation3 + $0x364] sm:$0xf0]  ;;  %v9642_v5 = vld [vmem:[#allocation3 + $0x250] sm:$0xf]  ;;  %v13326_v63 = vor.u32 %v12233_v41, %v9842_v50  ;;  %v13331_v34 = vpack.c.bf16 %v15013_v13, %v15013_v13  ;;  %4225 = vmatmul.bf16.vlgmr.msra.gmra.mxu2 %v13311_v53 }
 0x491   :  { %15006 = vst [vmem:[#allocation76_spill] sm:$0xff] %v13299_v17  ;;  %v12183_v8 = vld [vmem:[#allocation3 + $0x254] sm:$0xf0]  ;;  %v9706_v16 = vld [vmem:[#allocation3 + $0x2d0] sm:$0xf]  ;;  %v13334_v38 = vor.u32 %v12217_v54, %v9778_v2  ;;  %4199 = vmatmul.bf16.vlgmr.msra.gmra.mxu0 %v13316_v49  ;;  %4231 = vmatpush.bf16.msra.mxu3 %v13320_v39 }
 0x492   :  { %15010 = vst [vmem:[#allocation77_spill] sm:$0xff] %v13320_v39  ;;  %v12199_v40 = vld [vmem:[#allocation3 + $0x2d4] sm:$0xf0]  ;;  %4256 = vmatpush.bf16.msrb.mxu1 %v13299_v17  ;;  %v9834_v52 = vld [vmem:[#allocation3 + $0x3d0] sm:$0xf]  ;;  %4244 = vmatpush.bf16.msrb.mxu0 %v13322_v10  ;;  %v13341_v56 = vor.u32 %v12183_v8, %v9642_v5 }
 0x493   :  { %15011 = vst [vmem:[#allocation78_spill] sm:$0xff] %v13322_v10  ;;  %v12231_v22 = vld [vmem:[#allocation3 + $0x3d4] sm:$0xf0]  ;;  %v9770_v21 = vld [vmem:[#allocation3 + $0x350] sm:$0xf]  ;;  %v13343_v50 = vor.u32 %v12199_v40, %v9706_v16  ;;  %4270 = vmatpush.bf16.msrb.mxu2 %v13326_v63  ;;  %4212 = vmatmul.bf16.vlgmr.msra.gmra.mxu1 %v13331_v34 }
 0x494   :  { %15012 = vst [vmem:[#allocation79_spill] sm:$0xff] %v13326_v63  ;;  %v12215_v1 = vld [vmem:[#allocation3 + $0x354] sm:$0xf0]  ;;  %v9634_v41 = vld [vmem:[#allocation3 + $0x240] sm:$0xf]  ;;  %v13346_v2 = vor.u32 %v12231_v22, %v9834_v52 }
 0x495   :  { %15014 = vst [vmem:[#allocation80_spill] sm:$0xff] %v13334_v38  ;;  %v12181_v54 = vld [vmem:[#allocation3 + $0x244] sm:$0xf0]  ;;  %v9698_v13 = vld [vmem:[#allocation3 + $0x2c0] sm:$0xf]  ;;  %v13350_v3 = vor.u32 %v12215_v1, %v9770_v21  ;;  %4232 = vmatpush.bf16.msra.mxu3 %v13341_v56 }
 0x496   :  { %15015 = vst [vmem:[#allocation81_spill] sm:$0xff] %v13341_v56  ;;  %v12197_v17 = vld [vmem:[#allocation3 + $0x2c4] sm:$0xf0]  ;;  %4257 = vmatpush.bf16.msrb.mxu1 %v13334_v38  ;;  %v9826_v39 = vld [vmem:[#allocation3 + $0x3c0] sm:$0xf]  ;;  %4245 = vmatpush.bf16.msrb.mxu0 %v13343_v50  ;;  %v13354_v16 = vor.u32 %v12181_v54, %v9634_v41 }
 0x497   :  { %15016 = vst [vmem:[#allocation82_spill] sm:$0xff] %v13343_v50  ;;  %v12229_v10 = vld [vmem:[#allocation3 + $0x3c4] sm:$0xf0]  ;;  %v9762_v5 = vld [vmem:[#allocation3 + $0x340] sm:$0xf]  ;;  %v13356_v40 = vor.u32 %v12197_v17, %v9698_v13  ;;  %4271 = vmatpush.bf16.msrb.mxu2 %v13346_v2 }
 0x498   :  { %15017 = vst [vmem:[#allocation83_spill] sm:$0xff] %v13346_v2  ;;  %v12213_v8 = vld [vmem:[#allocation3 + $0x344] sm:$0xf0]  ;;  %v9626_v52 = vld [vmem:[#allocation3 + $0x230] sm:$0xf]  ;;  %v13359_v22 = vor.u32 %v12229_v10, %v9826_v39 }
 0x499   :  { %15018 = vst [vmem:[#allocation84_spill] sm:$0xff] %v13350_v3  ;;  %v12179_v63 = vld [vmem:[#allocation3 + $0x234] sm:$0xf0]  ;;  %v9690_v1 = vld [vmem:[#allocation3 + $0x2b0] sm:$0xf]  ;;  %v13362_v38 = vor.u32 %v12213_v8, %v9762_v5  ;;  %4233 = vmatpush.bf16.msra.mxu3 %v13354_v16 }
 0x49a   :  { %15019 = vst [vmem:[#allocation85_spill] sm:$0xff] %v13354_v16  ;;  %v12195_v21 = vld [vmem:[#allocation3 + $0x2b4] sm:$0xf0]  ;;  %4258 = vmatpush.bf16.msrb.mxu1 %v13350_v3  ;;  %v9818_v30 = vld [vmem:[#allocation3 + $0x3b0] sm:$0xf]  ;;  %4246 = vmatpush.bf16.msrb.mxu0 %v13356_v40  ;;  %v13366_v17 = vor.u32 %v12179_v63, %v9626_v52 }
 0x49b   :  { %15020 = vst [vmem:[#allocation86_spill] sm:$0xff] %v13356_v40  ;;  %v12227_v56 = vld [vmem:[#allocation3 + $0x3b4] sm:$0xf0]  ;;  %v9754_v29 = vld [vmem:[#allocation3 + $0x330] sm:$0xf]  ;;  %v13368_v41 = vor.u32 %v12195_v21, %v9690_v1  ;;  %4272 = vmatpush.bf16.msrb.mxu2 %v13359_v22 }
 0x49c   :  { %15021 = vst [vmem:[#allocation87_spill] sm:$0xff] %v13359_v22  ;;  %v12211_v50 = vld [vmem:[#allocation3 + $0x334] sm:$0xf0]  ;;  %v9618_v39 = vld [vmem:[#allocation3 + $0x220] sm:$0xf]  ;;  %v13371_v10 = vor.u32 %v12227_v56, %v9818_v30 }
 0x49d   :  { %15022 = vst [vmem:[#allocation88_spill] sm:$0xff] %v13362_v38  ;;  %v12177_v54 = vld [vmem:[#allocation3 + $0x224] sm:$0xf0]  ;;  %v9682_v13 = vld [vmem:[#allocation3 + $0x2a0] sm:$0xf]  ;;  %v13374_v8 = vor.u32 %v12211_v50, %v9754_v29  ;;  %4234 = vmatpush.bf16.msra.mxu3 %v13366_v17 }
 0x49e   :  { %15023 = vst [vmem:[#allocation89_spill] sm:$0xff] %v13366_v17  ;;  %v12193_v5 = vld [vmem:[#allocation3 + $0x2a4] sm:$0xf0]  ;;  %4259 = vmatpush.bf16.msrb.mxu1 %v13362_v38  ;;  %v9810_v2 = vld [vmem:[#allocation3 + $0x3a0] sm:$0xf]  ;;  %4247 = vmatpush.bf16.msrb.mxu0 %v13368_v41  ;;  %v13378_v63 = vor.u32 %v12177_v54, %v9618_v39 }
 0x49f   :  { %15024 = vst [vmem:[#allocation90_spill] sm:$0xff] %v13368_v41  ;;  %v12225_v16 = vld [vmem:[#allocation3 + $0x3a4] sm:$0xf0]  ;;  %v9746_v3 = vld [vmem:[#allocation3 + $0x320] sm:$0xf]  ;;  %v13380_v52 = vor.u32 %v12193_v5, %v9682_v13  ;;  %4273 = vmatpush.bf16.msrb.mxu2 %v13371_v10 }
 0x4a0   :  { %15025 = vst [vmem:[#allocation91_spill] sm:$0xff] %v13371_v10  ;;  %v12209_v40 = vld [vmem:[#allocation3 + $0x324] sm:$0xf0]  ;;  %v9610_v30 = vld [vmem:[#allocation3 + $0x210] sm:$0xf]  ;;  %v13383_v56 = vor.u32 %v12225_v16, %v9810_v2 }
 0x4a1   :  { %15026 = vst [vmem:[#allocation92_spill] sm:$0xff] %v13374_v8  ;;  %v12175_v1 = vld [vmem:[#allocation3 + $0x214] sm:$0xf0]  ;;  %v9674_v29 = vld [vmem:[#allocation3 + $0x290] sm:$0xf]  ;;  %v13386_v21 = vor.u32 %v12209_v40, %v9746_v3  ;;  %4235 = vmatpush.bf16.msra.mxu3 %v13378_v63 }
 0x4a2   :  { %15027 = vst [vmem:[#allocation93_spill] sm:$0xff] %v13378_v63  ;;  %v12191_v50 = vld [vmem:[#allocation3 + $0x294] sm:$0xf0]  ;;  %4260 = vmatpush.bf16.msrb.mxu1 %v13374_v8  ;;  %v9802_v22 = vld [vmem:[#allocation3 + $0x390] sm:$0xf]  ;;  %4248 = vmatpush.bf16.msrb.mxu0 %v13380_v52  ;;  %v13390_v39 = vor.u32 %v12175_v1, %v9610_v30 }
 0x4a3   :  { %15028 = vst [vmem:[#allocation94_spill] sm:$0xff] %v13380_v52  ;;  %v12223_v17 = vld [vmem:[#allocation3 + $0x394] sm:$0xf0]  ;;  %v9738_v38 = vld [vmem:[#allocation3 + $0x310] sm:$0xf]  ;;  %v13392_v54 = vor.u32 %v12191_v50, %v9674_v29  ;;  %4274 = vmatpush.bf16.msrb.mxu2 %v13383_v56 }
 0x4a4   :  { %15029 = vst [vmem:[#allocation95_spill] sm:$0xff] %v13383_v56  ;;  %v12207_v41 = vld [vmem:[#allocation3 + $0x314] sm:$0xf0]  ;;  %v9602_v2 = vld [vmem:[#allocation3 + $0x200] sm:$0xf]  ;;  %v13395_v5 = vor.u32 %v12223_v17, %v9802_v22 }
 0x4a5   :  { %15030 = vst [vmem:[#allocation96_spill] sm:$0xff] %v13386_v21  ;;  %v12173_v16 = vld [vmem:[#allocation3 + $0x204] sm:$0xf0]  ;;  %v9666_v13 = vld [vmem:[#allocation3 + $0x280] sm:$0xf]  ;;  %v13398_v8 = vor.u32 %v12207_v41, %v9738_v38  ;;  %4236 = vmatpush.bf16.msra.mxu3 %v13390_v39 }
 0x4a6   :  { %15031 = vst [vmem:[#allocation97_spill] sm:$0xff] %v13390_v39  ;;  %v12189_v3 = vld [vmem:[#allocation3 + $0x284] sm:$0xf0]  ;;  %v9794_v40 = vld [vmem:[#allocation3 + $0x380] sm:$0xf]  ;;  %4261 = vmatpush.bf16.msrb.mxu1 %v13386_v21  ;;  %4249 = vmatpush.bf16.msrb.mxu0 %v13392_v54  ;;  %v13402_v56 = vor.u32 %v12173_v16, %v9602_v2 }
 0x4a7   :  { %15032 = vst [vmem:[#allocation98_spill] sm:$0xff] %v13392_v54  ;;  %v12221_v10 = vld [vmem:[#allocation3 + $0x384] sm:$0xf0]  ;;  %v9914_v63 = vld [vmem:[#allocation3 + $0x470] sm:$0xf]  ;;  %v13404_v22 = vor.u32 %v12189_v3, %v9666_v13  ;;  %4275 = vmatpush.bf16.msrb.mxu2 %v13395_v5 }
 0x4a8   :  { %15033 = vst [vmem:[#allocation99_spill] sm:$0xff] %v13395_v5  ;;  %v12251_v52 = vld [vmem:[#allocation3 + $0x474] sm:$0xf0]  ;;  %v9978_v30 = vld [vmem:[#allocation3 + $0x4f0] sm:$0xf]  ;;  %v13407_v38 = vor.u32 %v12221_v10, %v9794_v40  ;;  %v15042_v10 = vmax.f32 %v13132_v9, 0.0 }
 0x4a9   :  { %15034 = vst [vmem:[#allocation100_spill] sm:$0xff] %v13398_v8  ;;  %v12267_v1 = vld [vmem:[#allocation3 + $0x4f4] sm:$0xf0]  ;;  %v10106_v29 = vld [vmem:[#allocation3 + $0x5f0] sm:$0xf]  ;;  %v13409_v41 = vor.u32 %v12251_v52, %v9914_v63  ;;  %4237 = vmatpush.bf16.msra.mxu3 %v13402_v56  ;;  %v15044_v40 = vmax.f32 %v13146_v45, 0.0 }
 0x4aa   :  { %v12299_v50 = vld [vmem:[#allocation3 + $0x5f4] sm:$0xf0]  ;;  %15035 = vst [vmem:[#allocation101_spill] sm:$0xff] %v13402_v56  ;;  %v9730_v17 = vld [vmem:[#allocation3 + $0x300] sm:$0xf]  ;;  %4262 = vmatpush.bf16.msrb.mxu1 %v13398_v8  ;;  %v13412_v0 = vor.u32 %v12267_v1, %v9978_v30  ;;  %v13421_v63 = vpack.c.bf16 %v15042_v10, %v15042_v10  ;;  %4250 = vmatpush.bf16.msrb.mxu0 %v13404_v22 }
 0x4ab   :  { %15036 = vst [vmem:[#allocation102_spill] sm:$0xff] %v13404_v22  ;;  %v12205_v28 = vld [vmem:[#allocation3 + $0x304] sm:$0xf0]  ;;  %v10042_v21 = vld [vmem:[#allocation3 + $0x570] sm:$0xf]  ;;  %v13414_v39 = vor.u32 %v12299_v50, %v10106_v29  ;;  %v13430_v30 = vpack.c.bf16 %v15044_v40, %v15044_v40  ;;  %4276 = vmatpush.bf16.msrb.mxu2 %v13407_v38  ;;  %v15046_v29 = vmax.f32 %v13130_v55, 0.0 }
 0x4ac   :  { %15037 = vst [vmem:[#allocation103_spill] sm:$0xff] %v13407_v38  ;;  %v12283_v7 = vld [vmem:[#allocation3 + $0x574] sm:$0xf0]  ;;  %v9906_v2 = vld [vmem:[#allocation3 + $0x460] sm:$0xf]  ;;  %v13416_v3 = vor.u32 %v12205_v28, %v9730_v17  ;;  %4238 = vmatmul.bf16.vlgmr.msra.gmra.mxu3 %v13421_v63  ;;  %v15049_v40 = vmax.f32 %v13148_v42, 0.0 }
 0x4ad   :  { %15038 = vst [vmem:[#allocation104_spill] sm:$0xff] %v13409_v41  ;;  %v12249_v16 = vld [vmem:[#allocation3 + $0x464] sm:$0xf0]  ;;  %v9970_v13 = vld [vmem:[#allocation3 + $0x4e0] sm:$0xf]  ;;  %v13425_v52 = vor.u32 %v12283_v7, %v10042_v21  ;;  %4282 = vmatpush.bf16.msrb.mxu3 %v13409_v41  ;;  %v13439_v50 = vpack.c.bf16 %v15046_v29, %v15046_v29 }
 0x4ae   :  { %15039 = vst [vmem:[#allocation105_spill] sm:$0xff] %v13412_v0  ;;  %v12265_v54 = vld [vmem:[#allocation3 + $0x4e4] sm:$0xf0]  ;;  %v10098_v19 = vld [vmem:[#allocation3 + $0x5e0] sm:$0xf]  ;;  %v13434_v28 = vor.u32 %v12249_v16, %v9906_v2  ;;  %4295 = vmatpush.bf16.msra.mxu0 %v13412_v0  ;;  %4263 = vmatpush.bf16.msrb.mxu1 %v13416_v3  ;;  %v13452_v29 = vpack.c.bf16 %v15049_v40, %v15049_v40 }
 0x4af   :  { %15040 = vst [vmem:[#allocation106_spill] sm:$0xff] %v13414_v39  ;;  %v12297_v5 = vld [vmem:[#allocation3 + $0x5e4] sm:$0xf0]  ;;  %v10034_v9 = vld [vmem:[#allocation3 + $0x560] sm:$0xf]  ;;  %4321 = vmatpush.bf16.msra.mxu2 %v13414_v39  ;;  %v13443_v45 = vor.u32 %v12265_v54, %v9970_v13  ;;  %4251 = vmatmul.bf16.vlgmr.msrb.gmra.mxu0 %v13439_v50 }
 0x4b0   :  { %15041 = vst [vmem:[#allocation107_spill] sm:$0xff] %v13416_v3  ;;  %v12281_v1 = vld [vmem:[#allocation3 + $0x564] sm:$0xf0]  ;;  %v13445_v7 = vor.u32 %v12297_v5, %v10098_v19  ;;  %v9898_v21 = vld [vmem:[#allocation3 + $0x450] sm:$0xf]  ;;  %4277 = vmatmul.bf16.vlgmr.msrb.gmra.mxu2 %v13430_v30 }
 0x4b1   :  { %15043 = vst [vmem:[#allocation108_spill] sm:$0xff] %v13425_v52  ;;  %v12247_v17 = vld [vmem:[#allocation3 + $0x454] sm:$0xf0]  ;;  %v9962_v10 = vld [vmem:[#allocation3 + $0x4d0] sm:$0xf]  ;;  %v13455_v54 = vor.u32 %v12281_v1, %v10034_v9  ;;  %4283 = vmatpush.bf16.msrb.mxu3 %v13434_v28  ;;  %4264 = vmatmul.bf16.vlgmr.msrb.gmra.mxu1 %v13452_v29 }
 0x4b2   :  { %15045 = vst [vmem:[#allocation109_spill] sm:$0xff] %v13434_v28  ;;  %v12263_v2 = vld [vmem:[#allocation3 + $0x4d4] sm:$0xf0]  ;;  %v10090_v55 = vld [vmem:[#allocation3 + $0x5d0] sm:$0xf]  ;;  %4308 = vmatpush.bf16.msra.mxu1 %v13425_v52  ;;  %v13459_v19 = vor.u32 %v12247_v17, %v9898_v21  ;;  %4296 = vmatpush.bf16.msra.mxu0 %v13443_v45 }
 0x4b3   :  { %15047 = vst [vmem:[#allocation110_spill] sm:$0xff] %v13443_v45  ;;  %v12295_v16 = vld [vmem:[#allocation3 + $0x5d4] sm:$0xf0]  ;;  %v10026_v5 = vld [vmem:[#allocation3 + $0x550] sm:$0xf]  ;;  %4322 = vmatpush.bf16.msra.mxu2 %v13445_v7  ;;  %v13464_v42 = vor.u32 %v12263_v2, %v9962_v10 }
 0x4b4   :  { %15048 = vst [vmem:[#allocation111_spill] sm:$0xff] %v13445_v7  ;;  %v12279_v13 = vld [vmem:[#allocation3 + $0x554] sm:$0xf0]  ;;  %v13466_v40 = vor.u32 %v12295_v16, %v10090_v55  ;;  %v9890_v9 = vld [vmem:[#allocation3 + $0x440] sm:$0xf] }
 0x4b5   :  { %15050 = vst [vmem:[#allocation112_spill] sm:$0xff] %v13455_v54  ;;  %v12245_v1 = vld [vmem:[#allocation3 + $0x444] sm:$0xf0]  ;;  %v9954_v39 = vld [vmem:[#allocation3 + $0x4c0] sm:$0xf]  ;;  %v13470_v21 = vor.u32 %v12279_v13, %v10026_v5  ;;  %4284 = vmatpush.bf16.msrb.mxu3 %v13459_v19 }
 0x4b6   :  { %15051 = vst [vmem:[#allocation113_spill] sm:$0xff] %v13459_v19  ;;  %v12261_v52 = vld [vmem:[#allocation3 + $0x4c4] sm:$0xf0]  ;;  %v10082_v0 = vld [vmem:[#allocation3 + $0x5c0] sm:$0xf]  ;;  %4309 = vmatpush.bf16.msra.mxu1 %v13455_v54  ;;  %v13473_v17 = vor.u32 %v12245_v1, %v9890_v9  ;;  %4297 = vmatpush.bf16.msra.mxu0 %v13464_v42 }
 0x4b7   :  { %15052 = vst [vmem:[#allocation114_spill] sm:$0xff] %v13464_v42  ;;  %v12293_v28 = vld [vmem:[#allocation3 + $0x5c4] sm:$0xf0]  ;;  %v10018_v10 = vld [vmem:[#allocation3 + $0x540] sm:$0xf]  ;;  %4323 = vmatpush.bf16.msra.mxu2 %v13466_v40  ;;  %v13477_v55 = vor.u32 %v12261_v52, %v9954_v39 }
 0x4b8   :  { %15053 = vst [vmem:[#allocation115_spill] sm:$0xff] %v13466_v40  ;;  %v12277_v2 = vld [vmem:[#allocation3 + $0x544] sm:$0xf0]  ;;  %v13479_v16 = vor.u32 %v12293_v28, %v10082_v0  ;;  %v9882_v7 = vld [vmem:[#allocation3 + $0x430] sm:$0xf] }
 0x4b9   :  { %15054 = vst [vmem:[#allocation116_spill] sm:$0xff] %v13470_v21  ;;  %v12243_v45 = vld [vmem:[#allocation3 + $0x434] sm:$0xf0]  ;;  %v9946_v41 = vld [vmem:[#allocation3 + $0x4b0] sm:$0xf]  ;;  %v13482_v9 = vor.u32 %v12277_v2, %v10018_v10  ;;  %4285 = vmatpush.bf16.msrb.mxu3 %v13473_v17 }
 0x4ba   :  { %15055 = vst [vmem:[#allocation117_spill] sm:$0xff] %v13473_v17  ;;  %v12259_v54 = vld [vmem:[#allocation3 + $0x4b4] sm:$0xf0]  ;;  %v10074_v5 = vld [vmem:[#allocation3 + $0x5b0] sm:$0xf]  ;;  %4310 = vmatpush.bf16.msra.mxu1 %v13470_v21  ;;  %v13485_v1 = vor.u32 %v12243_v45, %v9882_v7  ;;  %4298 = vmatpush.bf16.msra.mxu0 %v13477_v55 }
 0x4bb   :  { %15056 = vst [vmem:[#allocation118_spill] sm:$0xff] %v13477_v55  ;;  %v12291_v13 = vld [vmem:[#allocation3 + $0x5b4] sm:$0xf0]  ;;  %v10010_v42 = vld [vmem:[#allocation3 + $0x530] sm:$0xf]  ;;  %4324 = vmatpush.bf16.msra.mxu2 %v13479_v16  ;;  %v13489_v0 = vor.u32 %v12259_v54, %v9946_v41 }
 0x4bc   :  { %15057 = vst [vmem:[#allocation119_spill] sm:$0xff] %v13479_v16  ;;  %v12275_v40 = vld [vmem:[#allocation3 + $0x534] sm:$0xf0]  ;;  %v13491_v39 = vor.u32 %v12291_v13, %v10074_v5  ;;  %v9874_v52 = vld [vmem:[#allocation3 + $0x420] sm:$0xf] }
 0x4bd   :  { %15058 = vst [vmem:[#allocation120_spill] sm:$0xff] %v13482_v9  ;;  %v12241_v28 = vld [vmem:[#allocation3 + $0x424] sm:$0xf0]  ;;  %v9938_v19 = vld [vmem:[#allocation3 + $0x4a0] sm:$0xf]  ;;  %v13494_v45 = vor.u32 %v12275_v40, %v10010_v42  ;;  %4286 = vmatpush.bf16.msrb.mxu3 %v13485_v1 }
 0x4be   :  { %15059 = vst [vmem:[#allocation121_spill] sm:$0xff] %v13485_v1  ;;  %v12257_v21 = vld [vmem:[#allocation3 + $0x4a4] sm:$0xf0]  ;;  %v10066_v10 = vld [vmem:[#allocation3 + $0x5a0] sm:$0xf]  ;;  %4311 = vmatpush.bf16.msra.mxu1 %v13482_v9  ;;  %v13497_v7 = vor.u32 %v12241_v28, %v9874_v52  ;;  %4299 = vmatpush.bf16.msra.mxu0 %v13489_v0 }
 0x4bf   :  { %15060 = vst [vmem:[#allocation122_spill] sm:$0xff] %v13489_v0  ;;  %v12289_v2 = vld [vmem:[#allocation3 + $0x5a4] sm:$0xf0]  ;;  %v10002_v55 = vld [vmem:[#allocation3 + $0x520] sm:$0xf]  ;;  %4325 = vmatpush.bf16.msra.mxu2 %v13491_v39  ;;  %v13501_v41 = vor.u32 %v12257_v21, %v9938_v19 }
 0x4c0   :  { %15061 = vst [vmem:[#allocation123_spill] sm:$0xff] %v13491_v39  ;;  %v12273_v16 = vld [vmem:[#allocation3 + $0x524] sm:$0xf0]  ;;  %v13503_v54 = vor.u32 %v12289_v2, %v10066_v10  ;;  %v9866_v5 = vld [vmem:[#allocation3 + $0x410] sm:$0xf] }
 0x4c1   :  { %15062 = vst [vmem:[#allocation124_spill] sm:$0xff] %v13494_v45  ;;  %v12239_v13 = vld [vmem:[#allocation3 + $0x414] sm:$0xf0]  ;;  %v9930_v17 = vld [vmem:[#allocation3 + $0x490] sm:$0xf]  ;;  %v13506_v52 = vor.u32 %v12273_v16, %v10002_v55  ;;  %4287 = vmatpush.bf16.msrb.mxu3 %v13497_v7 }
 0x4c2   :  { %15063 = vst [vmem:[#allocation125_spill] sm:$0xff] %v13497_v7  ;;  %v12255_v9 = vld [vmem:[#allocation3 + $0x494] sm:$0xf0]  ;;  %v10058_v42 = vld [vmem:[#allocation3 + $0x590] sm:$0xf]  ;;  %4312 = vmatpush.bf16.msra.mxu1 %v13494_v45  ;;  %v13509_v0 = vor.u32 %v12239_v13, %v9866_v5  ;;  %4300 = vmatpush.bf16.msra.mxu0 %v13501_v41 }
 0x4c3   :  { %15064 = vst [vmem:[#allocation126_spill] sm:$0xff] %v13501_v41  ;;  %v12287_v40 = vld [vmem:[#allocation3 + $0x594] sm:$0xf0]  ;;  %v9994_v28 = vld [vmem:[#allocation3 + $0x510] sm:$0xf]  ;;  %4326 = vmatpush.bf16.msra.mxu2 %v13503_v54  ;;  %v13513_v10 = vor.u32 %v12255_v9, %v9930_v17 }
 0x4c4   :  { %15065 = vst [vmem:[#allocation127_spill] sm:$0xff] %v13503_v54  ;;  %v12271_v39 = vld [vmem:[#allocation3 + $0x514] sm:$0xf0]  ;;  %v9858_v19 = vld [vmem:[#allocation3 + $0x400] sm:$0xf]  ;;  %v13515_v2 = vor.u32 %v12287_v40, %v10058_v42 }
 0x4c5   :  { %15066 = vst [vmem:[#allocation128_spill] sm:$0xff] %v13506_v52  ;;  %v12237_v21 = vld [vmem:[#allocation3 + $0x404] sm:$0xf0]  ;;  %v9922_v1 = vld [vmem:[#allocation3 + $0x480] sm:$0xf]  ;;  %v13518_v5 = vor.u32 %v12271_v39, %v9994_v28  ;;  %4288 = vmatpush.bf16.msrb.mxu3 %v13509_v0 }
 0x4c6   :  { %15067 = vst [vmem:[#allocation129_spill] sm:$0xff] %v13509_v0  ;;  %v12253_v45 = vld [vmem:[#allocation3 + $0x484] sm:$0xf0]  ;;  %v10050_v55 = vld [vmem:[#allocation3 + $0x580] sm:$0xf]  ;;  %4313 = vmatpush.bf16.msra.mxu1 %v13506_v52  ;;  %v13521_v54 = vor.u32 %v12237_v21, %v9858_v19  ;;  %4301 = vmatpush.bf16.msra.mxu0 %v13513_v10 }
 0x4c7   :  { %15068 = vst [vmem:[#allocation130_spill] sm:$0xff] %v13513_v10  ;;  %v12285_v16 = vld [vmem:[#allocation3 + $0x584] sm:$0xf0]  ;;  %v10170_v38 = vld [vmem:[#allocation3 + $0x670] sm:$0xf]  ;;  %4327 = vmatpush.bf16.msra.mxu2 %v13515_v2  ;;  %v13525_v40 = vor.u32 %v12253_v45, %v9922_v1  ;;  %v15078_v1 = vmax.f32 %v13160_v20, 0.0 }
 0x4c8   :  { %15069 = vst [vmem:[#allocation131_spill] sm:$0xff] %v13515_v2  ;;  %v12315_v3 = vld [vmem:[#allocation3 + $0x674] sm:$0xf0]  ;;  %v10234_v13 = vld [vmem:[#allocation3 + $0x6f0] sm:$0xf]  ;;  %v13527_v41 = vor.u32 %v12285_v16, %v10050_v55  ;;  %v15080_v16 = vmax.f32 %v13170_v60, 0.0 }
 0x4c9   :  { %15070 = vst [vmem:[#allocation132_spill] sm:$0xff] %v13518_v5  ;;  %v12331_v7 = vld [vmem:[#allocation3 + $0x6f4] sm:$0xf0]  ;;  %v10362_v22 = vld [vmem:[#allocation3 + $0x7f0] sm:$0xf]  ;;  %v13529_v52 = vor.u32 %v12315_v3, %v10170_v38  ;;  %4289 = vmatpush.bf16.msrb.mxu3 %v13521_v54  ;;  %v13542_v45 = vpack.c.bf16 %v15078_v1, %v15078_v1  ;;  %v15081_v20 = vmax.f32 %v13158_v62, 0.0 }
 0x4ca   :  { %15071 = vst [vmem:[#allocation133_spill] sm:$0xff] %v13521_v54  ;;  %v12363_v17 = vld [vmem:[#allocation3 + $0x7f4] sm:$0xf0]  ;;  %v9986_v9 = vld [vmem:[#allocation3 + $0x500] sm:$0xf]  ;;  %v13531_v56 = vor.u32 %v12331_v7, %v10234_v13  ;;  %4314 = vmatpush.bf16.msra.mxu1 %v13518_v5  ;;  %4302 = vmatpush.bf16.msra.mxu0 %v13525_v40  ;;  %v13551_v13 = vpack.c.bf16 %v15080_v16, %v15080_v16  ;;  %v15085_v16 = vmax.f32 %v13172_v32, 0.0 }
 0x4cb   :  { %v12269_v42 = vld [vmem:[#allocation3 + $0x504] sm:$0xf0]  ;;  %15072 = vst [vmem:[#allocation134_spill] sm:$0xff] %v13525_v40  ;;  %v10298_v39 = vld [vmem:[#allocation3 + $0x770] sm:$0xf]  ;;  %v13534_v19 = vor.u32 %v12363_v17, %v10362_v22  ;;  %4328 = vmatpush.bf16.msra.mxu2 %v13527_v41  ;;  %v13556_v17 = vpack.c.bf16 %v15081_v20, %v15081_v20 }
 0x4cc   :  { %15073 = vst [vmem:[#allocation135_spill] sm:$0xff] %v13527_v41  ;;  %v12347_v28 = vld [vmem:[#allocation3 + $0x774] sm:$0xf0]  ;;  %v10162_v0 = vld [vmem:[#allocation3 + $0x660] sm:$0xf]  ;;  %v13536_v21 = vor.u32 %v12269_v42, %v9986_v9  ;;  %v13571_v20 = vpack.c.bf16 %v15085_v16, %v15085_v16  ;;  %4290 = vmatmul.bf16.vlgmr.msrb.gmra.mxu3 %v13542_v45 }
 0x4cd   :  { %15074 = vst [vmem:[#allocation136_spill] sm:$0xff] %v13529_v52  ;;  %v12313_v10 = vld [vmem:[#allocation3 + $0x664] sm:$0xf0]  ;;  %v10226_v8 = vld [vmem:[#allocation3 + $0x6e0] sm:$0xf]  ;;  %v13544_v38 = vor.u32 %v12347_v28, %v10298_v39  ;;  %4334 = vmatpush.bf16.msra.mxu3 %v13529_v52  ;;  %4303 = vmatmul.bf16.vlgmr.msra.gmra.mxu0 %v13556_v17 }
 0x4ce   :  { %15075 = vst [vmem:[#allocation137_spill] sm:$0xff] %v13531_v56  ;;  %v12329_v2 = vld [vmem:[#allocation3 + $0x6e4] sm:$0xf0]  ;;  %v10354_v3 = vld [vmem:[#allocation3 + $0x7e0] sm:$0xf]  ;;  %4347 = vmatpush.bf16.msrb.mxu0 %v13531_v56  ;;  %v13560_v9 = vor.u32 %v12313_v10, %v10162_v0  ;;  %4315 = vmatpush.bf16.msra.mxu1 %v13536_v21 }
 0x4cf   :  { %15076 = vst [vmem:[#allocation138_spill] sm:$0xff] %v13534_v19  ;;  %v12361_v7 = vld [vmem:[#allocation3 + $0x7e4] sm:$0xf0]  ;;  %v10290_v22 = vld [vmem:[#allocation3 + $0x760] sm:$0xf]  ;;  %v13562_v42 = vor.u32 %v12329_v2, %v10226_v8  ;;  %4373 = vmatpush.bf16.msrb.mxu2 %v13534_v19 }
 0x4d0   :  { %15077 = vst [vmem:[#allocation139_spill] sm:$0xff] %v13536_v21  ;;  %v12345_v55 = vld [vmem:[#allocation3 + $0x764] sm:$0xf0]  ;;  %v10154_v39 = vld [vmem:[#allocation3 + $0x650] sm:$0xf]  ;;  %v13566_v60 = vor.u32 %v12361_v7, %v10354_v3  ;;  %4329 = vmatmul.bf16.vlgmr.msra.gmra.mxu2 %v13551_v13 }
 0x4d1   :  { %15079 = vst [vmem:[#allocation140_spill] sm:$0xff] %v13544_v38  ;;  %v12311_v28 = vld [vmem:[#allocation3 + $0x654] sm:$0xf0]  ;;  %v10218_v62 = vld [vmem:[#allocation3 + $0x6d0] sm:$0xf]  ;;  %v13575_v8 = vor.u32 %v12345_v55, %v10290_v22  ;;  %4335 = vmatpush.bf16.msra.mxu3 %v13560_v9  ;;  %4316 = vmatmul.bf16.vlgmr.msra.gmra.mxu1 %v13571_v20 }
 0x4d2   :  { %15082 = vst [vmem:[#allocation141_spill] sm:$0xff] %v13560_v9  ;;  %v12327_v1 = vld [vmem:[#allocation3 + $0x6d4] sm:$0xf0]  ;;  %4360 = vmatpush.bf16.msrb.mxu1 %v13544_v38  ;;  %v10346_v0 = vld [vmem:[#allocation3 + $0x7d0] sm:$0xf]  ;;  %4348 = vmatpush.bf16.msrb.mxu0 %v13562_v42  ;;  %v13581_v32 = vor.u32 %v12311_v28, %v10154_v39 }
 0x4d3   :  { %15083 = vst [vmem:[#allocation142_spill] sm:$0xff] %v13562_v42  ;;  %v12359_v10 = vld [vmem:[#allocation3 + $0x7d4] sm:$0xf0]  ;;  %v10282_v2 = vld [vmem:[#allocation3 + $0x750] sm:$0xf]  ;;  %v13583_v7 = vor.u32 %v12327_v1, %v10218_v62  ;;  %4374 = vmatpush.bf16.msrb.mxu2 %v13566_v60 }
 0x4d4   :  { %15084 = vst [vmem:[#allocation143_spill] sm:$0xff] %v13566_v60  ;;  %v12343_v3 = vld [vmem:[#allocation3 + $0x754] sm:$0xf0]  ;;  %v10146_v16 = vld [vmem:[#allocation3 + $0x640] sm:$0xf]  ;;  %v13586_v22 = vor.u32 %v12359_v10, %v10346_v0 }
 0x4d5   :  { %15086 = vst [vmem:[#allocation144_spill] sm:$0xff] %v13575_v8  ;;  %v12309_v55 = vld [vmem:[#allocation3 + $0x644] sm:$0xf0]  ;;  %v10210_v19 = vld [vmem:[#allocation3 + $0x6c0] sm:$0xf]  ;;  %v13590_v56 = vor.u32 %v12343_v3, %v10282_v2  ;;  %4336 = vmatpush.bf16.msra.mxu3 %v13581_v32 }
 0x4d6   :  { %15087 = vst [vmem:[#allocation145_spill] sm:$0xff] %v13581_v32  ;;  %v12325_v38 = vld [vmem:[#allocation3 + $0x6c4] sm:$0xf0]  ;;  %4361 = vmatpush.bf16.msrb.mxu1 %v13575_v8  ;;  %v10338_v9 = vld [vmem:[#allocation3 + $0x7c0] sm:$0xf]  ;;  %4349 = vmatpush.bf16.msrb.mxu0 %v13583_v7  ;;  %v13594_v62 = vor.u32 %v12309_v55, %v10146_v16 }
 0x4d7   :  { %15088 = vst [vmem:[#allocation146_spill] sm:$0xff] %v13583_v7  ;;  %v12357_v42 = vld [vmem:[#allocation3 + $0x7c4] sm:$0xf0]  ;;  %v10274_v39 = vld [vmem:[#allocation3 + $0x740] sm:$0xf]  ;;  %v13596_v1 = vor.u32 %v12325_v38, %v10210_v19  ;;  %4375 = vmatpush.bf16.msrb.mxu2 %v13586_v22 }
 0x4d8   :  { %15089 = vst [vmem:[#allocation147_spill] sm:$0xff] %v13586_v22  ;;  %v12341_v28 = vld [vmem:[#allocation3 + $0x744] sm:$0xf0]  ;;  %v10138_v0 = vld [vmem:[#allocation3 + $0x630] sm:$0xf]  ;;  %v13599_v10 = vor.u32 %v12357_v42, %v10338_v9 }
 0x4d9   :  { %15090 = vst [vmem:[#allocation148_spill] sm:$0xff] %v13590_v56  ;;  %v12307_v60 = vld [vmem:[#allocation3 + $0x634] sm:$0xf0]  ;;  %v10202_v2 = vld [vmem:[#allocation3 + $0x6b0] sm:$0xf]  ;;  %v13602_v8 = vor.u32 %v12341_v28, %v10274_v39  ;;  %4337 = vmatpush.bf16.msra.mxu3 %v13594_v62 }
 0x4da   :  { %15091 = vst [vmem:[#allocation149_spill] sm:$0xff] %v13594_v62  ;;  %v12323_v3 = vld [vmem:[#allocation3 + $0x6b4] sm:$0xf0]  ;;  %4362 = vmatpush.bf16.msrb.mxu1 %v13590_v56  ;;  %v10330_v52 = vld [vmem:[#allocation3 + $0x7b0] sm:$0xf]  ;;  %4350 = vmatpush.bf16.msrb.mxu0 %v13596_v1  ;;  %v13606_v19 = vor.u32 %v12307_v60, %v10138_v0 }
 0x4db   :  { %15092 = vst [vmem:[#allocation150_spill] sm:$0xff] %v13596_v1  ;;  %v12355_v32 = vld [vmem:[#allocation3 + $0x7b4] sm:$0xf0]  ;;  %v10266_v41 = vld [vmem:[#allocation3 + $0x730] sm:$0xf]  ;;  %v13608_v38 = vor.u32 %v12323_v3, %v10202_v2  ;;  %4376 = vmatpush.bf16.msrb.mxu2 %v13599_v10 }
 0x4dc   :  { %15093 = vst [vmem:[#allocation151_spill] sm:$0xff] %v13599_v10  ;;  %v12339_v7 = vld [vmem:[#allocation3 + $0x734] sm:$0xf0]  ;;  %v10130_v9 = vld [vmem:[#allocation3 + $0x620] sm:$0xf]  ;;  %v13611_v42 = vor.u32 %v12355_v32, %v10330_v52 }
 0x4dd   :  { %15094 = vst [vmem:[#allocation152_spill] sm:$0xff] %v13602_v8  ;;  %v12305_v16 = vld [vmem:[#allocation3 + $0x624] sm:$0xf0]  ;;  %v10194_v55 = vld [vmem:[#allocation3 + $0x6a0] sm:$0xf]  ;;  %v13614_v28 = vor.u32 %v12339_v7, %v10266_v41  ;;  %4338 = vmatpush.bf16.msra.mxu3 %v13606_v19 }
 0x4de   :  { %15095 = vst [vmem:[#allocation153_spill] sm:$0xff] %v13606_v19  ;;  %v12321_v39 = vld [vmem:[#allocation3 + $0x6a4] sm:$0xf0]  ;;  %4363 = vmatpush.bf16.msrb.mxu1 %v13602_v8  ;;  %v10322_v22 = vld [vmem:[#allocation3 + $0x7a0] sm:$0xf]  ;;  %4351 = vmatpush.bf16.msrb.mxu0 %v13608_v38  ;;  %v13618_v60 = vor.u32 %v12305_v16, %v10130_v9 }
 0x4df   :  { %15096 = vst [vmem:[#allocation154_spill] sm:$0xff] %v13608_v38  ;;  %v12353_v62 = vld [vmem:[#allocation3 + $0x7a4] sm:$0xf0]  ;;  %v10258_v56 = vld [vmem:[#allocation3 + $0x720] sm:$0xf]  ;;  %v13620_v0 = vor.u32 %v12321_v39, %v10194_v55  ;;  %4377 = vmatpush.bf16.msrb.mxu2 %v13611_v42 }
 0x4e0   :  { %15097 = vst [vmem:[#allocation155_spill] sm:$0xff] %v13611_v42  ;;  %v12337_v1 = vld [vmem:[#allocation3 + $0x724] sm:$0xf0]  ;;  %v10122_v52 = vld [vmem:[#allocation3 + $0x610] sm:$0xf]  ;;  %v13623_v32 = vor.u32 %v12353_v62, %v10322_v22 }
 0x4e1   :  { %15098 = vst [vmem:[#allocation156_spill] sm:$0xff] %v13614_v28  ;;  %v12303_v2 = vld [vmem:[#allocation3 + $0x614] sm:$0xf0]  ;;  %v10186_v41 = vld [vmem:[#allocation3 + $0x690] sm:$0xf]  ;;  %v13626_v3 = vor.u32 %v12337_v1, %v10258_v56  ;;  %4339 = vmatpush.bf16.msra.mxu3 %v13618_v60 }
 0x4e2   :  { %15099 = vst [vmem:[#allocation157_spill] sm:$0xff] %v13618_v60  ;;  %v12319_v7 = vld [vmem:[#allocation3 + $0x694] sm:$0xf0]  ;;  %4364 = vmatpush.bf16.msrb.mxu1 %v13614_v28  ;;  %v10314_v10 = vld [vmem:[#allocation3 + $0x790] sm:$0xf]  ;;  %4352 = vmatpush.bf16.msrb.mxu0 %v13620_v0  ;;  %v13630_v9 = vor.u32 %v12303_v2, %v10122_v52 }
 0x4e3   :  { %15100 = vst [vmem:[#allocation158_spill] sm:$0xff] %v13620_v0  ;;  %v12351_v19 = vld [vmem:[#allocation3 + $0x794] sm:$0xf0]  ;;  %v10250_v8 = vld [vmem:[#allocation3 + $0x710] sm:$0xf]  ;;  %v13632_v16 = vor.u32 %v12319_v7, %v10186_v41  ;;  %4378 = vmatpush.bf16.msrb.mxu2 %v13623_v32 }
 0x4e4   :  { %15101 = vst [vmem:[#allocation159_spill] sm:$0xff] %v13623_v32  ;;  %v12335_v38 = vld [vmem:[#allocation3 + $0x714] sm:$0xf0]  ;;  %v10114_v22 = vld [vmem:[#allocation3 + $0x600] sm:$0xf]  ;;  %v13635_v39 = vor.u32 %v12351_v19, %v10314_v10 }
 0x4e5   :  { %15102 = vst [vmem:[#allocation160_spill] sm:$0xff] %v13626_v3  ;;  %v12301_v62 = vld [vmem:[#allocation3 + $0x604] sm:$0xf0]  ;;  %v10178_v55 = vld [vmem:[#allocation3 + $0x680] sm:$0xf]  ;;  %v13638_v28 = vor.u32 %v12335_v38, %v10250_v8  ;;  %4340 = vmatpush.bf16.msra.mxu3 %v13630_v9 }
 0x4e6   :  { %15103 = vst [vmem:[#allocation161_spill] sm:$0xff] %v13630_v9  ;;  %v12317_v56 = vld [vmem:[#allocation3 + $0x684] sm:$0xf0]  ;;  %v10306_v1 = vld [vmem:[#allocation3 + $0x780] sm:$0xf]  ;;  %4365 = vmatpush.bf16.msrb.mxu1 %v13626_v3  ;;  %4353 = vmatpush.bf16.msrb.mxu0 %v13632_v16  ;;  %v13642_v32 = vor.u32 %v12301_v62, %v10114_v22 }
 0x4e7   :  { %15104 = vst [vmem:[#allocation162_spill] sm:$0xff] %v13632_v16  ;;  %v12349_v42 = vld [vmem:[#allocation3 + $0x784] sm:$0xf0]  ;;  %v12122_v60 = vld [vmem:[#allocation3 + $0x74] sm:$0xf]  ;;  %v13644_v10 = vor.u32 %v12317_v56, %v10178_v55  ;;  %4379 = vmatpush.bf16.msrb.mxu2 %v13635_v39  ;;  %v15114_v16 = vmax.f32 %v13184_v43, 0.0 }
 0x4e8   :  { %15105 = vst [vmem:[#allocation163_spill] sm:$0xff] %v13635_v39  ;;  %v9404_v0 = vld [vmem:[#allocation3 + $0x78] sm:$0xf0]  ;;  %v12138_v52 = vld [vmem:[#allocation3 + $0xf4] sm:$0xf]  ;;  %v13647_v8 = vor.u32 %v12349_v42, %v10306_v1 }
 0x4e9   :  { %15106 = vst [vmem:[#allocation164_spill] sm:$0xff] %v13638_v28  ;;  %v9468_v2 = vld [vmem:[#allocation3 + $0xf8] sm:$0xf0]  ;;  %v12170_v41 = vld [vmem:[#allocation3 + $0x1f4] sm:$0xf]  ;;  %v13649_v38 = vor.u32 %v12122_v60, %v9404_v0  ;;  %v13661_v42 = vpack.c.bf16 %v15114_v16, %v15114_v16  ;;  %4341 = vmatpush.bf16.msra.mxu3 %v13642_v32 }
 0x4ea   :  { %v9596_v7 = vld [vmem:[#allocation3 + $0x1f8] sm:$0xf0]  ;;  %15107 = vst [vmem:[#allocation165_spill] sm:$0xff] %v13642_v32  ;;  %v10242_v19 = vld [vmem:[#allocation3 + $0x700] sm:$0xf]  ;;  %4366 = vmatpush.bf16.msrb.mxu1 %v13638_v28  ;;  %v13652_v54 = vor.u32 %v12138_v52, %v9468_v2  ;;  %4354 = vmatpush.bf16.msrb.mxu0 %v13644_v10  ;;  %v15116_v2 = vmax.f32 %v13196_v15, 0.0 }
 0x4eb   :  { %15108 = vst [vmem:[#allocation166_spill] sm:$0xff] %v13644_v10  ;;  %v12333_v21 = vld [vmem:[#allocation3 + $0x704] sm:$0xf0]  ;;  %v12154_v3 = vld [vmem:[#allocation3 + $0x174] sm:$0xf]  ;;  %v13654_v9 = vor.u32 %v12170_v41, %v9596_v7  ;;  %4380 = vmatpush.bf16.msrb.mxu2 %v13647_v8  ;;  %v15118_v7 = vmax.f32 %v13182_v33, 0.0 }
 0x4ec   :  { %15109 = vst [vmem:[#allocation167_spill] sm:$0xff] %v13647_v8  ;;  %v9532_v40 = vld [vmem:[#allocation3 + $0x178] sm:$0xf0]  ;;  %v12120_v22 = vld [vmem:[#allocation3 + $0x64] sm:$0xf]  ;;  %v13656_v56 = vor.u32 %v12333_v21, %v10242_v19  ;;  %v13670_v41 = vpack.c.bf16 %v15116_v2, %v15116_v2  ;;  %4342 = vmatmul.bf16.vlgmr.msra.gmra.mxu3 %v13661_v42 }
 0x4ed   :  { %15110 = vst [vmem:[#allocation168_spill] sm:$0xff] %v13649_v38  ;;  %v9396_v62 = vld [vmem:[#allocation3 + $0x68] sm:$0xf0]  ;;  %v12136_v55 = vld [vmem:[#allocation3 + $0xe4] sm:$0xf]  ;;  %v13665_v52 = vor.u32 %v12154_v3, %v9532_v40  ;;  %4386 = vmatpush.bf16.msrb.mxu3 %v13649_v38  ;;  %v13679_v19 = vpack.c.bf16 %v15118_v7, %v15118_v7  ;;  %v15121_v7 = vmax.f32 %v13194_v57, 0.0 }
 0x4ee   :  { %15111 = vst [vmem:[#allocation169_spill] sm:$0xff] %v13652_v54  ;;  %v9460_v60 = vld [vmem:[#allocation3 + $0xe8] sm:$0xf0]  ;;  %v12168_v0 = vld [vmem:[#allocation3 + $0x1e4] sm:$0xf]  ;;  %v13674_v43 = vor.u32 %v12120_v22, %v9396_v62  ;;  %4399 = vmatpush.bf16.msra.mxu0 %v13652_v54  ;;  %4367 = vmatpush.bf16.msrb.mxu1 %v13656_v56 }
 0x4ef   :  { %15112 = vst [vmem:[#allocation170_spill] sm:$0xff] %v13654_v9  ;;  %v9588_v1 = vld [vmem:[#allocation3 + $0x1e8] sm:$0xf0]  ;;  %v12152_v21 = vld [vmem:[#allocation3 + $0x164] sm:$0xf]  ;;  %4425 = vmatpush.bf16.msra.mxu2 %v13654_v9  ;;  %v13683_v15 = vor.u32 %v12136_v55, %v9460_v60  ;;  %v13692_v54 = vpack.c.bf16 %v15121_v7, %v15121_v7  ;;  %4355 = vmatmul.bf16.vlgmr.msrb.gmra.mxu0 %v13679_v19 }
 0x4f0   :  { %15113 = vst [vmem:[#allocation171_spill] sm:$0xff] %v13656_v56  ;;  %v9524_v16 = vld [vmem:[#allocation3 + $0x168] sm:$0xf0]  ;;  %v13685_v40 = vor.u32 %v12168_v0, %v9588_v1  ;;  %v12118_v3 = vld [vmem:[#allocation3 + $0x54] sm:$0xf]  ;;  %4381 = vmatmul.bf16.vlgmr.msrb.gmra.mxu2 %v13670_v41 }
 0x4f1   :  { %15115 = vst [vmem:[#allocation172_spill] sm:$0xff] %v13665_v52  ;;  %v9388_v2 = vld [vmem:[#allocation3 + $0x58] sm:$0xf0]  ;;  %v12134_v38 = vld [vmem:[#allocation3 + $0xd4] sm:$0xf]  ;;  %v13695_v55 = vor.u32 %v12152_v21, %v9524_v16  ;;  %4387 = vmatpush.bf16.msrb.mxu3 %v13674_v43  ;;  %4368 = vmatmul.bf16.vlgmr.msrb.gmra.mxu1 %v13692_v54 }
 0x4f2   :  { %15117 = vst [vmem:[#allocation173_spill] sm:$0xff] %v13674_v43  ;;  %v9452_v22 = vld [vmem:[#allocation3 + $0xd8] sm:$0xf0]  ;;  %v12166_v33 = vld [vmem:[#allocation3 + $0x1d4] sm:$0xf]  ;;  %4412 = vmatpush.bf16.msra.mxu1 %v13665_v52  ;;  %v13699_v60 = vor.u32 %v12118_v3, %v9388_v2  ;;  %4400 = vmatpush.bf16.msra.mxu0 %v13683_v15 }
 0x4f3   :  { %15119 = vst [vmem:[#allocation174_spill] sm:$0xff] %v13683_v15  ;;  %v9580_v62 = vld [vmem:[#allocation3 + $0x1d8] sm:$0xf0]  ;;  %v12150_v0 = vld [vmem:[#allocation3 + $0x154] sm:$0xf]  ;;  %4426 = vmatpush.bf16.msra.mxu2 %v13685_v40  ;;  %v13704_v57 = vor.u32 %v12134_v38, %v9452_v22 }
 0x4f4   :  { %15120 = vst [vmem:[#allocation175_spill] sm:$0xff] %v13685_v40  ;;  %v9516_v1 = vld [vmem:[#allocation3 + $0x158] sm:$0xf0]  ;;  %v13706_v7 = vor.u32 %v12166_v33, %v9580_v62  ;;  %v12116_v21 = vld [vmem:[#allocation3 + $0x44] sm:$0xf] }
 0x4f5   :  { %15122 = vst [vmem:[#allocation176_spill] sm:$0xff] %v13695_v55  ;;  %v9380_v16 = vld [vmem:[#allocation3 + $0x48] sm:$0xf0]  ;;  %v12132_v9 = vld [vmem:[#allocation3 + $0xc4] sm:$0xf]  ;;  %v13710_v52 = vor.u32 %v12150_v0, %v9516_v1  ;;  %4388 = vmatpush.bf16.msrb.mxu3 %v13699_v60 }
 0x4f6   :  { %15123 = vst [vmem:[#allocation177_spill] sm:$0xff] %v13699_v60  ;;  %v9444_v43 = vld [vmem:[#allocation3 + $0xc8] sm:$0xf0]  ;;  %v12164_v3 = vld [vmem:[#allocation3 + $0x1c4] sm:$0xf]  ;;  %4413 = vmatpush.bf16.msra.mxu1 %v13695_v55  ;;  %v13713_v15 = vor.u32 %v12116_v21, %v9380_v16  ;;  %4401 = vmatpush.bf16.msra.mxu0 %v13704_v57 }
 0x4f7   :  { %15124 = vst [vmem:[#allocation178_spill] sm:$0xff] %v13704_v57  ;;  %v9572_v2 = vld [vmem:[#allocation3 + $0x1c8] sm:$0xf0]  ;;  %v12148_v38 = vld [vmem:[#allocation3 + $0x144] sm:$0xf]  ;;  %4427 = vmatpush.bf16.msra.mxu2 %v13706_v7  ;;  %v13717_v33 = vor.u32 %v12132_v9, %v9444_v43 }
 0x4f8   :  { %15125 = vst [vmem:[#allocation179_spill] sm:$0xff] %v13706_v7  ;;  %v9508_v22 = vld [vmem:[#allocation3 + $0x148] sm:$0xf0]  ;;  %v13719_v62 = vor.u32 %v12164_v3, %v9572_v2  ;;  %v12114_v40 = vld [vmem:[#allocation3 + $0x34] sm:$0xf] }
 0x4f9   :  { %15126 = vst [vmem:[#allocation180_spill] sm:$0xff] %v13710_v52  ;;  %v9372_v8 = vld [vmem:[#allocation3 + $0x38] sm:$0xf0]  ;;  %v12130_v56 = vld [vmem:[#allocation3 + $0xb4] sm:$0xf]  ;;  %v13722_v21 = vor.u32 %v12148_v38, %v9508_v22  ;;  %4389 = vmatpush.bf16.msrb.mxu3 %v13713_v15 }
 0x4fa   :  { %15127 = vst [vmem:[#allocation181_spill] sm:$0xff] %v13713_v15  ;;  %v9436_v55 = vld [vmem:[#allocation3 + $0xb8] sm:$0xf0]  ;;  %v12162_v0 = vld [vmem:[#allocation3 + $0x1b4] sm:$0xf]  ;;  %4414 = vmatpush.bf16.msra.mxu1 %v13710_v52  ;;  %v13725_v16 = vor.u32 %v12114_v40, %v9372_v8  ;;  %4402 = vmatpush.bf16.msra.mxu0 %v13717_v33 }
 0x4fb   :  { %15128 = vst [vmem:[#allocation182_spill] sm:$0xff] %v13717_v33  ;;  %v9564_v1 = vld [vmem:[#allocation3 + $0x1b8] sm:$0xf0]  ;;  %v12146_v57 = vld [vmem:[#allocation3 + $0x134] sm:$0xf]  ;;  %4428 = vmatpush.bf16.msra.mxu2 %v13719_v62  ;;  %v13729_v9 = vor.u32 %v12130_v56, %v9436_v55 }
 0x4fc   :  { %15129 = vst [vmem:[#allocation183_spill] sm:$0xff] %v13719_v62  ;;  %v9500_v7 = vld [vmem:[#allocation3 + $0x138] sm:$0xf0]  ;;  %v13731_v43 = vor.u32 %v12162_v0, %v9564_v1  ;;  %v12112_v3 = vld [vmem:[#allocation3 + $0x24] sm:$0xf] }
 0x4fd   :  { %15130 = vst [vmem:[#allocation184_spill] sm:$0xff] %v13722_v21  ;;  %v9364_v2 = vld [vmem:[#allocation3 + $0x28] sm:$0xf0]  ;;  %v12128_v60 = vld [vmem:[#allocation3 + $0xa4] sm:$0xf]  ;;  %v13734_v8 = vor.u32 %v12146_v57, %v9500_v7  ;;  %4390 = vmatpush.bf16.msrb.mxu3 %v13725_v16 }
 0x4fe   :  { %15131 = vst [vmem:[#allocation185_spill] sm:$0xff] %v13725_v16  ;;  %v9428_v52 = vld [vmem:[#allocation3 + $0xa8] sm:$0xf0]  ;;  %v12160_v38 = vld [vmem:[#allocation3 + $0x1a4] sm:$0xf]  ;;  %4415 = vmatpush.bf16.msra.mxu1 %v13722_v21  ;;  %v13737_v40 = vor.u32 %v12112_v3, %v9364_v2  ;;  %4403 = vmatpush.bf16.msra.mxu0 %v13729_v9 }
 0x4ff   :  { %15132 = vst [vmem:[#allocation186_spill] sm:$0xff] %v13729_v9  ;;  %v9556_v22 = vld [vmem:[#allocation3 + $0x1a8] sm:$0xf0]  ;;  %v12144_v33 = vld [vmem:[#allocation3 + $0x124] sm:$0xf]  ;;  %4429 = vmatpush.bf16.msra.mxu2 %v13731_v43  ;;  %v13741_v56 = vor.u32 %v12128_v60, %v9428_v52 }
 0x500   :  { %15133 = vst [vmem:[#allocation187_spill] sm:$0xff] %v13731_v43  ;;  %v9492_v62 = vld [vmem:[#allocation3 + $0x128] sm:$0xf0]  ;;  %v13743_v55 = vor.u32 %v12160_v38, %v9556_v22  ;;  %v12110_v0 = vld [vmem:[#allocation3 + $0x14] sm:$0xf] }
 0x501   :  { %15134 = vst [vmem:[#allocation188_spill] sm:$0xff] %v13734_v8  ;;  %v9356_v1 = vld [vmem:[#allocation3 + $0x18] sm:$0xf0]  ;;  %v12126_v15 = vld [vmem:[#allocation3 + $0x94] sm:$0xf]  ;;  %v13746_v3 = vor.u32 %v12144_v33, %v9492_v62  ;;  %4391 = vmatpush.bf16.msrb.mxu3 %v13737_v40 }
 0x502   :  { %15135 = vst [vmem:[#allocation189_spill] sm:$0xff] %v13737_v40  ;;  %v9420_v21 = vld [vmem:[#allocation3 + $0x98] sm:$0xf0]  ;;  %v12158_v57 = vld [vmem:[#allocation3 + $0x194] sm:$0xf]  ;;  %4416 = vmatpush.bf16.msra.mxu1 %v13734_v8  ;;  %v13749_v9 = vor.u32 %v12110_v0, %v9356_v1  ;;  %4404 = vmatpush.bf16.msra.mxu0 %v13741_v56 }
 0x503   :  { %15136 = vst [vmem:[#allocation190_spill] sm:$0xff] %v13741_v56  ;;  %v9548_v7 = vld [vmem:[#allocation3 + $0x198] sm:$0xf0]  ;;  %v12142_v2 = vld [vmem:[#allocation3 + $0x114] sm:$0xf]  ;;  %4430 = vmatpush.bf16.msra.mxu2 %v13743_v55  ;;  %v13753_v38 = vor.u32 %v12126_v15, %v9420_v21 }
 0x504   :  { %15137 = vst [vmem:[#allocation191_spill] sm:$0xff] %v13743_v55  ;;  %v9484_v43 = vld [vmem:[#allocation3 + $0x118] sm:$0xf0]  ;;  %v12108_v52 = vld [vmem:[#allocation3 + $0x4] sm:$0xf]  ;;  %v13755_v22 = vor.u32 %v12158_v57, %v9548_v7 }
 0x505   :  { %15138 = vst [vmem:[#allocation192_spill] sm:$0xff] %v13746_v3  ;;  %v9348_v60 = vld [vmem:[#allocation3 + $0x8] sm:$0xf0]  ;;  %v12124_v16 = vld [vmem:[#allocation3 + $0x84] sm:$0xf]  ;;  %v13758_v0 = vor.u32 %v12142_v2, %v9484_v43  ;;  %4392 = vmatpush.bf16.msrb.mxu3 %v13749_v9 }
 0x506   :  { %15139 = vst [vmem:[#allocation193_spill] sm:$0xff] %v13749_v9  ;;  %v9412_v8 = vld [vmem:[#allocation3 + $0x88] sm:$0xf0]  ;;  %v12156_v33 = vld [vmem:[#allocation3 + $0x184] sm:$0xf]  ;;  %4417 = vmatpush.bf16.msra.mxu1 %v13746_v3  ;;  %v13761_v55 = vor.u32 %v12108_v52, %v9348_v60  ;;  %4405 = vmatpush.bf16.msra.mxu0 %v13753_v38 }
 0x507   :  { %15140 = vst [vmem:[#allocation194_spill] sm:$0xff] %v13753_v38  ;;  %v9540_v62 = vld [vmem:[#allocation3 + $0x188] sm:$0xf0]  ;;  %v12186_v10 = vld [vmem:[#allocation3 + $0x274] sm:$0xf]  ;;  %4431 = vmatpush.bf16.msra.mxu2 %v13755_v22  ;;  %v13765_v7 = vor.u32 %v12124_v16, %v9412_v8 }
 0x508   :  { %15141 = vst [vmem:[#allocation195_spill] sm:$0xff] %v13755_v22  ;;  %v9660_v32 = vld [vmem:[#allocation3 + $0x278] sm:$0xf0]  ;;  %v12202_v1 = vld [vmem:[#allocation3 + $0x2f4] sm:$0xf]  ;;  %v13767_v56 = vor.u32 %v12156_v33, %v9540_v62 }
 0x509   :  { %v9724_v40 = vld [vmem:[#allocation3 + $0x2f8] sm:$0xf0]  ;;  %v12234_v39 = vld [vmem:[#allocation3 + $0x3f4] sm:$0xf]  ;;  %v12140_v21 = vld [vmem:[#allocation3 + $0x104] sm:$0xf]  ;;  %v13769_v3 = vor.u32 %v12186_v10, %v9660_v32  ;;  %4393 = vmatpush.bf16.msrb.mxu3 %v13761_v55 }
 0x50a   :  { %v9852_v15 = vld [vmem:[#allocation3 + $0x3f8] sm:$0xf0]  ;;  %v9476_v57 = vld [vmem:[#allocation3 + $0x108] sm:$0xf0]  ;;  %15142 = vst [vmem:[#allocation196_spill] sm:$0xff] %v13767_v56  ;;  %v13771_v28 = vor.u32 %v12202_v1, %v9724_v40  ;;  %4418 = vmatpush.bf16.msra.mxu1 %v13758_v0  ;;  %4406 = vmatpush.bf16.msra.mxu0 %v13765_v7 }
 0x50b   :  { %v12218_v43 = vld [vmem:[#allocation3 + $0x374] sm:$0xf]  ;;  %v9788_v2 = vld [vmem:[#allocation3 + $0x378] sm:$0xf0]  ;;  %15143 = vst [vmem:[#allocation197_spill] sm:$0xff] %v13769_v3  ;;  %v13774_v52 = vor.u32 %v12234_v39, %v9852_v15  ;;  %v13776_v60 = vor.u32 %v12140_v21, %v9476_v57  ;;  %4432 = vmatpush.bf16.msra.mxu2 %v13767_v56 }
 0x50c   :  { %15144 = vst [vmem:[#allocation198_spill] sm:$0xff] %v13771_v28  ;;  %v12184_v9 = vld [vmem:[#allocation3 + $0x264] sm:$0xf]  ;;  %v9652_v38 = vld [vmem:[#allocation3 + $0x268] sm:$0xf0]  ;;  %v13779_v16 = vor.u32 %v12218_v43, %v9788_v2  ;;  %4394 = vmatmul.bf16.vlgmr.msrb.gmra.mxu3 %v13304_v46 }
 0x50d   :  { %15145 = vst [vmem:[#allocation199_spill] sm:$0xff] %v13774_v52  ;;  %v12200_v5 = vld [vmem:[#allocation3 + $0x2e4] sm:$0xf]  ;;  %v9716_v22 = vld [vmem:[#allocation3 + $0x2e8] sm:$0xf0]  ;;  %4438 = vmatpush.bf16.msra.mxu3 %v13769_v3  ;;  %v13785_v39 = vor.u32 %v12184_v9, %v9652_v38  ;;  %4407 = vmatmul.bf16.vlgmr.msra.gmra.mxu0 %v13316_v49 }
 0x50e   :  { %15146 = vst [vmem:[#allocation200_spill] sm:$0xff] %v13776_v60  ;;  %v12232_v8 = vld [vmem:[#allocation3 + $0x3e4] sm:$0xf]  ;;  %v9844_v33 = vld [vmem:[#allocation3 + $0x3e8] sm:$0xf0]  ;;  %4451 = vmatpush.bf16.msrb.mxu0 %v13771_v28  ;;  %v13787_v40 = vor.u32 %v12200_v5, %v9716_v22  ;;  %4419 = vmatpush.bf16.msra.mxu1 %v13776_v60 }
 0x50f   :  { %15147 = vst [vmem:[#allocation201_spill] sm:$0xff] %v13779_v16  ;;  %v12216_v32 = vld [vmem:[#allocation3 + $0x364] sm:$0xf]  ;;  %v9780_v10 = vld [vmem:[#allocation3 + $0x368] sm:$0xf0]  ;;  %4477 = vmatpush.bf16.msrb.mxu2 %v13774_v52  ;;  %v13791_v1 = vor.u32 %v12232_v8, %v9844_v33 }
 0x510   :  { %15148 = vst [vmem:[#allocation202_spill] sm:$0xff] %v13785_v39  ;;  %v12182_v62 = vld [vmem:[#allocation3 + $0x254] sm:$0xf]  ;;  %v9644_v15 = vld [vmem:[#allocation3 + $0x258] sm:$0xf0]  ;;  %v13794_v43 = vor.u32 %v12216_v32, %v9780_v10  ;;  %4433 = vmatmul.bf16.vlgmr.msra.gmra.mxu2 %v13311_v53 }
 0x511   :  { %15149 = vst [vmem:[#allocation203_spill] sm:$0xff] %v13787_v40  ;;  %v12198_v21 = vld [vmem:[#allocation3 + $0x2d4] sm:$0xf]  ;;  %v9708_v57 = vld [vmem:[#allocation3 + $0x2d8] sm:$0xf0]  ;;  %4439 = vmatpush.bf16.msra.mxu3 %v13785_v39  ;;  %v13801_v38 = vor.u32 %v12182_v62, %v9644_v15  ;;  %4420 = vmatmul.bf16.vlgmr.msra.gmra.mxu1 %v13331_v34  ;;  %v4200_v39 = vpop.f32.mrf.mxu0 }
 0x512   :  { %15150 = vst [vmem:[#allocation204_spill] sm:$0xff] %v13791_v1  ;;  %4464 = vmatpush.bf16.msrb.mxu1 %v13779_v16  ;;  %v12230_v2 = vld [vmem:[#allocation3 + $0x3d4] sm:$0xf]  ;;  %v9836_v28 = vld [vmem:[#allocation3 + $0x3d8] sm:$0xf0]  ;;  %4452 = vmatpush.bf16.msrb.mxu0 %v13787_v40  ;;  %v13803_v22 = vor.u32 %v12198_v21, %v9708_v57 }
 0x513   :  { %15151 = vst [vmem:[#allocation205_spill] sm:$0xff] %v13794_v43  ;;  %v12214_v5 = vld [vmem:[#allocation3 + $0x354] sm:$0xf]  ;;  %v9772_v9 = vld [vmem:[#allocation3 + $0x358] sm:$0xf0]  ;;  %4478 = vmatpush.bf16.msrb.mxu2 %v13791_v1  ;;  %v13806_v33 = vor.u32 %v12230_v2, %v9836_v28 }
 0x514   :  { %15152 = vst [vmem:[#allocation206_spill] sm:$0xff] %v13801_v38  ;;  %v12180_v8 = vld [vmem:[#allocation3 + $0x244] sm:$0xf]  ;;  %v9636_v46 = vld [vmem:[#allocation3 + $0x248] sm:$0xf0]  ;;  %v13810_v53 = vor.u32 %v12214_v5, %v9772_v9 }
 0x515   :  { %15153 = vst [vmem:[#allocation207_spill] sm:$0xff] %v13803_v22  ;;  %v12196_v32 = vld [vmem:[#allocation3 + $0x2c4] sm:$0xf]  ;;  %v9700_v10 = vld [vmem:[#allocation3 + $0x2c8] sm:$0xf0]  ;;  %4440 = vmatpush.bf16.msra.mxu3 %v13801_v38  ;;  %v13814_v21 = vor.u32 %v12180_v8, %v9636_v46 }
 0x516   :  { %15154 = vst [vmem:[#allocation208_spill] sm:$0xff] %v13806_v33  ;;  %4465 = vmatpush.bf16.msrb.mxu1 %v13794_v43  ;;  %v12228_v49 = vld [vmem:[#allocation3 + $0x3c4] sm:$0xf]  ;;  %v9828_v40 = vld [vmem:[#allocation3 + $0x3c8] sm:$0xf0]  ;;  %4453 = vmatpush.bf16.msrb.mxu0 %v13803_v22  ;;  %v13816_v28 = vor.u32 %v12196_v32, %v9700_v10 }
 0x517   :  { %15155 = vst [vmem:[#allocation209_spill] sm:$0xff] %v13810_v53  ;;  %v12212_v62 = vld [vmem:[#allocation3 + $0x344] sm:$0xf]  ;;  %v9764_v15 = vld [vmem:[#allocation3 + $0x348] sm:$0xf0]  ;;  %4479 = vmatpush.bf16.msrb.mxu2 %v13806_v33  ;;  %v13819_v34 = vor.u32 %v12228_v49, %v9828_v40  ;;  %v4213_v49 = vpop.f32.mrf.mxu1 }
 0x518   :  { %15156 = vst [vmem:[#allocation210_spill] sm:$0xff] %v13814_v21  ;;  %v12178_v57 = vld [vmem:[#allocation3 + $0x234] sm:$0xf]  ;;  %v9628_v2 = vld [vmem:[#allocation3 + $0x238] sm:$0xf0]  ;;  %v13822_v1 = vor.u32 %v12212_v62, %v9764_v15 }
 0x519   :  { %15157 = vst [vmem:[#allocation211_spill] sm:$0xff] %v13816_v28  ;;  %v12194_v5 = vld [vmem:[#allocation3 + $0x2b4] sm:$0xf]  ;;  %v9692_v9 = vld [vmem:[#allocation3 + $0x2b8] sm:$0xf0]  ;;  %4441 = vmatpush.bf16.msra.mxu3 %v13814_v21  ;;  %v13826_v46 = vor.u32 %v12178_v57, %v9628_v2 }
 0x51a   :  { %15158 = vst [vmem:[#allocation212_spill] sm:$0xff] %v13819_v34  ;;  %4466 = vmatpush.bf16.msrb.mxu1 %v13810_v53  ;;  %v12226_v43 = vld [vmem:[#allocation3 + $0x3b4] sm:$0xf]  ;;  %v9820_v38 = vld [vmem:[#allocation3 + $0x3b8] sm:$0xf0]  ;;  %4454 = vmatpush.bf16.msrb.mxu0 %v13816_v28  ;;  %v13828_v40 = vor.u32 %v12194_v5, %v9692_v9  ;;  %v4187_v9 = vpop.f32.mrf.mxu3 }
 0x51b   :  { %15159 = vst [vmem:[#allocation213_spill] sm:$0xff] %v13822_v1  ;;  %v12210_v22 = vld [vmem:[#allocation3 + $0x334] sm:$0xf]  ;;  %v9756_v8 = vld [vmem:[#allocation3 + $0x338] sm:$0xf0]  ;;  %4480 = vmatpush.bf16.msrb.mxu2 %v13819_v34  ;;  %v13832_v62 = vor.u32 %v12226_v43, %v9820_v38  ;;  %v15166_v34 = vperm.slane %v12928_v4, 0 }
 0x51c   :  { %15160 = vst [vmem:[#allocation214_spill] sm:$0xff] %v13826_v46  ;;  %v12176_v32 = vld [vmem:[#allocation3 + $0x224] sm:$0xf]  ;;  %v9620_v15 = vld [vmem:[#allocation3 + $0x228] sm:$0xf0]  ;;  %v13835_v21 = vor.u32 %v12210_v22, %v9756_v8 }
 0x51d   :  { %15161 = vst [vmem:[#allocation215_spill] sm:$0xff] %v13828_v40  ;;  %v12192_v33 = vld [vmem:[#allocation3 + $0x2a4] sm:$0xf]  ;;  %v9684_v53 = vld [vmem:[#allocation3 + $0x2a8] sm:$0xf0]  ;;  %4442 = vmatpush.bf16.msra.mxu3 %v13826_v46  ;;  %v13839_v10 = vor.u32 %v12176_v32, %v9620_v15  ;;  %v4188_v52 = vadd.f32 %v4187_v9, %v15166_v34 }
 0x51e   :  { %15162 = vst [vmem:[#allocation216_spill] sm:$0xff] %v13832_v62  ;;  %4467 = vmatpush.bf16.msrb.mxu1 %v13822_v1  ;;  %v12224_v28 = vld [vmem:[#allocation3 + $0x3a4] sm:$0xf]  ;;  %v9812_v57 = vld [vmem:[#allocation3 + $0x3a8] sm:$0xf0]  ;;  %4455 = vmatpush.bf16.msrb.mxu0 %v13828_v40  ;;  %v13841_v43 = vor.u32 %v12192_v33, %v9684_v53  ;;  %v4226_v1 = vpop.f32.mrf.mxu2  ;;  %v4202_v53 = vpop.f32.mrf.mxu0 }
 0x51f   :  { %15163 = vst [vmem:[#allocation217_spill] sm:$0xff] %v13835_v21  ;;  %v12208_v2 = vld [vmem:[#allocation3 + $0x324] sm:$0xf]  ;;  %v9748_v5 = vld [vmem:[#allocation3 + $0x328] sm:$0xf0]  ;;  %4481 = vmatpush.bf16.msrb.mxu2 %v13832_v62  ;;  %v13846_v22 = vor.u32 %v12224_v28, %v9812_v57  ;;  %v4201_v33 = vadd.f32 %v4200_v39, %v4188_v52 }
 0x520   :  { %15164 = vst [vmem:[#allocation218_spill] sm:$0xff] %v13839_v10  ;;  %v12174_v38 = vld [vmem:[#allocation3 + $0x214] sm:$0xf]  ;;  %v9612_v8 = vld [vmem:[#allocation3 + $0x218] sm:$0xf0]  ;;  %v13849_v46 = vor.u32 %v12208_v2, %v9748_v5  ;;  %v4215_v2 = vpop.f32.mrf.mxu1 }
 0x521   :  { %15165 = vst [vmem:[#allocation219_spill] sm:$0xff] %v13841_v43  ;;  %v12190_v16 = vld [vmem:[#allocation3 + $0x294] sm:$0xf]  ;;  %v9676_v3 = vld [vmem:[#allocation3 + $0x298] sm:$0xf0]  ;;  %4443 = vmatpush.bf16.msra.mxu3 %v13839_v10  ;;  %v13853_v34 = vor.u32 %v12174_v38, %v9612_v8 }
 0x522   :  { %15167 = vst [vmem:[#allocation220_spill] sm:$0xff] %v13846_v22  ;;  %4468 = vmatpush.bf16.msrb.mxu1 %v13835_v21  ;;  %v12222_v32 = vld [vmem:[#allocation3 + $0x394] sm:$0xf]  ;;  %v9804_v15 = vld [vmem:[#allocation3 + $0x398] sm:$0xf0]  ;;  %4456 = vmatpush.bf16.msrb.mxu0 %v13841_v43  ;;  %v13855_v28 = vor.u32 %v12190_v16, %v9676_v3  ;;  %v4214_v21 = vadd.f32 %v4213_v49, %v4201_v33  ;;  %v4189_v33 = vpop.f32.mrf.mxu3 }
 0x523   :  { %15168 = vst [vmem:[#allocation221_spill] sm:$0xff] %v13849_v46  ;;  %v12206_v40 = vld [vmem:[#allocation3 + $0x314] sm:$0xf]  ;;  %v9740_v56 = vld [vmem:[#allocation3 + $0x318] sm:$0xf0]  ;;  %4482 = vmatpush.bf16.msrb.mxu2 %v13846_v22  ;;  %v13858_v5 = vor.u32 %v12222_v32, %v9804_v15 }
 0x524   :  { %15169 = vst [vmem:[#allocation222_spill] sm:$0xff] %v13853_v34  ;;  %v12172_v57 = vld [vmem:[#allocation3 + $0x204] sm:$0xf]  ;;  %v9604_v9 = vld [vmem:[#allocation3 + $0x208] sm:$0xf0]  ;;  %v13861_v10 = vor.u32 %v12206_v40, %v9740_v56  ;;  %v13863_v16 = vadd.f32 %v4226_v1, %v4214_v21 }
 0x525   :  { %15170 = vst [vmem:[#allocation223_spill] sm:$0xff] %v13855_v28  ;;  %v12188_v62 = vld [vmem:[#allocation3 + $0x284] sm:$0xf]  ;;  %v9668_v52 = vld [vmem:[#allocation3 + $0x288] sm:$0xf0]  ;;  %4444 = vmatpush.bf16.msra.mxu3 %v13853_v34  ;;  %v13867_v32 = vor.u32 %v12172_v57, %v9604_v9 }
 0x526   :  { %15171 = vst [vmem:[#allocation224_spill] sm:$0xff] %v13858_v5  ;;  %v12220_v39 = vld [vmem:[#allocation3 + $0x384] sm:$0xf]  ;;  %v9796_v53 = vld [vmem:[#allocation3 + $0x388] sm:$0xf0]  ;;  %4469 = vmatpush.bf16.msrb.mxu1 %v13849_v46  ;;  %4457 = vmatpush.bf16.msrb.mxu0 %v13855_v28  ;;  %v13869_v15 = vor.u32 %v12188_v62, %v9668_v52  ;;  %v4228_v40 = vpop.f32.mrf.mxu2 }
 0x527   :  { %v12250_v38 = vld [vmem:[#allocation3 + $0x474] sm:$0xf]  ;;  %v9916_v8 = vld [vmem:[#allocation3 + $0x478] sm:$0xf0]  ;;  %v12204_v2 = vld [vmem:[#allocation3 + $0x304] sm:$0xf]  ;;  %4483 = vmatpush.bf16.msrb.mxu2 %v13858_v5  ;;  %v13872_v22 = vor.u32 %v12220_v39, %v9796_v53 }
 0x528   :  { %v12266_v3 = vld [vmem:[#allocation3 + $0x4f4] sm:$0xf]  ;;  %v9980_v43 = vld [vmem:[#allocation3 + $0x4f8] sm:$0xf0]  ;;  %v9732_v56 = vld [vmem:[#allocation3 + $0x308] sm:$0xf0]  ;;  %v13874_v1 = vor.u32 %v12250_v38, %v9916_v8 }
 0x529   :  { %v12298_v60 = vld [vmem:[#allocation3 + $0x5f4] sm:$0xf]  ;;  %v10108_v49 = vld [vmem:[#allocation3 + $0x5f8] sm:$0xf0]  ;;  %15172 = vst [vmem:[#allocation225_spill] sm:$0xff] %v13872_v22  ;;  %v13877_v33 = vor.u32 %v12266_v3, %v9980_v43  ;;  %v13881_v52 = vor.u32 %v12204_v2, %v9732_v56  ;;  %4445 = vmatpush.bf16.msra.mxu3 %v13867_v32 }
 0x52a   :  { %15173 = vst [vmem:[#allocation226_spill] sm:$0xff] %v13874_v1  ;;  %v12282_v21 = vld [vmem:[#allocation3 + $0x574] sm:$0xf]  ;;  %v10044_v46 = vld [vmem:[#allocation3 + $0x578] sm:$0xf0]  ;;  %4470 = vmatpush.bf16.msrb.mxu1 %v13861_v10  ;;  %v13879_v28 = vor.u32 %v12298_v60, %v10108_v49  ;;  %4458 = vmatpush.bf16.msrb.mxu0 %v13869_v15 }
 0x52b   :  { %15174 = vst [vmem:[#allocation227_spill] sm:$0xff] %v13877_v33  ;;  %v12248_v57 = vld [vmem:[#allocation3 + $0x464] sm:$0xf]  ;;  %v9908_v62 = vld [vmem:[#allocation3 + $0x468] sm:$0xf0]  ;;  %v13885_v39 = vor.u32 %v12282_v21, %v10044_v46  ;;  %4484 = vmatpush.bf16.msrb.mxu2 %v13872_v22 }
 0x52c   :  { %15175 = vst [vmem:[#allocation228_spill] sm:$0xff] %v13879_v28  ;;  %v12264_v9 = vld [vmem:[#allocation3 + $0x4e4] sm:$0xf]  ;;  %v9972_v40 = vld [vmem:[#allocation3 + $0x4e8] sm:$0xf0]  ;;  %v13889_v60 = vor.u32 %v12248_v57, %v9908_v62  ;;  %4446 = vmatmul.bf16.vlgmr.msra.gmra.mxu3 %v13421_v63 }
 0x52d   :  { %v12296_v34 = vld [vmem:[#allocation3 + $0x5e4] sm:$0xf]  ;;  %v10100_v5 = vld [vmem:[#allocation3 + $0x5e8] sm:$0xf0]  ;;  %15176 = vst [vmem:[#allocation229_spill] sm:$0xff] %v13885_v39  ;;  %4490 = vmatpush.bf16.msrb.mxu3 %v13874_v1  ;;  %v13893_v38 = vor.u32 %v12264_v9, %v9972_v40  ;;  %4459 = vmatmul.bf16.vlgmr.msrb.gmra.mxu0 %v13439_v50 }
 0x52e   :  { %15177 = vst [vmem:[#allocation230_spill] sm:$0xff] %v13889_v60  ;;  %v12280_v43 = vld [vmem:[#allocation3 + $0x564] sm:$0xf]  ;;  %v10036_v53 = vld [vmem:[#allocation3 + $0x568] sm:$0xf0]  ;;  %4503 = vmatpush.bf16.msra.mxu0 %v13877_v33  ;;  %v13895_v8 = vor.u32 %v12296_v34, %v10100_v5  ;;  %4471 = vmatpush.bf16.msrb.mxu1 %v13881_v52 }
 0x52f   :  { %4529 = vmatpush.bf16.msra.mxu2 %v13879_v28  ;;  %15178 = vst [vmem:[#allocation231_spill] sm:$0xff] %v13893_v38  ;;  %v12246_v3 = vld [vmem:[#allocation3 + $0x454] sm:$0xf]  ;;  %v9900_v49 = vld [vmem:[#allocation3 + $0x458] sm:$0xf0]  ;;  %v13900_v57 = vor.u32 %v12280_v43, %v10036_v53 }
 0x530   :  { %15179 = vst [vmem:[#allocation232_spill] sm:$0xff] %v13895_v8  ;;  %v12262_v46 = vld [vmem:[#allocation3 + $0x4d4] sm:$0xf]  ;;  %v9964_v2 = vld [vmem:[#allocation3 + $0x4d8] sm:$0xf0]  ;;  %4485 = vmatmul.bf16.vlgmr.msrb.gmra.mxu2 %v13430_v30  ;;  %v13904_v34 = vor.u32 %v12246_v3, %v9900_v49 }
 0x531   :  { %v12294_v56 = vld [vmem:[#allocation3 + $0x5d4] sm:$0xf]  ;;  %v10092_v21 = vld [vmem:[#allocation3 + $0x5d8] sm:$0xf0]  ;;  %15180 = vst [vmem:[#allocation233_spill] sm:$0xff] %v13900_v57  ;;  %4491 = vmatpush.bf16.msrb.mxu3 %v13889_v60  ;;  %v13909_v63 = vor.u32 %v12262_v46, %v9964_v2  ;;  %4472 = vmatmul.bf16.vlgmr.msrb.gmra.mxu1 %v13452_v29 }
 0x532   :  { %4516 = vmatpush.bf16.msra.mxu1 %v13885_v39  ;;  %15181 = vst [vmem:[#allocation234_spill] sm:$0xff] %v13904_v34  ;;  %v12278_v5 = vld [vmem:[#allocation3 + $0x554] sm:$0xf]  ;;  %v10028_v62 = vld [vmem:[#allocation3 + $0x558] sm:$0xf0]  ;;  %4504 = vmatpush.bf16.msra.mxu0 %v13893_v38  ;;  %v13911_v9 = vor.u32 %v12294_v56, %v10092_v21 }
 0x533   :  { %4530 = vmatpush.bf16.msra.mxu2 %v13895_v8  ;;  %15182 = vst [vmem:[#allocation235_spill] sm:$0xff] %v13909_v63  ;;  %v12244_v40 = vld [vmem:[#allocation3 + $0x444] sm:$0xf]  ;;  %v9892_v43 = vld [vmem:[#allocation3 + $0x448] sm:$0xf0]  ;;  %v13915_v3 = vor.u32 %v12278_v5, %v10028_v62 }
 0x534   :  { %15183 = vst [vmem:[#allocation236_spill] sm:$0xff] %v13911_v9  ;;  %v12260_v53 = vld [vmem:[#allocation3 + $0x4c4] sm:$0xf]  ;;  %v9956_v30 = vld [vmem:[#allocation3 + $0x4c8] sm:$0xf0]  ;;  %v13918_v50 = vor.u32 %v12244_v40, %v9892_v43  ;;  %v4252_v43 = vpop.f32.mrf.mxu0 }
 0x535   :  { %v12292_v28 = vld [vmem:[#allocation3 + $0x5c4] sm:$0xf]  ;;  %v10084_v60 = vld [vmem:[#allocation3 + $0x5c8] sm:$0xf0]  ;;  %15184 = vst [vmem:[#allocation237_spill] sm:$0xff] %v13915_v3  ;;  %4492 = vmatpush.bf16.msrb.mxu3 %v13904_v34  ;;  %v13922_v2 = vor.u32 %v12260_v53, %v9956_v30 }
 0x536   :  { %4517 = vmatpush.bf16.msra.mxu1 %v13900_v57  ;;  %15185 = vst [vmem:[#allocation238_spill] sm:$0xff] %v13918_v50  ;;  %v12276_v49 = vld [vmem:[#allocation3 + $0x544] sm:$0xf]  ;;  %v10020_v46 = vld [vmem:[#allocation3 + $0x548] sm:$0xf0]  ;;  %4505 = vmatpush.bf16.msra.mxu0 %v13909_v63  ;;  %v13924_v56 = vor.u32 %v12292_v28, %v10084_v60 }
 0x537   :  { %4531 = vmatpush.bf16.msra.mxu2 %v13911_v9  ;;  %15186 = vst [vmem:[#allocation239_spill] sm:$0xff] %v13922_v2  ;;  %v12242_v21 = vld [vmem:[#allocation3 + $0x434] sm:$0xf]  ;;  %v9884_v29 = vld [vmem:[#allocation3 + $0x438] sm:$0xf0]  ;;  %v13927_v40 = vor.u32 %v12276_v49, %v10020_v46  ;;  %v4265_v49 = vpop.f32.mrf.mxu1 }
 0x538   :  { %15187 = vst [vmem:[#allocation240_spill] sm:$0xff] %v13924_v56  ;;  %v12258_v8 = vld [vmem:[#allocation3 + $0x4b4] sm:$0xf]  ;;  %v9948_v57 = vld [vmem:[#allocation3 + $0x4b8] sm:$0xf0]  ;;  %v13930_v63 = vor.u32 %v12242_v21, %v9884_v29  ;;  %v4239_v29 = vpop.f32.mrf.mxu3 }
 0x539   :  { %v12290_v5 = vld [vmem:[#allocation3 + $0x5b4] sm:$0xf]  ;;  %v10076_v62 = vld [vmem:[#allocation3 + $0x5b8] sm:$0xf0]  ;;  %15188 = vst [vmem:[#allocation241_spill] sm:$0xff] %v13927_v40  ;;  %4493 = vmatpush.bf16.msrb.mxu3 %v13918_v50  ;;  %v13934_v28 = vor.u32 %v12258_v8, %v9948_v57 }
 0x53a   :  { %4518 = vmatpush.bf16.msra.mxu1 %v13915_v3  ;;  %15189 = vst [vmem:[#allocation242_spill] sm:$0xff] %v13930_v63  ;;  %v12274_v9 = vld [vmem:[#allocation3 + $0x534] sm:$0xf]  ;;  %v10012_v53 = vld [vmem:[#allocation3 + $0x538] sm:$0xf0]  ;;  %4506 = vmatpush.bf16.msra.mxu0 %v13922_v2  ;;  %v13936_v60 = vor.u32 %v12290_v5, %v10076_v62  ;;  %v4240_v5 = vadd.f32 %v4239_v29, %v13863_v16  ;;  %v4278_v62 = vpop.f32.mrf.mxu2 }
 0x53b   :  { %4532 = vmatpush.bf16.msra.mxu2 %v13924_v56  ;;  %15190 = vst [vmem:[#allocation243_spill] sm:$0xff] %v13934_v28  ;;  %v12240_v30 = vld [vmem:[#allocation3 + $0x424] sm:$0xf]  ;;  %v9876_v34 = vld [vmem:[#allocation3 + $0x428] sm:$0xf0]  ;;  %v13939_v21 = vor.u32 %v12274_v9, %v10012_v53 }
 0x53c   :  { %15191 = vst [vmem:[#allocation244_spill] sm:$0xff] %v13936_v60  ;;  %v12256_v3 = vld [vmem:[#allocation3 + $0x4a4] sm:$0xf]  ;;  %v9940_v46 = vld [vmem:[#allocation3 + $0x4a8] sm:$0xf0]  ;;  %v13942_v2 = vor.u32 %v12240_v30, %v9876_v34  ;;  %v4253_v30 = vadd.f32 %v4252_v43, %v4240_v5  ;;  %v4254_v29 = vpop.f32.mrf.mxu0 }
 0x53d   :  { %v12288_v38 = vld [vmem:[#allocation3 + $0x5a4] sm:$0xf]  ;;  %v10068_v39 = vld [vmem:[#allocation3 + $0x5a8] sm:$0xf0]  ;;  %15192 = vst [vmem:[#allocation245_spill] sm:$0xff] %v13939_v21  ;;  %4494 = vmatpush.bf16.msrb.mxu3 %v13930_v63  ;;  %v13947_v56 = vor.u32 %v12256_v3, %v9940_v46 }
 0x53e   :  { %4519 = vmatpush.bf16.msra.mxu1 %v13927_v40  ;;  %15193 = vst [vmem:[#allocation246_spill] sm:$0xff] %v13942_v2  ;;  %v12272_v8 = vld [vmem:[#allocation3 + $0x524] sm:$0xf]  ;;  %v10004_v57 = vld [vmem:[#allocation3 + $0x528] sm:$0xf0]  ;;  %4507 = vmatpush.bf16.msra.mxu0 %v13934_v28  ;;  %v13949_v50 = vor.u32 %v12288_v38, %v10068_v39  ;;  %v4266_v39 = vadd.f32 %v4265_v49, %v4253_v30 }
 0x53f   :  { %4533 = vmatpush.bf16.msra.mxu2 %v13936_v60  ;;  %15194 = vst [vmem:[#allocation247_spill] sm:$0xff] %v13947_v56  ;;  %v12238_v9 = vld [vmem:[#allocation3 + $0x414] sm:$0xf]  ;;  %v9868_v53 = vld [vmem:[#allocation3 + $0x418] sm:$0xf0]  ;;  %v13952_v1 = vor.u32 %v12272_v8, %v10004_v57  ;;  %v4267_v29 = vpop.f32.mrf.mxu1 }
 0x540   :  { %15195 = vst [vmem:[#allocation248_spill] sm:$0xff] %v13949_v50  ;;  %v12254_v40 = vld [vmem:[#allocation3 + $0x494] sm:$0xf]  ;;  %v9932_v33 = vld [vmem:[#allocation3 + $0x498] sm:$0xf0]  ;;  %v13955_v60 = vor.u32 %v12238_v9, %v9868_v53 }
 0x541   :  { %v12286_v63 = vld [vmem:[#allocation3 + $0x594] sm:$0xf]  ;;  %v10060_v34 = vld [vmem:[#allocation3 + $0x598] sm:$0xf0]  ;;  %15196 = vst [vmem:[#allocation249_spill] sm:$0xff] %v13952_v1  ;;  %4495 = vmatpush.bf16.msrb.mxu3 %v13942_v2  ;;  %v13959_v28 = vor.u32 %v12254_v40, %v9932_v33  ;;  %v13963_v2 = vadd.f32 %v4278_v62, %v4266_v39  ;;  %v4241_v33 = vpop.f32.mrf.mxu3 }
 0x542   :  { %4520 = vmatpush.bf16.msra.mxu1 %v13939_v21  ;;  %v12270_v16 = vld [vmem:[#allocation3 + $0x514] sm:$0xf]  ;;  %15197 = vst [vmem:[#allocation250_spill] sm:$0xff] %v13955_v60  ;;  %v9996_v3 = vld [vmem:[#allocation3 + $0x518] sm:$0xf0]  ;;  %4508 = vmatpush.bf16.msra.mxu0 %v13947_v56  ;;  %v13961_v43 = vor.u32 %v12286_v63, %v10060_v34  ;;  %v4280_v22 = vpop.f32.mrf.mxu2 }
 0x543   :  { %v12236_v38 = vld [vmem:[#allocation3 + $0x404] sm:$0xf]  ;;  %v9860_v46 = vld [vmem:[#allocation3 + $0x408] sm:$0xf0]  ;;  %4534 = vmatpush.bf16.msra.mxu2 %v13949_v50  ;;  %15198 = vst [vmem:[#allocation251_spill] sm:$0xff] %v13959_v28  ;;  %v13966_v49 = vor.u32 %v12270_v16, %v9996_v3 }
 0x544   :  { %15199 = vst [vmem:[#allocation252_spill] sm:$0xff] %v13961_v43  ;;  %v12252_v8 = vld [vmem:[#allocation3 + $0x484] sm:$0xf]  ;;  %v9924_v57 = vld [vmem:[#allocation3 + $0x488] sm:$0xf0]  ;;  %v13969_v63 = vor.u32 %v12236_v38, %v9860_v46 }
 0x545   :  { %v12284_v5 = vld [vmem:[#allocation3 + $0x584] sm:$0xf]  ;;  %v10052_v21 = vld [vmem:[#allocation3 + $0x588] sm:$0xf0]  ;;  %v12314_v9 = vld [vmem:[#allocation3 + $0x674] sm:$0xf]  ;;  %4496 = vmatpush.bf16.msrb.mxu3 %v13955_v60  ;;  %v13973_v62 = vor.u32 %v12252_v8, %v9924_v57 }
 0x546   :  { %v10172_v53 = vld [vmem:[#allocation3 + $0x678] sm:$0xf0]  ;;  %4521 = vmatpush.bf16.msra.mxu1 %v13952_v1  ;;  %v12330_v30 = vld [vmem:[#allocation3 + $0x6f4] sm:$0xf]  ;;  %v12268_v34 = vld [vmem:[#allocation3 + $0x504] sm:$0xf]  ;;  %4509 = vmatpush.bf16.msra.mxu0 %v13959_v28  ;;  %v13975_v16 = vor.u32 %v12284_v5, %v10052_v21 }
 0x547   :  { %v10236_v56 = vld [vmem:[#allocation3 + $0x6f8] sm:$0xf0]  ;;  %v12362_v50 = vld [vmem:[#allocation3 + $0x7f4] sm:$0xf]  ;;  %v9988_v29 = vld [vmem:[#allocation3 + $0x508] sm:$0xf0]  ;;  %4535 = vmatpush.bf16.msra.mxu2 %v13961_v43  ;;  %v13977_v1 = vor.u32 %v12314_v9, %v10172_v53 }
 0x548   :  { %v10364_v40 = vld [vmem:[#allocation3 + $0x7f8] sm:$0xf0]  ;;  %v12346_v3 = vld [vmem:[#allocation3 + $0x774] sm:$0xf]  ;;  %v13979_v33 = vor.u32 %v12330_v30, %v10236_v56  ;;  %v12312_v38 = vld [vmem:[#allocation3 + $0x664] sm:$0xf]  ;;  %v13984_v22 = vor.u32 %v12268_v34, %v9988_v29 }
 0x549   :  { %v10300_v39 = vld [vmem:[#allocation3 + $0x778] sm:$0xf0]  ;;  %15200 = vst [vmem:[#allocation253_spill] sm:$0xff] %v13977_v1  ;;  %v13982_v46 = vor.u32 %v12362_v50, %v10364_v40  ;;  %v10164_v28 = vld [vmem:[#allocation3 + $0x668] sm:$0xf0]  ;;  %4497 = vmatpush.bf16.msrb.mxu3 %v13969_v63 }
 0x54a   :  { %15201 = vst [vmem:[#allocation254_spill] sm:$0xff] %v13979_v33  ;;  %4522 = vmatpush.bf16.msra.mxu1 %v13966_v49  ;;  %v12328_v60 = vld [vmem:[#allocation3 + $0x6e4] sm:$0xf]  ;;  %v10228_v43 = vld [vmem:[#allocation3 + $0x6e8] sm:$0xf0]  ;;  %v13987_v21 = vor.u32 %v12346_v3, %v10300_v39  ;;  %4510 = vmatpush.bf16.msra.mxu0 %v13973_v62  ;;  %v13993_v50 = vor.u32 %v12312_v38, %v10164_v28 }
 0x54b   :  { %15202 = vst [vmem:[#allocation255_spill] sm:$0xff] %v13982_v46  ;;  %v12360_v8 = vld [vmem:[#allocation3 + $0x7e4] sm:$0xf]  ;;  %v10356_v57 = vld [vmem:[#allocation3 + $0x7e8] sm:$0xf0]  ;;  %4536 = vmatpush.bf16.msra.mxu2 %v13975_v16  ;;  %v13995_v9 = vor.u32 %v12328_v60, %v10228_v43 }
 0x54c   :  { %15203 = vst [vmem:[#allocation256_spill] sm:$0xff] %v13987_v21  ;;  %v12344_v56 = vld [vmem:[#allocation3 + $0x764] sm:$0xf]  ;;  %v10292_v5 = vld [vmem:[#allocation3 + $0x768] sm:$0xf0]  ;;  %v13999_v30 = vor.u32 %v12360_v8, %v10356_v57  ;;  %4498 = vmatmul.bf16.vlgmr.msrb.gmra.mxu3 %v13542_v45 }
 0x54d   :  { %4542 = vmatpush.bf16.msra.mxu3 %v13977_v1  ;;  %15204 = vst [vmem:[#allocation257_spill] sm:$0xff] %v13993_v50  ;;  %v12310_v53 = vld [vmem:[#allocation3 + $0x654] sm:$0xf]  ;;  %v10156_v40 = vld [vmem:[#allocation3 + $0x658] sm:$0xf0]  ;;  %v14003_v3 = vor.u32 %v12344_v56, %v10292_v5  ;;  %4511 = vmatmul.bf16.vlgmr.msra.gmra.mxu0 %v13556_v17 }
 0x54e   :  { %4555 = vmatpush.bf16.msrb.mxu0 %v13979_v33  ;;  %15205 = vst [vmem:[#allocation258_spill] sm:$0xff] %v13995_v9  ;;  %4523 = vmatpush.bf16.msra.mxu1 %v13984_v22  ;;  %v12326_v34 = vld [vmem:[#allocation3 + $0x6d4] sm:$0xf]  ;;  %v10220_v29 = vld [vmem:[#allocation3 + $0x6d8] sm:$0xf0]  ;;  %v14009_v38 = vor.u32 %v12310_v53, %v10156_v40 }
 0x54f   :  { %4581 = vmatpush.bf16.msrb.mxu2 %v13982_v46  ;;  %15206 = vst [vmem:[#allocation259_spill] sm:$0xff] %v13999_v30  ;;  %v12358_v28 = vld [vmem:[#allocation3 + $0x7d4] sm:$0xf]  ;;  %v10348_v39 = vld [vmem:[#allocation3 + $0x7d8] sm:$0xf0]  ;;  %v14011_v8 = vor.u32 %v12326_v34, %v10220_v29  ;;  %v4304_v46 = vpop.f32.mrf.mxu0 }
 0x550   :  { %15207 = vst [vmem:[#allocation260_spill] sm:$0xff] %v14003_v3  ;;  %4537 = vmatmul.bf16.vlgmr.msra.gmra.mxu2 %v13551_v13  ;;  %v12342_v60 = vld [vmem:[#allocation3 + $0x754] sm:$0xf]  ;;  %v10284_v43 = vld [vmem:[#allocation3 + $0x758] sm:$0xf0]  ;;  %v14014_v57 = vor.u32 %v12358_v28, %v10348_v39 }
 0x551   :  { %4543 = vmatpush.bf16.msra.mxu3 %v13993_v50  ;;  %15208 = vst [vmem:[#allocation261_spill] sm:$0xff] %v14009_v38  ;;  %v12308_v45 = vld [vmem:[#allocation3 + $0x644] sm:$0xf]  ;;  %4524 = vmatmul.bf16.vlgmr.msra.gmra.mxu1 %v13571_v20  ;;  %v10148_v13 = vld [vmem:[#allocation3 + $0x648] sm:$0xf0]  ;;  %v14018_v5 = vor.u32 %v12342_v60, %v10284_v43 }
 0x552   :  { %4568 = vmatpush.bf16.msrb.mxu1 %v13987_v21  ;;  %4556 = vmatpush.bf16.msrb.mxu0 %v13995_v9  ;;  %15209 = vst [vmem:[#allocation262_spill] sm:$0xff] %v14011_v8  ;;  %v12324_v56 = vld [vmem:[#allocation3 + $0x6c4] sm:$0xf]  ;;  %v10212_v17 = vld [vmem:[#allocation3 + $0x6c8] sm:$0xf0]  ;;  %v14022_v34 = vor.u32 %v12308_v45, %v10148_v13 }
 0x553   :  { %4582 = vmatpush.bf16.msrb.mxu2 %v13999_v30  ;;  %15210 = vst [vmem:[#allocation263_spill] sm:$0xff] %v14014_v57  ;;  %v12356_v50 = vld [vmem:[#allocation3 + $0x7c4] sm:$0xf]  ;;  %v10340_v9 = vld [vmem:[#allocation3 + $0x7c8] sm:$0xf0]  ;;  %v14024_v29 = vor.u32 %v12324_v56, %v10212_v17  ;;  %v4317_v56 = vpop.f32.mrf.mxu1 }
 0x554   :  { %15211 = vst [vmem:[#allocation264_spill] sm:$0xff] %v14018_v5  ;;  %v12340_v53 = vld [vmem:[#allocation3 + $0x744] sm:$0xf]  ;;  %v10276_v40 = vld [vmem:[#allocation3 + $0x748] sm:$0xf0]  ;;  %v14027_v28 = vor.u32 %v12356_v50, %v10340_v9 }
 0x555   :  { %4544 = vmatpush.bf16.msra.mxu3 %v14009_v38  ;;  %15212 = vst [vmem:[#allocation265_spill] sm:$0xff] %v14022_v34  ;;  %v12306_v20 = vld [vmem:[#allocation3 + $0x634] sm:$0xf]  ;;  %v10140_v39 = vld [vmem:[#allocation3 + $0x638] sm:$0xf0]  ;;  %v14030_v30 = vor.u32 %v12340_v53, %v10276_v40 }
 0x556   :  { %4569 = vmatpush.bf16.msrb.mxu1 %v14003_v3  ;;  %4557 = vmatpush.bf16.msrb.mxu0 %v14011_v8  ;;  %15213 = vst [vmem:[#allocation266_spill] sm:$0xff] %v14024_v29  ;;  %v12322_v60 = vld [vmem:[#allocation3 + $0x6b4] sm:$0xf]  ;;  %v10204_v43 = vld [vmem:[#allocation3 + $0x6b8] sm:$0xf0]  ;;  %v14034_v13 = vor.u32 %v12306_v20, %v10140_v39 }
 0x557   :  { %4583 = vmatpush.bf16.msrb.mxu2 %v14014_v57  ;;  %15214 = vst [vmem:[#allocation267_spill] sm:$0xff] %v14027_v28  ;;  %v12354_v3 = vld [vmem:[#allocation3 + $0x7b4] sm:$0xf]  ;;  %v10332_v38 = vld [vmem:[#allocation3 + $0x7b8] sm:$0xf0]  ;;  %v14036_v50 = vor.u32 %v12322_v60, %v10204_v43  ;;  %v4330_v43 = vpop.f32.mrf.mxu2 }
 0x558   :  { %15215 = vst [vmem:[#allocation268_spill] sm:$0xff] %v14030_v30  ;;  %v12338_v8 = vld [vmem:[#allocation3 + $0x734] sm:$0xf]  ;;  %v10268_v45 = vld [vmem:[#allocation3 + $0x738] sm:$0xf0]  ;;  %v14039_v17 = vor.u32 %v12354_v3, %v10332_v38 }
 0x559   :  { %4545 = vmatpush.bf16.msra.mxu3 %v14022_v34  ;;  %15216 = vst [vmem:[#allocation269_spill] sm:$0xff] %v14034_v13  ;;  %v12304_v9 = vld [vmem:[#allocation3 + $0x624] sm:$0xf]  ;;  %v10132_v53 = vld [vmem:[#allocation3 + $0x628] sm:$0xf0] }
 0x55a   :  { %4570 = vmatpush.bf16.msrb.mxu1 %v14018_v5  ;;  %4558 = vmatpush.bf16.msrb.mxu0 %v14024_v29  ;;  %15217 = vst [vmem:[#allocation270_spill] sm:$0xff] %v14036_v50  ;;  %v12320_v40 = vld [vmem:[#allocation3 + $0x6a4] sm:$0xf]  ;;  %v10196_v57 = vld [vmem:[#allocation3 + $0x6a8] sm:$0xf0]  ;;  %v14042_v5 = vor.u32 %v12338_v8, %v10268_v45  ;;  %v4291_v29 = vpop.f32.mrf.mxu3  ;;  %v14047_v3 = vor.u32 %v12304_v9, %v10132_v53 }
 0x55b   :  { %4584 = vmatpush.bf16.msrb.mxu2 %v14027_v28  ;;  %15218 = vst [vmem:[#allocation271_spill] sm:$0xff] %v14039_v17  ;;  %v12352_v34 = vld [vmem:[#allocation3 + $0x7a4] sm:$0xf]  ;;  %v10324_v21 = vld [vmem:[#allocation3 + $0x7a8] sm:$0xf0]  ;;  %v4292_v60 = vadd.f32 %v4291_v29, %v13963_v2  ;;  %v14049_v38 = vor.u32 %v12320_v40, %v10196_v57  ;;  %v4306_v29 = vpop.f32.mrf.mxu0 }
 0x55c   :  { %v12336_v20 = vld [vmem:[#allocation3 + $0x724] sm:$0xf]  ;;  %v10260_v39 = vld [vmem:[#allocation3 + $0x728] sm:$0xf0]  ;;  %15219 = vst [vmem:[#allocation272_spill] sm:$0xff] %v14047_v3  ;;  %v14052_v8 = vor.u32 %v12352_v34, %v10324_v21 }
 0x55d   :  { %4546 = vmatpush.bf16.msra.mxu3 %v14034_v13  ;;  %15220 = vst [vmem:[#allocation273_spill] sm:$0xff] %v14049_v38  ;;  %v12302_v28 = vld [vmem:[#allocation3 + $0x614] sm:$0xf]  ;;  %v10124_v45 = vld [vmem:[#allocation3 + $0x618] sm:$0xf0]  ;;  %v4305_v13 = vadd.f32 %v4304_v46, %v4292_v60  ;;  %v14055_v1 = vor.u32 %v12336_v20, %v10260_v39 }
 0x55e   :  { %4571 = vmatpush.bf16.msrb.mxu1 %v14030_v30  ;;  %4559 = vmatpush.bf16.msrb.mxu0 %v14036_v50  ;;  %v12318_v30 = vld [vmem:[#allocation3 + $0x694] sm:$0xf]  ;;  %v10188_v33 = vld [vmem:[#allocation3 + $0x698] sm:$0xf0]  ;;  %v14059_v21 = vor.u32 %v12302_v28, %v10124_v45  ;;  %v12300_v40 = vld [vmem:[#allocation3 + $0x604] sm:$0xf] }
 0x55f   :  { %4585 = vmatpush.bf16.msrb.mxu2 %v14039_v17  ;;  %v12350_v50 = vld [vmem:[#allocation3 + $0x794] sm:$0xf]  ;;  %v10316_v2 = vld [vmem:[#allocation3 + $0x798] sm:$0xf0]  ;;  %v4318_v53 = vadd.f32 %v4317_v56, %v4305_v13  ;;  %v14061_v34 = vor.u32 %v12318_v30, %v10188_v33  ;;  %v4319_v17 = vpop.f32.mrf.mxu1  ;;  %v10116_v20 = vld [vmem:[#allocation3 + $0x608] sm:$0xf0] }
 0x560   :  { %v12334_v9 = vld [vmem:[#allocation3 + $0x714] sm:$0xf]  ;;  %v10252_v57 = vld [vmem:[#allocation3 + $0x718] sm:$0xf0]  ;;  %v14064_v46 = vor.u32 %v12350_v50, %v10316_v2  ;;  %v12316_v39 = vld [vmem:[#allocation3 + $0x684] sm:$0xf]  ;;  %v14071_v30 = vor.u32 %v12300_v40, %v10116_v20  ;;  %v4332_v17 = vpop.f32.mrf.mxu2 }
 0x561   :  { %4547 = vmatpush.bf16.msra.mxu3 %v14047_v3  ;;  %v10180_v60 = vld [vmem:[#allocation3 + $0x688] sm:$0xf0]  ;;  %v4331_v29 = vadd.f32 %v4330_v43, %v4318_v53  ;;  %v14067_v3 = vor.u32 %v12334_v9, %v10252_v57  ;;  %v12332_v28 = vld [vmem:[#allocation3 + $0x704] sm:$0xf] }
 0x562   :  { %4572 = vmatpush.bf16.msrb.mxu1 %v14042_v5  ;;  %4560 = vmatpush.bf16.msrb.mxu0 %v14049_v38  ;;  %v12348_v38 = vld [vmem:[#allocation3 + $0x784] sm:$0xf]  ;;  %v10308_v13 = vld [vmem:[#allocation3 + $0x788] sm:$0xf0]  ;;  %v4293_v33 = vpop.f32.mrf.mxu3  ;;  %v14073_v50 = vor.u32 %v12316_v39, %v10180_v60 }
 0x563   :  { %4586 = vmatpush.bf16.msrb.mxu2 %v14052_v8  ;;  %v10244_v56 = vld [vmem:[#allocation3 + $0x708] sm:$0xf0]  ;;  %v14076_v45 = vor.u32 %v12348_v38, %v10308_v13 }
 0x564   :  { %v14079_v43 = vor.u32 %v12332_v28, %v10244_v56 }
 0x565   :  { %4548 = vmatpush.bf16.msra.mxu3 %v14059_v21 }
 0x566   :  { %4573 = vmatpush.bf16.msrb.mxu1 %v14055_v1  ;;  %4561 = vmatpush.bf16.msrb.mxu0 %v14061_v34 }
 0x567   :  { %4587 = vmatpush.bf16.msrb.mxu2 %v14064_v46 }
 0x569   :  { %4549 = vmatpush.bf16.msra.mxu3 %v14071_v30 }
 0x56a   :  { %4574 = vmatpush.bf16.msrb.mxu1 %v14067_v3  ;;  %4562 = vmatpush.bf16.msrb.mxu0 %v14073_v50 }
 0x56b   :  { %4588 = vmatpush.bf16.msrb.mxu2 %v14076_v45 }
 0x56c   :  { %4550 = vmatmul.bf16.vlgmr.msra.gmra.mxu3 %v13661_v42  ;;  %v15231_v42 = vld [vmem:[#allocation34_spill] sm:$0xff] }
 0x56d   :  { %4637 = vmatpush.bf16.msrb.mxu3 %v12930_v23  ;;  %4563 = vmatmul.bf16.vlgmr.msrb.gmra.mxu0 %v13679_v19  ;;  %v4356_v23 = vpop.f32.mrf.mxu0  ;;  %v14945_v19 = vperm.slane %v12928_v4, 1 }
 0x56e   :  { %4575 = vmatpush.bf16.msrb.mxu1 %v14079_v43  ;;  %4650 = vmatpush.bf16.msra.mxu0 %v12940_v36 }
 0x56f   :  { %4589 = vmatmul.bf16.vlgmr.msrb.gmra.mxu2 %v13670_v41 }
 0x570   :  { %4676 = vmatpush.bf16.msra.mxu2 %v12942_v37 }
 0x571   :  { %4576 = vmatmul.bf16.vlgmr.msrb.gmra.mxu1 %v13692_v54  ;;  %4638 = vmatpush.bf16.msrb.mxu3 %v12935_v31  ;;  %v4343_v31 = vpop.f32.mrf.mxu3  ;;  %v15230_v54 = vld [vmem:[#allocation30_spill] sm:$0xff] }
 0x572   :  { %4663 = vmatpush.bf16.msra.mxu1 %v12932_v27  ;;  %4651 = vmatpush.bf16.msra.mxu0 %v12946_v44  ;;  %v4369_v27 = vpop.f32.mrf.mxu1 }
 0x573   :  { %v4382_v36 = vpop.f32.mrf.mxu2 }
 0x574   :  { %4677 = vmatpush.bf16.msra.mxu2 %v12951_v48 }
 0x575   :  { %4639 = vmatpush.bf16.msrb.mxu3 %v12949_v47  ;;  %v4358_v44 = vpop.f32.mrf.mxu0 }
 0x576   :  { %4664 = vmatpush.bf16.msra.mxu1 %v12938_v35  ;;  %4652 = vmatpush.bf16.msra.mxu0 %v12958_v58  ;;  %v4344_v35 = vadd.f32 %v4343_v31, %v4331_v29 }
 0x578   :  { %4678 = vmatpush.bf16.msra.mxu2 %v12960_v59  ;;  %v4357_v37 = vadd.f32 %v4356_v23, %v4344_v35 }
 0x579   :  { %4640 = vmatpush.bf16.msrb.mxu3 %v12963_v61  ;;  %v4345_v59 = vpop.f32.mrf.mxu3  ;;  %v15222_v61 = vld [vmem:[#allocation24_spill] sm:$0xff] }
 0x57a   :  { %4665 = vmatpush.bf16.msra.mxu1 %v12954_v51  ;;  %4653 = vmatpush.bf16.msra.mxu0 %v12970_v11  ;;  %v4370_v47 = vadd.f32 %v4369_v27, %v4357_v37  ;;  %v4371_v48 = vpop.f32.mrf.mxu1  ;;  %v15221_v51 = vld [vmem:[#allocation27_spill] sm:$0xff]  ;;  %v15223_v11 = vld [vmem:[#allocation28_spill] sm:$0xff] }
 0x57c   :  { %4679 = vmatpush.bf16.msra.mxu2 %v12972_v12  ;;  %v4383_v58 = vadd.f32 %v4382_v36, %v4370_v47  ;;  %v15224_v12 = vld [vmem:[#allocation25_spill] sm:$0xff] }
 0x57d   :  { %4641 = vmatpush.bf16.msrb.mxu3 %v12975_v14  ;;  %v15225_v14 = vld [vmem:[#allocation31_spill] sm:$0xff] }
 0x57e   :  { %4666 = vmatpush.bf16.msra.mxu1 %v12966_v6  ;;  %4654 = vmatpush.bf16.msra.mxu0 %v12982_v24  ;;  %v4384_v6 = vpop.f32.mrf.mxu2  ;;  %v15227_v24 = vld [vmem:[#allocation32_spill] sm:$0xff] }
 0x580   :  { %4680 = vmatpush.bf16.msra.mxu2 %v12984_v25  ;;  %v15228_v25 = vld [vmem:[#allocation29_spill] sm:$0xff] }
 0x581   :  { %4642 = vmatpush.bf16.msrb.mxu3 %v12987_v26  ;;  %v15229_v26 = vld [vmem:[#allocation33_spill] sm:$0xff] }
 0x582   :  { %4667 = vmatpush.bf16.msra.mxu1 %v12978_v18  ;;  %4655 = vmatpush.bf16.msra.mxu0 %v15221_v51  ;;  %v15226_v18 = vld [vmem:[#allocation26_spill] sm:$0xff] }
 0x584   :  { %4681 = vmatpush.bf16.msra.mxu2 %v15223_v11 }
 0x585   :  { %4643 = vmatpush.bf16.msrb.mxu3 %v15224_v12 }
 0x586   :  { %4668 = vmatpush.bf16.msra.mxu1 %v15222_v61  ;;  %4656 = vmatpush.bf16.msra.mxu0 %v15225_v14 }
 0x588   :  { %4682 = vmatpush.bf16.msra.mxu2 %v15227_v24 }
 0x589   :  { %4644 = vmatpush.bf16.msrb.mxu3 %v15228_v25 }
 0x58a   :  { %4669 = vmatpush.bf16.msra.mxu1 %v15226_v18  ;;  %4657 = vmatpush.bf16.msra.mxu0 %v15229_v26  ;;  %v4408_v41 = vpop.f32.mrf.mxu0 }
 0x58c   :  { %4683 = vmatpush.bf16.msra.mxu2 %v15231_v42 }
 0x58e   :  { %4670 = vmatpush.bf16.msra.mxu1 %v15230_v54  ;;  %v4421_v38 = vpop.f32.mrf.mxu1 }
 0x58f   :  { %v4395_v2 = vpop.f32.mrf.mxu3 }
 0x590   :  { %v4396_v9 = vadd.f32 %v4395_v2, %v14945_v19  ;;  %v12463_v19 = vld [vmem:[#allocation2 + $0x31c] sm:$0xf] }
 0x592   :  { %v4409_v53 = vadd.f32 %v4408_v41, %v4396_v9  ;;  %v4410_v40 = vpop.f32.mrf.mxu0 }
 0x593   :  { %v4434_v57 = vpop.f32.mrf.mxu2 }
 0x594   :  { %v4422_v20 = vadd.f32 %v4421_v38, %v4409_v53 }
 0x596   :  { %v4423_v39 = vpop.f32.mrf.mxu1  ;;  %v4435_v60 = vadd.f32 %v4434_v57, %v4422_v20 }
 0x597   :  { %v4397_v29 = vpop.f32.mrf.mxu3 }
 0x59b   :  { %v4436_v13 = vpop.f32.mrf.mxu2 }
 0x59c   :  { %v15233_v13 = vld [vmem:[#allocation40_spill] sm:$0xff] }
 0x5aa   :  { %v4460_v28 = vpop.f32.mrf.mxu0 }
 0x5ae   :  { %v4473_v56 = vpop.f32.mrf.mxu1 }
 0x5af   :  { %v4447_v33 = vpop.f32.mrf.mxu3 }
 0x5b0   :  { %v4448_v48 = vadd.f32 %v4447_v33, %v4435_v60  ;;  %v15232_v60 = vld [vmem:[#allocation39_spill] sm:$0xff] }
 0x5b1   :  { %v4594_v29 = vadd.f32 %v4383_v58, %v15232_v60 }
 0x5b2   :  { %v4462_v23 = vpop.f32.mrf.mxu0  ;;  %v4461_v61 = vadd.f32 %v4460_v28, %v4448_v48 }
 0x5b3   :  { %v4486_v17 = vpop.f32.mrf.mxu2  ;;  %v15234_v23 = vld [vmem:[#allocation36_spill] sm:$0xff] }
 0x5b4   :  { %v4474_v12 = vadd.f32 %v4473_v56, %v4461_v61 }
 0x5b6   :  { %v4475_v27 = vpop.f32.mrf.mxu1  ;;  %v4487_v14 = vadd.f32 %v4486_v17, %v4474_v12 }
 0x5b7   :  { %v4449_v31 = vpop.f32.mrf.mxu3 }
 0x5bb   :  { %v4488_v35 = vpop.f32.mrf.mxu2 }
 0x5ca   :  { %v4512_v36 = vpop.f32.mrf.mxu0 }
 0x5ce   :  { %v4525_v37 = vpop.f32.mrf.mxu1 }
 0x5cf   :  { %v4499_v44 = vpop.f32.mrf.mxu3 }
 0x5d0   :  { %v4500_v18 = vadd.f32 %v4499_v44, %v4487_v14  ;;  %v15235_v14 = vld [vmem:[#allocation20_spill] sm:$0xff] }
 0x5d2   :  { %v4514_v51 = vpop.f32.mrf.mxu0  ;;  %v4513_v24 = vadd.f32 %v4512_v36, %v4500_v18  ;;  %v14944_v18 = vperm.slane %v15235_v14, 0 }
 0x5d3   :  { %v4538_v47 = vpop.f32.mrf.mxu2 }
 0x5d4   :  { %v4526_v26 = vadd.f32 %v4525_v37, %v4513_v24  ;;  %v14943_v24 = vperm.slane %v15235_v14, 1  ;;  %v12475_v14 = vld [vmem:[#allocation2 + $0x374] sm:$0xf0] }
 0x5d6   :  { %v4527_v59 = vpop.f32.mrf.mxu1  ;;  %v4539_v42 = vadd.f32 %v4538_v47, %v4526_v26 }
 0x5d7   :  { %v4501_v6 = vpop.f32.mrf.mxu3 }
 0x5db   :  { %v4540_v11 = vpop.f32.mrf.mxu2 }
 0x5ea   :  { %v4564_v25 = vpop.f32.mrf.mxu0 }
 0x5ee   :  { %v4577_v54 = vpop.f32.mrf.mxu1 }
 0x5ef   :  { %v4551_v41 = vpop.f32.mrf.mxu3 }
 0x5f0   :  { %v4552_v38 = vadd.f32 %v4551_v41, %v4539_v42  ;;  %v15236_v42 = vld [vmem:[#allocation21_spill] sm:$0xff] }
 0x5f1   :  { %v14942_v41 = vperm.slane %v15236_v42, 0 }
 0x5f2   :  { %v4590_v2 = vpop.f32.mrf.mxu2  ;;  %v4566_v9 = vpop.f32.mrf.mxu0  ;;  %v4565_v57 = vadd.f32 %v4564_v25, %v4552_v38  ;;  %v14941_v38 = vperm.slane %v15236_v42, 1  ;;  %v10810_v42 = vld [vmem:[#allocation2 + $0x338] sm:$0xf] }
 0x5f4   :  { %v4578_v40 = vadd.f32 %v4577_v54, %v4565_v57 }
 0x5f6   :  { %v4579_v53 = vpop.f32.mrf.mxu1  ;;  %v4591_v20 = vadd.f32 %v4590_v2, %v4578_v40 }
 0x5f7   :  { %v4553_v39 = vpop.f32.mrf.mxu3 }
 0x5f8   :  { %v4595_v28 = vadd.f32 %v4591_v20, %v15233_v13 }
 0x5fa   :  { %v4592_v56 = vpop.f32.mrf.mxu2  ;;  %v4596_v33 = vadd.f32 %v4595_v28, %v4594_v29 }
 0x5fc   :  { %4597 = vadd.xlane.f32.xlu0 %v4596_v33 }
 0x66f   :  { %v4598_v17 = vpop.xlane.xlu0 %4597 }
 0x670   :  { %v4599_v27 = vmul.f32 %v4598_v17, %v15234_v23 }
 0x672   :  { %v4600_v31 = vsub.f32 %v4594_v29, %v4599_v27  ;;  %v4601_v35 = vsub.f32 %v4595_v28, %v4599_v27  ;;  %v15237_v29 = vld [vmem:[#allocation35_spill] sm:$0xff] }
 0x673   :  { %v15238_v13 = vperm.slane %v15237_v29, 1  ;;  %v15239_v33 = vperm.slane %v15237_v29, 0 }
 0x674   :  { %v4602_v36 = vmul.f32 %v4600_v31, %v4600_v31  ;;  %v4603_v37 = vmul.f32 %v4601_v35, %v4601_v35 }
 0x676   :  { %v4604_v44 = vadd.f32 %v4603_v37, %v4602_v36 }
 0x678   :  { %4605 = vadd.xlane.f32.xlu0 %v4604_v44 }
 0x6eb   :  { %v4606_v47 = vpop.xlane.xlu0 %4605 }
 0x6ec   :  { %v4607_v48 = vmul.f32 %v4606_v47, %v15234_v23 }
 0x6ee   :  { %v4608_v51 = vadd.f32 1e-05, %v4607_v48 }
 0x6f0   :  { %12736 = vrsqrt.f32 %v4608_v51  ;;  %vm4615_vm5 = vweird.f32 %v4608_v51 }
 0x6f6   :  { %v12737_v58 = vpop.eup %12736 }
 0x6f7   :  { %v4610_v59 = vmul.f32 %v12737_v58, %v4608_v51  ;;  %vm4616_vm4 = vweird.f32 %v12737_v58 }
 0x6f8   :  { %vm4617_vm6 = vmor %vm4615_vm5, %vm4616_vm4 }
 0x6f9   :  { %v4611_v61 = vmul.f32 %v12737_v58, %v4610_v59  ;;  %v10818_v59 = vld [vmem:[#allocation2 + $0x380] sm:$0xf] }
 0x6fb   :  { %v4612_v6 = vmul.f32 0.5, %v4611_v61  ;;  %v12484_v61 = vld [vmem:[#allocation2 + $0x3bc] sm:$0xf0] }
 0x6fd   :  { %v4613_v11 = vsub.f32 1.5, %v4612_v6  ;;  %v11330_v6 = vld [vmem:[#allocation2 + $0x780] sm:$0xf] }
 0x6ff   :  { %v4614_v12 = vmul.f32 %v12737_v58, %v4613_v11  ;;  %v10819_v11 = vor.u32 %v12484_v61, %v10818_v59  ;;  %v10692_v59 = vld [vmem:[#allocation2 + $0x2c0] sm:$0xf0] }
 0x700   :  { %v12572_v61 = vld [vmem:[#allocation2 + $0x684] sm:$0xf] }
 0x701   :  { %v4618_v25 = vsel %vm4617_vm6, %v12737_v58, %v4614_v12  ;;  %v12612_v12 = vld [vmem:[#allocation2 + $0x7bc] sm:$0xf0]  ;;  %6258 = vmatpush.bf16.msra.mxu3 %v10819_v11 }
 0x702   :  { %v4619_v26 = vmul.f32 %v4618_v25, %v4600_v31  ;;  %v4620_v54 = vmul.f32 %v4618_v25, %v4601_v35  ;;  %v12476_v25 = vld [vmem:[#allocation2 + $0x384] sm:$0xf] }
 0x704   :  { %v4626_v2 = vmul.f32 %v14944_v18, %v4619_v26  ;;  %v4627_v9 = vmul.f32 %v14943_v24, %v4620_v54  ;;  %v10820_v26 = vld [vmem:[#allocation2 + $0x3c0] sm:$0xf0]  ;;  %v11331_v54 = vor.u32 %v12612_v12, %v11330_v6  ;;  %v11290_v24 = vld [vmem:[#allocation2 + $0x718] sm:$0xf] }
 0x705   :  { %v11204_v6 = vld [vmem:[#allocation2 + $0x6c0] sm:$0xf0]  ;;  %v12599_v18 = vld [vmem:[#allocation2 + $0x754] sm:$0xf0] }
 0x706   :  { %v4633_v57 = vadd.f32 %v14942_v41, %v4626_v2  ;;  %v4634_v53 = vadd.f32 %v14941_v38, %v4627_v9  ;;  %v10823_v2 = vor.u32 %v12476_v25, %v10820_v26  ;;  %v12604_v9 = vld [vmem:[#allocation2 + $0x784] sm:$0xf]  ;;  %6271 = vmatpush.bf16.msrb.mxu0 %v11331_v54  ;;  %v10626_v25 = vld [vmem:[#allocation2 + $0x200] sm:$0xf]  ;;  %v12479_v38 = vld [vmem:[#allocation2 + $0x39c] sm:$0xf] }
 0x707   :  { %v12436_v26 = vld [vmem:[#allocation2 + $0x23c] sm:$0xf0] }
 0x708   :  { %v4635_v40 = vpack.c.bf16 %v4633_v57, %v4633_v57  ;;  %v4636_v20 = vpack.c.bf16 %v4634_v53, %v4634_v53  ;;  %6284 = vmatpush.bf16.msrb.mxu1 %v10823_v2  ;;  %v11138_v54 = vld [vmem:[#allocation2 + $0x600] sm:$0xf]  ;;  %v11207_v2 = vor.u32 %v12572_v61, %v11204_v6 }
 0x709   :  { %v11010_v61 = vld [vmem:[#allocation2 + $0x500] sm:$0xf] }
 0x70a   :  { %4645 = vmatmul.bf16.vlgmr.msrb.gmra.mxu3 %v4635_v40  ;;  %4658 = vmatmul.bf16.vlgmr.msra.gmra.mxu0 %v4636_v20 }
 0x70b   :  { %4671 = vmatmul.bf16.vlgmr.msra.gmra.mxu1 %v4635_v40  ;;  %4684 = vmatmul.bf16.vlgmr.msra.gmra.mxu2 %v4636_v20  ;;  %v10754_v40 = vld [vmem:[#allocation2 + $0x300] sm:$0xf] }
 0x70c   :  { %v12468_v20 = vld [vmem:[#allocation2 + $0x33c] sm:$0xf0] }
 0x70d   :  { %v10755_v29 = vor.u32 %v12468_v20, %v10754_v40  ;;  %v10628_v40 = vld [vmem:[#allocation2 + $0x240] sm:$0xf0] }
 0x70e   :  { %v11140_v20 = vld [vmem:[#allocation2 + $0x640] sm:$0xf0] }
 0x70f   :  { %6259 = vmatpush.bf16.msra.mxu3 %v10755_v29 }
 0x787   :  { %v4659_v39 = vpop.f32.mrf.mxu0 }
 0x788   :  { %v4672_v60 = vpop.f32.mrf.mxu1 }
 0x789   :  { %v4673_v28 = vadd.f32 %v4672_v60, %v15238_v13  ;;  %v12596_v60 = vld [vmem:[#allocation2 + $0x73c] sm:$0xf0] }
 0x78d   :  { %v4646_v56 = vpop.f32.mrf.mxu3 }
 0x78e   :  { %v4647_v17 = vadd.f32 %v4646_v56, %v15239_v33  ;;  %v4685_v27 = vpop.f32.mrf.mxu2  ;;  %v10756_v56 = vld [vmem:[#allocation2 + $0x340] sm:$0xf0] }
 0x78f   :  { %v4686_v31 = vadd.f32 %v4685_v27, %v4673_v28  ;;  %v4661_v35 = vpop.f32.mrf.mxu0  ;;  %v12460_v28 = vld [vmem:[#allocation2 + $0x304] sm:$0xf] }
 0x790   :  { %v4660_v36 = vadd.f32 %v4659_v39, %v4647_v17  ;;  %v4674_v37 = vpop.f32.mrf.mxu1  ;;  %v11266_v39 = vld [vmem:[#allocation2 + $0x700] sm:$0xf]  ;;  %v12588_v33 = vld [vmem:[#allocation2 + $0x704] sm:$0xf]  ;;  %v10759_v17 = vor.u32 %v12460_v28, %v10756_v56 }
 0x791   :  { %v14146_v47 = vadd.f32 %v4686_v31, %v4634_v53  ;;  %v11267_v13 = vor.u32 %v12596_v60, %v11266_v39  ;;  %v11268_v27 = vld [vmem:[#allocation2 + $0x740] sm:$0xf0]  ;;  %v10690_v31 = vld [vmem:[#allocation2 + $0x280] sm:$0xf]  ;;  %v10627_v39 = vor.u32 %v12436_v26, %v10626_v25 }
 0x792   :  { %v14144_v44 = vadd.f32 %v4660_v36, %v4633_v57  ;;  %v11332_v57 = vld [vmem:[#allocation2 + $0x7c0] sm:$0xf0]  ;;  %v12452_v35 = vld [vmem:[#allocation2 + $0x2bc] sm:$0xf0]  ;;  %v11271_v36 = vor.u32 %v12588_v33, %v11268_v27  ;;  %6285 = vmatpush.bf16.msrb.mxu1 %v10759_v17 }
 0x793   :  { %v11335_v53 = vor.u32 %v12604_v9, %v11332_v57  ;;  %v11202_v37 = vld [vmem:[#allocation2 + $0x680] sm:$0xf]  ;;  %6272 = vmatpush.bf16.msrb.mxu0 %v11267_v13  ;;  %v12428_v57 = vld [vmem:[#allocation2 + $0x204] sm:$0xf] }
 0x794   :  { %v4691_v48 = vadd.f32 %v14146_v47, %v14144_v44  ;;  %v12564_v9 = vld [vmem:[#allocation2 + $0x63c] sm:$0xf0]  ;;  %v10631_v29 = vor.u32 %v12428_v57, %v10628_v40  ;;  %v12412_v27 = vld [vmem:[#allocation2 + $0x184] sm:$0xf] }
 0x795   :  { %v4648_v51 = vpop.f32.mrf.mxu3  ;;  %6297 = vmatpush.bf16.msrb.mxu2 %v11335_v53  ;;  %v12556_v53 = vld [vmem:[#allocation2 + $0x604] sm:$0xf]  ;;  %v11139_v60 = vor.u32 %v12564_v9, %v11138_v54  ;;  %v10562_v13 = vld [vmem:[#allocation2 + $0x180] sm:$0xf] }
 0x796   :  { %v4687_v58 = vpop.f32.mrf.mxu2  ;;  %4692 = vadd.xlane.f32.xlu1 %v4691_v48  ;;  %v12580_v48 = vld [vmem:[#allocation2 + $0x6bc] sm:$0xf0]  ;;  %v12444_v51 = vld [vmem:[#allocation2 + $0x284] sm:$0xf]  ;;  %v11143_v33 = vor.u32 %v12556_v53, %v11140_v20 }
 0x797   :  { %v10691_v58 = vor.u32 %v12452_v35, %v10690_v31  ;;  %v11203_v11 = vor.u32 %v12580_v48, %v11202_v37  ;;  %v10695_v12 = vor.u32 %v12444_v51, %v10692_v59  ;;  %v12420_v28 = vld [vmem:[#allocation2 + $0x1bc] sm:$0xf0]  ;;  %v10564_v31 = vld [vmem:[#allocation2 + $0x1c0] sm:$0xf0] }
 0x798   :  { %v11074_v56 = vld [vmem:[#allocation2 + $0x580] sm:$0xf]  ;;  %v12540_v35 = vld [vmem:[#allocation2 + $0x584] sm:$0xf]  ;;  %v10563_v37 = vor.u32 %v12420_v28, %v10562_v13  ;;  %v10567_v51 = vor.u32 %v12412_v27, %v10564_v31 }
 0x799   :  { %6298 = vmatpush.bf16.msrb.mxu2 %v11271_v36  ;;  %6260 = vmatpush.bf16.msra.mxu3 %v10691_v58  ;;  %v12548_v17 = vld [vmem:[#allocation2 + $0x5bc] sm:$0xf0]  ;;  %v11076_v36 = vld [vmem:[#allocation2 + $0x5c0] sm:$0xf0] }
 0x79a   :  { %6273 = vmatpush.bf16.msrb.mxu0 %v11203_v11  ;;  %6286 = vmatpush.bf16.msrb.mxu1 %v10695_v12  ;;  %v11075_v48 = vor.u32 %v12548_v17, %v11074_v56  ;;  %v10498_v58 = vld [vmem:[#allocation2 + $0x100] sm:$0xf]  ;;  %v11079_v6 = vor.u32 %v12540_v35, %v11076_v36  ;;  %v12396_v12 = vld [vmem:[#allocation2 + $0x104] sm:$0xf] }
 0x79b   :  { %v12404_v59 = vld [vmem:[#allocation2 + $0x13c] sm:$0xf0]  ;;  %v10500_v25 = vld [vmem:[#allocation2 + $0x140] sm:$0xf0] }
 0x79c   :  { %v12532_v11 = vld [vmem:[#allocation2 + $0x53c] sm:$0xf0]  ;;  %v12524_v26 = vld [vmem:[#allocation2 + $0x504] sm:$0xf]  ;;  %v10503_v57 = vor.u32 %v12396_v12, %v10500_v25 }
 0x79d   :  { %6299 = vmatpush.bf16.msrb.mxu2 %v11207_v2  ;;  %6261 = vmatpush.bf16.msra.mxu3 %v10627_v39  ;;  %v11012_v54 = vld [vmem:[#allocation2 + $0x540] sm:$0xf0]  ;;  %v10499_v2 = vor.u32 %v12404_v59, %v10498_v58  ;;  %v11011_v9 = vor.u32 %v12532_v11, %v11010_v61  ;;  %v10434_v40 = vld [vmem:[#allocation2 + $0x80] sm:$0xf] }
 0x79e   :  { %6274 = vmatpush.bf16.msrb.mxu0 %v11139_v60  ;;  %6287 = vmatpush.bf16.msrb.mxu1 %v10631_v29  ;;  %v12388_v53 = vld [vmem:[#allocation2 + $0xbc] sm:$0xf0]  ;;  %v11015_v39 = vor.u32 %v12524_v26, %v11012_v54  ;;  %v12380_v29 = vld [vmem:[#allocation2 + $0x84] sm:$0xf] }
 0x79f   :  { %v10946_v20 = vld [vmem:[#allocation2 + $0x480] sm:$0xf]  ;;  %v10436_v13 = vld [vmem:[#allocation2 + $0xc0] sm:$0xf0]  ;;  %v10435_v17 = vor.u32 %v12388_v53, %v10434_v40  ;;  %v12485_v53 = vld [vmem:[#allocation2 + $0x3c4] sm:$0xf0] }
 0x7a0   :  { %v12516_v60 = vld [vmem:[#allocation2 + $0x4bc] sm:$0xf0]  ;;  %v12508_v28 = vld [vmem:[#allocation2 + $0x484] sm:$0xf]  ;;  %v10439_v35 = vor.u32 %v12380_v29, %v10436_v13  ;;  %v12477_v13 = vld [vmem:[#allocation2 + $0x38c] sm:$0xf] }
 0x7a1   :  { %6300 = vmatpush.bf16.msrb.mxu2 %v11143_v33  ;;  %6262 = vmatpush.bf16.msra.mxu3 %v10563_v37  ;;  %v10948_v56 = vld [vmem:[#allocation2 + $0x4c0] sm:$0xf0]  ;;  %v10947_v31 = vor.u32 %v12516_v60, %v10946_v20  ;;  %v10370_v61 = vld [vmem:[#allocation2] sm:$0xf]  ;;  %v11338_v20 = vld [vmem:[#allocation2 + $0x788] sm:$0xf] }
 0x7a2   :  { %6275 = vmatpush.bf16.msrb.mxu0 %v11075_v48  ;;  %6288 = vmatpush.bf16.msrb.mxu1 %v10567_v51  ;;  %v10951_v36 = vor.u32 %v12508_v28, %v10948_v56  ;;  %v10882_v11 = vld [vmem:[#allocation2 + $0x400] sm:$0xf]  ;;  %v12364_v25 = vld [vmem:[#allocation2 + $0x4] sm:$0xf]  ;;  %v10828_v28 = vld [vmem:[#allocation2 + $0x3c8] sm:$0xf0] }
 0x7a3   :  { %v12500_v12 = vld [vmem:[#allocation2 + $0x43c] sm:$0xf0]  ;;  %v12605_v56 = vld [vmem:[#allocation2 + $0x78c] sm:$0xf] }
 0x7a4   :  { %v10883_v26 = vor.u32 %v12500_v12, %v10882_v11  ;;  %v12589_v11 = vld [vmem:[#allocation2 + $0x70c] sm:$0xf] }
 0x7a5   :  { %6301 = vmatpush.bf16.msrb.mxu2 %v11079_v6  ;;  %6263 = vmatpush.bf16.msra.mxu3 %v10499_v2  ;;  %v12372_v6 = vld [vmem:[#allocation2 + $0x3c] sm:$0xf0]  ;;  %v12492_v2 = vld [vmem:[#allocation2 + $0x404] sm:$0xf] }
 0x7a6   :  { %6276 = vmatpush.bf16.msrb.mxu0 %v11011_v9  ;;  %6289 = vmatpush.bf16.msrb.mxu1 %v10503_v57  ;;  %v10884_v9 = vld [vmem:[#allocation2 + $0x440] sm:$0xf0]  ;;  %v10826_v57 = vld [vmem:[#allocation2 + $0x388] sm:$0xf] }
 0x7a7   :  { %v10887_v40 = vor.u32 %v12492_v2, %v10884_v9  ;;  %v10827_v60 = vor.u32 %v12485_v53, %v10826_v57  ;;  %v12581_v9 = vld [vmem:[#allocation2 + $0x6c4] sm:$0xf0]  ;;  %v12445_v57 = vld [vmem:[#allocation2 + $0x28c] sm:$0xf] }
 0x7a9   :  { %6302 = vmatpush.bf16.msrb.mxu2 %v11015_v39  ;;  %6264 = vmatpush.bf16.msra.mxu3 %v10435_v17  ;;  %v12613_v39 = vld [vmem:[#allocation2 + $0x7c4] sm:$0xf0]  ;;  %v11340_v17 = vld [vmem:[#allocation2 + $0x7c8] sm:$0xf0] }
 0x7aa   :  { %6277 = vmatpush.bf16.msrb.mxu0 %v10947_v31  ;;  %6290 = vmatpush.bf16.msrb.mxu1 %v10439_v35  ;;  %v11339_v29 = vor.u32 %v12613_v39, %v11338_v20  ;;  %v12469_v31 = vld [vmem:[#allocation2 + $0x344] sm:$0xf0]  ;;  %v11343_v35 = vor.u32 %v12605_v56, %v11340_v17  ;;  %v12573_v39 = vld [vmem:[#allocation2 + $0x68c] sm:$0xf] }
 0x7ab   :  { %v11146_v56 = vld [vmem:[#allocation2 + $0x608] sm:$0xf] }
 0x7ac   :  { %v12565_v17 = vld [vmem:[#allocation2 + $0x644] sm:$0xf0] }
 0x7ad   :  { %6303 = vmatpush.bf16.msrb.mxu2 %v10951_v36 }
 0x7ae   :  { %6278 = vmatpush.bf16.msrb.mxu0 %v10883_v26  ;;  %v12453_v26 = vld [vmem:[#allocation2 + $0x2c4] sm:$0xf0] }
 0x7b1   :  { %6304 = vmatpush.bf16.msrb.mxu2 %v10887_v40  ;;  %v10700_v40 = vld [vmem:[#allocation2 + $0x2c8] sm:$0xf0] }
 0x7b2   :  { %6323 = vmatpush.bf16.msra.mxu0 %v11339_v29  ;;  %v10703_v20 = vor.u32 %v12445_v57, %v10700_v40  ;;  %v10506_v40 = vld [vmem:[#allocation2 + $0x108] sm:$0xf] }
 0x7b5   :  { %6349 = vmatpush.bf16.msra.mxu2 %v11343_v35  ;;  %v11147_v35 = vor.u32 %v12565_v17, %v11146_v56  ;;  %v11020_v17 = vld [vmem:[#allocation2 + $0x548] sm:$0xf0] }
 0x809   :  { %v4693_v33 = vpop.xlane.xlu1 %4692 }
 0x80a   :  { %v4694_v27 = vmul.f32 %v4693_v33, %v15234_v23  ;;  %v10831_v33 = vor.u32 %v12477_v13, %v10828_v28  ;;  %v10634_v13 = vld [vmem:[#allocation2 + $0x208] sm:$0xf] }
 0x80b   :  { %v12437_v28 = vld [vmem:[#allocation2 + $0x244] sm:$0xf0] }
 0x80c   :  { %v14152_v37 = vsub.f32 %v14144_v44, %v4694_v27  ;;  %v14155_v48 = vsub.f32 %v14146_v47, %v4694_v27  ;;  %v10371_v44 = vor.u32 %v12372_v6, %v10370_v61  ;;  %v10372_v47 = vld [vmem:[#allocation2 + $0x40] sm:$0xf0]  ;;  %v10762_v27 = vld [vmem:[#allocation2 + $0x308] sm:$0xf]  ;;  %v10764_v6 = vld [vmem:[#allocation2 + $0x348] sm:$0xf0] }
 0x80d   :  { %v10375_v54 = vor.u32 %v12364_v25, %v10372_v47  ;;  %v10763_v36 = vor.u32 %v12469_v31, %v10762_v27  ;;  %v10698_v47 = vld [vmem:[#allocation2 + $0x288] sm:$0xf]  ;;  %v12429_v27 = vld [vmem:[#allocation2 + $0x20c] sm:$0xf] }
 0x80e   :  { %v4697_v51 = vmul.f32 %v14152_v37, %v14152_v37  ;;  %v4698_v58 = vmul.f32 %v14155_v48, %v14155_v48  ;;  %6265 = vmatpush.bf16.msra.mxu3 %v10371_v44  ;;  %v11276_v44 = vld [vmem:[#allocation2 + $0x748] sm:$0xf0]  ;;  %v10699_v2 = vor.u32 %v12453_v26, %v10698_v47 }
 0x80f   :  { %6291 = vmatpush.bf16.msrb.mxu1 %v10375_v54  ;;  %v11279_v25 = vor.u32 %v12589_v11, %v11276_v44  ;;  %v11210_v54 = vld [vmem:[#allocation2 + $0x688] sm:$0xf]  ;;  %v10636_v31 = vld [vmem:[#allocation2 + $0x248] sm:$0xf0] }
 0x810   :  { %v4699_v59 = vadd.f32 %v4698_v58, %v4697_v51  ;;  %v11274_v51 = vld [vmem:[#allocation2 + $0x708] sm:$0xf]  ;;  %v11211_v53 = vor.u32 %v12581_v9, %v11210_v54  ;;  %v10572_v47 = vld [vmem:[#allocation2 + $0x1c8] sm:$0xf0] }
 0x811   :  { %v12597_v58 = vld [vmem:[#allocation2 + $0x744] sm:$0xf0]  ;;  %6350 = vmatpush.bf16.msra.mxu2 %v11279_v25  ;;  %v12413_v25 = vld [vmem:[#allocation2 + $0x18c] sm:$0xf] }
 0x812   :  { %4700 = vadd.xlane.f32.xlu1 %v4699_v59  ;;  %6310 = vmatpush.bf16.msrb.mxu3 %v10827_v60  ;;  %v12461_v59 = vld [vmem:[#allocation2 + $0x30c] sm:$0xf]  ;;  %v11275_v61 = vor.u32 %v12597_v58, %v11274_v51  ;;  %v11082_v11 = vld [vmem:[#allocation2 + $0x588] sm:$0xf]  ;;  %v10575_v54 = vor.u32 %v12413_v25, %v10572_v47 }
 0x813   :  { %6336 = vmatpush.bf16.msra.mxu1 %v10831_v33  ;;  %v10767_v12 = vor.u32 %v12461_v59, %v10764_v6  ;;  %v11212_v60 = vld [vmem:[#allocation2 + $0x6c8] sm:$0xf0]  ;;  %v10635_v33 = vor.u32 %v12437_v28, %v10634_v13  ;;  %v12421_v6 = vld [vmem:[#allocation2 + $0x1c4] sm:$0xf0] }
 0x814   :  { %6324 = vmatpush.bf16.msra.mxu0 %v11275_v61  ;;  %v11215_v29 = vor.u32 %v12573_v39, %v11212_v60  ;;  %v12557_v51 = vld [vmem:[#allocation2 + $0x60c] sm:$0xf]  ;;  %v10570_v61 = vld [vmem:[#allocation2 + $0x188] sm:$0xf] }
 0x815   :  { %v11148_v58 = vld [vmem:[#allocation2 + $0x648] sm:$0xf0]  ;;  %v10571_v44 = vor.u32 %v12421_v6, %v10570_v61  ;;  %v12533_v60 = vld [vmem:[#allocation2 + $0x544] sm:$0xf0] }
 0x816   :  { %6311 = vmatpush.bf16.msrb.mxu3 %v10763_v36  ;;  %v10639_v36 = vor.u32 %v12429_v27, %v10636_v31  ;;  %6351 = vmatpush.bf16.msra.mxu2 %v11215_v29  ;;  %v11151_v59 = vor.u32 %v12557_v51, %v11148_v58  ;;  %v11084_v9 = vld [vmem:[#allocation2 + $0x5c8] sm:$0xf0]  ;;  %v10442_v31 = vld [vmem:[#allocation2 + $0x88] sm:$0xf] }
 0x817   :  { %6337 = vmatpush.bf16.msra.mxu1 %v10767_v12  ;;  %v12549_v12 = vld [vmem:[#allocation2 + $0x5c4] sm:$0xf0]  ;;  %v12397_v29 = vld [vmem:[#allocation2 + $0x10c] sm:$0xf] }
 0x818   :  { %6325 = vmatpush.bf16.msra.mxu0 %v11211_v53  ;;  %v11083_v26 = vor.u32 %v12549_v12, %v11082_v11  ;;  %v12405_v53 = vld [vmem:[#allocation2 + $0x144] sm:$0xf0]  ;;  %v10508_v13 = vld [vmem:[#allocation2 + $0x148] sm:$0xf0] }
 0x819   :  { %v10507_v39 = vor.u32 %v12405_v53, %v10506_v40  ;;  %v10511_v56 = vor.u32 %v12397_v29, %v10508_v13  ;;  %v12517_v58 = vld [vmem:[#allocation2 + $0x4c4] sm:$0xf0]  ;;  %v10444_v61 = vld [vmem:[#allocation2 + $0xc8] sm:$0xf0] }
 0x81a   :  { %6312 = vmatpush.bf16.msrb.mxu3 %v10699_v2  ;;  %v12541_v2 = vld [vmem:[#allocation2 + $0x58c] sm:$0xf]  ;;  %6352 = vmatpush.bf16.msra.mxu2 %v11151_v59  ;;  %v10378_v47 = vld [vmem:[#allocation2 + $0x8] sm:$0xf] }
 0x81b   :  { %6338 = vmatpush.bf16.msra.mxu1 %v10703_v20  ;;  %v11087_v57 = vor.u32 %v12541_v2, %v11084_v9  ;;  %v11018_v20 = vld [vmem:[#allocation2 + $0x508] sm:$0xf]  ;;  %v12381_v59 = vld [vmem:[#allocation2 + $0x8c] sm:$0xf] }
 0x81c   :  { %6326 = vmatpush.bf16.msra.mxu0 %v11147_v35  ;;  %v11019_v28 = vor.u32 %v12533_v60, %v11018_v20  ;;  %v12389_v35 = vld [vmem:[#allocation2 + $0xc4] sm:$0xf0]  ;;  %v10447_v11 = vor.u32 %v12381_v59, %v10444_v61  ;;  %v10956_v12 = vld [vmem:[#allocation2 + $0x4c8] sm:$0xf0]  ;;  %v15240_v61 = vld [vmem:[#allocation37_spill] sm:$0xff] }
 0x81d   :  { %v10443_v51 = vor.u32 %v12389_v35, %v10442_v31  ;;  %v12501_v9 = vld [vmem:[#allocation2 + $0x444] sm:$0xf0]  ;;  %v10380_v40 = vld [vmem:[#allocation2 + $0x48] sm:$0xf0] }
 0x81e   :  { %6313 = vmatpush.bf16.msrb.mxu3 %v10635_v33  ;;  %v12525_v33 = vld [vmem:[#allocation2 + $0x50c] sm:$0xf]  ;;  %6353 = vmatpush.bf16.msra.mxu2 %v11087_v57 }
 0x81f   :  { %6339 = vmatpush.bf16.msra.mxu1 %v10639_v36  ;;  %v11023_v27 = vor.u32 %v12525_v33, %v11020_v17  ;;  %v10954_v36 = vld [vmem:[#allocation2 + $0x488] sm:$0xf]  ;;  %v12365_v57 = vld [vmem:[#allocation2 + $0xc] sm:$0xf] }
 0x820   :  { %6327 = vmatpush.bf16.msra.mxu0 %v11083_v26  ;;  %v10955_v6 = vor.u32 %v12517_v58, %v10954_v36  ;;  %v12373_v26 = vld [vmem:[#allocation2 + $0x44] sm:$0xf0]  ;;  %v10383_v20 = vor.u32 %v12365_v57, %v10380_v40  ;;  %v10892_v60 = vld [vmem:[#allocation2 + $0x448] sm:$0xf0] }
 0x821   :  { %v10379_v2 = vor.u32 %v12373_v26, %v10378_v47  ;;  %v12486_v47 = vld [vmem:[#allocation2 + $0x3cc] sm:$0xf0] }
 0x822   :  { %6314 = vmatpush.bf16.msrb.mxu3 %v10571_v44  ;;  %v12509_v44 = vld [vmem:[#allocation2 + $0x48c] sm:$0xf]  ;;  %6354 = vmatpush.bf16.msra.mxu2 %v11023_v27  ;;  %v11346_v26 = vld [vmem:[#allocation2 + $0x790] sm:$0xf] }
 0x823   :  { %6340 = vmatpush.bf16.msra.mxu1 %v10575_v54  ;;  %v10959_v25 = vor.u32 %v12509_v44, %v10956_v12  ;;  %v10890_v54 = vld [vmem:[#allocation2 + $0x408] sm:$0xf]  ;;  %v15242_v44 = vperm.slane %v15240_v61, 1 }
 0x824   :  { %6328 = vmatpush.bf16.msra.mxu0 %v11019_v28  ;;  %v10891_v53 = vor.u32 %v12501_v9, %v10890_v54  ;;  %v12614_v54 = vld [vmem:[#allocation2 + $0x7cc] sm:$0xf0]  ;;  %v15243_v9 = vld [vmem:[#allocation38_spill] sm:$0xff] }
 0x825   :  { %v15244_v57 = vperm.slane %v15243_v9, 0 }
 0x826   :  { %6315 = vmatpush.bf16.msrb.mxu3 %v10507_v39  ;;  %v12493_v39 = vld [vmem:[#allocation2 + $0x40c] sm:$0xf]  ;;  %6355 = vmatpush.bf16.msra.mxu2 %v10959_v25  ;;  %v10834_v25 = vld [vmem:[#allocation2 + $0x390] sm:$0xf] }
 0x827   :  { %6341 = vmatpush.bf16.msra.mxu1 %v10511_v56  ;;  %v10895_v29 = vor.u32 %v12493_v39, %v10892_v60  ;;  %v11348_v39 = vld [vmem:[#allocation2 + $0x7d0] sm:$0xf0] }
 0x828   :  { %6329 = vmatpush.bf16.msra.mxu0 %v10955_v6  ;;  %v15241_v6 = vperm.slane %v15240_v61, 0 }
 0x82a   :  { %6316 = vmatpush.bf16.msrb.mxu3 %v10443_v51  ;;  %6356 = vmatpush.bf16.msra.mxu2 %v10895_v29 }
 0x82b   :  { %6342 = vmatpush.bf16.msra.mxu1 %v10447_v11 }
 0x82c   :  { %6330 = vmatpush.bf16.msra.mxu0 %v10891_v53  ;;  %v15245_v53 = vperm.slane %v15243_v9, 1  ;;  %v12574_v9 = vld [vmem:[#allocation2 + $0x694] sm:$0xf] }
 0x82e   :  { %6317 = vmatpush.bf16.msrb.mxu3 %v10379_v2  ;;  %v12478_v2 = vld [vmem:[#allocation2 + $0x394] sm:$0xf] }
 0x82f   :  { %6343 = vmatpush.bf16.msra.mxu1 %v10383_v20  ;;  %v12606_v20 = vld [vmem:[#allocation2 + $0x794] sm:$0xf] }
 0x885   :  { %v4701_v13 = vpop.xlane.xlu1 %4700 }
 0x886   :  { %v4702_v28 = vmul.f32 %v4701_v13, %v15234_v23  ;;  %v10835_v13 = vor.u32 %v12486_v47, %v10834_v25  ;;  %v11218_v47 = vld [vmem:[#allocation2 + $0x690] sm:$0xf] }
 0x888   :  { %v4703_v56 = vadd.f32 1e-05, %v4702_v28  ;;  %v11347_v28 = vor.u32 %v12614_v54, %v11346_v26  ;;  %v12582_v26 = vld [vmem:[#allocation2 + $0x6cc] sm:$0xf0]  ;;  %v12446_v54 = vld [vmem:[#allocation2 + $0x294] sm:$0xf] }
 0x88a   :  { %12738 = vrsqrt.f32 %v4703_v56  ;;  %vm4710_vm8 = vweird.f32 %v4703_v56 }
 0x890   :  { %v12739_v33 = vpop.eup %12738 }
 0x891   :  { %v4705_v17 = vmul.f32 %v12739_v33, %v4703_v56  ;;  %vm4711_vm7 = vweird.f32 %v12739_v33  ;;  %v10770_v56 = vld [vmem:[#allocation2 + $0x310] sm:$0xf] }
 0x892   :  { %vm4712_vm9 = vmor %vm4710_vm8, %vm4711_vm7 }
 0x893   :  { %v4706_v27 = vmul.f32 %v12739_v33, %v4705_v17 }
 0x895   :  { %v4707_v31 = vmul.f32 0.5, %v4706_v27  ;;  %v11351_v27 = vor.u32 %v12606_v20, %v11348_v39  ;;  %v10642_v20 = vld [vmem:[#allocation2 + $0x210] sm:$0xf] }
 0x896   :  { %v12438_v39 = vld [vmem:[#allocation2 + $0x24c] sm:$0xf0] }
 0x897   :  { %v4708_v35 = vsub.f32 1.5, %v4707_v31  ;;  %v11282_v31 = vld [vmem:[#allocation2 + $0x710] sm:$0xf] }
 0x899   :  { %v4709_v36 = vmul.f32 %v12739_v33, %v4708_v35  ;;  %v12598_v35 = vld [vmem:[#allocation2 + $0x74c] sm:$0xf0] }
 0x89b   :  { %v4713_v51 = vsel %vm4712_vm9, %v12739_v33, %v4709_v36  ;;  %v12470_v33 = vld [vmem:[#allocation2 + $0x34c] sm:$0xf0]  ;;  %v12462_v36 = vld [vmem:[#allocation2 + $0x314] sm:$0xf] }
 0x89c   :  { %v4714_v58 = vmul.f32 %v4713_v51, %v14152_v37  ;;  %v4715_v59 = vmul.f32 %v4713_v51, %v14155_v48  ;;  %v10836_v48 = vld [vmem:[#allocation2 + $0x3d0] sm:$0xf0]  ;;  %v10771_v61 = vor.u32 %v12470_v33, %v10770_v56  ;;  %v11154_v56 = vld [vmem:[#allocation2 + $0x610] sm:$0xf] }
 0x89d   :  { %v10839_v17 = vor.u32 %v12478_v2, %v10836_v48  ;;  %v10772_v51 = vld [vmem:[#allocation2 + $0x350] sm:$0xf0]  ;;  %v11219_v48 = vor.u32 %v12582_v26, %v11218_v47  ;;  %v12566_v33 = vld [vmem:[#allocation2 + $0x64c] sm:$0xf0] }
 0x89e   :  { %v4716_v11 = vmul.f32 %v4714_v58, %v15241_v6  ;;  %v4717_v12 = vmul.f32 %v4715_v59, %v15242_v44  ;;  %v12590_v58 = vld [vmem:[#allocation2 + $0x714] sm:$0xf]  ;;  %v11283_v6 = vor.u32 %v12598_v35, %v11282_v31  ;;  %v12454_v44 = vld [vmem:[#allocation2 + $0x2cc] sm:$0xf0] }
 0x89f   :  { %v11284_v59 = vld [vmem:[#allocation2 + $0x750] sm:$0xf0] }
 0x8a0   :  { %v14170_v40 = vadd.f32 %v4716_v11, %v15244_v57  ;;  %v14174_v37 = vadd.f32 %v4717_v12, %v15245_v53  ;;  %v10706_v11 = vld [vmem:[#allocation2 + $0x290] sm:$0xf]  ;;  %v10775_v12 = vor.u32 %v12462_v36, %v10772_v51  ;;  %v11287_v25 = vor.u32 %v12590_v58, %v11284_v59  ;;  %v10708_v2 = vld [vmem:[#allocation2 + $0x2d0] sm:$0xf0] }
 0x8a1   :  { %v11220_v57 = vld [vmem:[#allocation2 + $0x6d0] sm:$0xf0]  ;;  %v10707_v53 = vor.u32 %v12454_v44, %v10706_v11  ;;  %v10643_v36 = vor.u32 %v12438_v39, %v10642_v20  ;;  %v11155_v51 = vor.u32 %v12566_v33, %v11154_v56  ;;  %v10578_v58 = vld [vmem:[#allocation2 + $0x190] sm:$0xf] }
 0x8a2   :  { %15246 = vst [vmem:[#allocation27_spill] sm:$0xff] %v14174_v37  ;;  %v14178_v60 = vpack.c.bf16 %v14170_v40, %v14170_v40  ;;  %v14182_v29 = vpack.c.bf16 %v14174_v37, %v14174_v37  ;;  %v12558_v31 = vld [vmem:[#allocation2 + $0x614] sm:$0xf]  ;;  %v12422_v59 = vld [vmem:[#allocation2 + $0x1cc] sm:$0xf0] }
 0x8a3   :  { %v11156_v35 = vld [vmem:[#allocation2 + $0x650] sm:$0xf0]  ;;  %v11090_v11 = vld [vmem:[#allocation2 + $0x590] sm:$0xf]  ;;  %v10492_v37 = vld [vmem:[#allocation2 + $0xf8] sm:$0xf0] }
 0x8a4   :  { %6266 = vmatmul.bf16.vlgmr.msra.gmra.mxu3 %v14178_v60  ;;  %6279 = vmatmul.bf16.vlgmr.msrb.gmra.mxu0 %v14182_v29  ;;  %v12550_v44 = vld [vmem:[#allocation2 + $0x5cc] sm:$0xf0]  ;;  %v12542_v47 = vld [vmem:[#allocation2 + $0x594] sm:$0xf] }
 0x8a5   :  { %6292 = vmatmul.bf16.vlgmr.msrb.gmra.mxu1 %v14178_v60  ;;  %6305 = vmatmul.bf16.vlgmr.msrb.gmra.mxu2 %v14182_v29  ;;  %v11092_v26 = vld [vmem:[#allocation2 + $0x5d0] sm:$0xf0]  ;;  %v11026_v20 = vld [vmem:[#allocation2 + $0x510] sm:$0xf] }
 0x8a6   :  { %6362 = vmatpush.bf16.msra.mxu3 %v10835_v13  ;;  %6375 = vmatpush.bf16.msrb.mxu0 %v11347_v28  ;;  %v10711_v13 = vor.u32 %v12446_v54, %v10708_v2  ;;  %v11223_v28 = vor.u32 %v12574_v9, %v11220_v57  ;;  %v10579_v54 = vor.u32 %v12422_v59, %v10578_v58  ;;  %v10514_v9 = vld [vmem:[#allocation2 + $0x110] sm:$0xf]  ;;  %v12526_v56 = vld [vmem:[#allocation2 + $0x514] sm:$0xf] }
 0x8a7   :  { %6388 = vmatpush.bf16.msrb.mxu1 %v10839_v17  ;;  %6401 = vmatpush.bf16.msrb.mxu2 %v11351_v27  ;;  %v12430_v17 = vld [vmem:[#allocation2 + $0x214] sm:$0xf]  ;;  %v11091_v2 = vor.u32 %v12550_v44, %v11090_v11  ;;  %v12406_v57 = vld [vmem:[#allocation2 + $0x14c] sm:$0xf0] }
 0x8a8   :  { %v10644_v27 = vld [vmem:[#allocation2 + $0x250] sm:$0xf0]  ;;  %v12534_v39 = vld [vmem:[#allocation2 + $0x54c] sm:$0xf0] }
 0x8a9   :  { %v11028_v33 = vld [vmem:[#allocation2 + $0x550] sm:$0xf0]  ;;  %v10962_v58 = vld [vmem:[#allocation2 + $0x490] sm:$0xf] }
 0x8aa   :  { %6363 = vmatpush.bf16.msra.mxu3 %v10771_v61  ;;  %6376 = vmatpush.bf16.msrb.mxu0 %v11283_v6  ;;  %v10647_v61 = vor.u32 %v12430_v17, %v10644_v27  ;;  %v11159_v6 = vor.u32 %v12558_v31, %v11156_v35  ;;  %v10515_v17 = vor.u32 %v12406_v57, %v10514_v9  ;;  %v10450_v31 = vld [vmem:[#allocation2 + $0x90] sm:$0xf]  ;;  %v12510_v11 = vld [vmem:[#allocation2 + $0x494] sm:$0xf] }
 0x8ab   :  { %6389 = vmatpush.bf16.msrb.mxu1 %v10775_v12  ;;  %6402 = vmatpush.bf16.msrb.mxu2 %v11287_v25  ;;  %v12414_v12 = vld [vmem:[#allocation2 + $0x194] sm:$0xf]  ;;  %v11027_v27 = vor.u32 %v12534_v39, %v11026_v20  ;;  %v12390_v35 = vld [vmem:[#allocation2 + $0xcc] sm:$0xf0] }
 0x8ac   :  { %v10580_v25 = vld [vmem:[#allocation2 + $0x1d0] sm:$0xf0]  ;;  %v12518_v59 = vld [vmem:[#allocation2 + $0x4cc] sm:$0xf0] }
 0x8ad   :  { %v10964_v44 = vld [vmem:[#allocation2 + $0x4d0] sm:$0xf0] }
 0x8ae   :  { %6364 = vmatpush.bf16.msra.mxu3 %v10707_v53  ;;  %6377 = vmatpush.bf16.msrb.mxu0 %v11219_v48  ;;  %v10583_v53 = vor.u32 %v12414_v12, %v10580_v25  ;;  %v11095_v48 = vor.u32 %v12542_v47, %v11092_v26  ;;  %v10386_v12 = vld [vmem:[#allocation2 + $0x10] sm:$0xf]  ;;  %v10451_v25 = vor.u32 %v12390_v35, %v10450_v31  ;;  %v12494_v20 = vld [vmem:[#allocation2 + $0x414] sm:$0xf]  ;;  %v10844_v31 = vld [vmem:[#allocation2 + $0x3d8] sm:$0xf0] }
 0x8af   :  { %6390 = vmatpush.bf16.msrb.mxu1 %v10711_v13  ;;  %6403 = vmatpush.bf16.msrb.mxu2 %v11223_v28  ;;  %v12398_v13 = vld [vmem:[#allocation2 + $0x114] sm:$0xf]  ;;  %v10963_v47 = vor.u32 %v12518_v59, %v10962_v58  ;;  %v12374_v26 = vld [vmem:[#allocation2 + $0x4c] sm:$0xf0]  ;;  %v10967_v57 = vor.u32 %v12510_v11, %v10964_v44  ;;  %v12607_v35 = vld [vmem:[#allocation2 + $0x79c] sm:$0xf]  ;;  %v10847_v44 = vor.u32 %v12479_v38, %v10844_v31 }
 0x8b0   :  { %v10516_v28 = vld [vmem:[#allocation2 + $0x150] sm:$0xf0]  ;;  %v11356_v58 = vld [vmem:[#allocation2 + $0x7d8] sm:$0xf0]  ;;  %v12471_v11 = vld [vmem:[#allocation2 + $0x354] sm:$0xf0] }
 0x8b1   :  { %v10900_v39 = vld [vmem:[#allocation2 + $0x450] sm:$0xf0]  ;;  %v11359_v41 = vor.u32 %v12607_v35, %v11356_v58  ;;  %v12431_v31 = vld [vmem:[#allocation2 + $0x21c] sm:$0xf] }
 0x8b2   :  { %6365 = vmatpush.bf16.msra.mxu3 %v10643_v36  ;;  %6378 = vmatpush.bf16.msrb.mxu0 %v11155_v51  ;;  %v10519_v36 = vor.u32 %v12398_v13, %v10516_v28  ;;  %v11031_v51 = vor.u32 %v12526_v56, %v11028_v33  ;;  %v10842_v13 = vld [vmem:[#allocation2 + $0x398] sm:$0xf]  ;;  %v10652_v35 = vld [vmem:[#allocation2 + $0x258] sm:$0xf0] }
 0x8b3   :  { %6391 = vmatpush.bf16.msrb.mxu1 %v10647_v61  ;;  %6404 = vmatpush.bf16.msrb.mxu2 %v11159_v6  ;;  %v12382_v61 = vld [vmem:[#allocation2 + $0x94] sm:$0xf]  ;;  %v12487_v28 = vld [vmem:[#allocation2 + $0x3d4] sm:$0xf0]  ;;  %v12559_v58 = vld [vmem:[#allocation2 + $0x61c] sm:$0xf] }
 0x8b4   :  { %6318 = vmatmul.bf16.vlgmr.msrb.gmra.mxu3 %v14178_v60  ;;  %6331 = vmatmul.bf16.vlgmr.msra.gmra.mxu0 %v14182_v29  ;;  %v10452_v6 = vld [vmem:[#allocation2 + $0xd0] sm:$0xf0]  ;;  %v11354_v56 = vld [vmem:[#allocation2 + $0x798] sm:$0xf]  ;;  %v10843_v59 = vor.u32 %v12487_v28, %v10842_v13  ;;  %v12575_v13 = vld [vmem:[#allocation2 + $0x69c] sm:$0xf] }
 0x8b5   :  { %6344 = vmatmul.bf16.vlgmr.msra.gmra.mxu1 %v14178_v60  ;;  %6357 = vmatmul.bf16.vlgmr.msra.gmra.mxu2 %v14182_v29  ;;  %v10455_v9 = vor.u32 %v12382_v61, %v10452_v6  ;;  %v12615_v33 = vld [vmem:[#allocation2 + $0x7d4] sm:$0xf0]  ;;  %v11228_v28 = vld [vmem:[#allocation2 + $0x6d8] sm:$0xf0] }
 0x8b6   :  { %6366 = vmatpush.bf16.msra.mxu3 %v10579_v54  ;;  %6379 = vmatpush.bf16.msrb.mxu0 %v11091_v2  ;;  %v10898_v54 = vld [vmem:[#allocation2 + $0x410] sm:$0xf]  ;;  %v11355_v61 = vor.u32 %v12615_v33, %v11354_v56  ;;  %v10778_v6 = vld [vmem:[#allocation2 + $0x318] sm:$0xf]  ;;  %v11231_v33 = vor.u32 %v12575_v13, %v11228_v28  ;;  %v12399_v28 = vld [vmem:[#allocation2 + $0x11c] sm:$0xf] }
 0x8b7   :  { %6392 = vmatpush.bf16.msrb.mxu1 %v10583_v53  ;;  %6405 = vmatpush.bf16.msrb.mxu2 %v11095_v48  ;;  %v12502_v2 = vld [vmem:[#allocation2 + $0x44c] sm:$0xf0]  ;;  %v12366_v53 = vld [vmem:[#allocation2 + $0x14] sm:$0xf]  ;;  %v12535_v13 = vld [vmem:[#allocation2 + $0x554] sm:$0xf0] }
 0x8b8   :  { %v10388_v48 = vld [vmem:[#allocation2 + $0x50] sm:$0xf0] }
 0x8ba   :  { %6367 = vmatpush.bf16.msra.mxu3 %v10515_v17  ;;  %6380 = vmatpush.bf16.msrb.mxu0 %v11027_v27  ;;  %v10387_v17 = vor.u32 %v12374_v26, %v10386_v12  ;;  %v10899_v27 = vor.u32 %v12502_v2, %v10898_v54  ;;  %v10780_v12 = vld [vmem:[#allocation2 + $0x358] sm:$0xf0]  ;;  %v10779_v26 = vor.u32 %v12471_v11, %v10778_v6  ;;  %v10714_v2 = vld [vmem:[#allocation2 + $0x298] sm:$0xf] }
 0x8bb   :  { %6393 = vmatpush.bf16.msrb.mxu1 %v10519_v36  ;;  %6406 = vmatpush.bf16.msrb.mxu2 %v11031_v51  ;;  %v10391_v36 = vor.u32 %v12366_v53, %v10388_v48  ;;  %v10903_v51 = vor.u32 %v12494_v20, %v10900_v39  ;;  %v11291_v54 = vor.u32 %v12599_v18, %v11290_v24  ;;  %v11226_v53 = vld [vmem:[#allocation2 + $0x698] sm:$0xf]  ;;  %v12447_v20 = vld [vmem:[#allocation2 + $0x29c] sm:$0xf] }
 0x8bc   :  { %v10783_v38 = vor.u32 %v12463_v19, %v10780_v12  ;;  %v12583_v48 = vld [vmem:[#allocation2 + $0x6d4] sm:$0xf0]  ;;  %v10716_v39 = vld [vmem:[#allocation2 + $0x2d8] sm:$0xf0]  ;;  %v10655_v11 = vor.u32 %v12431_v31, %v10652_v35 }
 0x8bd   :  { %v11227_v24 = vor.u32 %v12583_v48, %v11226_v53  ;;  %v10650_v19 = vld [vmem:[#allocation2 + $0x218] sm:$0xf]  ;;  %v10719_v56 = vor.u32 %v12447_v20, %v10716_v39 }
 0x8be   :  { %6368 = vmatpush.bf16.msra.mxu3 %v10451_v25  ;;  %6381 = vmatpush.bf16.msrb.mxu0 %v10963_v47  ;;  %v12591_v25 = vld [vmem:[#allocation2 + $0x71c] sm:$0xf]  ;;  %v12423_v6 = vld [vmem:[#allocation2 + $0x1d4] sm:$0xf0] }
 0x8bf   :  { %6394 = vmatpush.bf16.msrb.mxu1 %v10455_v9  ;;  %6407 = vmatpush.bf16.msrb.mxu2 %v10967_v57  ;;  %v11292_v47 = vld [vmem:[#allocation2 + $0x758] sm:$0xf0]  ;;  %v12455_v9 = vld [vmem:[#allocation2 + $0x2d4] sm:$0xf0] }
 0x8c0   :  { %v11295_v57 = vor.u32 %v12591_v25, %v11292_v47  ;;  %v10715_v18 = vor.u32 %v12455_v9, %v10714_v2  ;;  %v11098_v12 = vld [vmem:[#allocation2 + $0x598] sm:$0xf]  ;;  %v12415_v47 = vld [vmem:[#allocation2 + $0x19c] sm:$0xf] }
 0x8c1   :  { %v12551_v25 = vld [vmem:[#allocation2 + $0x5d4] sm:$0xf0]  ;;  %v11100_v2 = vld [vmem:[#allocation2 + $0x5d8] sm:$0xf0] }
 0x8c2   :  { %6369 = vmatpush.bf16.msra.mxu3 %v10387_v17  ;;  %6382 = vmatpush.bf16.msrb.mxu0 %v10899_v27  ;;  %v11162_v17 = vld [vmem:[#allocation2 + $0x618] sm:$0xf] }
 0x8c3   :  { %6395 = vmatpush.bf16.msrb.mxu1 %v10391_v36  ;;  %6408 = vmatpush.bf16.msrb.mxu2 %v10903_v51  ;;  %v12567_v27 = vld [vmem:[#allocation2 + $0x654] sm:$0xf0]  ;;  %v11164_v36 = vld [vmem:[#allocation2 + $0x658] sm:$0xf0] }
 0x8c4   :  { %v12407_v53 = vld [vmem:[#allocation2 + $0x154] sm:$0xf0] }
 0x8c5   :  { %6370 = vmatmul.bf16.vlgmr.msra.gmra.mxu3 %v14178_v60  ;;  %6383 = vmatmul.bf16.vlgmr.msrb.gmra.mxu0 %v14182_v29  ;;  %v11034_v39 = vld [vmem:[#allocation2 + $0x518] sm:$0xf] }
 0x8c6   :  { %6414 = vmatpush.bf16.msrb.mxu3 %v10843_v59  ;;  %6427 = vmatpush.bf16.msra.mxu0 %v11355_v61  ;;  %v11163_v59 = vor.u32 %v12567_v27, %v11162_v17  ;;  %v10586_v61 = vld [vmem:[#allocation2 + $0x198] sm:$0xf] }
 0x8c7   :  { %6440 = vmatpush.bf16.msra.mxu1 %v10847_v44  ;;  %6453 = vmatpush.bf16.msra.mxu2 %v11359_v41  ;;  %v12439_v41 = vld [vmem:[#allocation2 + $0x254] sm:$0xf0]  ;;  %v11167_v44 = vor.u32 %v12559_v58, %v11164_v36  ;;  %v10587_v9 = vor.u32 %v12423_v6, %v10586_v61  ;;  %v12383_v36 = vld [vmem:[#allocation2 + $0x9c] sm:$0xf] }
 0x8c8   :  { %6396 = vmatmul.bf16.vlgmr.msrb.gmra.mxu1 %v14178_v60  ;;  %6409 = vmatmul.bf16.vlgmr.msrb.gmra.mxu2 %v14182_v29  ;;  %v10651_v51 = vor.u32 %v12439_v41, %v10650_v19  ;;  %v11036_v19 = vld [vmem:[#allocation2 + $0x558] sm:$0xf0]  ;;  %v12391_v17 = vld [vmem:[#allocation2 + $0xd4] sm:$0xf0] }
 0x8c9   :  { %v10970_v35 = vld [vmem:[#allocation2 + $0x498] sm:$0xf]  ;;  %v10972_v61 = vld [vmem:[#allocation2 + $0x4d8] sm:$0xf0] }
 0x8ca   :  { %6415 = vmatpush.bf16.msrb.mxu3 %v10779_v26  ;;  %6428 = vmatpush.bf16.msra.mxu0 %v11291_v54  ;;  %v10588_v26 = vld [vmem:[#allocation2 + $0x1d8] sm:$0xf0]  ;;  %v12519_v58 = vld [vmem:[#allocation2 + $0x4d4] sm:$0xf0] }
 0x8cb   :  { %6441 = vmatpush.bf16.msra.mxu1 %v10783_v38  ;;  %6454 = vmatpush.bf16.msra.mxu2 %v11295_v57  ;;  %v12543_v54 = vld [vmem:[#allocation2 + $0x59c] sm:$0xf]  ;;  %v11099_v38 = vor.u32 %v12551_v25, %v11098_v12  ;;  %v10522_v57 = vld [vmem:[#allocation2 + $0x118] sm:$0xf]  ;;  %v10591_v48 = vor.u32 %v12415_v47, %v10588_v26 }
 0x8cc   :  { %v11103_v20 = vor.u32 %v12543_v54, %v11100_v2  ;;  %v10523_v41 = vor.u32 %v12407_v53, %v10522_v57  ;;  %v10394_v6 = vld [vmem:[#allocation2 + $0x18] sm:$0xf]  ;;  %v12367_v2 = vld [vmem:[#allocation2 + $0x1c] sm:$0xf]  ;;  %v10850_v53 = vld [vmem:[#allocation2 + $0x3a0] sm:$0xf] }
 0x8cd   :  { %v12375_v12 = vld [vmem:[#allocation2 + $0x54] sm:$0xf0]  ;;  %v10908_v57 = vld [vmem:[#allocation2 + $0x458] sm:$0xf0] }
 0x8ce   :  { %6416 = vmatpush.bf16.msrb.mxu3 %v10715_v18  ;;  %6429 = vmatpush.bf16.msra.mxu0 %v11227_v24  ;;  %v10524_v18 = vld [vmem:[#allocation2 + $0x158] sm:$0xf0]  ;;  %v10906_v25 = vld [vmem:[#allocation2 + $0x418] sm:$0xf] }
 0x8cf   :  { %6442 = vmatpush.bf16.msra.mxu1 %v10719_v56  ;;  %6455 = vmatpush.bf16.msra.mxu2 %v11231_v33  ;;  %v12527_v24 = vld [vmem:[#allocation2 + $0x51c] sm:$0xf]  ;;  %v11035_v56 = vor.u32 %v12535_v13, %v11034_v39  ;;  %v10458_v33 = vld [vmem:[#allocation2 + $0x98] sm:$0xf]  ;;  %v10527_v27 = vor.u32 %v12399_v28, %v10524_v18  ;;  %v12616_v39 = vld [vmem:[#allocation2 + $0x7dc] sm:$0xf0]  ;;  %v10395_v28 = vor.u32 %v12375_v12, %v10394_v6 }
 0x8d0   :  { %v11039_v31 = vor.u32 %v12527_v24, %v11036_v19  ;;  %v12503_v47 = vld [vmem:[#allocation2 + $0x454] sm:$0xf0]  ;;  %v12480_v13 = vld [vmem:[#allocation2 + $0x3a4] sm:$0xf] }
 0x8d1   :  { %v10907_v18 = vor.u32 %v12503_v47, %v10906_v25  ;;  %v10852_v24 = vld [vmem:[#allocation2 + $0x3e0] sm:$0xf0]  ;;  %v10722_v47 = vld [vmem:[#allocation2 + $0x2a0] sm:$0xf] }
 0x8d2   :  { %6417 = vmatpush.bf16.msrb.mxu3 %v10651_v51  ;;  %6430 = vmatpush.bf16.msra.mxu0 %v11163_v59  ;;  %v10460_v51 = vld [vmem:[#allocation2 + $0xd8] sm:$0xf0]  ;;  %v12608_v19 = vld [vmem:[#allocation2 + $0x7a4] sm:$0xf] }
 0x8d3   :  { %6443 = vmatpush.bf16.msra.mxu1 %v10655_v11  ;;  %6456 = vmatpush.bf16.msra.mxu2 %v11167_v44  ;;  %v12511_v59 = vld [vmem:[#allocation2 + $0x49c] sm:$0xf]  ;;  %v10459_v11 = vor.u32 %v12391_v17, %v10458_v33  ;;  %v10971_v44 = vor.u32 %v12519_v58, %v10970_v35  ;;  %v10463_v26 = vor.u32 %v12383_v36, %v10460_v51  ;;  %v12472_v35 = vld [vmem:[#allocation2 + $0x35c] sm:$0xf0]  ;;  %v10788_v6 = vld [vmem:[#allocation2 + $0x360] sm:$0xf0] }
 0x8d4   :  { %v10975_v54 = vor.u32 %v12511_v59, %v10972_v61  ;;  %v10855_v58 = vor.u32 %v12480_v13, %v10852_v24  ;;  %v11298_v51 = vld [vmem:[#allocation2 + $0x720] sm:$0xf]  ;;  %v12464_v61 = vld [vmem:[#allocation2 + $0x324] sm:$0xf] }
 0x8d5   :  { %v12600_v59 = vld [vmem:[#allocation2 + $0x75c] sm:$0xf0] }
 0x8d6   :  { %6418 = vmatpush.bf16.msrb.mxu3 %v10587_v9  ;;  %6431 = vmatpush.bf16.msra.mxu0 %v11099_v38  ;;  %v10396_v9 = vld [vmem:[#allocation2 + $0x58] sm:$0xf0]  ;;  %v11299_v25 = vor.u32 %v12600_v59, %v11298_v51  ;;  %v12424_v51 = vld [vmem:[#allocation2 + $0x1dc] sm:$0xf0] }
 0x8d7   :  { %6444 = vmatpush.bf16.msra.mxu1 %v10591_v48  ;;  %6457 = vmatpush.bf16.msra.mxu2 %v11103_v20  ;;  %v12495_v38 = vld [vmem:[#allocation2 + $0x41c] sm:$0xf]  ;;  %v12488_v48 = vld [vmem:[#allocation2 + $0x3dc] sm:$0xf0] }
 0x8d8   :  { %v11362_v20 = vld [vmem:[#allocation2 + $0x7a0] sm:$0xf]  ;;  %v10911_v33 = vor.u32 %v12495_v38, %v10908_v57  ;;  %v10851_v17 = vor.u32 %v12488_v48, %v10850_v53  ;;  %v12448_v57 = vld [vmem:[#allocation2 + $0x2a4] sm:$0xf] }
 0x8d9   :  { %v12584_v38 = vld [vmem:[#allocation2 + $0x6dc] sm:$0xf0]  ;;  %v10724_v53 = vld [vmem:[#allocation2 + $0x2e0] sm:$0xf0] }
 0x8da   :  { %6419 = vmatpush.bf16.msrb.mxu3 %v10523_v41  ;;  %6432 = vmatpush.bf16.msra.mxu0 %v11035_v56  ;;  %v11364_v41 = vld [vmem:[#allocation2 + $0x7e0] sm:$0xf0]  ;;  %v10399_v56 = vor.u32 %v12367_v2, %v10396_v9  ;;  %v11234_v9 = vld [vmem:[#allocation2 + $0x6a0] sm:$0xf]  ;;  %v10727_v24 = vor.u32 %v12448_v57, %v10724_v53 }
 0x8db   :  { %6445 = vmatpush.bf16.msra.mxu1 %v10527_v27  ;;  %6458 = vmatpush.bf16.msra.mxu2 %v11039_v31  ;;  %v11363_v27 = vor.u32 %v12616_v39, %v11362_v20  ;;  %v10786_v31 = vld [vmem:[#allocation2 + $0x320] sm:$0xf]  ;;  %v11367_v36 = vor.u32 %v12608_v19, %v11364_v41  ;;  %v12576_v48 = vld [vmem:[#allocation2 + $0x6a4] sm:$0xf]  ;;  %v11235_v13 = vor.u32 %v12584_v38, %v11234_v9 }
 0x8dc   :  { %v10787_v12 = vor.u32 %v12472_v35, %v10786_v31  ;;  %v11236_v20 = vld [vmem:[#allocation2 + $0x6e0] sm:$0xf0]  ;;  %v11170_v41 = vld [vmem:[#allocation2 + $0x620] sm:$0xf] }
 0x8dd   :  { %v11239_v19 = vor.u32 %v12576_v48, %v11236_v20  ;;  %v11172_v31 = vld [vmem:[#allocation2 + $0x660] sm:$0xf0]  ;;  %v12408_v9 = vld [vmem:[#allocation2 + $0x15c] sm:$0xf0] }
 0x8de   :  { %6420 = vmatpush.bf16.msrb.mxu3 %v10459_v11  ;;  %6433 = vmatpush.bf16.msra.mxu0 %v10971_v44  ;;  %v12592_v11 = vld [vmem:[#allocation2 + $0x724] sm:$0xf]  ;;  %v11042_v53 = vld [vmem:[#allocation2 + $0x520] sm:$0xf] }
 0x8df   :  { %6446 = vmatpush.bf16.msra.mxu1 %v10463_v26  ;;  %6459 = vmatpush.bf16.msra.mxu2 %v10975_v54  ;;  %v11300_v44 = vld [vmem:[#allocation2 + $0x760] sm:$0xf0]  ;;  %v12456_v26 = vld [vmem:[#allocation2 + $0x2dc] sm:$0xf0]  ;;  %v10791_v54 = vor.u32 %v12464_v61, %v10788_v6 }
 0x8e0   :  { %v11303_v2 = vor.u32 %v12592_v11, %v11300_v44  ;;  %v10723_v39 = vor.u32 %v12456_v26, %v10722_v47  ;;  %v11106_v6 = vld [vmem:[#allocation2 + $0x5a0] sm:$0xf]  ;;  %v12416_v44 = vld [vmem:[#allocation2 + $0x1a4] sm:$0xf] }
 0x8e1   :  { %v12552_v11 = vld [vmem:[#allocation2 + $0x5dc] sm:$0xf0]  ;;  %v11108_v47 = vld [vmem:[#allocation2 + $0x5e0] sm:$0xf0] }
 0x8e2   :  { %6421 = vmatpush.bf16.msrb.mxu3 %v10395_v28  ;;  %6434 = vmatpush.bf16.msra.mxu0 %v10907_v18  ;;  %v10658_v28 = vld [vmem:[#allocation2 + $0x220] sm:$0xf]  ;;  %v12400_v20 = vld [vmem:[#allocation2 + $0x124] sm:$0xf] }
 0x8e3   :  { %6447 = vmatpush.bf16.msra.mxu1 %v10399_v56  ;;  %6460 = vmatpush.bf16.msra.mxu2 %v10911_v33  ;;  %v12440_v18 = vld [vmem:[#allocation2 + $0x25c] sm:$0xf0]  ;;  %v12432_v33 = vld [vmem:[#allocation2 + $0x224] sm:$0xf] }
 0x8e4   :  { %v12568_v56 = vld [vmem:[#allocation2 + $0x65c] sm:$0xf0]  ;;  %v10659_v35 = vor.u32 %v12440_v18, %v10658_v28  ;;  %v11044_v28 = vld [vmem:[#allocation2 + $0x560] sm:$0xf0] }
 0x8e5   :  { %6422 = vmatmul.bf16.vlgmr.msrb.gmra.mxu3 %v14178_v60  ;;  %6435 = vmatmul.bf16.vlgmr.msra.gmra.mxu0 %v14182_v29  ;;  %v12536_v48 = vld [vmem:[#allocation2 + $0x55c] sm:$0xf0] }
 0x8e6   :  { %6466 = vmatpush.bf16.msra.mxu3 %v10851_v17  ;;  %6479 = vmatpush.bf16.msrb.mxu0 %v11363_v27  ;;  %v10660_v17 = vld [vmem:[#allocation2 + $0x260] sm:$0xf0] }
 0x8e7   :  { %6492 = vmatpush.bf16.msrb.mxu1 %v10855_v58  ;;  %6505 = vmatpush.bf16.msrb.mxu2 %v11367_v36  ;;  %v12560_v27 = vld [vmem:[#allocation2 + $0x624] sm:$0xf]  ;;  %v11171_v58 = vor.u32 %v12568_v56, %v11170_v41  ;;  %v10594_v36 = vld [vmem:[#allocation2 + $0x1a0] sm:$0xf]  ;;  %v10663_v59 = vor.u32 %v12432_v33, %v10660_v17 }
 0x8e8   :  { %6448 = vmatmul.bf16.vlgmr.msra.gmra.mxu1 %v14178_v60  ;;  %6461 = vmatmul.bf16.vlgmr.msra.gmra.mxu2 %v14182_v29  ;;  %v11175_v61 = vor.u32 %v12560_v27, %v11172_v31  ;;  %v10595_v26 = vor.u32 %v12424_v51, %v10594_v36  ;;  %v12392_v41 = vld [vmem:[#allocation2 + $0xdc] sm:$0xf0]  ;;  %v12384_v31 = vld [vmem:[#allocation2 + $0xa4] sm:$0xf] }
 0x8e9   :  { %v10978_v17 = vld [vmem:[#allocation2 + $0x4a0] sm:$0xf]  ;;  %v10980_v36 = vld [vmem:[#allocation2 + $0x4e0] sm:$0xf0] }
 0x8ea   :  { %6467 = vmatpush.bf16.msra.mxu3 %v10787_v12  ;;  %6480 = vmatpush.bf16.msrb.mxu0 %v11299_v25  ;;  %v10596_v12 = vld [vmem:[#allocation2 + $0x1e0] sm:$0xf0]  ;;  %v12520_v27 = vld [vmem:[#allocation2 + $0x4dc] sm:$0xf0] }
 0x8eb   :  { %6493 = vmatpush.bf16.msrb.mxu1 %v10791_v54  ;;  %6506 = vmatpush.bf16.msrb.mxu2 %v11303_v2  ;;  %v12544_v25 = vld [vmem:[#allocation2 + $0x5a4] sm:$0xf]  ;;  %v11107_v54 = vor.u32 %v12552_v11, %v11106_v6  ;;  %v10530_v2 = vld [vmem:[#allocation2 + $0x120] sm:$0xf]  ;;  %v10599_v38 = vor.u32 %v12416_v44, %v10596_v12 }
 0x8ec   :  { %v11111_v57 = vor.u32 %v12544_v25, %v11108_v47  ;;  %v10531_v18 = vor.u32 %v12408_v9, %v10530_v2  ;;  %v10402_v51 = vld [vmem:[#allocation2 + $0x20] sm:$0xf]  ;;  %v12368_v47 = vld [vmem:[#allocation2 + $0x24] sm:$0xf]  ;;  %v10858_v9 = vld [vmem:[#allocation2 + $0x3a8] sm:$0xf] }
 0x8ed   :  { %v12376_v6 = vld [vmem:[#allocation2 + $0x5c] sm:$0xf0]  ;;  %v10916_v2 = vld [vmem:[#allocation2 + $0x460] sm:$0xf0] }
 0x8ee   :  { %6468 = vmatpush.bf16.msra.mxu3 %v10723_v39  ;;  %6481 = vmatpush.bf16.msrb.mxu0 %v11235_v13  ;;  %v10532_v39 = vld [vmem:[#allocation2 + $0x160] sm:$0xf0]  ;;  %v10914_v11 = vld [vmem:[#allocation2 + $0x420] sm:$0xf] }
 0x8ef   :  { %6494 = vmatpush.bf16.msrb.mxu1 %v10727_v24  ;;  %6507 = vmatpush.bf16.msrb.mxu2 %v11239_v19  ;;  %v12528_v13 = vld [vmem:[#allocation2 + $0x524] sm:$0xf]  ;;  %v11043_v24 = vor.u32 %v12536_v48, %v11042_v53  ;;  %v10466_v19 = vld [vmem:[#allocation2 + $0xa0] sm:$0xf]  ;;  %v10535_v56 = vor.u32 %v12400_v20, %v10532_v39  ;;  %v12617_v53 = vld [vmem:[#allocation2 + $0x7e4] sm:$0xf0]  ;;  %v10403_v20 = vor.u32 %v12376_v6, %v10402_v51 }
 0x8f0   :  { %v11047_v33 = vor.u32 %v12528_v13, %v11044_v28  ;;  %v12504_v44 = vld [vmem:[#allocation2 + $0x45c] sm:$0xf0]  ;;  %v12481_v48 = vld [vmem:[#allocation2 + $0x3ac] sm:$0xf] }
 0x8f1   :  { %v10915_v39 = vor.u32 %v12504_v44, %v10914_v11  ;;  %v10860_v13 = vld [vmem:[#allocation2 + $0x3e8] sm:$0xf0]  ;;  %v10730_v44 = vld [vmem:[#allocation2 + $0x2a8] sm:$0xf] }
 0x8f2   :  { %6469 = vmatpush.bf16.msra.mxu3 %v10659_v35  ;;  %6482 = vmatpush.bf16.msrb.mxu0 %v11171_v58  ;;  %v10468_v35 = vld [vmem:[#allocation2 + $0xe0] sm:$0xf0]  ;;  %v12609_v28 = vld [vmem:[#allocation2 + $0x7ac] sm:$0xf] }
 0x8f3   :  { %6495 = vmatpush.bf16.msrb.mxu1 %v10663_v59  ;;  %6508 = vmatpush.bf16.msrb.mxu2 %v11175_v61  ;;  %v12512_v58 = vld [vmem:[#allocation2 + $0x4a4] sm:$0xf]  ;;  %v10467_v59 = vor.u32 %v12392_v41, %v10466_v19  ;;  %v10979_v61 = vor.u32 %v12520_v27, %v10978_v17  ;;  %v10471_v12 = vor.u32 %v12384_v31, %v10468_v35  ;;  %v12473_v17 = vld [vmem:[#allocation2 + $0x364] sm:$0xf0]  ;;  %v10796_v51 = vld [vmem:[#allocation2 + $0x368] sm:$0xf0] }
 0x8f4   :  { %v10983_v25 = vor.u32 %v12512_v58, %v10980_v36  ;;  %v10863_v27 = vor.u32 %v12481_v48, %v10860_v13  ;;  %v11306_v35 = vld [vmem:[#allocation2 + $0x728] sm:$0xf]  ;;  %v12465_v36 = vld [vmem:[#allocation2 + $0x32c] sm:$0xf] }
 0x8f5   :  { %v12601_v58 = vld [vmem:[#allocation2 + $0x764] sm:$0xf0] }
 0x8f6   :  { %6470 = vmatpush.bf16.msra.mxu3 %v10595_v26  ;;  %6483 = vmatpush.bf16.msrb.mxu0 %v11107_v54  ;;  %v10404_v26 = vld [vmem:[#allocation2 + $0x60] sm:$0xf0]  ;;  %v11307_v11 = vor.u32 %v12601_v58, %v11306_v35  ;;  %v12425_v35 = vld [vmem:[#allocation2 + $0x1e4] sm:$0xf0] }
 0x8f7   :  { %6496 = vmatpush.bf16.msrb.mxu1 %v10599_v38  ;;  %6509 = vmatpush.bf16.msrb.mxu2 %v11111_v57  ;;  %v12496_v54 = vld [vmem:[#allocation2 + $0x424] sm:$0xf]  ;;  %v12489_v38 = vld [vmem:[#allocation2 + $0x3e4] sm:$0xf0] }
 0x8f8   :  { %v11370_v57 = vld [vmem:[#allocation2 + $0x7a8] sm:$0xf]  ;;  %v10919_v19 = vor.u32 %v12496_v54, %v10916_v2  ;;  %v10859_v41 = vor.u32 %v12489_v38, %v10858_v9  ;;  %v12449_v2 = vld [vmem:[#allocation2 + $0x2ac] sm:$0xf] }
 0x8f9   :  { %v12585_v54 = vld [vmem:[#allocation2 + $0x6e4] sm:$0xf0]  ;;  %v10732_v9 = vld [vmem:[#allocation2 + $0x2e8] sm:$0xf0] }
 0x8fa   :  { %6471 = vmatpush.bf16.msra.mxu3 %v10531_v18  ;;  %6484 = vmatpush.bf16.msrb.mxu0 %v11043_v24  ;;  %v11372_v18 = vld [vmem:[#allocation2 + $0x7e8] sm:$0xf0]  ;;  %v10407_v24 = vor.u32 %v12368_v47, %v10404_v26  ;;  %v11242_v26 = vld [vmem:[#allocation2 + $0x6a8] sm:$0xf]  ;;  %v10735_v13 = vor.u32 %v12449_v2, %v10732_v9 }
 0x8fb   :  { %6497 = vmatpush.bf16.msrb.mxu1 %v10535_v56  ;;  %6510 = vmatpush.bf16.msrb.mxu2 %v11047_v33  ;;  %v11371_v56 = vor.u32 %v12617_v53, %v11370_v57  ;;  %v10794_v33 = vld [vmem:[#allocation2 + $0x328] sm:$0xf]  ;;  %v11375_v31 = vor.u32 %v12609_v28, %v11372_v18  ;;  %v12577_v38 = vld [vmem:[#allocation2 + $0x6ac] sm:$0xf]  ;;  %v11243_v48 = vor.u32 %v12585_v54, %v11242_v26 }
 0x8fc   :  { %v10795_v6 = vor.u32 %v12473_v17, %v10794_v33  ;;  %v11244_v57 = vld [vmem:[#allocation2 + $0x6e8] sm:$0xf0]  ;;  %v11178_v18 = vld [vmem:[#allocation2 + $0x628] sm:$0xf] }
 0x8fd   :  { %v11247_v28 = vor.u32 %v12577_v38, %v11244_v57  ;;  %v11180_v33 = vld [vmem:[#allocation2 + $0x668] sm:$0xf0]  ;;  %v12409_v26 = vld [vmem:[#allocation2 + $0x164] sm:$0xf0] }
 0x8fe   :  { %6472 = vmatpush.bf16.msra.mxu3 %v10467_v59  ;;  %6485 = vmatpush.bf16.msrb.mxu0 %v10979_v61  ;;  %v12593_v59 = vld [vmem:[#allocation2 + $0x72c] sm:$0xf]  ;;  %v11050_v9 = vld [vmem:[#allocation2 + $0x528] sm:$0xf] }
 0x8ff   :  { %6498 = vmatpush.bf16.msrb.mxu1 %v10471_v12  ;;  %6511 = vmatpush.bf16.msrb.mxu2 %v10983_v25  ;;  %v11308_v61 = vld [vmem:[#allocation2 + $0x768] sm:$0xf0]  ;;  %v12457_v12 = vld [vmem:[#allocation2 + $0x2e4] sm:$0xf0]  ;;  %v10799_v25 = vor.u32 %v12465_v36, %v10796_v51 }
 0x900   :  { %v11311_v47 = vor.u32 %v12593_v59, %v11308_v61  ;;  %v10731_v53 = vor.u32 %v12457_v12, %v10730_v44  ;;  %v11114_v51 = vld [vmem:[#allocation2 + $0x5a8] sm:$0xf]  ;;  %v12417_v61 = vld [vmem:[#allocation2 + $0x1ac] sm:$0xf] }
 0x901   :  { %v12553_v59 = vld [vmem:[#allocation2 + $0x5e4] sm:$0xf0]  ;;  %v11116_v44 = vld [vmem:[#allocation2 + $0x5e8] sm:$0xf0] }
 0x902   :  { %6473 = vmatpush.bf16.msra.mxu3 %v10403_v20  ;;  %6486 = vmatpush.bf16.msrb.mxu0 %v10915_v39  ;;  %v10666_v20 = vld [vmem:[#allocation2 + $0x228] sm:$0xf]  ;;  %v12401_v57 = vld [vmem:[#allocation2 + $0x12c] sm:$0xf] }
 0x903   :  { %6499 = vmatpush.bf16.msrb.mxu1 %v10407_v24  ;;  %6512 = vmatpush.bf16.msrb.mxu2 %v10919_v19  ;;  %v12441_v39 = vld [vmem:[#allocation2 + $0x264] sm:$0xf0]  ;;  %v12433_v19 = vld [vmem:[#allocation2 + $0x22c] sm:$0xf] }
 0x904   :  { %v12569_v24 = vld [vmem:[#allocation2 + $0x664] sm:$0xf0]  ;;  %v10667_v17 = vor.u32 %v12441_v39, %v10666_v20  ;;  %v11052_v20 = vld [vmem:[#allocation2 + $0x568] sm:$0xf0] }
 0x905   :  { %6474 = vmatmul.bf16.vlgmr.msra.gmra.mxu3 %v14178_v60  ;;  %6487 = vmatmul.bf16.vlgmr.msrb.gmra.mxu0 %v14182_v29  ;;  %v12537_v38 = vld [vmem:[#allocation2 + $0x564] sm:$0xf0] }
 0x906   :  { %6518 = vmatpush.bf16.msrb.mxu3 %v10859_v41  ;;  %6531 = vmatpush.bf16.msra.mxu0 %v11371_v56  ;;  %v10668_v41 = vld [vmem:[#allocation2 + $0x268] sm:$0xf0] }
 0x907   :  { %6544 = vmatpush.bf16.msra.mxu1 %v10863_v27  ;;  %6557 = vmatpush.bf16.msra.mxu2 %v11375_v31  ;;  %v12561_v56 = vld [vmem:[#allocation2 + $0x62c] sm:$0xf]  ;;  %v11179_v27 = vor.u32 %v12569_v24, %v11178_v18  ;;  %v10602_v31 = vld [vmem:[#allocation2 + $0x1a8] sm:$0xf]  ;;  %v10671_v58 = vor.u32 %v12433_v19, %v10668_v41 }
 0x908   :  { %6500 = vmatmul.bf16.vlgmr.msrb.gmra.mxu1 %v14178_v60  ;;  %6513 = vmatmul.bf16.vlgmr.msrb.gmra.mxu2 %v14182_v29  ;;  %v11183_v36 = vor.u32 %v12561_v56, %v11180_v33  ;;  %v10603_v12 = vor.u32 %v12425_v35, %v10602_v31  ;;  %v12393_v18 = vld [vmem:[#allocation2 + $0xe4] sm:$0xf0]  ;;  %v12385_v33 = vld [vmem:[#allocation2 + $0xac] sm:$0xf] }
 0x909   :  { %v10986_v41 = vld [vmem:[#allocation2 + $0x4a8] sm:$0xf]  ;;  %v10988_v31 = vld [vmem:[#allocation2 + $0x4e8] sm:$0xf0] }
 0x90a   :  { %6519 = vmatpush.bf16.msrb.mxu3 %v10795_v6  ;;  %6532 = vmatpush.bf16.msra.mxu0 %v11307_v11  ;;  %v10604_v6 = vld [vmem:[#allocation2 + $0x1e8] sm:$0xf0]  ;;  %v12521_v56 = vld [vmem:[#allocation2 + $0x4e4] sm:$0xf0] }
 0x90b   :  { %6545 = vmatpush.bf16.msra.mxu1 %v10799_v25  ;;  %6558 = vmatpush.bf16.msra.mxu2 %v11311_v47  ;;  %v12545_v11 = vld [vmem:[#allocation2 + $0x5ac] sm:$0xf]  ;;  %v11115_v25 = vor.u32 %v12553_v59, %v11114_v51  ;;  %v10538_v47 = vld [vmem:[#allocation2 + $0x128] sm:$0xf]  ;;  %v10607_v54 = vor.u32 %v12417_v61, %v10604_v6 }
 0x90c   :  { %v11119_v2 = vor.u32 %v12545_v11, %v11116_v44  ;;  %v10539_v39 = vor.u32 %v12409_v26, %v10538_v47  ;;  %v10410_v35 = vld [vmem:[#allocation2 + $0x28] sm:$0xf]  ;;  %v12369_v44 = vld [vmem:[#allocation2 + $0x2c] sm:$0xf]  ;;  %v10866_v26 = vld [vmem:[#allocation2 + $0x3b0] sm:$0xf] }
 0x90d   :  { %v12377_v51 = vld [vmem:[#allocation2 + $0x64] sm:$0xf0]  ;;  %v10924_v47 = vld [vmem:[#allocation2 + $0x468] sm:$0xf0] }
 0x90e   :  { %6520 = vmatpush.bf16.msrb.mxu3 %v10731_v53  ;;  %6533 = vmatpush.bf16.msra.mxu0 %v11243_v48  ;;  %v10540_v53 = vld [vmem:[#allocation2 + $0x168] sm:$0xf0]  ;;  %v10922_v59 = vld [vmem:[#allocation2 + $0x428] sm:$0xf] }
 0x90f   :  { %6546 = vmatpush.bf16.msra.mxu1 %v10735_v13  ;;  %6559 = vmatpush.bf16.msra.mxu2 %v11247_v28  ;;  %v12529_v48 = vld [vmem:[#allocation2 + $0x52c] sm:$0xf]  ;;  %v11051_v13 = vor.u32 %v12537_v38, %v11050_v9  ;;  %v10474_v28 = vld [vmem:[#allocation2 + $0xa8] sm:$0xf]  ;;  %v10543_v24 = vor.u32 %v12401_v57, %v10540_v53  ;;  %v12618_v9 = vld [vmem:[#allocation2 + $0x7ec] sm:$0xf0]  ;;  %v10411_v57 = vor.u32 %v12377_v51, %v10410_v35 }
 0x910   :  { %v11055_v19 = vor.u32 %v12529_v48, %v11052_v20  ;;  %v12505_v61 = vld [vmem:[#allocation2 + $0x464] sm:$0xf0]  ;;  %v12482_v38 = vld [vmem:[#allocation2 + $0x3b4] sm:$0xf] }
 0x911   :  { %v10923_v53 = vor.u32 %v12505_v61, %v10922_v59  ;;  %v10868_v48 = vld [vmem:[#allocation2 + $0x3f0] sm:$0xf0]  ;;  %v10738_v61 = vld [vmem:[#allocation2 + $0x2b0] sm:$0xf] }
 0x912   :  { %6521 = vmatpush.bf16.msrb.mxu3 %v10667_v17  ;;  %6534 = vmatpush.bf16.msra.mxu0 %v11179_v27  ;;  %v10476_v17 = vld [vmem:[#allocation2 + $0xe8] sm:$0xf0]  ;;  %v12610_v20 = vld [vmem:[#allocation2 + $0x7b4] sm:$0xf] }
 0x913   :  { %6547 = vmatpush.bf16.msra.mxu1 %v10671_v58  ;;  %6560 = vmatpush.bf16.msra.mxu2 %v11183_v36  ;;  %v12513_v27 = vld [vmem:[#allocation2 + $0x4ac] sm:$0xf]  ;;  %v10475_v58 = vor.u32 %v12393_v18, %v10474_v28  ;;  %v10987_v36 = vor.u32 %v12521_v56, %v10986_v41  ;;  %v10479_v6 = vor.u32 %v12385_v33, %v10476_v17  ;;  %v12474_v41 = vld [vmem:[#allocation2 + $0x36c] sm:$0xf0]  ;;  %v10804_v35 = vld [vmem:[#allocation2 + $0x370] sm:$0xf0] }
 0x914   :  { %v10991_v11 = vor.u32 %v12513_v27, %v10988_v31  ;;  %v10871_v56 = vor.u32 %v12482_v38, %v10868_v48  ;;  %v11314_v17 = vld [vmem:[#allocation2 + $0x730] sm:$0xf]  ;;  %v12466_v31 = vld [vmem:[#allocation2 + $0x334] sm:$0xf] }
 0x915   :  { %v12602_v27 = vld [vmem:[#allocation2 + $0x76c] sm:$0xf0] }
 0x916   :  { %6522 = vmatpush.bf16.msrb.mxu3 %v10603_v12  ;;  %6535 = vmatpush.bf16.msra.mxu0 %v11115_v25  ;;  %v10412_v12 = vld [vmem:[#allocation2 + $0x68] sm:$0xf0]  ;;  %v11315_v59 = vor.u32 %v12602_v27, %v11314_v17  ;;  %v10674_v48 = vld [vmem:[#allocation2 + $0x230] sm:$0xf] }
 0x917   :  { %6548 = vmatpush.bf16.msra.mxu1 %v10607_v54  ;;  %6561 = vmatpush.bf16.msra.mxu2 %v11119_v2  ;;  %v12497_v25 = vld [vmem:[#allocation2 + $0x42c] sm:$0xf]  ;;  %v12490_v54 = vld [vmem:[#allocation2 + $0x3ec] sm:$0xf0] }
 0x918   :  { %v11378_v2 = vld [vmem:[#allocation2 + $0x7b0] sm:$0xf]  ;;  %v10927_v28 = vor.u32 %v12497_v25, %v10924_v47  ;;  %v10867_v18 = vor.u32 %v12490_v54, %v10866_v26  ;;  %v12450_v47 = vld [vmem:[#allocation2 + $0x2b4] sm:$0xf] }
 0x919   :  { %v12586_v25 = vld [vmem:[#allocation2 + $0x6ec] sm:$0xf0]  ;;  %v10740_v26 = vld [vmem:[#allocation2 + $0x2f0] sm:$0xf0] }
 0x91a   :  { %6523 = vmatpush.bf16.msrb.mxu3 %v10539_v39  ;;  %6536 = vmatpush.bf16.msra.mxu0 %v11051_v13  ;;  %v11380_v39 = vld [vmem:[#allocation2 + $0x7f0] sm:$0xf0]  ;;  %v10415_v13 = vor.u32 %v12369_v44, %v10412_v12  ;;  %v11250_v12 = vld [vmem:[#allocation2 + $0x6b0] sm:$0xf] }
 0x91b   :  { %6549 = vmatpush.bf16.msra.mxu1 %v10543_v24  ;;  %6562 = vmatpush.bf16.msra.mxu2 %v11055_v19  ;;  %v11379_v24 = vor.u32 %v12618_v9, %v11378_v2  ;;  %v10802_v19 = vld [vmem:[#allocation2 + $0x330] sm:$0xf]  ;;  %v11383_v33 = vor.u32 %v12610_v20, %v11380_v39  ;;  %v12578_v54 = vld [vmem:[#allocation2 + $0x6b4] sm:$0xf]  ;;  %v10743_v39 = vor.u32 %v12450_v47, %v10740_v26 }
 0x91c   :  { %v10803_v51 = vor.u32 %v12474_v41, %v10802_v19  ;;  %v11252_v2 = vld [vmem:[#allocation2 + $0x6f0] sm:$0xf0]  ;;  %v12442_v20 = vld [vmem:[#allocation2 + $0x26c] sm:$0xf0] }
 0x91d   :  { %v10676_v19 = vld [vmem:[#allocation2 + $0x270] sm:$0xf0]  ;;  %v10610_v27 = vld [vmem:[#allocation2 + $0x1b0] sm:$0xf] }
 0x91e   :  { %6524 = vmatpush.bf16.msrb.mxu3 %v10475_v58  ;;  %6537 = vmatpush.bf16.msra.mxu0 %v10987_v36  ;;  %v12594_v58 = vld [vmem:[#allocation2 + $0x734] sm:$0xf] }
 0x91f   :  { %6550 = vmatpush.bf16.msra.mxu1 %v10479_v6  ;;  %6563 = vmatpush.bf16.msra.mxu2 %v10991_v11  ;;  %v11316_v36 = vld [vmem:[#allocation2 + $0x770] sm:$0xf0]  ;;  %v12458_v6 = vld [vmem:[#allocation2 + $0x2ec] sm:$0xf0]  ;;  %v10807_v11 = vor.u32 %v12466_v31, %v10804_v35  ;;  %v15247_v35 = vld [vmem:[#allocation22_spill] sm:$0xff] }
 0x920   :  { %v11319_v44 = vor.u32 %v12594_v58, %v11316_v36  ;;  %v10739_v38 = vor.u32 %v12458_v6, %v10738_v61  ;;  %v12562_v41 = vld [vmem:[#allocation2 + $0x634] sm:$0xf]  ;;  %v12426_v31 = vld [vmem:[#allocation2 + $0x1ec] sm:$0xf0]  ;;  %v15248_v58 = vperm.slane %v15247_v35, 1 }
 0x921   :  { %v6280_v9 = vpop.f32.mrf.mxu0  ;;  %v11122_v6 = vld [vmem:[#allocation2 + $0x5b0] sm:$0xf]  ;;  %v10612_v26 = vld [vmem:[#allocation2 + $0x1f0] sm:$0xf0] }
 0x922   :  { %6525 = vmatpush.bf16.msrb.mxu3 %v10411_v57  ;;  %6538 = vmatpush.bf16.msra.mxu0 %v10923_v53  ;;  %v11251_v57 = vor.u32 %v12586_v25, %v11250_v12  ;;  %v6293_v53 = vpop.f32.mrf.mxu1  ;;  %v15249_v12 = vperm.slane %v15247_v35, 0 }
 0x923   :  { %6551 = vmatpush.bf16.msra.mxu1 %v10415_v13  ;;  %6564 = vmatpush.bf16.msra.mxu2 %v10927_v28  ;;  %v11255_v13 = vor.u32 %v12578_v54, %v11252_v2  ;;  %v11186_v28 = vld [vmem:[#allocation2 + $0x630] sm:$0xf]  ;;  %v6294_v36 = vadd.f32 %v6293_v53, %v15248_v58  ;;  %v12546_v54 = vld [vmem:[#allocation2 + $0x5b4] sm:$0xf]  ;;  %v10611_v53 = vor.u32 %v12426_v31, %v10610_v27 }
 0x924   :  { %v11124_v2 = vld [vmem:[#allocation2 + $0x5f0] sm:$0xf0]  ;;  %v12394_v27 = vld [vmem:[#allocation2 + $0xec] sm:$0xf0] }
 0x925   :  { %6526 = vmatmul.bf16.vlgmr.msrb.gmra.mxu3 %v14178_v60  ;;  %6539 = vmatmul.bf16.vlgmr.msra.gmra.mxu0 %v14182_v29  ;;  %v10548_v58 = vld [vmem:[#allocation2 + $0x170] sm:$0xf0] }
 0x926   :  { %6570 = vmatpush.bf16.msra.mxu3 %v10867_v18  ;;  %6583 = vmatpush.bf16.msrb.mxu0 %v11379_v24  ;;  %v12570_v18 = vld [vmem:[#allocation2 + $0x66c] sm:$0xf0]  ;;  %v12434_v24 = vld [vmem:[#allocation2 + $0x234] sm:$0xf] }
 0x927   :  { %6596 = vmatpush.bf16.msrb.mxu1 %v10871_v56  ;;  %6609 = vmatpush.bf16.msrb.mxu2 %v11383_v33  ;;  %v11188_v56 = vld [vmem:[#allocation2 + $0x670] sm:$0xf0]  ;;  %v10675_v33 = vor.u32 %v12442_v20, %v10674_v48  ;;  %v11187_v17 = vor.u32 %v12570_v18, %v11186_v28  ;;  %v6267_v61 = vpop.f32.mrf.mxu3  ;;  %v12410_v28 = vld [vmem:[#allocation2 + $0x16c] sm:$0xf0] }
 0x928   :  { %6552 = vmatmul.bf16.vlgmr.msra.gmra.mxu1 %v14178_v60  ;;  %6565 = vmatmul.bf16.vlgmr.msra.gmra.mxu2 %v14182_v29  ;;  %v6268_v25 = vadd.f32 %v6267_v61, %v15249_v12  ;;  %v6306_v47 = vpop.f32.mrf.mxu2  ;;  %v11060_v61 = vld [vmem:[#allocation2 + $0x570] sm:$0xf0] }
 0x92a   :  { %6571 = vmatpush.bf16.msra.mxu3 %v10803_v51  ;;  %6584 = vmatpush.bf16.msrb.mxu0 %v11315_v59  ;;  %v10679_v51 = vor.u32 %v12434_v24, %v10676_v19  ;;  %v11191_v59 = vor.u32 %v12562_v41, %v11188_v56  ;;  %v14214_v48 = vadd.f32 %v6280_v9, %v6268_v25  ;;  %v11058_v19 = vld [vmem:[#allocation2 + $0x530] sm:$0xf]  ;;  %v12402_v56 = vld [vmem:[#allocation2 + $0x134] sm:$0xf] }
 0x92b   :  { %6597 = vmatpush.bf16.msrb.mxu1 %v10807_v11  ;;  %6610 = vmatpush.bf16.msrb.mxu2 %v11319_v44  ;;  %v12554_v11 = vld [vmem:[#allocation2 + $0x5ec] sm:$0xf0]  ;;  %v12418_v44 = vld [vmem:[#allocation2 + $0x1b4] sm:$0xf]  ;;  %v11127_v24 = vor.u32 %v12546_v54, %v11124_v2  ;;  %v10551_v31 = vor.u32 %v12402_v56, %v10548_v58 }
 0x92c   :  { %v11123_v20 = vor.u32 %v12554_v11, %v11122_v6  ;;  %v10615_v18 = vor.u32 %v12418_v44, %v10612_v26  ;;  %v12538_v41 = vld [vmem:[#allocation2 + $0x56c] sm:$0xf0]  ;;  %v12386_v44 = vld [vmem:[#allocation2 + $0xb4] sm:$0xf] }
 0x92d   :  { %v11059_v9 = vor.u32 %v12538_v41, %v11058_v19  ;;  %v12522_v11 = vld [vmem:[#allocation2 + $0x4ec] sm:$0xf0]  ;;  %v10484_v25 = vld [vmem:[#allocation2 + $0xf0] sm:$0xf0] }
 0x92e   :  { %6572 = vmatpush.bf16.msra.mxu3 %v10739_v38  ;;  %6585 = vmatpush.bf16.msrb.mxu0 %v11251_v57  ;;  %v14212_v38 = vadd.f32 %v6306_v47, %v6294_v36  ;;  %v6282_v57 = vpop.f32.mrf.mxu0  ;;  %v12530_v36 = vld [vmem:[#allocation2 + $0x534] sm:$0xf]  ;;  %v10418_v2 = vld [vmem:[#allocation2 + $0x30] sm:$0xf] }
 0x92f   :  { %6598 = vmatpush.bf16.msrb.mxu1 %v10743_v39  ;;  %6611 = vmatpush.bf16.msrb.mxu2 %v11255_v13  ;;  %v6295_v39 = vpop.f32.mrf.mxu1  ;;  %v10546_v13 = vld [vmem:[#allocation2 + $0x130] sm:$0xf]  ;;  %v11063_v6 = vor.u32 %v12530_v36, %v11060_v61  ;;  %v12514_v47 = vld [vmem:[#allocation2 + $0x4b4] sm:$0xf]  ;;  %v10874_v36 = vld [vmem:[#allocation2 + $0x3b8] sm:$0xf] }
 0x930   :  { %v6308_v12 = vpop.f32.mrf.mxu2  ;;  %v10996_v26 = vld [vmem:[#allocation2 + $0x4f0] sm:$0xf0]  ;;  %v12378_v39 = vld [vmem:[#allocation2 + $0x6c] sm:$0xf0]  ;;  %v12491_v61 = vld [vmem:[#allocation2 + $0x3f4] sm:$0xf0] }
 0x931   :  { %v12370_v19 = vld [vmem:[#allocation2 + $0x34] sm:$0xf]  ;;  %v11388_v12 = vld [vmem:[#allocation2 + $0x7f8] sm:$0xf0] }
 0x932   :  { %6573 = vmatpush.bf16.msra.mxu3 %v10675_v33  ;;  %6586 = vmatpush.bf16.msrb.mxu0 %v11187_v17  ;;  %v10547_v33 = vor.u32 %v12410_v28, %v10546_v13  ;;  %v10482_v17 = vld [vmem:[#allocation2 + $0xb0] sm:$0xf]  ;;  %v10420_v41 = vld [vmem:[#allocation2 + $0x70] sm:$0xf0] }
 0x933   :  { %6599 = vmatpush.bf16.msrb.mxu1 %v10679_v51  ;;  %6612 = vmatpush.bf16.msrb.mxu2 %v11191_v59  ;;  %v6269_v51 = vpop.f32.mrf.mxu3  ;;  %v10994_v59 = vld [vmem:[#allocation2 + $0x4b0] sm:$0xf]  ;;  %v10483_v57 = vor.u32 %v12394_v27, %v10482_v17  ;;  %v12498_v56 = vld [vmem:[#allocation2 + $0x434] sm:$0xf]  ;;  %v10419_v17 = vor.u32 %v12378_v39, %v10418_v2  ;;  %v11322_v2 = vld [vmem:[#allocation2 + $0x738] sm:$0xf] }
 0x934   :  { %v10930_v13 = vld [vmem:[#allocation2 + $0x430] sm:$0xf]  ;;  %v10932_v58 = vld [vmem:[#allocation2 + $0x470] sm:$0xf0]  ;;  %v11386_v51 = vld [vmem:[#allocation2 + $0x7b8] sm:$0xf] }
 0x935   :  { %v12506_v28 = vld [vmem:[#allocation2 + $0x46c] sm:$0xf0]  ;;  %v12603_v39 = vld [vmem:[#allocation2 + $0x774] sm:$0xf0] }
 0x936   :  { %6574 = vmatpush.bf16.msra.mxu3 %v10611_v53  ;;  %6587 = vmatpush.bf16.msrb.mxu0 %v11123_v20  ;;  %v14216_v54 = vpop.f32.mrf.mxu0  ;;  %v10995_v53 = vor.u32 %v12522_v11, %v10994_v59  ;;  %v10931_v27 = vor.u32 %v12506_v28, %v10930_v13  ;;  %v10876_v59 = vld [vmem:[#allocation2 + $0x3f8] sm:$0xf0] }
 0x937   :  { %6600 = vmatpush.bf16.msrb.mxu1 %v10615_v18  ;;  %6613 = vmatpush.bf16.msrb.mxu2 %v11127_v24  ;;  %v14218_v20 = vpop.f32.mrf.mxu1  ;;  %v10487_v18 = vor.u32 %v12386_v44, %v10484_v25  ;;  %v10999_v24 = vor.u32 %v12514_v47, %v10996_v26  ;;  %v12611_v11 = vld [vmem:[#allocation2 + $0x7bc] sm:$0xf]  ;;  %v10875_v25 = vor.u32 %v12491_v61, %v10874_v36  ;;  %v12459_v36 = vld [vmem:[#allocation2 + $0x2f4] sm:$0xf0] }
 0x938   :  { %v14222_v26 = vpop.f32.mrf.mxu2  ;;  %v12467_v13 = vld [vmem:[#allocation2 + $0x33c] sm:$0xf] }
 0x93a   :  { %6575 = vmatpush.bf16.msra.mxu3 %v10547_v33  ;;  %6588 = vmatpush.bf16.msrb.mxu0 %v11059_v9  ;;  %v12619_v33 = vld [vmem:[#allocation2 + $0x7f4] sm:$0xf0]  ;;  %v12483_v9 = vld [vmem:[#allocation2 + $0x3bc] sm:$0xf] }
 0x93b   :  { %6601 = vmatpush.bf16.msrb.mxu1 %v10551_v31  ;;  %6614 = vmatpush.bf16.msrb.mxu2 %v11063_v6  ;;  %v10423_v31 = vor.u32 %v12370_v19, %v10420_v41  ;;  %v10935_v6 = vor.u32 %v12498_v56, %v10932_v58  ;;  %v14220_v44 = vpop.f32.mrf.mxu3  ;;  %v11387_v47 = vor.u32 %v12619_v33, %v11386_v51  ;;  %v11324_v19 = vld [vmem:[#allocation2 + $0x778] sm:$0xf0]  ;;  %v10746_v58 = vld [vmem:[#allocation2 + $0x2b8] sm:$0xf] }
 0x93c   :  { %v10879_v23 = vor.u32 %v12483_v9, %v10876_v59  ;;  %v10811_v41 = vor.u32 %v12475_v14, %v10810_v42  ;;  %v11323_v56 = vor.u32 %v12603_v39, %v11322_v2  ;;  %v11258_v33 = vld [vmem:[#allocation2 + $0x6b8] sm:$0xf]  ;;  %v12579_v59 = vld [vmem:[#allocation2 + $0x6bc] sm:$0xf] }
 0x93d   :  { %v12587_v9 = vld [vmem:[#allocation2 + $0x6f4] sm:$0xf0]  ;;  %v12435_v2 = vld [vmem:[#allocation2 + $0x23c] sm:$0xf] }
 0x93e   :  { %6576 = vmatpush.bf16.msra.mxu3 %v10483_v57  ;;  %6589 = vmatpush.bf16.msrb.mxu0 %v10995_v53  ;;  %v11391_v57 = vor.u32 %v12611_v11, %v11388_v12  ;;  %v6334_v53 = vpop.f32.mrf.mxu0  ;;  %v11260_v11 = vld [vmem:[#allocation2 + $0x6f8] sm:$0xf0]  ;;  %v11259_v42 = vor.u32 %v12587_v9, %v11258_v33  ;;  %v12555_v33 = vld [vmem:[#allocation2 + $0x5f4] sm:$0xf0] }
 0x93f   :  { %6602 = vmatpush.bf16.msrb.mxu1 %v10487_v18  ;;  %6615 = vmatpush.bf16.msrb.mxu2 %v10999_v24  ;;  %v6347_v28 = vpop.f32.mrf.mxu1  ;;  %v10812_v18 = vld [vmem:[#allocation2 + $0x378] sm:$0xf0]  ;;  %v12571_v53 = vld [vmem:[#allocation2 + $0x674] sm:$0xf0] }
 0x940   :  { %v12595_v24 = vld [vmem:[#allocation2 + $0x73c] sm:$0xf]  ;;  %v10815_v61 = vor.u32 %v12467_v13, %v10812_v18  ;;  %v6360_v12 = vpop.f32.mrf.mxu2 }
 0x941   :  { %v11327_v51 = vor.u32 %v12595_v24, %v11324_v19  ;;  %v10684_v39 = vld [vmem:[#allocation2 + $0x278] sm:$0xf0]  ;;  %v15250_v12 = vperm.slane %v15247_v35, 5 }
 0x942   :  { %6577 = vmatpush.bf16.msra.mxu3 %v10419_v17  ;;  %6590 = vmatpush.bf16.msrb.mxu0 %v10931_v27  ;;  %v12451_v17 = vld [vmem:[#allocation2 + $0x2bc] sm:$0xf] }
 0x943   :  { %6603 = vmatpush.bf16.msrb.mxu1 %v10423_v31  ;;  %6616 = vmatpush.bf16.msrb.mxu2 %v10935_v6  ;;  %v10748_v27 = vld [vmem:[#allocation2 + $0x2f8] sm:$0xf0]  ;;  %v6321_v14 = vpop.f32.mrf.mxu3  ;;  %v10682_v31 = vld [vmem:[#allocation2 + $0x238] sm:$0xf] }
 0x944   :  { %v12443_v6 = vld [vmem:[#allocation2 + $0x274] sm:$0xf0]  ;;  %v12563_v13 = vld [vmem:[#allocation2 + $0x63c] sm:$0xf] }
 0x945   :  { %6578 = vmatmul.bf16.vlgmr.msra.gmra.mxu3 %v14178_v60  ;;  %6591 = vmatmul.bf16.vlgmr.msrb.gmra.mxu0 %v14182_v29  ;;  %v11196_v28 = vld [vmem:[#allocation2 + $0x678] sm:$0xf0]  ;;  %v10683_v19 = vor.u32 %v12443_v6, %v10682_v31 }
 0x946   :  { %6622 = vmatpush.bf16.msrb.mxu3 %v10875_v25  ;;  %6635 = vmatpush.bf16.msra.mxu0 %v11387_v47  ;;  %v10751_v25 = vor.u32 %v12451_v17, %v10748_v27  ;;  %v11263_v47 = vor.u32 %v12579_v59, %v11260_v11  ;;  %v6384_v18 = vpop.f32.mrf.mxu0  ;;  %v12419_v9 = vld [vmem:[#allocation2 + $0x1bc] sm:$0xf] }
 0x947   :  { %6648 = vmatpush.bf16.msra.mxu1 %v10879_v23  ;;  %6661 = vmatpush.bf16.msra.mxu2 %v11391_v57  ;;  %v10747_v23 = vor.u32 %v12459_v36, %v10746_v58  ;;  %v11194_v57 = vld [vmem:[#allocation2 + $0x638] sm:$0xf]  ;;  %v6397_v24 = vpop.f32.mrf.mxu1  ;;  %v10687_v36 = vor.u32 %v12435_v2, %v10684_v39  ;;  %v10620_v17 = vld [vmem:[#allocation2 + $0x1f8] sm:$0xf0]  ;;  %v15251_v39 = vperm.slane %v15247_v35, 4 }
 0x948   :  { %6604 = vmatmul.bf16.vlgmr.msrb.gmra.mxu1 %v14178_v60  ;;  %6617 = vmatmul.bf16.vlgmr.msrb.gmra.mxu2 %v14182_v29  ;;  %v12427_v58 = vld [vmem:[#allocation2 + $0x1f4] sm:$0xf0]  ;;  %v12547_v27 = vld [vmem:[#allocation2 + $0x5bc] sm:$0xf]  ;;  %v6398_v31 = vadd.f32 %v6397_v24, %v15250_v12  ;;  %v10623_v6 = vor.u32 %v12419_v9, %v10620_v17 }
 0x949   :  { %v11132_v59 = vld [vmem:[#allocation2 + $0x5f8] sm:$0xf0]  ;;  %v10490_v9 = vld [vmem:[#allocation2 + $0xb8] sm:$0xf] }
 0x94a   :  { %6623 = vmatpush.bf16.msrb.mxu3 %v10811_v41  ;;  %6636 = vmatpush.bf16.msra.mxu0 %v11323_v56  ;;  %v11195_v41 = vor.u32 %v12571_v53, %v11194_v57  ;;  %v10618_v56 = vld [vmem:[#allocation2 + $0x1b8] sm:$0xf]  ;;  %v12403_v2 = vld [vmem:[#allocation2 + $0x13c] sm:$0xf] }
 0x94b   :  { %6649 = vmatpush.bf16.msra.mxu1 %v10815_v61  ;;  %6662 = vmatpush.bf16.msra.mxu2 %v11327_v51  ;;  %v11199_v61 = vor.u32 %v12563_v13, %v11196_v28  ;;  %v11130_v51 = vld [vmem:[#allocation2 + $0x5b8] sm:$0xf]  ;;  %v10619_v11 = vor.u32 %v12427_v58, %v10618_v56  ;;  %v6410_v28 = vpop.f32.mrf.mxu2  ;;  %v11068_v56 = vld [vmem:[#allocation2 + $0x578] sm:$0xf0] }
 0x94c   :  { %v11131_v14 = vor.u32 %v12555_v33, %v11130_v51  ;;  %v11066_v57 = vld [vmem:[#allocation2 + $0x538] sm:$0xf]  ;;  %v14232_v58 = vadd.f32 %v6410_v28, %v6398_v31  ;;  %v12515_v31 = vld [vmem:[#allocation2 + $0x4bc] sm:$0xf] }
 0x94d   :  { %v12539_v53 = vld [vmem:[#allocation2 + $0x574] sm:$0xf0]  ;;  %v11004_v28 = vld [vmem:[#allocation2 + $0x4f8] sm:$0xf0] }
 0x94e   :  { %6624 = vmatpush.bf16.msrb.mxu3 %v10747_v23  ;;  %6637 = vmatpush.bf16.msra.mxu0 %v11259_v42  ;;  %v10554_v23 = vld [vmem:[#allocation2 + $0x138] sm:$0xf]  ;;  %v6386_v51 = vpop.f32.mrf.mxu0  ;;  %v11067_v33 = vor.u32 %v12539_v53, %v11066_v57  ;;  %v12371_v53 = vld [vmem:[#allocation2 + $0x3c] sm:$0xf] }
 0x94f   :  { %6650 = vmatpush.bf16.msra.mxu1 %v10751_v25  ;;  %6663 = vmatpush.bf16.msra.mxu2 %v11263_v47  ;;  %v12411_v42 = vld [vmem:[#allocation2 + $0x174] sm:$0xf0]  ;;  %v11135_v25 = vor.u32 %v12547_v27, %v11132_v59  ;;  %v6371_v47 = vpop.f32.mrf.mxu3 }
 0x950   :  { %v6372_v13 = vadd.f32 %v6371_v47, %v15251_v39  ;;  %v12395_v17 = vld [vmem:[#allocation2 + $0xf4] sm:$0xf0]  ;;  %v12387_v39 = vld [vmem:[#allocation2 + $0xbc] sm:$0xf] }
 0x951   :  { %v11002_v12 = vld [vmem:[#allocation2 + $0x4b8] sm:$0xf] }
 0x952   :  { %6625 = vmatpush.bf16.msrb.mxu3 %v10683_v19  ;;  %6638 = vmatpush.bf16.msra.mxu0 %v11195_v41  ;;  %v10556_v19 = vld [vmem:[#allocation2 + $0x178] sm:$0xf0]  ;;  %v14234_v24 = vadd.f32 %v6384_v18, %v6372_v13  ;;  %v12523_v47 = vld [vmem:[#allocation2 + $0x4f4] sm:$0xf0] }
 0x953   :  { %6651 = vmatpush.bf16.msra.mxu1 %v10687_v36  ;;  %6664 = vmatpush.bf16.msra.mxu2 %v11199_v61  ;;  %v12531_v41 = vld [vmem:[#allocation2 + $0x53c] sm:$0xf]  ;;  %v6399_v36 = vpop.f32.mrf.mxu1  ;;  %v10555_v61 = vor.u32 %v12411_v42, %v10554_v23  ;;  %v10559_v27 = vor.u32 %v12403_v2, %v10556_v19  ;;  %v11003_v18 = vor.u32 %v12523_v47, %v11002_v12  ;;  %v12379_v13 = vld [vmem:[#allocation2 + $0x74] sm:$0xf0]  ;;  %v6412_v2 = vpop.f32.mrf.mxu2  ;;  %v15257_v12 = vld [vmem:[#allocation46_spill] sm:$0xff] }
 0x954   :  { %v11071_v59 = vor.u32 %v12531_v41, %v11068_v56  ;;  %v10495_v23 = vor.u32 %v12387_v39, %v10492_v37  ;;  %v11007_v42 = vor.u32 %v12515_v31, %v11004_v28  ;;  %v12507_v57 = vld [vmem:[#allocation2 + $0x474] sm:$0xf0]  ;;  %v10428_v19 = vld [vmem:[#allocation2 + $0x78] sm:$0xf0]  ;;  %v15258_v47 = vld [vmem:[#allocation48_spill] sm:$0xff] }
 0x955   :  { %v12499_v41 = vld [vmem:[#allocation2 + $0x43c] sm:$0xf]  ;;  %v15259_v39 = vld [vmem:[#allocation47_spill] sm:$0xff]  ;;  %v15269_v2 = vld [vmem:[#allocation58_spill] sm:$0xff] }
 0x956   :  { %6626 = vmatpush.bf16.msrb.mxu3 %v10619_v11  ;;  %6639 = vmatpush.bf16.msra.mxu0 %v11131_v14  ;;  %v10491_v11 = vor.u32 %v12395_v17, %v10490_v9  ;;  %v10426_v14 = vld [vmem:[#allocation2 + $0x38] sm:$0xf]  ;;  %v10940_v56 = vld [vmem:[#allocation2 + $0x478] sm:$0xf0]  ;;  %v15253_v9 = vld [vmem:[#allocation42_spill] sm:$0xff] }
 0x957   :  { %6652 = vmatpush.bf16.msra.mxu1 %v10623_v6  ;;  %6665 = vmatpush.bf16.msra.mxu2 %v11135_v25  ;;  %v6373_v6 = vpop.f32.mrf.mxu3  ;;  %v10938_v25 = vld [vmem:[#allocation2 + $0x438] sm:$0xf]  ;;  %v10427_v51 = vor.u32 %v12379_v13, %v10426_v14  ;;  %v15254_v17 = vld [vmem:[#allocation44_spill] sm:$0xff]  ;;  %v15265_v13 = vld [vmem:[#allocation54_spill] sm:$0xff] }
 0x958   :  { %v10939_v36 = vor.u32 %v12507_v57, %v10938_v25  ;;  %v15252_v37 = vld [vmem:[#allocation41_spill] sm:$0xff]  ;;  %v15262_v14 = vld [vmem:[#allocation52_spill] sm:$0xff] }
 0x959   :  { %v15260_v28 = vld [vmem:[#allocation49_spill] sm:$0xff] }
 0x95a   :  { %6627 = vmatpush.bf16.msrb.mxu3 %v10555_v61  ;;  %6640 = vmatpush.bf16.msra.mxu0 %v11067_v33  ;;  %v10431_v61 = vor.u32 %v12371_v53, %v10428_v19  ;;  %v10943_v33 = vor.u32 %v12499_v41, %v10940_v56  ;;  %v15268_v53 = vld [vmem:[#allocation57_spill] sm:$0xff]  ;;  %v15270_v41 = vld [vmem:[#allocation60_spill] sm:$0xff]  ;;  %v15271_v56 = vld [vmem:[#allocation59_spill] sm:$0xff] }
 0x95b   :  { %6653 = vmatpush.bf16.msra.mxu1 %v10559_v27  ;;  %6666 = vmatpush.bf16.msra.mxu2 %v11071_v59  ;;  %v15255_v27 = vld [vmem:[#allocation43_spill] sm:$0xff]  ;;  %v15256_v59 = vld [vmem:[#allocation45_spill] sm:$0xff] }
 0x95e   :  { %6628 = vmatpush.bf16.msrb.mxu3 %v10491_v11  ;;  %6641 = vmatpush.bf16.msra.mxu0 %v11003_v18  ;;  %v15261_v11 = vld [vmem:[#allocation50_spill] sm:$0xff] }
 0x95f   :  { %6654 = vmatpush.bf16.msra.mxu1 %v10495_v23  ;;  %6667 = vmatpush.bf16.msra.mxu2 %v11007_v42  ;;  %v15266_v23 = vld [vmem:[#allocation56_spill] sm:$0xff]  ;;  %v15267_v42 = vld [vmem:[#allocation55_spill] sm:$0xff] }
 0x962   :  { %6629 = vmatpush.bf16.msrb.mxu3 %v10427_v51  ;;  %6642 = vmatpush.bf16.msra.mxu0 %v10939_v36  ;;  %v14248_v31 = vpop.f32.mrf.mxu0  ;;  %v15272_v51 = vperm.slane %v15247_v35, 2 }
 0x963   :  { %6655 = vmatpush.bf16.msra.mxu1 %v10431_v61  ;;  %6668 = vmatpush.bf16.msra.mxu2 %v10943_v33  ;;  %v15273_v61 = vld [vmem:[#allocation61_spill] sm:$0xff]  ;;  %v15274_v33 = vld [vmem:[#allocation62_spill] sm:$0xff] }
 0x964   :  { %v6320_v36 = vadd.f32 %v14220_v44, %v15272_v51  ;;  %v15279_v44 = vld [vmem:[#allocation66_spill] sm:$0xff]  ;;  %v15290_v51 = vld [vmem:[#allocation77_spill] sm:$0xff] }
 0x965   :  { %6630 = vmatmul.bf16.vlgmr.msrb.gmra.mxu3 %v14178_v60  ;;  %6643 = vmatmul.bf16.vlgmr.msra.gmra.mxu0 %v14182_v29  ;;  %v14252_v18 = vpop.f32.mrf.mxu1 }
 0x966   :  { %6706 = vmatpush.bf16.msra.mxu3 %v15252_v37  ;;  %6719 = vmatpush.bf16.msrb.mxu0 %v15253_v9  ;;  %v15275_v37 = vperm.slane %v15247_v35, 3 }
 0x967   :  { %6732 = vmatpush.bf16.msrb.mxu1 %v15254_v17  ;;  %6745 = vmatpush.bf16.msrb.mxu2 %v15255_v27  ;;  %v15276_v17 = vld [vmem:[#allocation64_spill] sm:$0xff]  ;;  %v15277_v27 = vld [vmem:[#allocation63_spill] sm:$0xff] }
 0x968   :  { %6656 = vmatmul.bf16.vlgmr.msra.gmra.mxu1 %v14178_v60  ;;  %6669 = vmatmul.bf16.vlgmr.msra.gmra.mxu2 %v14182_v29  ;;  %v15263_v60 = vld [vmem:[#allocation51_spill] sm:$0xff]  ;;  %v15264_v29 = vld [vmem:[#allocation53_spill] sm:$0xff]  ;;  %v14260_v6 = vpop.f32.mrf.mxu3  ;;  %v6346_v9 = vadd.f32 %v14218_v20, %v15275_v37  ;;  %v6674_v20 = vmax.f32 %v14214_v48, 0.0 }
 0x96a   :  { %6707 = vmatpush.bf16.msra.mxu3 %v15256_v59  ;;  %6720 = vmatpush.bf16.msrb.mxu0 %v15257_v12  ;;  %v6438_v57 = vpop.f32.mrf.mxu0 }
 0x96b   :  { %6733 = vmatpush.bf16.msrb.mxu1 %v15258_v47  ;;  %6746 = vmatpush.bf16.msrb.mxu2 %v15259_v39  ;;  %v14262_v25 = vpop.f32.mrf.mxu2  ;;  %v6333_v47 = vadd.f32 %v14216_v54, %v6320_v36  ;;  %v6359_v39 = vadd.f32 %v14222_v26, %v6346_v9  ;;  %v15284_v54 = vld [vmem:[#allocation75_spill] sm:$0xff]  ;;  %v14290_v57 = vpack.c.bf16 %v6674_v20, %v6674_v20  ;;  %v15291_v36 = vld [vmem:[#allocation78_spill] sm:$0xff]  ;;  %v15294_v9 = vld [vmem:[#allocation81_spill] sm:$0xff] }
 0x96c   :  { %v15285_v26 = vld [vmem:[#allocation71_spill] sm:$0xff] }
 0x96d   :  { %v6451_v19 = vpop.f32.mrf.mxu1 }
 0x96e   :  { %6708 = vmatpush.bf16.msra.mxu3 %v15260_v28  ;;  %6721 = vmatpush.bf16.msrb.mxu0 %v15261_v11  ;;  %v15278_v28 = vld [vmem:[#allocation65_spill] sm:$0xff]  ;;  %v15280_v11 = vld [vmem:[#allocation68_spill] sm:$0xff] }
 0x96f   :  { %6734 = vmatpush.bf16.msrb.mxu1 %v15262_v14  ;;  %6747 = vmatpush.bf16.msrb.mxu2 %v15263_v60  ;;  %v15281_v14 = vld [vmem:[#allocation67_spill] sm:$0xff]  ;;  %v6675_v60 = vmax.f32 %v14212_v38, 0.0  ;;  %v15287_v19 = vld [vmem:[#allocation73_spill] sm:$0xff] }
 0x970   :  { %v6425_v59 = vpop.f32.mrf.mxu3 }
 0x971   :  { %v15296_v59 = vld [vmem:[#allocation84_spill] sm:$0xff] }
 0x972   :  { %6709 = vmatpush.bf16.msra.mxu3 %v15264_v29  ;;  %6722 = vmatpush.bf16.msrb.mxu0 %v15265_v13  ;;  %v6676_v29 = vmax.f32 %v6333_v47, 0.0  ;;  %v6677_v13 = vmax.f32 %v6359_v39, 0.0  ;;  %v15298_v47 = vld [vmem:[#allocation85_spill] sm:$0xff]  ;;  %v15299_v39 = vld [vmem:[#allocation86_spill] sm:$0xff] }
 0x973   :  { %6735 = vmatpush.bf16.msrb.mxu1 %v15266_v23  ;;  %6748 = vmatpush.bf16.msrb.mxu2 %v15267_v42  ;;  %v6464_v12 = vpop.f32.mrf.mxu2  ;;  %v15282_v23 = vld [vmem:[#allocation69_spill] sm:$0xff]  ;;  %v15283_v42 = vld [vmem:[#allocation70_spill] sm:$0xff] }
 0x974   :  { %v14296_v48 = vpack.c.bf16 %v6676_v29, %v6676_v29  ;;  %v14298_v38 = vpack.c.bf16 %v6677_v13, %v6677_v13  ;;  %v15297_v12 = vld [vmem:[#allocation83_spill] sm:$0xff]  ;;  %v15303_v29 = vld [vmem:[#allocation90_spill] sm:$0xff] }
 0x976   :  { %6710 = vmatpush.bf16.msra.mxu3 %v15268_v53  ;;  %6723 = vmatpush.bf16.msrb.mxu0 %v15269_v2  ;;  %v14292_v53 = vpack.c.bf16 %v6675_v60, %v6675_v60  ;;  %v15286_v2 = vld [vmem:[#allocation72_spill] sm:$0xff]  ;;  %v15302_v60 = vld [vmem:[#allocation89_spill] sm:$0xff] }
 0x977   :  { %6736 = vmatpush.bf16.msrb.mxu1 %v15270_v41  ;;  %6749 = vmatpush.bf16.msrb.mxu2 %v15271_v56  ;;  %v15288_v41 = vld [vmem:[#allocation76_spill] sm:$0xff]  ;;  %v15289_v56 = vld [vmem:[#allocation74_spill] sm:$0xff] }
 0x97a   :  { %6711 = vmatpush.bf16.msra.mxu3 %v15273_v61  ;;  %6724 = vmatpush.bf16.msrb.mxu0 %v15274_v33  ;;  %v15292_v61 = vld [vmem:[#allocation80_spill] sm:$0xff]  ;;  %v15293_v33 = vld [vmem:[#allocation79_spill] sm:$0xff] }
 0x97b   :  { %6737 = vmatpush.bf16.msrb.mxu1 %v15276_v17  ;;  %6750 = vmatpush.bf16.msrb.mxu2 %v15277_v27  ;;  %v15295_v17 = vld [vmem:[#allocation82_spill] sm:$0xff] }
 0x97e   :  { %6712 = vmatpush.bf16.msra.mxu3 %v15278_v28  ;;  %6725 = vmatpush.bf16.msrb.mxu0 %v15279_v44  ;;  %v15300_v28 = vld [vmem:[#allocation88_spill] sm:$0xff]  ;;  %v15301_v44 = vld [vmem:[#allocation87_spill] sm:$0xff] }
 0x97f   :  { %6738 = vmatpush.bf16.msrb.mxu1 %v15280_v11  ;;  %6751 = vmatpush.bf16.msrb.mxu2 %v15281_v14 }
 0x982   :  { %6713 = vmatpush.bf16.msra.mxu3 %v15282_v23  ;;  %6726 = vmatpush.bf16.msrb.mxu0 %v15283_v42  ;;  %v14310_v37 = vpop.f32.mrf.mxu0  ;;  %v15304_v23 = vld [vmem:[#allocation92_spill] sm:$0xff]  ;;  %v15305_v42 = vld [vmem:[#allocation91_spill] sm:$0xff] }
 0x983   :  { %6739 = vmatpush.bf16.msrb.mxu1 %v15284_v54  ;;  %6752 = vmatpush.bf16.msrb.mxu2 %v15285_v26  ;;  %v15306_v54 = vperm.slane %v15247_v35, 6 }
 0x985   :  { %6714 = vmatmul.bf16.vlgmr.msra.gmra.mxu3 %v14290_v57  ;;  %6727 = vmatmul.bf16.vlgmr.msrb.gmra.mxu0 %v14292_v53  ;;  %v14314_v27 = vpop.f32.mrf.mxu1  ;;  %v6424_v26 = vadd.f32 %v14260_v6, %v15306_v54  ;;  %v15313_v6 = vld [vmem:[#allocation98_spill] sm:$0xff] }
 0x986   :  { %6758 = vmatpush.bf16.msrb.mxu3 %v15286_v2  ;;  %6771 = vmatpush.bf16.msra.mxu0 %v15287_v19  ;;  %v15307_v2 = vld [vmem:[#allocation93_spill] sm:$0xff]  ;;  %v15308_v19 = vld [vmem:[#allocation94_spill] sm:$0xff] }
 0x987   :  { %6784 = vmatpush.bf16.msra.mxu1 %v15288_v41  ;;  %6797 = vmatpush.bf16.msra.mxu2 %v15289_v56  ;;  %v15309_v41 = vperm.slane %v15247_v35, 7  ;;  %v6678_v35 = vmax.f32 %v14234_v24, 0.0  ;;  %v15323_v54 = vld [vmem:[#allocation106_spill] sm:$0xff] }
 0x988   :  { %6740 = vmatmul.bf16.vlgmr.msrb.gmra.mxu1 %v14296_v48  ;;  %6753 = vmatmul.bf16.vlgmr.msrb.gmra.mxu2 %v14298_v38  ;;  %v14322_v11 = vpop.f32.mrf.mxu3 }
 0x989   :  { %v6450_v56 = vadd.f32 %v14252_v18, %v15309_v41  ;;  %v6679_v18 = vmax.f32 %v14232_v58, 0.0  ;;  %v15327_v41 = vld [vmem:[#allocation111_spill] sm:$0xff] }
 0x98a   :  { %6759 = vmatpush.bf16.msrb.mxu3 %v15290_v51  ;;  %6772 = vmatpush.bf16.msra.mxu0 %v15291_v36  ;;  %v6490_v20 = vpop.f32.mrf.mxu0  ;;  %v15310_v51 = vld [vmem:[#allocation96_spill] sm:$0xff]  ;;  %v15311_v36 = vld [vmem:[#allocation95_spill] sm:$0xff] }
 0x98b   :  { %6785 = vmatpush.bf16.msra.mxu1 %v15292_v61  ;;  %6798 = vmatpush.bf16.msra.mxu2 %v15293_v33  ;;  %v14324_v14 = vpop.f32.mrf.mxu2  ;;  %v15317_v20 = vld [vmem:[#allocation102_spill] sm:$0xff] }
 0x98d   :  { %v6503_v13 = vpop.f32.mrf.mxu1 }
 0x98e   :  { %6760 = vmatpush.bf16.msrb.mxu3 %v15294_v9  ;;  %6773 = vmatpush.bf16.msra.mxu0 %v15295_v17  ;;  %v6437_v9 = vadd.f32 %v14248_v31, %v6424_v26  ;;  %v6463_v17 = vadd.f32 %v14262_v25, %v6450_v56  ;;  %v15318_v31 = vld [vmem:[#allocation107_spill] sm:$0xff]  ;;  %v15320_v13 = vld [vmem:[#allocation104_spill] sm:$0xff]  ;;  %v15324_v26 = vld [vmem:[#allocation109_spill] sm:$0xff] }
 0x98f   :  { %6786 = vmatpush.bf16.msra.mxu1 %v15296_v59  ;;  %6799 = vmatpush.bf16.msra.mxu2 %v15297_v12  ;;  %v15312_v59 = vld [vmem:[#allocation97_spill] sm:$0xff]  ;;  %v15314_v12 = vld [vmem:[#allocation100_spill] sm:$0xff]  ;;  %v15319_v25 = vld [vmem:[#allocation103_spill] sm:$0xff] }
 0x990   :  { %v6477_v61 = vpop.f32.mrf.mxu3 }
 0x992   :  { %6761 = vmatpush.bf16.msrb.mxu3 %v15298_v47  ;;  %6774 = vmatpush.bf16.msra.mxu0 %v15299_v39  ;;  %v15315_v47 = vld [vmem:[#allocation99_spill] sm:$0xff]  ;;  %v6680_v39 = vmax.f32 %v6437_v9, 0.0 }
 0x993   :  { %6787 = vmatpush.bf16.msra.mxu1 %v15300_v28  ;;  %6800 = vmatpush.bf16.msra.mxu2 %v15301_v44  ;;  %v6516_v33 = vpop.f32.mrf.mxu2  ;;  %v6681_v28 = vmax.f32 %v6463_v17, 0.0  ;;  %v15316_v44 = vld [vmem:[#allocation101_spill] sm:$0xff]  ;;  %v15331_v9 = vld [vmem:[#allocation115_spill] sm:$0xff] }
 0x994   :  { %v14358_v24 = vpack.c.bf16 %v6680_v39, %v6680_v39  ;;  %v15330_v33 = vld [vmem:[#allocation116_spill] sm:$0xff]  ;;  %v15332_v17 = vld [vmem:[#allocation117_spill] sm:$0xff] }
 0x995   :  { %v14360_v58 = vpack.c.bf16 %v6681_v28, %v6681_v28  ;;  %v15336_v39 = vld [vmem:[#allocation121_spill] sm:$0xff]  ;;  %v15337_v28 = vld [vmem:[#allocation122_spill] sm:$0xff] }
 0x996   :  { %6762 = vmatpush.bf16.msrb.mxu3 %v15302_v60  ;;  %6775 = vmatpush.bf16.msra.mxu0 %v15303_v29  ;;  %v14352_v60 = vpack.c.bf16 %v6678_v35, %v6678_v35  ;;  %v14354_v29 = vpack.c.bf16 %v6679_v18, %v6679_v18 }
 0x997   :  { %6788 = vmatpush.bf16.msra.mxu1 %v15304_v23  ;;  %6801 = vmatpush.bf16.msra.mxu2 %v15305_v42  ;;  %v15321_v23 = vld [vmem:[#allocation105_spill] sm:$0xff]  ;;  %v15322_v42 = vld [vmem:[#allocation108_spill] sm:$0xff] }
 0x99a   :  { %6763 = vmatpush.bf16.msrb.mxu3 %v15307_v2  ;;  %6776 = vmatpush.bf16.msra.mxu0 %v15308_v19  ;;  %v15325_v2 = vld [vmem:[#allocation110_spill] sm:$0xff]  ;;  %v15326_v19 = vld [vmem:[#allocation112_spill] sm:$0xff] }
 0x99b   :  { %6789 = vmatpush.bf16.msra.mxu1 %v15310_v51  ;;  %6802 = vmatpush.bf16.msra.mxu2 %v15311_v36  ;;  %v15328_v51 = vld [vmem:[#allocation113_spill] sm:$0xff]  ;;  %v15329_v36 = vld [vmem:[#allocation114_spill] sm:$0xff] }
 0x99e   :  { %6764 = vmatpush.bf16.msrb.mxu3 %v15312_v59  ;;  %6777 = vmatpush.bf16.msra.mxu0 %v15313_v6  ;;  %v15333_v59 = vld [vmem:[#allocation118_spill] sm:$0xff]  ;;  %v15334_v6 = vld [vmem:[#allocation120_spill] sm:$0xff] }
 0x99f   :  { %6790 = vmatpush.bf16.msra.mxu1 %v15314_v12  ;;  %6803 = vmatpush.bf16.msra.mxu2 %v15315_v47  ;;  %v15335_v12 = vld [vmem:[#allocation119_spill] sm:$0xff] }
 0x9a2   :  { %6765 = vmatpush.bf16.msrb.mxu3 %v15316_v44  ;;  %6778 = vmatpush.bf16.msra.mxu0 %v15317_v20  ;;  %v6540_v56 = vpop.f32.mrf.mxu0  ;;  %v15338_v20 = vld [vmem:[#allocation124_spill] sm:$0xff] }
 0x9a3   :  { %6791 = vmatpush.bf16.msra.mxu1 %v15318_v31  ;;  %6804 = vmatpush.bf16.msra.mxu2 %v15319_v25  ;;  %v15339_v31 = vld [vmem:[#allocation123_spill] sm:$0xff] }
 0x9a4   :  { %v15340_v25 = vld [vmem:[#allocation23_spill] sm:$0xff] }
 0x9a5   :  { %6766 = vmatmul.bf16.vlgmr.msrb.gmra.mxu3 %v14352_v60  ;;  %6779 = vmatmul.bf16.vlgmr.msra.gmra.mxu0 %v14354_v29  ;;  %v6553_v61 = vpop.f32.mrf.mxu1 }
 0x9a6   :  { %6810 = vmatpush.bf16.msra.mxu3 %v15320_v13  ;;  %6823 = vmatpush.bf16.msrb.mxu0 %v15321_v23  ;;  %v15341_v13 = vperm.slane %v15340_v25, 0 }
 0x9a7   :  { %6836 = vmatpush.bf16.msrb.mxu1 %v15322_v42  ;;  %6849 = vmatpush.bf16.msrb.mxu2 %v15323_v54  ;;  %v15342_v42 = vperm.slane %v15340_v25, 2 }
 0x9a8   :  { %6792 = vmatmul.bf16.vlgmr.msra.gmra.mxu1 %v14358_v24  ;;  %6805 = vmatmul.bf16.vlgmr.msra.gmra.mxu2 %v14360_v58  ;;  %v6527_v47 = vpop.f32.mrf.mxu3  ;;  %v6476_v23 = vadd.f32 %v14322_v11, %v15341_v13  ;;  %v15353_v13 = vld [vmem:[#allocation133_spill] sm:$0xff] }
 0x9a9   :  { %v6528_v54 = vadd.f32 %v6527_v47, %v15342_v42  ;;  %v15357_v42 = vld [vmem:[#allocation136_spill] sm:$0xff] }
 0x9aa   :  { %6811 = vmatpush.bf16.msra.mxu3 %v15324_v26  ;;  %6824 = vmatpush.bf16.msrb.mxu0 %v15325_v2  ;;  %v6542_v18 = vpop.f32.mrf.mxu0  ;;  %v15343_v26 = vperm.slane %v15340_v25, 1  ;;  %v6489_v11 = vadd.f32 %v14310_v37, %v6476_v23  ;;  %v15354_v37 = vld [vmem:[#allocation134_spill] sm:$0xff] }
 0x9ab   :  { %6837 = vmatpush.bf16.msrb.mxu1 %v15326_v19  ;;  %6850 = vmatpush.bf16.msrb.mxu2 %v15327_v41  ;;  %v6566_v35 = vpop.f32.mrf.mxu2  ;;  %v15344_v19 = vld [vmem:[#allocation125_spill] sm:$0xff]  ;;  %v15345_v41 = vld [vmem:[#allocation126_spill] sm:$0xff] }
 0x9ac   :  { %v6502_v2 = vadd.f32 %v14314_v27, %v15343_v26  ;;  %v15349_v27 = vld [vmem:[#allocation129_spill] sm:$0xff]  ;;  %v15350_v18 = vld [vmem:[#allocation130_spill] sm:$0xff] }
 0x9ad   :  { %v6555_v44 = vpop.f32.mrf.mxu1 }
 0x9ae   :  { %6812 = vmatpush.bf16.msra.mxu3 %v15328_v51  ;;  %6825 = vmatpush.bf16.msrb.mxu0 %v15329_v36  ;;  %v15346_v51 = vperm.slane %v15340_v25, 3 }
 0x9af   :  { %6838 = vmatpush.bf16.msrb.mxu1 %v15330_v33  ;;  %6851 = vmatpush.bf16.msrb.mxu2 %v15331_v9  ;;  %v15347_v33 = vld [vmem:[#allocation128_spill] sm:$0xff]  ;;  %v15348_v9 = vld [vmem:[#allocation127_spill] sm:$0xff] }
 0x9b0   :  { %v6554_v36 = vadd.f32 %v6553_v61, %v15346_v51  ;;  %v6682_v61 = vmax.f32 %v6489_v11, 0.0  ;;  %v15361_v51 = vld [vmem:[#allocation141_spill] sm:$0xff] }
 0x9b1   :  { %v15365_v11 = vld [vmem:[#allocation145_spill] sm:$0xff] }
 0x9b2   :  { %6813 = vmatpush.bf16.msra.mxu3 %v15332_v17  ;;  %6826 = vmatpush.bf16.msrb.mxu0 %v15333_v59  ;;  %v6529_v17 = vpop.f32.mrf.mxu3  ;;  %v6515_v59 = vadd.f32 %v14324_v14, %v6502_v2  ;;  %v6567_v47 = vadd.f32 %v6566_v35, %v6554_v36  ;;  %v15355_v14 = vld [vmem:[#allocation139_spill] sm:$0xff]  ;;  %v14408_v35 = vpack.c.bf16 %v6682_v61, %v6682_v61  ;;  %v15362_v36 = vld [vmem:[#allocation142_spill] sm:$0xff] }
 0x9b3   :  { %6839 = vmatpush.bf16.msrb.mxu1 %v15334_v6  ;;  %6852 = vmatpush.bf16.msrb.mxu2 %v15335_v12  ;;  %v6568_v6 = vpop.f32.mrf.mxu2  ;;  %v6541_v12 = vadd.f32 %v6540_v56, %v6528_v54  ;;  %v15356_v56 = vld [vmem:[#allocation135_spill] sm:$0xff]  ;;  %v15358_v54 = vld [vmem:[#allocation137_spill] sm:$0xff] }
 0x9b4   :  { %v6683_v44 = vmax.f32 %v6515_v59, 0.0  ;;  %v15366_v59 = vld [vmem:[#allocation146_spill] sm:$0xff] }
 0x9b6   :  { %6814 = vmatpush.bf16.msra.mxu3 %v15336_v39  ;;  %6827 = vmatpush.bf16.msrb.mxu0 %v15337_v28  ;;  %v15351_v39 = vld [vmem:[#allocation132_spill] sm:$0xff]  ;;  %v15352_v28 = vld [vmem:[#allocation131_spill] sm:$0xff]  ;;  %v14410_v23 = vpack.c.bf16 %v6683_v44, %v6683_v44 }
 0x9b7   :  { %6840 = vmatpush.bf16.msrb.mxu1 %v15338_v20  ;;  %6853 = vmatpush.bf16.msrb.mxu2 %v15339_v31  ;;  %v6684_v20 = vmax.f32 %v6541_v12, 0.0  ;;  %v6685_v31 = vmax.f32 %v6567_v47, 0.0  ;;  %v15367_v12 = vld [vmem:[#allocation148_spill] sm:$0xff]  ;;  %v15368_v47 = vld [vmem:[#allocation147_spill] sm:$0xff] }
 0x9b9   :  { %v14414_v26 = vpack.c.bf16 %v6684_v20, %v6684_v20  ;;  %v14416_v2 = vpack.c.bf16 %v6685_v31, %v6685_v31  ;;  %v15373_v31 = vld [vmem:[#allocation153_spill] sm:$0xff] }
 0x9ba   :  { %6815 = vmatpush.bf16.msra.mxu3 %v15344_v19  ;;  %6828 = vmatpush.bf16.msrb.mxu0 %v15345_v41  ;;  %v15359_v19 = vld [vmem:[#allocation140_spill] sm:$0xff]  ;;  %v15360_v41 = vld [vmem:[#allocation138_spill] sm:$0xff] }
 0x9bb   :  { %6841 = vmatpush.bf16.msrb.mxu1 %v15347_v33  ;;  %6854 = vmatpush.bf16.msrb.mxu2 %v15348_v9  ;;  %v15363_v33 = vld [vmem:[#allocation144_spill] sm:$0xff]  ;;  %v15364_v9 = vld [vmem:[#allocation143_spill] sm:$0xff] }
 0x9be   :  { %6816 = vmatpush.bf16.msra.mxu3 %v15349_v27  ;;  %6829 = vmatpush.bf16.msrb.mxu0 %v15350_v18  ;;  %v15369_v27 = vld [vmem:[#allocation149_spill] sm:$0xff]  ;;  %v15370_v18 = vld [vmem:[#allocation150_spill] sm:$0xff] }
 0x9bf   :  { %6842 = vmatpush.bf16.msrb.mxu1 %v15351_v39  ;;  %6855 = vmatpush.bf16.msrb.mxu2 %v15352_v28  ;;  %v15371_v39 = vld [vmem:[#allocation152_spill] sm:$0xff]  ;;  %v15372_v28 = vld [vmem:[#allocation151_spill] sm:$0xff] }
 0x9c2   :  { %6817 = vmatpush.bf16.msra.mxu3 %v15353_v13  ;;  %6830 = vmatpush.bf16.msrb.mxu0 %v15354_v37  ;;  %v6592_v17 = vpop.f32.mrf.mxu0  ;;  %v15374_v13 = vld [vmem:[#allocation154_spill] sm:$0xff] }
 0x9c3   :  { %6843 = vmatpush.bf16.msrb.mxu1 %v15355_v14  ;;  %6856 = vmatpush.bf16.msrb.mxu2 %v15356_v56  ;;  %v15375_v14 = vld [vmem:[#allocation156_spill] sm:$0xff]  ;;  %v15376_v56 = vld [vmem:[#allocation155_spill] sm:$0xff] }
 0x9c5   :  { %6818 = vmatmul.bf16.vlgmr.msra.gmra.mxu3 %v14408_v35  ;;  %6831 = vmatmul.bf16.vlgmr.msrb.gmra.mxu0 %v14410_v23  ;;  %v6605_v6 = vpop.f32.mrf.mxu1 }
 0x9c6   :  { %6862 = vmatpush.bf16.msrb.mxu3 %v15357_v42  ;;  %6875 = vmatpush.bf16.msra.mxu0 %v15358_v54  ;;  %v15377_v42 = vperm.slane %v15340_v25, 4 }
 0x9c7   :  { %6888 = vmatpush.bf16.msra.mxu1 %v15359_v19  ;;  %6901 = vmatpush.bf16.msra.mxu2 %v15360_v41  ;;  %v15378_v19 = vperm.slane %v15340_v25, 5 }
 0x9c8   :  { %6844 = vmatmul.bf16.vlgmr.msrb.gmra.mxu1 %v14414_v26  ;;  %6857 = vmatmul.bf16.vlgmr.msrb.gmra.mxu2 %v14416_v2  ;;  %v6579_v61 = vpop.f32.mrf.mxu3 }
 0x9c9   :  { %v6580_v54 = vadd.f32 %v6579_v61, %v15377_v42  ;;  %v6606_v41 = vadd.f32 %v6605_v6, %v15378_v19  ;;  %v15393_v42 = vld [vmem:[#allocation172_spill] sm:$0xff]  ;;  %v15395_v19 = vld [vmem:[#allocation173_spill] sm:$0xff] }
 0x9ca   :  { %6863 = vmatpush.bf16.msrb.mxu3 %v15361_v51  ;;  %6876 = vmatpush.bf16.msra.mxu0 %v15362_v36  ;;  %v6594_v20 = vpop.f32.mrf.mxu0  ;;  %v15379_v51 = vld [vmem:[#allocation157_spill] sm:$0xff]  ;;  %v15380_v36 = vld [vmem:[#allocation158_spill] sm:$0xff] }
 0x9cb   :  { %6889 = vmatpush.bf16.msra.mxu1 %v15363_v33  ;;  %6902 = vmatpush.bf16.msra.mxu2 %v15364_v9  ;;  %v6618_v44 = vpop.f32.mrf.mxu2  ;;  %v15381_v33 = vld [vmem:[#allocation160_spill] sm:$0xff]  ;;  %v15382_v9 = vld [vmem:[#allocation159_spill] sm:$0xff]  ;;  %v15387_v20 = vld [vmem:[#allocation165_spill] sm:$0xff] }
 0x9cd   :  { %v6607_v37 = vpop.f32.mrf.mxu1 }
 0x9ce   :  { %6864 = vmatpush.bf16.msrb.mxu3 %v15365_v11  ;;  %6877 = vmatpush.bf16.msra.mxu0 %v15366_v59  ;;  %v6593_v59 = vadd.f32 %v6592_v17, %v6580_v54  ;;  %v15390_v37 = vld [vmem:[#allocation167_spill] sm:$0xff]  ;;  %v15394_v54 = vld [vmem:[#allocation170_spill] sm:$0xff] }
 0x9cf   :  { %6890 = vmatpush.bf16.msra.mxu1 %v15367_v12  ;;  %6903 = vmatpush.bf16.msra.mxu2 %v15368_v47  ;;  %v6619_v12 = vadd.f32 %v6618_v44, %v6606_v41  ;;  %v15396_v41 = vld [vmem:[#allocation174_spill] sm:$0xff] }
 0x9d0   :  { %v6581_v11 = vpop.f32.mrf.mxu3  ;;  %v6686_v6 = vmax.f32 %v6593_v59, 0.0 }
 0x9d1   :  { %v6687_v61 = vmax.f32 %v6619_v12, 0.0  ;;  %v15400_v11 = vld [vmem:[#allocation178_spill] sm:$0xff]  ;;  %v15401_v12 = vld [vmem:[#allocation180_spill] sm:$0xff] }
 0x9d2   :  { %6865 = vmatpush.bf16.msrb.mxu3 %v15369_v27  ;;  %6878 = vmatpush.bf16.msra.mxu0 %v15370_v18  ;;  %v15383_v27 = vld [vmem:[#allocation161_spill] sm:$0xff]  ;;  %v15384_v18 = vld [vmem:[#allocation162_spill] sm:$0xff]  ;;  %v14456_v17 = vpack.c.bf16 %v6686_v6, %v6686_v6  ;;  %v15406_v6 = vld [vmem:[#allocation184_spill] sm:$0xff] }
 0x9d3   :  { %6891 = vmatpush.bf16.msra.mxu1 %v15371_v39  ;;  %6904 = vmatpush.bf16.msra.mxu2 %v15372_v28  ;;  %v6620_v47 = vpop.f32.mrf.mxu2  ;;  %v15385_v39 = vld [vmem:[#allocation164_spill] sm:$0xff]  ;;  %v15386_v28 = vld [vmem:[#allocation163_spill] sm:$0xff]  ;;  %v14458_v44 = vpack.c.bf16 %v6687_v61, %v6687_v61 }
 0x9d4   :  { %v15402_v47 = vld [vmem:[#allocation179_spill] sm:$0xff] }
 0x9d5   :  { %v15407_v61 = vld [vmem:[#allocation183_spill] sm:$0xff] }
 0x9d6   :  { %6866 = vmatpush.bf16.msrb.mxu3 %v15373_v31  ;;  %6879 = vmatpush.bf16.msra.mxu0 %v15374_v13  ;;  %v15388_v31 = vld [vmem:[#allocation166_spill] sm:$0xff]  ;;  %v15389_v13 = vld [vmem:[#allocation171_spill] sm:$0xff] }
 0x9d7   :  { %6892 = vmatpush.bf16.msra.mxu1 %v15375_v14  ;;  %6905 = vmatpush.bf16.msra.mxu2 %v15376_v56  ;;  %v15391_v14 = vld [vmem:[#allocation168_spill] sm:$0xff]  ;;  %v15392_v56 = vld [vmem:[#allocation169_spill] sm:$0xff] }
 0x9da   :  { %6867 = vmatpush.bf16.msrb.mxu3 %v15379_v51  ;;  %6880 = vmatpush.bf16.msra.mxu0 %v15380_v36  ;;  %v15397_v51 = vld [vmem:[#allocation176_spill] sm:$0xff]  ;;  %v15398_v36 = vld [vmem:[#allocation175_spill] sm:$0xff] }
 0x9db   :  { %6893 = vmatpush.bf16.msra.mxu1 %v15381_v33  ;;  %6906 = vmatpush.bf16.msra.mxu2 %v15382_v9  ;;  %v15399_v9 = vld [vmem:[#allocation177_spill] sm:$0xff] }
 0x9de   :  { %6868 = vmatpush.bf16.msrb.mxu3 %v15383_v27  ;;  %6881 = vmatpush.bf16.msra.mxu0 %v15384_v18  ;;  %v15403_v27 = vld [vmem:[#allocation181_spill] sm:$0xff]  ;;  %v15404_v18 = vld [vmem:[#allocation182_spill] sm:$0xff] }
 0x9df   :  { %6894 = vmatpush.bf16.msra.mxu1 %v15385_v39  ;;  %6907 = vmatpush.bf16.msra.mxu2 %v15386_v28  ;;  %v15405_v39 = vperm.slane %v15340_v25, 7 }
 0x9e2   :  { %6869 = vmatpush.bf16.msrb.mxu3 %v15387_v20  ;;  %6882 = vmatpush.bf16.msra.mxu0 %v15388_v31  ;;  %v6644_v33 = vpop.f32.mrf.mxu0  ;;  %v15408_v31 = vperm.slane %v15340_v25, 6  ;;  %v15413_v25 = vld [vmem:[#allocation189_spill] sm:$0xff] }
 0x9e3   :  { %6895 = vmatpush.bf16.msra.mxu1 %v15389_v13  ;;  %6908 = vmatpush.bf16.msra.mxu2 %v15390_v37 }
 0x9e5   :  { %6870 = vmatmul.bf16.vlgmr.msrb.gmra.mxu3 %v14456_v17  ;;  %6883 = vmatmul.bf16.vlgmr.msra.gmra.mxu0 %v14458_v44  ;;  %v6657_v59 = vpop.f32.mrf.mxu1 }
 0x9e6   :  { %6914 = vmatpush.bf16.msra.mxu3 %v15391_v14  ;;  %6927 = vmatpush.bf16.msrb.mxu0 %v15392_v56  ;;  %v6658_v28 = vadd.f32 %v6657_v59, %v15405_v39 }
 0x9e7   :  { %6940 = vmatpush.bf16.msrb.mxu1 %v15393_v42  ;;  %6953 = vmatpush.bf16.msrb.mxu2 %v15394_v54  ;;  %v15409_v42 = vld [vmem:[#allocation185_spill] sm:$0xff]  ;;  %v15410_v54 = vld [vmem:[#allocation186_spill] sm:$0xff] }
 0x9e8   :  { %v6631_v20 = vpop.f32.mrf.mxu3 }
 0x9e9   :  { %v6632_v13 = vadd.f32 %v6631_v20, %v15408_v31  ;;  %v15420_v20 = vld [vmem:[#allocation200_spill] sm:$0xff] }
 0x9ea   :  { %6915 = vmatpush.bf16.msra.mxu3 %v15395_v19  ;;  %6928 = vmatpush.bf16.msrb.mxu0 %v15396_v41  ;;  %v6646_v56 = vpop.f32.mrf.mxu0  ;;  %v15421_v31 = vld [vmem:[#allocation196_spill] sm:$0xff] }
 0x9eb   :  { %6941 = vmatpush.bf16.msrb.mxu1 %v15397_v51  ;;  %6954 = vmatpush.bf16.msrb.mxu2 %v15398_v36  ;;  %v6670_v37 = vpop.f32.mrf.mxu2  ;;  %v6645_v19 = vadd.f32 %v6644_v33, %v6632_v13  ;;  %v15411_v51 = vld [vmem:[#allocation188_spill] sm:$0xff]  ;;  %v15412_v36 = vld [vmem:[#allocation187_spill] sm:$0xff]  ;;  %v15422_v13 = vld [vmem:[#allocation197_spill] sm:$0xff] }
 0x9ec   :  { %v6671_v14 = vadd.f32 %v6670_v37, %v6658_v28  ;;  %v15417_v28 = vld [vmem:[#allocation193_spill] sm:$0xff]  ;;  %v15423_v37 = vld [vmem:[#allocation198_spill] sm:$0xff]  ;;  %v15425_v56 = vld [vmem:[#allocation199_spill] sm:$0xff] }
 0x9ed   :  { %v6659_v41 = vpop.f32.mrf.mxu1 }
 0x9ee   :  { %6916 = vmatpush.bf16.msra.mxu3 %v15399_v9  ;;  %6929 = vmatpush.bf16.msrb.mxu0 %v15400_v11  ;;  %v6689_v9 = vmax.f32 %v6671_v14, 0.0  ;;  %v6688_v11 = vmax.f32 %v6645_v19, 0.0  ;;  %v15424_v14 = vld [vmem:[#allocation201_spill] sm:$0xff]  ;;  %v15430_v19 = vld [vmem:[#allocation206_spill] sm:$0xff]  ;;  %v15431_v41 = vld [vmem:[#allocation207_spill] sm:$0xff] }
 0x9ef   :  { %6942 = vmatpush.bf16.msrb.mxu1 %v15401_v12  ;;  %6955 = vmatpush.bf16.msrb.mxu2 %v15402_v47  ;;  %v15414_v47 = vld [vmem:[#allocation190_spill] sm:$0xff] }
 0x9f0   :  { %v14486_v59 = vpack.c.bf16 %v6689_v9, %v6689_v9  ;;  %v14488_v12 = vpack.c.bf16 %v6688_v11, %v6688_v11  ;;  %v6633_v33 = vpop.f32.mrf.mxu3  ;;  %v15433_v9 = vld [vmem:[#allocation208_spill] sm:$0xff]  ;;  %v15436_v11 = vld [vmem:[#allocation213_spill] sm:$0xff] }
 0x9f2   :  { %6917 = vmatpush.bf16.msra.mxu3 %v15403_v27  ;;  %6930 = vmatpush.bf16.msrb.mxu0 %v15404_v18  ;;  %v15415_v27 = vld [vmem:[#allocation192_spill] sm:$0xff]  ;;  %v15416_v18 = vld [vmem:[#allocation191_spill] sm:$0xff] }
 0x9f3   :  { %6943 = vmatpush.bf16.msrb.mxu1 %v15406_v6  ;;  %6956 = vmatpush.bf16.msrb.mxu2 %v15407_v61  ;;  %v6672_v39 = vpop.f32.mrf.mxu2  ;;  %v15418_v6 = vld [vmem:[#allocation194_spill] sm:$0xff]  ;;  %v15419_v61 = vld [vmem:[#allocation195_spill] sm:$0xff] }
 0x9f4   :  { %6909 = vmatmul.bf16.vlgmr.msra.gmra.mxu2 %v14486_v59  ;;  %6896 = vmatmul.bf16.vlgmr.msra.gmra.mxu1 %v14488_v12 }
 0x9f6   :  { %6918 = vmatpush.bf16.msra.mxu3 %v15409_v42  ;;  %6931 = vmatpush.bf16.msrb.mxu0 %v15410_v54  ;;  %v15429_v42 = vld [vmem:[#allocation204_spill] sm:$0xff] }
 0x9f7   :  { %6944 = vmatpush.bf16.msrb.mxu1 %v15411_v51  ;;  %6957 = vmatpush.bf16.msrb.mxu2 %v15412_v36  ;;  %v15432_v36 = vld [vmem:[#allocation209_spill] sm:$0xff] }
 0x9fa   :  { %6919 = vmatpush.bf16.msra.mxu3 %v15413_v25  ;;  %6932 = vmatpush.bf16.msrb.mxu0 %v15414_v47  ;;  %v15437_v25 = vld [vmem:[#allocation212_spill] sm:$0xff] }
 0x9fb   :  { %6945 = vmatpush.bf16.msrb.mxu1 %v15415_v27  ;;  %6958 = vmatpush.bf16.msrb.mxu2 %v15416_v18  ;;  %v15438_v27 = vperm.slane %v12928_v4, 0 }
 0x9fe   :  { %6920 = vmatpush.bf16.msra.mxu3 %v15417_v28  ;;  %6933 = vmatpush.bf16.msrb.mxu0 %v15418_v6  ;;  %v15439_v28 = vld [vmem:[#allocation214_spill] sm:$0xff]  ;;  %v15440_v6 = vld [vmem:[#allocation215_spill] sm:$0xff] }
 0x9ff   :  { %6946 = vmatpush.bf16.msrb.mxu1 %v13758_v0  ;;  %6959 = vmatpush.bf16.msrb.mxu2 %v15419_v61  ;;  %v15426_v0 = vld [vmem:[#allocation202_spill] sm:$0xff]  ;;  %v15441_v61 = vld [vmem:[#allocation217_spill] sm:$0xff] }
 0xa02   :  { %6921 = vmatpush.bf16.msra.mxu3 %v13761_v55  ;;  %6934 = vmatpush.bf16.msrb.mxu0 %v13765_v7  ;;  %v15427_v55 = vld [vmem:[#allocation203_spill] sm:$0xff]  ;;  %v15428_v7 = vld [vmem:[#allocation205_spill] sm:$0xff]  ;;  %v6728_v54 = vpop.f32.mrf.mxu0 }
 0xa03   :  { %6947 = vmatpush.bf16.msrb.mxu1 %v15420_v20  ;;  %6960 = vmatpush.bf16.msrb.mxu2 %v15421_v31  ;;  %v15442_v20 = vld [vmem:[#allocation216_spill] sm:$0xff] }
 0xa05   :  { %6922 = vmatmul.bf16.vlgmr.msra.gmra.mxu3 %v14290_v57  ;;  %6935 = vmatmul.bf16.vlgmr.msrb.gmra.mxu0 %v14292_v53  ;;  %v6741_v51 = vpop.f32.mrf.mxu1  ;;  %v15434_v57 = vld [vmem:[#allocation210_spill] sm:$0xff]  ;;  %v15435_v53 = vld [vmem:[#allocation211_spill] sm:$0xff] }
 0xa06   :  { %6966 = vmatpush.bf16.msrb.mxu3 %v15422_v13  ;;  %6979 = vmatpush.bf16.msra.mxu0 %v15423_v37  ;;  %v15443_v37 = vld [vmem:[#allocation218_spill] sm:$0xff] }
 0xa07   :  { %6992 = vmatpush.bf16.msra.mxu1 %v15424_v14  ;;  %7005 = vmatpush.bf16.msra.mxu2 %v15425_v56  ;;  %v15444_v14 = vld [vmem:[#allocation219_spill] sm:$0xff]  ;;  %v15445_v56 = vld [vmem:[#allocation221_spill] sm:$0xff] }
 0xa08   :  { %6961 = vmatmul.bf16.vlgmr.msrb.gmra.mxu2 %v14298_v38  ;;  %6948 = vmatmul.bf16.vlgmr.msrb.gmra.mxu1 %v14296_v48  ;;  %v6715_v47 = vpop.f32.mrf.mxu3 }
 0xa09   :  { %v6716_v18 = vadd.f32 %v6715_v47, %v15438_v27  ;;  %v15461_v47 = vld [vmem:[#allocation237_spill] sm:$0xff] }
 0xa0a   :  { %6967 = vmatpush.bf16.msrb.mxu3 %v15426_v0  ;;  %6980 = vmatpush.bf16.msra.mxu0 %v15427_v55  ;;  %v6730_v39 = vpop.f32.mrf.mxu0  ;;  %v15446_v0 = vld [vmem:[#allocation220_spill] sm:$0xff]  ;;  %v15465_v27 = vld [vmem:[#allocation241_spill] sm:$0xff] }
 0xa0b   :  { %6993 = vmatpush.bf16.msra.mxu1 %v15428_v7  ;;  %7006 = vmatpush.bf16.msra.mxu2 %v15429_v42  ;;  %v6754_v33 = vpop.f32.mrf.mxu2  ;;  %v6729_v38 = vadd.f32 %v6728_v54, %v6716_v18  ;;  %v15447_v42 = vld [vmem:[#allocation222_spill] sm:$0xff]  ;;  %v15448_v54 = vld [vmem:[#allocation223_spill] sm:$0xff]  ;;  %v15466_v18 = vld [vmem:[#allocation240_spill] sm:$0xff] }
 0xa0d   :  { %v6743_v48 = vpop.f32.mrf.mxu1  ;;  %v6742_v31 = vadd.f32 %v6741_v51, %v6729_v38  ;;  %v15451_v51 = vld [vmem:[#allocation226_spill] sm:$0xff] }
 0xa0e   :  { %6968 = vmatpush.bf16.msrb.mxu3 %v15430_v19  ;;  %6981 = vmatpush.bf16.msra.mxu0 %v15431_v41  ;;  %v15449_v19 = vld [vmem:[#allocation224_spill] sm:$0xff]  ;;  %v15450_v41 = vld [vmem:[#allocation225_spill] sm:$0xff]  ;;  %v15467_v38 = vld [vmem:[#allocation242_spill] sm:$0xff] }
 0xa0f   :  { %6994 = vmatpush.bf16.msra.mxu1 %v15432_v36  ;;  %7007 = vmatpush.bf16.msra.mxu2 %v15433_v9  ;;  %v6755_v13 = vadd.f32 %v6754_v33, %v6742_v31  ;;  %v15452_v36 = vld [vmem:[#allocation227_spill] sm:$0xff]  ;;  %v15453_v9 = vld [vmem:[#allocation229_spill] sm:$0xff] }
 0xa10   :  { %v6717_v55 = vpop.f32.mrf.mxu3  ;;  %v15468_v48 = vld [vmem:[#allocation243_spill] sm:$0xff]  ;;  %v15469_v31 = vld [vmem:[#allocation245_spill] sm:$0xff] }
 0xa11   :  { %v15472_v55 = vld [vmem:[#allocation247_spill] sm:$0xff] }
 0xa12   :  { %6969 = vmatpush.bf16.msrb.mxu3 %v15434_v57  ;;  %6982 = vmatpush.bf16.msra.mxu0 %v15435_v53  ;;  %v15454_v57 = vld [vmem:[#allocation228_spill] sm:$0xff] }
 0xa13   :  { %6995 = vmatpush.bf16.msra.mxu1 %v15436_v11  ;;  %7008 = vmatpush.bf16.msra.mxu2 %v15437_v25  ;;  %v6756_v7 = vpop.f32.mrf.mxu2  ;;  %v15459_v11 = vld [vmem:[#allocation234_spill] sm:$0xff]  ;;  %v15460_v25 = vld [vmem:[#allocation235_spill] sm:$0xff] }
 0xa14   :  { %v15473_v7 = vld [vmem:[#allocation249_spill] sm:$0xff] }
 0xa16   :  { %6970 = vmatpush.bf16.msrb.mxu3 %v15439_v28  ;;  %6983 = vmatpush.bf16.msra.mxu0 %v15440_v6 }
 0xa17   :  { %6996 = vmatpush.bf16.msra.mxu1 %v15441_v61  ;;  %7009 = vmatpush.bf16.msra.mxu2 %v15442_v20 }
 0xa1a   :  { %6971 = vmatpush.bf16.msrb.mxu3 %v15443_v37  ;;  %6984 = vmatpush.bf16.msra.mxu0 %v15444_v14  ;;  %v15470_v37 = vld [vmem:[#allocation244_spill] sm:$0xff] }
 0xa1b   :  { %6997 = vmatpush.bf16.msra.mxu1 %v15445_v56  ;;  %7010 = vmatpush.bf16.msra.mxu2 %v15446_v0  ;;  %v15471_v0 = vld [vmem:[#allocation246_spill] sm:$0xff] }
 0xa1e   :  { %6972 = vmatpush.bf16.msrb.mxu3 %v15447_v42  ;;  %6985 = vmatpush.bf16.msra.mxu0 %v15448_v54 }
 0xa1f   :  { %6998 = vmatpush.bf16.msra.mxu1 %v13861_v10  ;;  %7011 = vmatpush.bf16.msra.mxu2 %v15449_v19  ;;  %v15455_v10 = vld [vmem:[#allocation230_spill] sm:$0xff] }
 0xa20   :  { %v15475_v19 = vld [vmem:[#allocation250_spill] sm:$0xff] }
 0xa22   :  { %6973 = vmatpush.bf16.msrb.mxu3 %v13867_v32  ;;  %6986 = vmatpush.bf16.msra.mxu0 %v13869_v15  ;;  %v15456_v32 = vld [vmem:[#allocation231_spill] sm:$0xff]  ;;  %v15457_v15 = vld [vmem:[#allocation233_spill] sm:$0xff]  ;;  %v6780_v53 = vpop.f32.mrf.mxu0 }
 0xa23   :  { %6999 = vmatpush.bf16.msra.mxu1 %v13881_v52  ;;  %7012 = vmatpush.bf16.msra.mxu2 %v15450_v41  ;;  %v15458_v52 = vld [vmem:[#allocation232_spill] sm:$0xff]  ;;  %v15476_v41 = vld [vmem:[#allocation251_spill] sm:$0xff] }
 0xa25   :  { %6974 = vmatmul.bf16.vlgmr.msrb.gmra.mxu3 %v14352_v60  ;;  %6987 = vmatmul.bf16.vlgmr.msra.gmra.mxu0 %v14354_v29  ;;  %v6793_v60 = vpop.f32.mrf.mxu1  ;;  %v15462_v29 = vld [vmem:[#allocation236_spill] sm:$0xff] }
 0xa26   :  { %7018 = vmatpush.bf16.msra.mxu3 %v15451_v51  ;;  %7031 = vmatpush.bf16.msrb.mxu0 %v15452_v36  ;;  %v15477_v51 = vld [vmem:[#allocation252_spill] sm:$0xff]  ;;  %v15478_v36 = vld [vmem:[#allocation253_spill] sm:$0xff] }
 0xa27   :  { %7044 = vmatpush.bf16.msrb.mxu1 %v15453_v9  ;;  %7057 = vmatpush.bf16.msrb.mxu2 %v15454_v57  ;;  %v15479_v9 = vld [vmem:[#allocation254_spill] sm:$0xff]  ;;  %v15480_v57 = vld [vmem:[#allocation256_spill] sm:$0xff] }
 0xa28   :  { %7000 = vmatmul.bf16.vlgmr.msra.gmra.mxu1 %v14358_v24  ;;  %7013 = vmatmul.bf16.vlgmr.msra.gmra.mxu2 %v14360_v58  ;;  %v15463_v24 = vld [vmem:[#allocation238_spill] sm:$0xff]  ;;  %v15464_v58 = vld [vmem:[#allocation239_spill] sm:$0xff]  ;;  %v6767_v33 = vpop.f32.mrf.mxu3 }
 0xa29   :  { %v6768_v39 = vadd.f32 %v6767_v33, %v6755_v13  ;;  %v15474_v13 = vld [vmem:[#allocation248_spill] sm:$0xff]  ;;  %v15496_v33 = vld [vmem:[#allocation271_spill] sm:$0xff] }
 0xa2a   :  { %7019 = vmatpush.bf16.msra.mxu3 %v15455_v10  ;;  %7032 = vmatpush.bf16.msrb.mxu0 %v15456_v32  ;;  %v6782_v6 = vpop.f32.mrf.mxu0  ;;  %v15481_v10 = vld [vmem:[#allocation255_spill] sm:$0xff]  ;;  %v15486_v32 = vld [vmem:[#allocation261_spill] sm:$0xff] }
 0xa2b   :  { %7045 = vmatpush.bf16.msrb.mxu1 %v15457_v15  ;;  %7058 = vmatpush.bf16.msrb.mxu2 %v15458_v52  ;;  %v6806_v28 = vpop.f32.mrf.mxu2  ;;  %v6781_v61 = vadd.f32 %v6780_v53, %v6768_v39  ;;  %v15487_v15 = vld [vmem:[#allocation262_spill] sm:$0xff]  ;;  %v15488_v52 = vld [vmem:[#allocation264_spill] sm:$0xff] }
 0xa2c   :  { %v15492_v53 = vld [vmem:[#allocation268_spill] sm:$0xff] }
 0xa2d   :  { %v6795_v20 = vpop.f32.mrf.mxu1  ;;  %v6794_v14 = vadd.f32 %v6793_v60, %v6781_v61  ;;  %v15497_v6 = vld [vmem:[#allocation272_spill] sm:$0xff] }
 0xa2e   :  { %7020 = vmatpush.bf16.msra.mxu3 %v15459_v11  ;;  %7033 = vmatpush.bf16.msrb.mxu0 %v15460_v25  ;;  %v15493_v11 = vld [vmem:[#allocation267_spill] sm:$0xff] }
 0xa2f   :  { %7046 = vmatpush.bf16.msrb.mxu1 %v15461_v47  ;;  %7059 = vmatpush.bf16.msrb.mxu2 %v15462_v29  ;;  %v6807_v56 = vadd.f32 %v6806_v28, %v6794_v14 }
 0xa30   :  { %v6769_v42 = vpop.f32.mrf.mxu3 }
 0xa32   :  { %7021 = vmatpush.bf16.msra.mxu3 %v15463_v24  ;;  %7034 = vmatpush.bf16.msrb.mxu0 %v15464_v58  ;;  %v15494_v24 = vld [vmem:[#allocation269_spill] sm:$0xff]  ;;  %v15495_v58 = vld [vmem:[#allocation270_spill] sm:$0xff] }
 0xa33   :  { %7047 = vmatpush.bf16.msrb.mxu1 %v15465_v27  ;;  %7060 = vmatpush.bf16.msrb.mxu2 %v15466_v18  ;;  %v6808_v54 = vpop.f32.mrf.mxu2 }
 0xa36   :  { %7022 = vmatpush.bf16.msra.mxu3 %v15467_v38  ;;  %7035 = vmatpush.bf16.msrb.mxu0 %v15468_v48  ;;  %v15498_v38 = vld [vmem:[#allocation273_spill] sm:$0xff] }
 0xa37   :  { %7048 = vmatpush.bf16.msrb.mxu1 %v15469_v31  ;;  %7061 = vmatpush.bf16.msrb.mxu2 %v15470_v37 }
 0xa3a   :  { %7023 = vmatpush.bf16.msra.mxu3 %v15471_v0  ;;  %7036 = vmatpush.bf16.msrb.mxu0 %v15472_v55 }
 0xa3b   :  { %7049 = vmatpush.bf16.msrb.mxu1 %v15473_v7  ;;  %7062 = vmatpush.bf16.msrb.mxu2 %v15474_v13 }
 0xa3e   :  { %7024 = vmatpush.bf16.msra.mxu3 %v15475_v19  ;;  %7037 = vmatpush.bf16.msrb.mxu0 %v15476_v41 }
 0xa3f   :  { %7050 = vmatpush.bf16.msrb.mxu1 %v13966_v49  ;;  %7063 = vmatpush.bf16.msrb.mxu2 %v15477_v51  ;;  %v15482_v49 = vld [vmem:[#allocation257_spill] sm:$0xff] }
 0xa42   :  { %7025 = vmatpush.bf16.msra.mxu3 %v13969_v63  ;;  %7038 = vmatpush.bf16.msrb.mxu0 %v13973_v62  ;;  %v15483_v63 = vld [vmem:[#allocation258_spill] sm:$0xff]  ;;  %v15484_v62 = vld [vmem:[#allocation260_spill] sm:$0xff] }
 0xa43   :  { %7051 = vmatpush.bf16.msrb.mxu1 %v13984_v22  ;;  %7064 = vmatpush.bf16.msrb.mxu2 %v13975_v16  ;;  %v15485_v16 = vld [vmem:[#allocation259_spill] sm:$0xff]  ;;  %v6832_v22 = vpop.f32.mrf.mxu0 }
 0xa45   :  { %7026 = vmatmul.bf16.vlgmr.msra.gmra.mxu3 %v14408_v35  ;;  %7039 = vmatmul.bf16.vlgmr.msrb.gmra.mxu0 %v14410_v23  ;;  %v6845_v35 = vpop.f32.mrf.mxu1  ;;  %v15489_v23 = vld [vmem:[#allocation263_spill] sm:$0xff] }
 0xa46   :  { %7070 = vmatpush.bf16.msrb.mxu3 %v15478_v36  ;;  %7083 = vmatpush.bf16.msra.mxu0 %v15479_v9 }
 0xa47   :  { %7096 = vmatpush.bf16.msra.mxu1 %v15480_v57  ;;  %7109 = vmatpush.bf16.msra.mxu2 %v15481_v10 }
 0xa48   :  { %7052 = vmatmul.bf16.vlgmr.msrb.gmra.mxu1 %v14414_v26  ;;  %7065 = vmatmul.bf16.vlgmr.msrb.gmra.mxu2 %v14416_v2  ;;  %v15490_v26 = vld [vmem:[#allocation265_spill] sm:$0xff]  ;;  %v15491_v2 = vld [vmem:[#allocation266_spill] sm:$0xff]  ;;  %v6819_v25 = vpop.f32.mrf.mxu3 }
 0xa49   :  { %v6820_v60 = vadd.f32 %v6819_v25, %v6807_v56 }
 0xa4a   :  { %7071 = vmatpush.bf16.msrb.mxu3 %v15482_v49  ;;  %7084 = vmatpush.bf16.msra.mxu0 %v15483_v63 }
 0xa4b   :  { %7097 = vmatpush.bf16.msra.mxu1 %v15484_v62  ;;  %7110 = vmatpush.bf16.msra.mxu2 %v15485_v16  ;;  %v6858_v47 = vpop.f32.mrf.mxu2  ;;  %v6834_v29 = vpop.f32.mrf.mxu0  ;;  %v6833_v27 = vadd.f32 %v6832_v22, %v6820_v60 }
 0xa4d   :  { %v6847_v18 = vpop.f32.mrf.mxu1  ;;  %v6846_v39 = vadd.f32 %v6845_v35, %v6833_v27 }
 0xa4e   :  { %7072 = vmatpush.bf16.msrb.mxu3 %v15486_v32  ;;  %7085 = vmatpush.bf16.msra.mxu0 %v15487_v15 }
 0xa4f   :  { %7098 = vmatpush.bf16.msra.mxu1 %v15488_v52  ;;  %7111 = vmatpush.bf16.msra.mxu2 %v15489_v23  ;;  %v6859_v28 = vadd.f32 %v6858_v47, %v6846_v39 }
 0xa50   :  { %v6821_v48 = vpop.f32.mrf.mxu3 }
 0xa52   :  { %7073 = vmatpush.bf16.msrb.mxu3 %v15490_v26  ;;  %7086 = vmatpush.bf16.msra.mxu0 %v15491_v2 }
 0xa53   :  { %7099 = vmatpush.bf16.msra.mxu1 %v15492_v53  ;;  %7112 = vmatpush.bf16.msra.mxu2 %v15493_v11  ;;  %v6860_v61 = vpop.f32.mrf.mxu2 }
 0xa54   :  { %v15500_v61 = vld [vmem:[#allocation27_spill] sm:$0xff] }
 0xa56   :  { %7074 = vmatpush.bf16.msrb.mxu3 %v15494_v24  ;;  %7087 = vmatpush.bf16.msra.mxu0 %v15495_v58 }
 0xa57   :  { %7100 = vmatpush.bf16.msra.mxu1 %v14042_v5  ;;  %7113 = vmatpush.bf16.msra.mxu2 %v15496_v33 }
 0xa5a   :  { %7075 = vmatpush.bf16.msrb.mxu3 %v15497_v6  ;;  %7088 = vmatpush.bf16.msra.mxu0 %v15498_v38 }
 0xa5b   :  { %7101 = vmatpush.bf16.msra.mxu1 %v14055_v1  ;;  %7114 = vmatpush.bf16.msra.mxu2 %v14052_v8 }
 0xa5e   :  { %7076 = vmatpush.bf16.msrb.mxu3 %v14059_v21  ;;  %7089 = vmatpush.bf16.msra.mxu0 %v14061_v34 }
 0xa5f   :  { %7102 = vmatpush.bf16.msra.mxu1 %v14067_v3  ;;  %7115 = vmatpush.bf16.msra.mxu2 %v14064_v46 }
 0xa62   :  { %7077 = vmatpush.bf16.msrb.mxu3 %v14071_v30  ;;  %7090 = vmatpush.bf16.msra.mxu0 %v14073_v50  ;;  %v6884_v1 = vpop.f32.mrf.mxu0 }
 0xa63   :  { %7103 = vmatpush.bf16.msra.mxu1 %v14079_v43  ;;  %7116 = vmatpush.bf16.msra.mxu2 %v14076_v45 }
 0xa65   :  { %7078 = vmatmul.bf16.vlgmr.msrb.gmra.mxu3 %v14456_v17  ;;  %7091 = vmatmul.bf16.vlgmr.msra.gmra.mxu0 %v14458_v44  ;;  %v15499_v44 = vperm.slane %v12928_v4, 1 }
 0xa66   :  { %7104 = vmatmul.bf16.vlgmr.msra.gmra.mxu1 %v14488_v12  ;;  %7117 = vmatmul.bf16.vlgmr.msra.gmra.mxu2 %v14486_v59 }
 0xa68   :  { %v6871_v5 = vpop.f32.mrf.mxu3 }
 0xa69   :  { %v6872_v3 = vadd.f32 %v6871_v5, %v6859_v28 }
 0xa6a   :  { %v6886_v8 = vpop.f32.mrf.mxu0 }
 0xa6b   :  { %v6885_v21 = vadd.f32 %v6884_v1, %v6872_v3  ;;  %v11450_v3 = vld [vmem:[#allocation7 + $0x270] sm:$0xf]  ;;  %v12635_v8 = vld [vmem:[#allocation7 + $0x274] sm:$0xf0] }
 0xa70   :  { %v6873_v34 = vpop.f32.mrf.mxu3 }
 0xa71   :  { %v6897_v46 = vpop.f32.mrf.mxu1  ;;  %v11451_v34 = vor.u32 %v12635_v8, %v11450_v3  ;;  %v12642_v8 = vld [vmem:[#allocation7 + $0x2b4] sm:$0xf] }
 0xa72   :  { %v6898_v30 = vadd.f32 %v6897_v46, %v6885_v21  ;;  %v11514_v21 = vld [vmem:[#allocation7 + $0x2f0] sm:$0xf]  ;;  %v12651_v46 = vld [vmem:[#allocation7 + $0x2f4] sm:$0xf0] }
 0xa73   :  { %7353 = vmatpush.bf16.msra.mxu3 %v11451_v34 }
 0xa77   :  { %v6910_v50 = vpop.f32.mrf.mxu2 }
 0xa78   :  { %v6911_v43 = vadd.f32 %v6910_v50, %v6898_v30  ;;  %v12634_v30 = vld [vmem:[#allocation7 + $0x274] sm:$0xf]  ;;  %v11452_v50 = vld [vmem:[#allocation7 + $0x278] sm:$0xf0] }
 0xa79   :  { %v6899_v20 = vpop.f32.mrf.mxu1 }
 0xa7a   :  { %v7122_v48 = vadd.f32 %v6911_v43, %v14170_v40  ;;  %v11515_v20 = vor.u32 %v12651_v46, %v11514_v21  ;;  %v15501_v43 = vld [vmem:[#allocation36_spill] sm:$0xff]  ;;  %v11484_v21 = vld [vmem:[#allocation7 + $0x2b8] sm:$0xf0]  ;;  %v11410_v46 = vld [vmem:[#allocation7 + $0x220] sm:$0xf] }
 0xa7b   :  { %v11487_v34 = vor.u32 %v12642_v8, %v11484_v21  ;;  %v12664_v21 = vld [vmem:[#allocation7 + $0x364] sm:$0xf] }
 0xa7c   :  { %7366 = vmatpush.bf16.msrb.mxu0 %v11515_v20 }
 0xa7f   :  { %v6912_v31 = vpop.f32.mrf.mxu2 }
 0xa80   :  { %v12650_v31 = vld [vmem:[#allocation7 + $0x2f4] sm:$0xf] }
 0xa82   :  { %v6936_v45 = vpop.f32.mrf.mxu0 }
 0xa85   :  { %v6949_v14 = vpop.f32.mrf.mxu1 }
 0xa88   :  { %v6923_v17 = vpop.f32.mrf.mxu3 }
 0xa89   :  { %v6924_v37 = vadd.f32 %v6923_v17, %v15499_v44  ;;  %v11516_v17 = vld [vmem:[#allocation7 + $0x2f8] sm:$0xf0] }
 0xa8a   :  { %v6938_v12 = vpop.f32.mrf.mxu0  ;;  %v11519_v44 = vor.u32 %v12650_v31, %v11516_v17  ;;  %v12624_v31 = vld [vmem:[#allocation7 + $0x224] sm:$0xf]  ;;  %v11412_v17 = vld [vmem:[#allocation7 + $0x228] sm:$0xf0] }
 0xa8b   :  { %v6937_v59 = vadd.f32 %v6936_v45, %v6924_v37  ;;  %v6962_v55 = vpop.f32.mrf.mxu2  ;;  %v11455_v45 = vor.u32 %v12634_v30, %v11452_v50  ;;  %v12625_v30 = vld [vmem:[#allocation7 + $0x224] sm:$0xf0]  ;;  %v11474_v50 = vld [vmem:[#allocation7 + $0x2a0] sm:$0xf] }
 0xa8c   :  { %7392 = vmatpush.bf16.msrb.mxu2 %v11519_v44  ;;  %v11411_v20 = vor.u32 %v12625_v30, %v11410_v46  ;;  %v11626_v46 = vld [vmem:[#allocation7 + $0x3d0] sm:$0xf] }
 0xa8d   :  { %v6950_v56 = vadd.f32 %v6949_v14, %v6937_v59  ;;  %v6951_v7 = vpop.f32.mrf.mxu1  ;;  %7379 = vmatpush.bf16.msrb.mxu1 %v11455_v45  ;;  %v12641_v45 = vld [vmem:[#allocation7 + $0x2a4] sm:$0xf0] }
 0xa8e   :  { %v12633_v7 = vld [vmem:[#allocation7 + $0x264] sm:$0xf0]  ;;  %v11475_v44 = vor.u32 %v12641_v45, %v11474_v50  ;;  %v12679_v50 = vld [vmem:[#allocation7 + $0x3d4] sm:$0xf0]  ;;  %v11628_v45 = vld [vmem:[#allocation7 + $0x3d8] sm:$0xf0] }
 0xa8f   :  { %v6963_v4 = vadd.f32 %v6962_v55, %v6950_v56  ;;  %v11442_v55 = vld [vmem:[#allocation7 + $0x260] sm:$0xf] }
 0xa90   :  { %v6925_v0 = vpop.f32.mrf.mxu3 }
 0xa93   :  { %v6964_v13 = vpop.f32.mrf.mxu2 }
 0xa94   :  { %v11506_v13 = vld [vmem:[#allocation7 + $0x2e0] sm:$0xf] }
 0xaa2   :  { %v6988_v42 = vpop.f32.mrf.mxu0 }
 0xaa5   :  { %v7001_v54 = vpop.f32.mrf.mxu1 }
 0xaa8   :  { %v6975_v19 = vpop.f32.mrf.mxu3 }
 0xaa9   :  { %v6976_v16 = vadd.f32 %v6975_v19, %v6963_v4  ;;  %v12632_v19 = vld [vmem:[#allocation7 + $0x264] sm:$0xf]  ;;  %v12631_v4 = vld [vmem:[#allocation7 + $0x254] sm:$0xf0] }
 0xaaa   :  { %v6990_v51 = vpop.f32.mrf.mxu0 }
 0xaab   :  { %v7014_v41 = vpop.f32.mrf.mxu2  ;;  %v6989_v15 = vadd.f32 %v6988_v42, %v6976_v16  ;;  %v11443_v42 = vor.u32 %v12633_v7, %v11442_v55  ;;  %v12647_v16 = vld [vmem:[#allocation7 + $0x2d4] sm:$0xf0]  ;;  %v11466_v7 = vld [vmem:[#allocation7 + $0x290] sm:$0xf] }
 0xaac   :  { %v12623_v55 = vld [vmem:[#allocation7 + $0x214] sm:$0xf0] }
 0xaad   :  { %v7003_v36 = vpop.f32.mrf.mxu1  ;;  %v7002_v23 = vadd.f32 %v7001_v54, %v6989_v15  ;;  %v12649_v54 = vld [vmem:[#allocation7 + $0x2e4] sm:$0xf0]  ;;  %7354 = vmatpush.bf16.msra.mxu3 %v11443_v42  ;;  %v12639_v42 = vld [vmem:[#allocation7 + $0x294] sm:$0xf0] }
 0xaae   :  { %v11507_v51 = vor.u32 %v12649_v54, %v11506_v13  ;;  %v12622_v54 = vld [vmem:[#allocation7 + $0x214] sm:$0xf] }
 0xaaf   :  { %v7015_v26 = vadd.f32 %v7014_v41, %v7002_v23  ;;  %v11444_v41 = vld [vmem:[#allocation7 + $0x268] sm:$0xf0]  ;;  %v11500_v23 = vld [vmem:[#allocation7 + $0x2d8] sm:$0xf0] }
 0xab0   :  { %v6977_v9 = vpop.f32.mrf.mxu3  ;;  %v11447_v36 = vor.u32 %v12632_v19, %v11444_v41  ;;  %7367 = vmatpush.bf16.msrb.mxu0 %v11507_v51  ;;  %v11404_v19 = vld [vmem:[#allocation7 + $0x218] sm:$0xf0]  ;;  %v11467_v41 = vor.u32 %v12639_v42, %v11466_v7  ;;  %v11620_v42 = vld [vmem:[#allocation7 + $0x3c8] sm:$0xf0] }
 0xab1   :  { %v12648_v9 = vld [vmem:[#allocation7 + $0x2e4] sm:$0xf]  ;;  %v11407_v51 = vor.u32 %v12622_v54, %v11404_v19  ;;  %v11554_v54 = vld [vmem:[#allocation7 + $0x340] sm:$0xf]  ;;  %v12661_v19 = vld [vmem:[#allocation7 + $0x344] sm:$0xf0] }
 0xab2   :  { %7380 = vmatpush.bf16.msrb.mxu1 %v11447_v36  ;;  %v12638_v36 = vld [vmem:[#allocation7 + $0x294] sm:$0xf] }
 0xab3   :  { %v7016_v57 = vpop.f32.mrf.mxu2 }
 0xab4   :  { %v11508_v57 = vld [vmem:[#allocation7 + $0x2e8] sm:$0xf0] }
 0xac2   :  { %v7040_v10 = vpop.f32.mrf.mxu0 }
 0xac5   :  { %v7053_v49 = vpop.f32.mrf.mxu1 }
 0xac8   :  { %v7027_v63 = vpop.f32.mrf.mxu3 }
 0xac9   :  { %v7028_v2 = vadd.f32 %v7027_v63, %v7015_v26  ;;  %v11498_v63 = vld [vmem:[#allocation7 + $0x2d0] sm:$0xf] }
 0xaca   :  { %v7042_v22 = vpop.f32.mrf.mxu0  ;;  %v11499_v15 = vor.u32 %v12647_v16, %v11498_v63  ;;  %v12620_v16 = vld [vmem:[#allocation7 + $0x204] sm:$0xf] }
 0xacb   :  { %v7066_v62 = vpop.f32.mrf.mxu2  ;;  %v7041_v53 = vadd.f32 %v7040_v10, %v7028_v2  ;;  %v11511_v10 = vor.u32 %v12648_v9, %v11508_v57  ;;  %v12630_v22 = vld [vmem:[#allocation7 + $0x254] sm:$0xf]  ;;  %v11426_v2 = vld [vmem:[#allocation7 + $0x240] sm:$0xf]  ;;  %v11468_v9 = vld [vmem:[#allocation7 + $0x298] sm:$0xf0] }
 0xacc   :  { %7368 = vmatpush.bf16.msrb.mxu0 %v11499_v15  ;;  %v11471_v57 = vor.u32 %v12638_v36, %v11468_v9 }
 0xacd   :  { %v7055_v32 = vpop.f32.mrf.mxu1  ;;  %v7054_v25 = vadd.f32 %v7053_v49, %v7041_v53  ;;  %v11434_v49 = vld [vmem:[#allocation7 + $0x250] sm:$0xf]  ;;  %7393 = vmatpush.bf16.msrb.mxu2 %v11511_v10  ;;  %v12629_v53 = vld [vmem:[#allocation7 + $0x244] sm:$0xf0]  ;;  %v11394_v10 = vld [vmem:[#allocation7 + $0x200] sm:$0xf] }
 0xace   :  { %v11436_v32 = vld [vmem:[#allocation7 + $0x258] sm:$0xf0] }
 0xacf   :  { %v7067_v47 = vadd.f32 %v7066_v62, %v7054_v25  ;;  %v11435_v62 = vor.u32 %v12631_v4, %v11434_v49  ;;  %v11427_v25 = vor.u32 %v12629_v53, %v11426_v2  ;;  %v12621_v49 = vld [vmem:[#allocation7 + $0x204] sm:$0xf0]  ;;  %v11458_v4 = vld [vmem:[#allocation7 + $0x280] sm:$0xf]  ;;  %v11642_v2 = vld [vmem:[#allocation7 + $0x3f0] sm:$0xf] }
 0xad0   :  { %v7029_v35 = vpop.f32.mrf.mxu3  ;;  %v11395_v63 = vor.u32 %v12621_v49, %v11394_v10  ;;  %v12683_v53 = vld [vmem:[#allocation7 + $0x3f4] sm:$0xf0]  ;;  %v11555_v49 = vor.u32 %v12661_v19, %v11554_v54  ;;  %v11586_v19 = vld [vmem:[#allocation7 + $0x380] sm:$0xf] }
 0xad1   :  { %v11439_v35 = vor.u32 %v12630_v22, %v11436_v32  ;;  %7355 = vmatpush.bf16.msra.mxu3 %v11435_v62  ;;  %v12637_v62 = vld [vmem:[#allocation7 + $0x284] sm:$0xf0]  ;;  %v11396_v22 = vld [vmem:[#allocation7 + $0x208] sm:$0xf0] }
 0xad2   :  { %v11459_v32 = vor.u32 %v12637_v62, %v11458_v4  ;;  %v11399_v15 = vor.u32 %v12620_v16, %v11396_v22  ;;  %v11610_v4 = vld [vmem:[#allocation7 + $0x3b0] sm:$0xf]  ;;  %v12674_v16 = vld [vmem:[#allocation7 + $0x3b4] sm:$0xf]  ;;  %v11612_v22 = vld [vmem:[#allocation7 + $0x3b8] sm:$0xf0] }
 0xad3   :  { %v7068_v52 = vpop.f32.mrf.mxu2  ;;  %7381 = vmatpush.bf16.msrb.mxu1 %v11439_v35  ;;  %v12636_v35 = vld [vmem:[#allocation7 + $0x284] sm:$0xf] }
 0xad4   :  { %v12646_v52 = vld [vmem:[#allocation7 + $0x2d4] sm:$0xf] }
 0xad5   :  { %v11503_v26 = vor.u32 %v12646_v52, %v11500_v23  ;;  %7356 = vmatpush.bf16.msra.mxu3 %v11427_v25  ;;  %v11460_v52 = vld [vmem:[#allocation7 + $0x288] sm:$0xf0] }
 0xad6   :  { %v11463_v23 = vor.u32 %v12636_v35, %v11460_v52  ;;  %v11615_v52 = vor.u32 %v12674_v16, %v11612_v22  ;;  %v11678_v22 = vld [vmem:[#allocation7 + $0x470] sm:$0xf] }
 0xad7   :  { %7394 = vmatpush.bf16.msrb.mxu2 %v11503_v26 }
 0xae2   :  { %v7092_v11 = vpop.f32.mrf.mxu0 }
 0xae3   :  { %v7105_v60 = vpop.f32.mrf.mxu1 }
 0xae8   :  { %v7079_v29 = vpop.f32.mrf.mxu3 }
 0xae9   :  { %v7080_v24 = vadd.f32 %v7079_v29, %v7067_v47  ;;  %v7118_v58 = vpop.f32.mrf.mxu2  ;;  %v12628_v47 = vld [vmem:[#allocation7 + $0x244] sm:$0xf]  ;;  %v11428_v29 = vld [vmem:[#allocation7 + $0x248] sm:$0xf0] }
 0xaea   :  { %v7094_v27 = vpop.f32.mrf.mxu0 }
 0xaeb   :  { %v7093_v18 = vadd.f32 %v7092_v11, %v7080_v24  ;;  %v7107_v33 = vpop.f32.mrf.mxu1  ;;  %v11490_v11 = vld [vmem:[#allocation7 + $0x2c0] sm:$0xf]  ;;  %v12644_v27 = vld [vmem:[#allocation7 + $0x2c4] sm:$0xf] }
 0xaed   :  { %v7106_v39 = vadd.f32 %v7105_v60, %v7093_v18  ;;  %v12645_v60 = vld [vmem:[#allocation7 + $0x2c4] sm:$0xf0]  ;;  %v11492_v18 = vld [vmem:[#allocation7 + $0x2c8] sm:$0xf0] }
 0xaee   :  { %v11491_v24 = vor.u32 %v12645_v60, %v11490_v11  ;;  %v11495_v33 = vor.u32 %v12644_v27, %v11492_v18  ;;  %v12682_v11 = vld [vmem:[#allocation7 + $0x3f4] sm:$0xf]  ;;  %v11643_v60 = vor.u32 %v12683_v53, %v11642_v2 }
 0xaef   :  { %v7119_v28 = vadd.f32 %v7118_v58, %v7106_v39  ;;  %v11431_v58 = vor.u32 %v12628_v47, %v11428_v29  ;;  %v11418_v39 = vld [vmem:[#allocation7 + $0x230] sm:$0xf]  ;;  %v11644_v47 = vld [vmem:[#allocation7 + $0x3f8] sm:$0xf0]  ;;  %v12666_v18 = vld [vmem:[#allocation7 + $0x374] sm:$0xf] }
 0xaf0   :  { %v7081_v6 = vpop.f32.mrf.mxu3  ;;  %7369 = vmatpush.bf16.msrb.mxu0 %v11491_v24  ;;  %7395 = vmatpush.bf16.msrb.mxu2 %v11495_v33  ;;  %v11578_v29 = vld [vmem:[#allocation7 + $0x370] sm:$0xf]  ;;  %v12667_v24 = vld [vmem:[#allocation7 + $0x374] sm:$0xf0]  ;;  %v11580_v33 = vld [vmem:[#allocation7 + $0x378] sm:$0xf0] }
 0xaf1   :  { %v7120_v38 = vpop.f32.mrf.mxu2  ;;  %v7123_v1 = vadd.f32 %v7119_v28, %v15500_v61  ;;  %7382 = vmatpush.bf16.msrb.mxu1 %v11431_v58  ;;  %v12627_v28 = vld [vmem:[#allocation7 + $0x234] sm:$0xf0]  ;;  %v11482_v6 = vld [vmem:[#allocation7 + $0x2b0] sm:$0xf]  ;;  %v12626_v61 = vld [vmem:[#allocation7 + $0x234] sm:$0xf]  ;;  %v11647_v58 = vor.u32 %v12682_v11, %v11644_v47  ;;  %v11579_v27 = vor.u32 %v12667_v24, %v11578_v29 }
 0xaf2   :  { %v11419_v38 = vor.u32 %v12627_v28, %v11418_v39  ;;  %v11634_v39 = vld [vmem:[#allocation7 + $0x3e0] sm:$0xf] }
 0xaf3   :  { %v7124_v5 = vadd.f32 %v7123_v1, %v7122_v48 }
 0xaf4   :  { %7357 = vmatpush.bf16.msra.mxu3 %v11419_v38  ;;  %7396 = vmatpush.bf16.msrb.mxu2 %v11487_v34  ;;  %v12681_v38 = vld [vmem:[#allocation7 + $0x3e4] sm:$0xf0]  ;;  %v11572_v34 = vld [vmem:[#allocation7 + $0x368] sm:$0xf0] }
 0xaf5   :  { %7125 = vadd.xlane.f32.xlu2 %v7124_v5  ;;  %v11575_v30 = vor.u32 %v12664_v21, %v11572_v34  ;;  %v11604_v21 = vld [vmem:[#allocation7 + $0x3a8] sm:$0xf0] }
 0xaf8   :  { %7358 = vmatpush.bf16.msra.mxu3 %v11411_v20  ;;  %v12678_v20 = vld [vmem:[#allocation7 + $0x3d4] sm:$0xf] }
 0xb68   :  { %v7126_v40 = vpop.xlane.xlu2 %7125 }
 0xb69   :  { %v7127_v37 = vmul.f32 %v7126_v40, %v15501_v43  ;;  %v11415_v40 = vor.u32 %v12624_v31, %v11412_v17  ;;  %v11627_v31 = vor.u32 %v12679_v50, %v11626_v46  ;;  %v11562_v17 = vld [vmem:[#allocation7 + $0x350] sm:$0xf]  ;;  %v11538_v46 = vld [vmem:[#allocation7 + $0x320] sm:$0xf]  ;;  %v12656_v50 = vld [vmem:[#allocation7 + $0x324] sm:$0xf] }
 0xb6b   :  { %v14623_v12 = vsub.f32 %v7122_v48, %v7127_v37  ;;  %v14625_v14 = vsub.f32 %v7123_v1, %v7127_v37  ;;  %v12643_v48 = vld [vmem:[#allocation7 + $0x2b4] sm:$0xf0]  ;;  %v11420_v1 = vld [vmem:[#allocation7 + $0x238] sm:$0xf0]  ;;  %v12640_v37 = vld [vmem:[#allocation7 + $0x2a4] sm:$0xf] }
 0xb6c   :  { %v11483_v5 = vor.u32 %v12643_v48, %v11482_v6  ;;  %v11423_v3 = vor.u32 %v12626_v61, %v11420_v1  ;;  %v11583_v6 = vor.u32 %v12666_v18, %v11580_v33  ;;  %v12680_v48 = vld [vmem:[#allocation7 + $0x3e4] sm:$0xf]  ;;  %v11635_v61 = vor.u32 %v12681_v38, %v11634_v39  ;;  %v11636_v1 = vld [vmem:[#allocation7 + $0x3e8] sm:$0xf0]  ;;  %v12658_v38 = vld [vmem:[#allocation7 + $0x334] sm:$0xf] }
 0xb6d   :  { %v7130_v59 = vmul.f32 %v14623_v12, %v14623_v12  ;;  %v7131_v56 = vmul.f32 %v14625_v14, %v14625_v14 }
 0xb6e   :  { %7370 = vmatpush.bf16.msrb.mxu0 %v11483_v5  ;;  %7383 = vmatpush.bf16.msrb.mxu1 %v11423_v3  ;;  %v12665_v5 = vld [vmem:[#allocation7 + $0x364] sm:$0xf0]  ;;  %v11639_v3 = vor.u32 %v12680_v48, %v11636_v1 }
 0xb6f   :  { %v7132_v0 = vadd.f32 %v7131_v56, %v7130_v59  ;;  %v11476_v59 = vld [vmem:[#allocation7 + $0x2a8] sm:$0xf0] }
 0xb70   :  { %v11479_v56 = vor.u32 %v12640_v37, %v11476_v59  ;;  %v11631_v37 = vor.u32 %v12678_v20, %v11628_v45  ;;  %v11540_v45 = vld [vmem:[#allocation7 + $0x328] sm:$0xf0] }
 0xb71   :  { %7133 = vadd.xlane.f32.xlu2 %v7132_v0  ;;  %v11402_v0 = vld [vmem:[#allocation7 + $0x210] sm:$0xf] }
 0xb72   :  { %7371 = vmatpush.bf16.msrb.mxu0 %v11475_v44  ;;  %7384 = vmatpush.bf16.msrb.mxu1 %v11415_v40  ;;  %v11403_v13 = vor.u32 %v12623_v55, %v11402_v0  ;;  %v12663_v44 = vld [vmem:[#allocation7 + $0x354] sm:$0xf0]  ;;  %v12662_v40 = vld [vmem:[#allocation7 + $0x354] sm:$0xf]  ;;  %v11618_v0 = vld [vmem:[#allocation7 + $0x3c0] sm:$0xf] }
 0xb73   :  { %7397 = vmatpush.bf16.msrb.mxu2 %v11479_v56  ;;  %v11563_v59 = vor.u32 %v12663_v44, %v11562_v17  ;;  %v11564_v56 = vld [vmem:[#allocation7 + $0x358] sm:$0xf0]  ;;  %v12677_v55 = vld [vmem:[#allocation7 + $0x3c4] sm:$0xf0]  ;;  %v11594_v17 = vld [vmem:[#allocation7 + $0x390] sm:$0xf] }
 0xb74   :  { %7359 = vmatpush.bf16.msra.mxu3 %v11403_v13  ;;  %v11567_v7 = vor.u32 %v12662_v40, %v11564_v56  ;;  %v12676_v13 = vld [vmem:[#allocation7 + $0x3c4] sm:$0xf]  ;;  %v11619_v9 = vor.u32 %v12677_v55, %v11618_v0  ;;  %v12671_v44 = vld [vmem:[#allocation7 + $0x394] sm:$0xf0]  ;;  %v12670_v40 = vld [vmem:[#allocation7 + $0x394] sm:$0xf] }
 0xb75   :  { %v11623_v10 = vor.u32 %v12676_v13, %v11620_v42  ;;  %v11530_v0 = vld [vmem:[#allocation7 + $0x310] sm:$0xf]  ;;  %v12655_v55 = vld [vmem:[#allocation7 + $0x314] sm:$0xf0]  ;;  %v11532_v42 = vld [vmem:[#allocation7 + $0x318] sm:$0xf0] }
 0xb76   :  { %7372 = vmatpush.bf16.msrb.mxu0 %v11467_v41  ;;  %7385 = vmatpush.bf16.msrb.mxu1 %v11407_v51  ;;  %v12660_v41 = vld [vmem:[#allocation7 + $0x344] sm:$0xf]  ;;  %v11556_v51 = vld [vmem:[#allocation7 + $0x348] sm:$0xf0]  ;;  %v11531_v13 = vor.u32 %v12655_v55, %v11530_v0 }
 0xb77   :  { %7398 = vmatpush.bf16.msrb.mxu2 %v11471_v57  ;;  %v11559_v62 = vor.u32 %v12660_v41, %v11556_v51  ;;  %v12669_v41 = vld [vmem:[#allocation7 + $0x384] sm:$0xf0]  ;;  %v12668_v51 = vld [vmem:[#allocation7 + $0x384] sm:$0xf] }
 0xb78   :  { %7360 = vmatpush.bf16.msra.mxu3 %v11395_v63  ;;  %v12675_v63 = vld [vmem:[#allocation7 + $0x3b4] sm:$0xf0] }
 0xb7a   :  { %7373 = vmatpush.bf16.msrb.mxu0 %v11459_v32  ;;  %7386 = vmatpush.bf16.msrb.mxu1 %v11399_v15  ;;  %v11611_v15 = vor.u32 %v12675_v63, %v11610_v4  ;;  %v12652_v4 = vld [vmem:[#allocation7 + $0x304] sm:$0xf] }
 0xb7b   :  { %7399 = vmatpush.bf16.msrb.mxu2 %v11463_v23 }
 0xb7c   :  { %7607 = vmatpush.bf16.msrb.mxu3 %v11579_v27 }
 0xb7e   :  { %7620 = vmatpush.bf16.msra.mxu0 %v11643_v60  ;;  %7633 = vmatpush.bf16.msra.mxu1 %v11583_v6 }
 0xb7f   :  { %7646 = vmatpush.bf16.msra.mxu2 %v11647_v58  ;;  %v15505_v58 = vld [vmem:[#allocation21_spill] sm:$0xff] }
 0xb80   :  { %v15506_v27 = vperm.slane %v15505_v58, 0  ;;  %v15507_v33 = vperm.slane %v15505_v58, 1  ;;  %v12697_v58 = vld [vmem:[#allocation7 + $0x4d4] sm:$0xf0] }
 0xb82   :  { %7621 = vmatpush.bf16.msra.mxu0 %v11635_v61  ;;  %7634 = vmatpush.bf16.msra.mxu1 %v11575_v30  ;;  %v11548_v61 = vld [vmem:[#allocation7 + $0x338] sm:$0xf0]  ;;  %v12657_v30 = vld [vmem:[#allocation7 + $0x324] sm:$0xf0] }
 0xb83   :  { %7647 = vmatpush.bf16.msra.mxu2 %v11639_v3  ;;  %v11551_v1 = vor.u32 %v12658_v38, %v11548_v61  ;;  %v11539_v20 = vor.u32 %v12657_v30, %v11538_v46  ;;  %v12687_v38 = vld [vmem:[#allocation7 + $0x434] sm:$0xf0]  ;;  %v11694_v61 = vld [vmem:[#allocation7 + $0x4b0] sm:$0xf] }
 0xb86   :  { %7622 = vmatpush.bf16.msra.mxu0 %v11627_v31  ;;  %7635 = vmatpush.bf16.msra.mxu1 %v11567_v7  ;;  %v11543_v31 = vor.u32 %v12656_v50, %v11540_v45  ;;  %v12654_v7 = vld [vmem:[#allocation7 + $0x314] sm:$0xf]  ;;  %v11654_v45 = vld [vmem:[#allocation7 + $0x410] sm:$0xf] }
 0xb87   :  { %7648 = vmatpush.bf16.msra.mxu2 %v11631_v37  ;;  %v11595_v37 = vor.u32 %v12671_v44, %v11594_v17  ;;  %v11535_v54 = vor.u32 %v12654_v7, %v11532_v42 }
 0xb8a   :  { %7623 = vmatpush.bf16.msra.mxu0 %v11619_v9  ;;  %7636 = vmatpush.bf16.msra.mxu1 %v11559_v62  ;;  %v11588_v9 = vld [vmem:[#allocation7 + $0x388] sm:$0xf0] }
 0xb8b   :  { %7649 = vmatpush.bf16.msra.mxu2 %v11623_v10  ;;  %v11522_v10 = vld [vmem:[#allocation7 + $0x300] sm:$0xf]  ;;  %v11524_v62 = vld [vmem:[#allocation7 + $0x308] sm:$0xf0] }
 0xb8c   :  { %v11527_v16 = vor.u32 %v12652_v4, %v11524_v62  ;;  %v12694_v62 = vld [vmem:[#allocation7 + $0x4a4] sm:$0xf0] }
 0xb8e   :  { %7624 = vmatpush.bf16.msra.mxu0 %v11611_v15  ;;  %7637 = vmatpush.bf16.msra.mxu1 %v11551_v1  ;;  %v11674_v15 = vld [vmem:[#allocation7 + $0x460] sm:$0xf]  ;;  %v12695_v1 = vld [vmem:[#allocation7 + $0x4b4] sm:$0xf0] }
 0xb8f   :  { %7650 = vmatpush.bf16.msra.mxu2 %v11615_v52  ;;  %v12690_v52 = vld [vmem:[#allocation7 + $0x464] sm:$0xf0] }
 0xb92   :  { %7638 = vmatpush.bf16.msra.mxu1 %v11543_v31  ;;  %v12685_v31 = vld [vmem:[#allocation7 + $0x414] sm:$0xf0] }
 0xb96   :  { %7639 = vmatpush.bf16.msra.mxu1 %v11535_v54 }
 0xb9a   :  { %7640 = vmatpush.bf16.msra.mxu1 %v11527_v16  ;;  %v11783_v16 = vld [vmem:[#allocation7 + $0x4f4] sm:$0xf] }
 0xbe4   :  { %v7134_v26 = vpop.xlane.xlu2 %7133 }
 0xbe5   :  { %v7135_v25 = vmul.f32 %v7134_v26, %v15501_v43  ;;  %v11570_v43 = vld [vmem:[#allocation7 + $0x360] sm:$0xf] }
 0xbe6   :  { %v11571_v8 = vor.u32 %v12665_v5, %v11570_v43  ;;  %v11602_v43 = vld [vmem:[#allocation7 + $0x3a0] sm:$0xf]  ;;  %v12673_v5 = vld [vmem:[#allocation7 + $0x3a4] sm:$0xf0] }
 0xbe7   :  { %v14632_v28 = vadd.f32 1e-05, %v7135_v25  ;;  %v15502_v25 = vld [vmem:[#allocation20_spill] sm:$0xff]  ;;  %v11603_v3 = vor.u32 %v12673_v5, %v11602_v43  ;;  %v7185_v5 = vld [vmem:[#allocation9 + $0x1f] sm:$0x3] }
 0xbe8   :  { %7608 = vmatpush.bf16.msrb.mxu3 %v11571_v8  ;;  %v15503_v60 = vperm.slane %v15502_v25, 0  ;;  %v15504_v29 = vperm.slane %v15502_v25, 1  ;;  %v12672_v8 = vld [vmem:[#allocation7 + $0x3a4] sm:$0xf]  ;;  %v12698_v25 = vld [vmem:[#allocation7 + $0x4e4] sm:$0xf0] }
 0xbe9   :  { %12740 = vrsqrt.f32 %v14632_v28  ;;  %vm7143_vm11 = vweird.f32 %v14632_v28  ;;  %v11607_v34 = vor.u32 %v12672_v8, %v11604_v21  ;;  %7625 = vmatpush.bf16.msra.mxu0 %v11603_v3  ;;  %v11658_v3 = vld [vmem:[#allocation7 + $0x420] sm:$0xf]  ;;  %v12686_v8 = vld [vmem:[#allocation7 + $0x424] sm:$0xf0]  ;;  %v7190_v30 = vperm.slane %v7185_v5, 1 }
 0xbea   :  { %v11659_v50 = vor.u32 %v12686_v8, %v11658_v3  ;;  %v11767_v3 = vld [vmem:[#allocation7 + $0x4b4] sm:$0xf]  ;;  %v12713_v8 = vld [vmem:[#allocation7 + $0x4b8] sm:$0xf0] }
 0xbeb   :  { %7651 = vmatpush.bf16.msra.mxu2 %v11607_v34  ;;  %v11695_v34 = vor.u32 %v12695_v1, %v11694_v61  ;;  %v11735_v1 = vld [vmem:[#allocation7 + $0x434] sm:$0xf] }
 0xbec   :  { %7609 = vmatpush.bf16.msrb.mxu3 %v11563_v59  ;;  %v11596_v59 = vld [vmem:[#allocation7 + $0x398] sm:$0xf0] }
 0xbed   :  { %v11599_v56 = vor.u32 %v12670_v40, %v11596_v59  ;;  %7626 = vmatpush.bf16.msra.mxu0 %v11595_v37  ;;  %v11655_v40 = vor.u32 %v12685_v31, %v11654_v45  ;;  %v11727_v31 = vld [vmem:[#allocation7 + $0x414] sm:$0xf] }
 0xbef   :  { %v12741_v36 = vpop.eup %12740  ;;  %7652 = vmatpush.bf16.msra.mxu2 %v11599_v56 }
 0xbf0   :  { %v7138_v57 = vmul.f32 %v12741_v36, %v14632_v28  ;;  %7610 = vmatpush.bf16.msrb.mxu3 %v11555_v49  ;;  %vm7144_vm10 = vweird.f32 %v12741_v36  ;;  %v12653_v49 = vld [vmem:[#allocation7 + $0x304] sm:$0xf0] }
 0xbf1   :  { %vm7145_vm12 = vmor %vm7143_vm11, %vm7144_vm10  ;;  %v11523_v63 = vor.u32 %v12653_v49, %v11522_v10  ;;  %v11650_v10 = vld [vmem:[#allocation7 + $0x400] sm:$0xf]  ;;  %v12684_v49 = vld [vmem:[#allocation7 + $0x404] sm:$0xf0] }
 0xbf2   :  { %v7139_v32 = vmul.f32 %v12741_v36, %v7138_v57  ;;  %v11591_v57 = vor.u32 %v12668_v51, %v11588_v9  ;;  %v12709_v9 = vld [vmem:[#allocation7 + $0x478] sm:$0xf0]  ;;  %v11651_v4 = vor.u32 %v12684_v49, %v11650_v10 }
 0xbf4   :  { %v7140_v35 = vmul.f32 0.5, %v7139_v32  ;;  %7653 = vmatpush.bf16.msra.mxu2 %v11591_v57  ;;  %v12691_v32 = vld [vmem:[#allocation7 + $0x474] sm:$0xf0] }
 0xbf6   :  { %v7141_v23 = vsub.f32 1.5, %v7140_v35  ;;  %v11679_v35 = vor.u32 %v12691_v32, %v11678_v22  ;;  %v12717_v32 = vld [vmem:[#allocation7 + $0x4f8] sm:$0xf0] }
 0xbf8   :  { %v7142_v26 = vmul.f32 %v12741_v36, %v7141_v23  ;;  %v11710_v23 = vld [vmem:[#allocation7 + $0x4f0] sm:$0xf] }
 0xbfa   :  { %v7146_v2 = vsel %vm7145_vm12, %v12741_v36, %v7142_v26  ;;  %v11587_v36 = vor.u32 %v12669_v41, %v11586_v19  ;;  %v12699_v26 = vld [vmem:[#allocation7 + $0x4f4] sm:$0xf0] }
 0xbfb   :  { %v7147_v53 = vmul.f32 %v7146_v2, %v14623_v12  ;;  %v7148_v11 = vmul.f32 %v7146_v2, %v14625_v14  ;;  %v11546_v12 = vld [vmem:[#allocation7 + $0x330] sm:$0xf]  ;;  %v12659_v14 = vld [vmem:[#allocation7 + $0x334] sm:$0xf0]  ;;  %v11675_v2 = vor.u32 %v12690_v52, %v11674_v15  ;;  %v11784_v15 = vor.u32 %v12717_v32, %v11783_v16  ;;  %v12708_v52 = vld [vmem:[#allocation7 + $0x468] sm:$0xf0] }
 0xbfc   :  { %v11547_v48 = vor.u32 %v12659_v14, %v11546_v12  ;;  %7627 = vmatpush.bf16.msra.mxu0 %v11587_v36  ;;  %v11662_v14 = vld [vmem:[#allocation7 + $0x430] sm:$0xf]  ;;  %v11751_v36 = vld [vmem:[#allocation7 + $0x474] sm:$0xf] }
 0xbfd   :  { %v7149_v47 = vmul.f32 %v7147_v53, %v15503_v60  ;;  %v7150_v24 = vmul.f32 %v7148_v11, %v15504_v29  ;;  %v11711_v53 = vor.u32 %v12699_v26, %v11710_v23  ;;  %v11706_v11 = vld [vmem:[#allocation7 + $0x4e0] sm:$0xf]  ;;  %v11670_v60 = vld [vmem:[#allocation7 + $0x450] sm:$0xf]  ;;  %v11663_v43 = vor.u32 %v12687_v38, %v11662_v14  ;;  %v11771_v38 = vld [vmem:[#allocation7 + $0x4c4] sm:$0xf] }
 0xbfe   :  { %7611 = vmatpush.bf16.msrb.mxu3 %v11547_v48  ;;  %v11707_v29 = vor.u32 %v12698_v25, %v11706_v11  ;;  %v11752_v57 = vor.u32 %v12709_v9, %v11751_v36  ;;  %v11686_v26 = vld [vmem:[#allocation7 + $0x490] sm:$0xf]  ;;  %v12716_v25 = vld [vmem:[#allocation7 + $0x4e8] sm:$0xf0] }
 0xbff   :  { %v7151_v18 = vadd.f32 %v7149_v47, %v15506_v27  ;;  %v7152_v39 = vadd.f32 %v7150_v24, %v15507_v33  ;;  %v12689_v47 = vld [vmem:[#allocation7 + $0x454] sm:$0xf0]  ;;  %v11702_v24 = vld [vmem:[#allocation7 + $0x4d0] sm:$0xf]  ;;  %v12688_v33 = vld [vmem:[#allocation7 + $0x444] sm:$0xf0] }
 0xc00   :  { %v11671_v27 = vor.u32 %v12689_v47, %v11670_v60  ;;  %v11743_v47 = vld [vmem:[#allocation7 + $0x454] sm:$0xf] }
 0xc01   :  { %v7186_v28 = vpack.c.bf16 %v7151_v18, %v7151_v18  ;;  %v7187_v6 = vpack.c.bf16 %v7152_v39, %v7152_v39  ;;  %v11666_v18 = vld [vmem:[#allocation7 + $0x440] sm:$0xf]  ;;  %v11703_v39 = vor.u32 %v12697_v58, %v11702_v24 }
 0xc02   :  { %7612 = vmatpush.bf16.msrb.mxu3 %v11539_v20  ;;  %v11667_v12 = vor.u32 %v12688_v33, %v11666_v18  ;;  %v7189_v20 = vperm.slane %v7185_v5, 0  ;;  %v11682_v58 = vld [vmem:[#allocation7 + $0x480] sm:$0xf]  ;;  %v11775_v33 = vld [vmem:[#allocation7 + $0x4d4] sm:$0xf] }
 0xc03   :  { %7361 = vmatmul.bf16.vlgmr.msra.gmra.mxu3 %v7186_v28  ;;  %7374 = vmatmul.bf16.vlgmr.msrb.gmra.mxu0 %v7187_v6 }
 0xc04   :  { %7387 = vmatmul.bf16.vlgmr.msrb.gmra.mxu1 %v7186_v28  ;;  %7400 = vmatmul.bf16.vlgmr.msrb.gmra.mxu2 %v7187_v6  ;;  %v11698_v28 = vld [vmem:[#allocation7 + $0x4c0] sm:$0xf]  ;;  %v12696_v6 = vld [vmem:[#allocation7 + $0x4c4] sm:$0xf0] }
 0xc05   :  { %7808 = vmatpush.bf16.msrb.mxu0 %v11711_v53  ;;  %v11699_v48 = vor.u32 %v12696_v6, %v11698_v28  ;;  %8014 = vmatpush.bf16.msrb.mxu2 %v11752_v57  ;;  %v11779_v53 = vld [vmem:[#allocation7 + $0x4e4] sm:$0xf] }
 0xc06   :  { %7613 = vmatpush.bf16.msrb.mxu3 %v11531_v13  ;;  %v11780_v60 = vor.u32 %v12716_v25, %v11779_v53  ;;  %v11739_v6 = vld [vmem:[#allocation7 + $0x444] sm:$0xf] }
 0xc09   :  { %7809 = vmatpush.bf16.msrb.mxu0 %v11707_v29  ;;  %v12707_v29 = vld [vmem:[#allocation7 + $0x458] sm:$0xf0] }
 0xc0a   :  { %7614 = vmatpush.bf16.msrb.mxu3 %v11523_v63  ;;  %v11690_v63 = vld [vmem:[#allocation7 + $0x4a0] sm:$0xf]  ;;  %v11744_v24 = vor.u32 %v12707_v29, %v11743_v47 }
 0xc0b   :  { %v11691_v22 = vor.u32 %v12694_v62, %v11690_v63 }
 0xc0d   :  { %7810 = vmatpush.bf16.msrb.mxu0 %v11703_v39  ;;  %v12715_v39 = vld [vmem:[#allocation7 + $0x4d8] sm:$0xf0] }
 0xc0e   :  { %7795 = vmatpush.bf16.msra.mxu3 %v11679_v35  ;;  %v11747_v35 = vld [vmem:[#allocation7 + $0x464] sm:$0xf]  ;;  %v11776_v28 = vor.u32 %v12715_v39, %v11775_v33 }
 0xc0f   :  { %v11748_v23 = vor.u32 %v12708_v52, %v11747_v35 }
 0xc11   :  { %7811 = vmatpush.bf16.msrb.mxu0 %v11699_v48  ;;  %8015 = vmatpush.bf16.msrb.mxu2 %v11748_v23  ;;  %v12714_v48 = vld [vmem:[#allocation7 + $0x4c8] sm:$0xf0] }
 0xc12   :  { %7796 = vmatpush.bf16.msra.mxu3 %v11675_v2  ;;  %v12693_v2 = vld [vmem:[#allocation7 + $0x494] sm:$0xf0]  ;;  %v11772_v61 = vor.u32 %v12714_v48, %v11771_v38 }
 0xc13   :  { %v11687_v11 = vor.u32 %v12693_v2, %v11686_v26 }
 0xc15   :  { %7812 = vmatpush.bf16.msrb.mxu0 %v11695_v34  ;;  %8016 = vmatpush.bf16.msrb.mxu2 %v11744_v24  ;;  %v11731_v34 = vld [vmem:[#allocation7 + $0x424] sm:$0xf] }
 0xc16   :  { %7797 = vmatpush.bf16.msra.mxu3 %v11671_v27  ;;  %v12692_v27 = vld [vmem:[#allocation7 + $0x484] sm:$0xf0] }
 0xc17   :  { %v11683_v18 = vor.u32 %v12692_v27, %v11682_v58 }
 0xc19   :  { %7813 = vmatpush.bf16.msrb.mxu0 %v11691_v22 }
 0xc1a   :  { %7798 = vmatpush.bf16.msra.mxu3 %v11667_v12  ;;  %v12706_v12 = vld [vmem:[#allocation7 + $0x448] sm:$0xf0] }
 0xc1b   :  { %v11740_v14 = vor.u32 %v12706_v12, %v11739_v6 }
 0xc1d   :  { %7814 = vmatpush.bf16.msrb.mxu0 %v11687_v11  ;;  %8017 = vmatpush.bf16.msrb.mxu2 %v11740_v14 }
 0xc1e   :  { %7799 = vmatpush.bf16.msra.mxu3 %v11663_v43  ;;  %v12705_v43 = vld [vmem:[#allocation7 + $0x438] sm:$0xf0] }
 0xc1f   :  { %v11736_v5 = vor.u32 %v12705_v43, %v11735_v1 }
 0xc21   :  { %7815 = vmatpush.bf16.msrb.mxu0 %v11683_v18  ;;  %8018 = vmatpush.bf16.msrb.mxu2 %v11736_v5  ;;  %v11718_v5 = vld [vmem:[#allocation7 + $0x510] sm:$0xf] }
 0xc22   :  { %7800 = vmatpush.bf16.msra.mxu3 %v11659_v50  ;;  %v11763_v50 = vld [vmem:[#allocation7 + $0x4a4] sm:$0xf] }
 0xc26   :  { %7801 = vmatpush.bf16.msra.mxu3 %v11655_v40  ;;  %v11759_v40 = vld [vmem:[#allocation7 + $0x494] sm:$0xf] }
 0xc2a   :  { %7802 = vmatpush.bf16.msra.mxu3 %v11651_v4 }
 0xc80   :  { %v7375_v21 = vpop.f32.mrf.mxu0 }
 0xc81   :  { %v7388_v46 = vpop.f32.mrf.mxu1 }
 0xc82   :  { %v7389_v17 = vadd.f32 %v7388_v46, %v7190_v30  ;;  %v12704_v46 = vld [vmem:[#allocation7 + $0x428] sm:$0xf0] }
 0xc83   :  { %v11732_v30 = vor.u32 %v12704_v46, %v11731_v34  ;;  %v12700_v34 = vld [vmem:[#allocation7 + $0x504] sm:$0xf0] }
 0xc85   :  { %8019 = vmatpush.bf16.msrb.mxu2 %v11732_v30  ;;  %v11791_v30 = vld [vmem:[#allocation7 + $0x514] sm:$0xf] }
 0xc86   :  { %v7362_v44 = vpop.f32.mrf.mxu3 }
 0xc87   :  { %v7363_v37 = vadd.f32 %v7362_v44, %v7189_v20  ;;  %v7401_v59 = vpop.f32.mrf.mxu2  ;;  %v12712_v20 = vld [vmem:[#allocation7 + $0x4a8] sm:$0xf0] }
 0xc88   :  { %v7402_v56 = vadd.f32 %v7401_v59, %v7389_v17  ;;  %v7377_v0 = vpop.f32.mrf.mxu0  ;;  %v11764_v45 = vor.u32 %v12712_v20, %v11763_v50  ;;  %v12703_v17 = vld [vmem:[#allocation7 + $0x418] sm:$0xf0] }
 0xc89   :  { %v7376_v55 = vadd.f32 %v7375_v21, %v7363_v37  ;;  %v7390_v7 = vpop.f32.mrf.mxu1  ;;  %v11768_v21 = vor.u32 %v12713_v8, %v11767_v3  ;;  %v11728_v44 = vor.u32 %v12703_v17, %v11727_v31  ;;  %v12711_v37 = vld [vmem:[#allocation7 + $0x498] sm:$0xf0]  ;;  %v12702_v0 = vld [vmem:[#allocation7 + $0x408] sm:$0xf0]  ;;  %v12701_v3 = vld [vmem:[#allocation7 + $0x514] sm:$0xf0] }
 0xc8a   :  { %v7406_v13 = vmax.f32 %v7402_v56, 0.0  ;;  %v11760_v59 = vor.u32 %v12711_v37, %v11759_v40  ;;  %v11723_v56 = vld [vmem:[#allocation7 + $0x404] sm:$0xf]  ;;  %v11719_v8 = vor.u32 %v12701_v3, %v11718_v5  ;;  %v12719_v50 = vld [vmem:[#allocation7 + $0x518] sm:$0xf0] }
 0xc8b   :  { %v7405_v42 = vmax.f32 %v7376_v55, 0.0  ;;  %8020 = vmatpush.bf16.msrb.mxu2 %v11728_v44  ;;  %v11755_v55 = vld [vmem:[#allocation7 + $0x484] sm:$0xf]  ;;  %v11724_v7 = vor.u32 %v12702_v0, %v11723_v56  ;;  %v11792_v20 = vor.u32 %v12719_v50, %v11791_v30  ;;  %v12718_v31 = vld [vmem:[#allocation7 + $0x508] sm:$0xf0] }
 0xc8c   :  { %v7441_v54 = vpack.c.bf16 %v7406_v13, %v7406_v13  ;;  %v12710_v13 = vld [vmem:[#allocation7 + $0x488] sm:$0xf0]  ;;  %7853 = vmatpush.bf16.msrb.mxu1 %v11719_v8  ;;  %v12734_v40 = vld [vmem:[#allocation9 + $0x23] ss:$0 sm:$0xff] }
 0xc8d   :  { %v7440_v19 = vpack.c.bf16 %v7405_v42, %v7405_v42  ;;  %v11756_v42 = vor.u32 %v12710_v13, %v11755_v55 }
 0xc8e   :  { %7628 = vmatmul.bf16.vlgmr.msra.gmra.mxu0 %v7441_v54  ;;  %7654 = vmatmul.bf16.vlgmr.msra.gmra.mxu2 %v7441_v54  ;;  %v7364_v41 = vpop.f32.mrf.mxu3  ;;  %v7439_v54 = vld [vmem:[#allocation9 + $0x21] sm:$0x3] }
 0xc8f   :  { %v7403_v51 = vpop.f32.mrf.mxu2  ;;  %7615 = vmatmul.bf16.vlgmr.msrb.gmra.mxu3 %v7440_v19  ;;  %7641 = vmatmul.bf16.vlgmr.msra.gmra.mxu1 %v7440_v19  ;;  %v12880_v19 = vmov 8.0   ;;  %v7443_v57 = vperm.slane %v7439_v54, 0 }
 0xc90   :  { %8027 = vmatpush.bf16.msrb.mxu3 %v11784_v15  ;;  %8021 = vmatpush.bf16.msrb.mxu2 %v11724_v7  ;;  %12742 = vrcp.f32 %v12880_v19  ;;  %v7444_v51 = vperm.slane %v7439_v54, 1 }
 0xc94   :  { %8028 = vmatpush.bf16.msrb.mxu3 %v11780_v60 }
 0xc96   :  { %v12743_v9 = vpop.eup %12742 }
 0xc97   :  { %v7875_v63 = vmul.f32 8.0, %v12743_v9  ;;  %vm7879_vm13 = vweird.f32 %v12743_v9 }
 0xc98   :  { %8029 = vmatpush.bf16.msrb.mxu3 %v11776_v28 }
 0xc99   :  { %v7876_v26 = vsub.f32 1.0, %v7875_v63 }
 0xc9b   :  { %v7877_v29 = vmul.f32 %v12743_v9, %v7876_v26 }
 0xc9c   :  { %8030 = vmatpush.bf16.msrb.mxu3 %v11772_v61 }
 0xc9d   :  { %v7878_v39 = vadd.f32 %v12743_v9, %v7877_v29 }
 0xc9f   :  { %v7880_v14 = vsel %vm7879_vm13, %v12743_v9, %v7878_v39 }
 0xca0   :  { %8031 = vmatpush.bf16.msrb.mxu3 %v11768_v21  ;;  %v11714_v21 = vld [vmem:[#allocation7 + $0x500] sm:$0xf] }
 0xca1   :  { %v11715_v46 = vor.u32 %v12700_v34, %v11714_v21 }
 0xca3   :  { %7854 = vmatpush.bf16.msrb.mxu1 %v11715_v46 }
 0xca4   :  { %8032 = vmatpush.bf16.msrb.mxu3 %v11764_v45  ;;  %v11787_v45 = vld [vmem:[#allocation7 + $0x504] sm:$0xf] }
 0xca5   :  { %v11788_v17 = vor.u32 %v12718_v31, %v11787_v45 }
 0xca7   :  { %8068 = vmatpush.bf16.msra.mxu1 %v11792_v20 }
 0xca8   :  { %8033 = vmatpush.bf16.msrb.mxu3 %v11760_v59 }
 0xcab   :  { %8069 = vmatpush.bf16.msra.mxu1 %v11788_v17 }
 0xcac   :  { %8034 = vmatpush.bf16.msrb.mxu3 %v11756_v42  ;;  %v7915_v42 = vld [vmem:[#allocation9 + $0x25] sm:$0x1] }
 0xd0b   :  { %v7629_v41 = vpop.f32.mrf.mxu0 }
 0xd0c   :  { %v7642_v36 = vpop.f32.mrf.mxu1 }
 0xd0d   :  { %v7643_v10 = vadd.f32 %v7642_v36, %v7444_v51 }
 0xd11   :  { %v7655_v49 = vpop.f32.mrf.mxu2 }
 0xd12   :  { %v7656_v4 = vadd.f32 %v7655_v49, %v7643_v10  ;;  %v7616_v62 = vpop.f32.mrf.mxu3  ;;  %v12735_v49 = vld [vmem:[#allocation9 + $0x24] ss:$0 sm:$0xff] }
 0xd13   :  { %v7617_v16 = vadd.f32 %v7616_v62, %v7443_v57  ;;  %v7631_v22 = vpop.f32.mrf.mxu0 }
 0xd14   :  { %v7660_v32 = vmax.f32 %v7656_v4, 0.0  ;;  %v7644_v15 = vpop.f32.mrf.mxu1 }
 0xd15   :  { %v7630_v35 = vadd.f32 %v7629_v41, %v7617_v16  ;;  %v8045_v16 = vld [vmem:[#allocation9 + $0x26] sm:$0x1] }
 0xd16   :  { %v7695_v52 = vpack.c.bf16 %v7660_v32, %v7660_v32  ;;  %v7868_v23 = vrot.slane %v7660_v32, 4 }
 0xd17   :  { %v7659_v2 = vmax.f32 %v7630_v35, 0.0 }
 0xd18   :  { %v7869_v53 = vadd.f32 %v7868_v23, %v7660_v32  ;;  %7816 = vmatmul.bf16.vlgmr.msrb.gmra.mxu0 %v7695_v52 }
 0xd19   :  { %v7694_v11 = vpack.c.bf16 %v7659_v2, %v7659_v2  ;;  %v7862_v25 = vrot.slane %v7659_v2, 4  ;;  %v7657_v60 = vpop.f32.mrf.mxu2 }
 0xd1a   :  { %v7870_v47 = vrot.slane %v7869_v53, 2  ;;  %v7618_v24 = vpop.f32.mrf.mxu3 }
 0xd1b   :  { %v7863_v58 = vadd.f32 %v7862_v25, %v7659_v2  ;;  %7803 = vmatmul.bf16.vlgmr.msra.gmra.mxu3 %v7694_v11 }
 0xd1c   :  { %v7871_v27 = vadd.f32 %v7870_v47, %v7869_v53 }
 0xd1d   :  { %v7864_v18 = vrot.slane %v7863_v58, 2 }
 0xd1e   :  { %v7872_v33 = vrot.slane %v7871_v27, 1 }
 0xd1f   :  { %v7865_v28 = vadd.f32 %v7864_v18, %v7863_v58 }
 0xd20   :  { %v7873_v6 = vadd.f32 %v7872_v33, %v7871_v27 }
 0xd21   :  { %v7866_v12 = vrot.slane %v7865_v28, 1 }
 0xd22   :  { %v7882_v48 = vmul.f32 %v7880_v14, %v7873_v6 }
 0xd23   :  { %v7867_v38 = vadd.f32 %v7866_v12, %v7865_v28 }
 0xd24   :  { %v7917_v43 = vpack.c.bf16 %v7882_v48, %v7882_v48 }
 0xd25   :  { %v7881_v61 = vmul.f32 %v7880_v14, %v7867_v38 }
 0xd27   :  { %v7916_v1 = vpack.c.bf16 %v7881_v61, %v7881_v61 }
 0xd29   :  { %8022 = vmatmul.bf16.vlgmr.msrb.gmra.mxu2 %v7916_v1 }
 0xd2b   :  { %8035 = vmatmul.bf16.vlgmr.msrb.gmra.mxu3 %v7917_v43 }
 0xd95   :  { %v7817_v44 = vpop.f32.mrf.mxu0 }
 0xd9d   :  { %v7819_v37 = vpop.f32.mrf.mxu0 }
 0xd9e   :  { %v7804_v59 = vpop.f32.mrf.mxu3 }
 0xd9f   :  { %v7805_v56 = vadd.f32 %v12734_v40, %v7804_v59 }
 0xda1   :  { %v7818_v0 = vadd.f32 %v7817_v44, %v7805_v56 }
 0xda3   :  { %v7821_v55 = vmax.f32 %v7818_v0, 0.0 }
 0xda5   :  { %v7827_v7 = vpack.c.bf16 %v7821_v55, %v7821_v55 }
 0xda6   :  { %v7806_v13 = vpop.f32.mrf.mxu3 }
 0xda7   :  { %11720 = vmatmul.msk.bf16.vlgmr.msrb.gmra.mxu1 %vm7843_vm14, %v7827_v7 }
 0xdac   :  { %v8023_v54 = vpop.f32.mrf.mxu2 }
 0xdad   :  { %v8024_v19 = vadd.f32 %v8023_v54, %v7915_v42 }
 0xdae   :  { %v8036_v41 = vpop.f32.mrf.mxu3 }
 0xdaf   :  { %v8037_v51 = vadd.f32 %v8036_v41, %v8024_v19 }
 0xdb1   :  { %v8040_v36 = vmax.f32 %v8037_v51, 0.0 }
 0xdb3   :  { %v8046_v57 = vpack.c.bf16 %v8040_v36, %v8040_v36 }
 0xdb4   :  { %v8025_v9 = vpop.f32.mrf.mxu2 }
 0xdb6   :  { %v8038_v10 = vpop.f32.mrf.mxu3 }
 0xdb7   :  { %11793 = vmatmul.msk.bf16.vlgmr.msra.gmra.mxu1 %vm7843_vm14, %v8046_v57 }
 0xe24   :  { %v7856_v4 = vpop.f32.mrf.mxu1 }
 0xe25   :  { %v7857_v63 = vadd.f32 %v12735_v49, %v7856_v4 }
 0xe27   :  { %7861 = vst.msk [vmem:[%s14658_s5] sm:$0xff] %vm7860_vm15, %v7857_v63 }
 0xe2c   :  { %v7858_v62 = vpop.f32.mrf.mxu1 }
 0xe34   :  { %v8071_v22 = vpop.f32.mrf.mxu1 }
 0xe35   :  { %v8072_v32 = vadd.f32 %v8071_v22, %v8045_v16 }
 0xe37   :  { %v8075_v15 = vperm.slane %v8072_v32, 0 }
 0xe39   :  { %8076 = vst.msk [vmem:[%s14658_s5 + $0x8] sm:$0xff] %vm7860_vm15, %v8075_v15 }
 0xe3c   :  { %v8073_v35 = vpop.f32.mrf.mxu1 }
 0xe3d   :  { %8081 = vsyncpa [#allocation6], 1 }
 0xe3e   :  { %8082 = vsyncpa [#allocation8], 1 }
 0xe3f   :  { %8083 = vsyncmov [#allocation4] }
 0xe42   :  { %s8084_s19 = vpop.sfrf %8083 }
 0xe43   :  { %p11794_p0 = scmp.ne.s32.totalorder %s8084_s19, 0 }
 0xe45   :  { %8088 = shalt.err (%p11794_p0)  }
 0xe46   :  { %8090 = vsyncmov [#allocation4 + $0x1] }
 0xe49   :  { %s8091_s20 = vpop.sfrf %8090 }
 0xe4a   :  { %p11795_p1 = scmp.ne.s32.totalorder %s8091_s20, 0 }
 0xe4c   :  { %8095 = shalt.err (%p11795_p1)  }

</bundles_post_ra>
